<compile_context>
chip_gen: v5e
topology: v5e:2x2
jax: 0.10.0
libtpu: 0.0.40
codegen_flags: <defaults>
</compile_context>

<pallas_src>
import functools

import numpy as np
import jax
import jax.numpy as jnp
from jax import lax
from jax.experimental import pallas as pl
from jax.experimental.pallas import tpu as pltpu

EPS = 1e-5  # nn.BatchNorm2d default eps

# conv stack config from the module: (Cout, kernel, stride)
CONV_CFG = [(32, 8, 4), (64, 4, 2), (64, 3, 1)]


def _vmem():
    # whole-array blocks resident in VMEM (total operand footprint well under 1 MiB)
    return pl.BlockSpec(memory_space=pltpu.MemorySpace.VMEM)


# ---------------------------------------------------------------------------
# Fused Pallas kernel
# ---------------------------------------------------------------------------
def _bn_relu(y, bn):
    """Train-mode BatchNorm over rows (two-pass stats, biased var) + ReLU.

    y: [N, C] f32 (rows = batch*spatial, cols = channels)   bn: [2, C] = [gamma; beta]
    Conv bias is omitted upstream: it is cancelled exactly by the mean subtraction.
    """
    n = jnp.float32(y.shape[0])
    mean = jnp.sum(y, axis=0, keepdims=True) / n
    d = y - mean
    var = jnp.sum(d * d, axis=0, keepdims=True) / n
    return jnp.maximum(d * lax.rsqrt(var + EPS) * bn[0:1, :] + bn[1:2, :], 0.0)


def _make_fused_kernel(B, h1, h2, c1=32, k2=4, s2=2):
    """conv1(im2col GEMM)+BN+ReLU -> conv2 (in-kernel im2col, 1 GEMM) -> conv3 (1 GEMM)
    -> packed dueling heads (2 GEMMs, combine pre-folded into the weights)."""

    def kernel(p1_ref, w1_ref, bn1_ref, w2_ref, bn2_ref, w3_ref, bn3_ref,
               w1h_ref, b1h_ref, w2h_ref, b2h_ref, o_ref, a1_s):
        f32, bf16 = jnp.float32, jnp.bfloat16

        # ---- conv1: im2col GEMM + BN + ReLU; keep the map in a VMEM scratch laid out
        # (B, oh, ow, c) so the conv2 taps are plain indexed reads.
        y1 = jnp.dot(p1_ref[...], w1_ref[...], preferred_element_type=f32)  # [B*h1*h1, 32]
        a1_s[...] = _bn_relu(y1, bn1_ref[...]).reshape(B, h1, h1, c1)

        # ---- conv2: build the im2col patch matrix [h2*h2*B, k2*k2*c1]
        # (rows position-major, cols tap-major) and do a single K=512 GEMM.
        pos_blocks = []
        for i in range(h2):
            for j in range(h2):
                taps = [a1_s[:, s2 * i + kh, s2 * j + kw, :]        # (B, c1)
                        for kh in range(k2) for kw in range(k2)]
                pos_blocks.append(jnp.concatenate(taps, axis=-1))   # (B, k2*k2*c1)
        p2 = jnp.concatenate(pos_blocks, axis=0).astype(bf16)       # (h2*h2*B, 512)
        a2 = _bn_relu(jnp.dot(p2, w2_ref[...], preferred_element_type=f32),
                      bn2_ref[...])                                  # (h2*h2*B, 64) f32

        # ---- conv3: 3x3 kernel over the 3x3 map == per-sample FC.  The per-position
        # blocks are contiguous row slices because conv2 rows are position-major.
        p3 = jnp.concatenate([a2[p * B:(p + 1) * B, :] for p in range(h2 * h2)],
                             axis=-1).astype(bf16)                   # (B, 576)
        a3 = _bn_relu(jnp.dot(p3, w3_ref[...], preferred_element_type=f32),
                      bn3_ref[...]).astype(bf16)                     # (B, 64) flat features

        # ---- dueling heads: both 512-hidden layers in one GEMM; the dueling combine is
        # pre-folded into w2h, whose N dim is zero-padded to 128 for a lane-dense store.
        h = jnp.maximum(jnp.dot(a3, w1h_ref[...], preferred_element_type=f32)
                        + b1h_ref[...], 0.0).astype(bf16)            # (B, 1024)
        o_ref[...] = (jnp.dot(h, w2h_ref[...], preferred_element_type=f32)
                      + b2h_ref[...])                                # (B, 128)

    return kernel


# ---------------------------------------------------------------------------
# Wrapper
# ---------------------------------------------------------------------------
def _im2col(x, k, s):
    """NCHW -> patch matrix [B*OH*OW, C*k*k] with (c, kh, kw) column order."""
    B, C, H, W = x.shape
    OH = (H - k) // s + 1
    OW = (W - k) // s + 1
    cols = []
    for kh in range(k):
        for kw in range(k):
            cols.append(x[:, :, kh:kh + s * OH:s, kw:kw + s * OW:s])   # [B,C,OH,OW]
    patches = jnp.stack(cols, axis=2)                                  # [B,C,k*k,OH,OW]
    patches = patches.transpose(0, 3, 4, 1, 2).reshape(B * OH * OW, C * k * k)
    return patches


def prepare_operands(params):
    """One-time, data-independent weight preprocessing for the fused kernel."""
    bf16 = jnp.bfloat16
    ops = {}

    # conv1 GEMM weight (Cin*8*8, 32); conv biases dropped (cancelled by BN mean-sub).
    ops["w1"] = params["conv0_w"].reshape(32, -1).T.astype(bf16)
    ops["bn1"] = jnp.stack([params["bn0_g"], params["bn0_b"]])

    # conv2 GEMM weight: rows ordered (kh, kw, cin) to match the in-kernel tap concat.
    ops["w2"] = jnp.transpose(params["conv1_w"], (2, 3, 1, 0)).reshape(-1, 64).astype(bf16)
    ops["bn2"] = jnp.stack([params["bn1_g"], params["bn1_b"]])

    # conv3 GEMM weight: rows ordered (kh, kw, cin) = (spatial position, channel).
    ops["w3"] = jnp.transpose(params["conv2_w"], (2, 3, 1, 0)).reshape(-1, 64).astype(bf16)
    ops["bn3"] = jnp.stack([params["bn2_g"], params["bn2_b"]])

    # packed dueling heads: hidden layers side by side ...
    ops["w1h"] = jnp.concatenate([params["w1a"], params["w1v"]], axis=1).astype(bf16)  # (F,1024)
    ops["b1h"] = jnp.concatenate([params["b1a"], params["b1v"]]).reshape(1, -1)        # (1,1024)

    # ... and the output layers with the dueling combine folded in:
    #   q = h_a @ (Wa (I - J/n)) + h_v @ (Wv 1^T) + (ba (I - J/n) + bv)
    n_act = params["w2a"].shape[1]
    assert n_act < 128, "head padding assumes n_actions < 128"
    n_pad = 128                                  # lane-dense output store
    comb = jnp.eye(n_act, dtype=jnp.float32) - 1.0 / n_act
    w2h = jnp.concatenate([params["w2a"] @ comb,
                           jnp.tile(params["w2v"], (1, n_act))], axis=0)   # (1024, n_act)
    ops["w2h"] = jnp.pad(w2h, ((0, 0), (0, n_pad - n_act))).astype(bf16)   # (1024, 128)
    b2h = params["b2a"] @ comb + params["b2v"][0]
    ops["b2h"] = jnp.pad(b2h, (0, n_pad - n_act)).reshape(1, -1)           # (1, 128) f32
    return ops


def dueling_dqn_forward(x, ops, *, n_actions):
    B, _, H, _ = x.shape
    h1 = (H - 8) // 4 + 1
    h2 = (h1 - 4) // 2 + 1
    assert (h2 - 3) // 1 + 1 == 1, "kernel folds conv3 as an FC; needs a 1x1 conv3 output"

    patches1 = _im2col(x, 8, 4).astype(jnp.bfloat16)        # [B*h1*h1, Cin*64]
    n_pad = ops["w2h"].shape[1]

    operands = (patches1, ops["w1"], ops["bn1"], ops["w2"], ops["bn2"],
                ops["w3"], ops["bn3"], ops["w1h"], ops["b1h"], ops["w2h"], ops["b2h"])
    flops = 2 * B * (h1 * h1 * patches1.shape[1] * 32 + h2 * h2 * 512 * 64
                     + 576 * 64 + 64 * 1024 + 1024 * n_pad)
    bytes_accessed = sum(int(np.prod(a.shape)) * a.dtype.itemsize for a in operands) \
        + B * n_pad * 4

    out_pad = pl.pallas_call(
        _make_fused_kernel(B, h1, h2),
        out_shape=jax.ShapeDtypeStruct((B, n_pad), jnp.float32),
        in_specs=[_vmem()] * len(operands),
        out_specs=_vmem(),
        scratch_shapes=[pltpu.VMEM((B, h1, h1, 32), jnp.float32)],
        compiler_params=pltpu.CompilerParams(vmem_limit_bytes=32 * 1024 * 1024),
        cost_estimate=pl.CostEstimate(flops=flops, transcendentals=0,
                                      bytes_accessed=bytes_accessed),
    )(*operands)
    return out_pad[:, :n_actions]


# ---------------------------------------------------------------------------
# Deterministic parameter init (shapes from DuelingDQN.__init__)
# ---------------------------------------------------------------------------
def init_params(key, in_channels, spatial, n_actions):
    params = {}
    keys = iter(jax.random.split(key, 32))

    def unif(shape, fan_in):
        bound = 1.0 / jnp.sqrt(jnp.float32(fan_in))
        return jax.random.uniform(next(keys), shape, jnp.float32, -bound, bound)

    cin, h = in_channels, spatial
    for i, (cout, k, s) in enumerate(CONV_CFG):
        params[f"conv{i}_w"] = unif((cout, cin, k, k), cin * k * k)    # torch OIHW
        params[f"conv{i}_b"] = unif((cout,), cin * k * k)              # used by reference only
        params[f"bn{i}_g"] = 1.0 + 0.1 * jax.random.normal(next(keys), (cout,), jnp.float32)
        params[f"bn{i}_b"] = 0.1 * jax.random.normal(next(keys), (cout,), jnp.float32)
        cin = cout
        h = (h - k) // s + 1
    conv_out = cin * h * h

    params["w1a"] = unif((conv_out, 512), conv_out)
    params["b1a"] = unif((512,), conv_out)
    params["w2a"] = unif((512, n_actions), 512)
    params["b2a"] = unif((n_actions,), 512)
    params["w1v"] = unif((conv_out, 512), conv_out)
    params["b1v"] = unif((512,), conv_out)
    params["w2v"] = unif((512, 1), 512)
    params["b2v"] = unif((1,), 512)
    return params


# ---------------------------------------------------------------------------
# Pure-JAX reference (PyTorch semantics, incl. conv bias; f32 end-to-end)
# ---------------------------------------------------------------------------
def reference_forward(x, params):
    h = x
    for i, (_, k, s) in enumerate(CONV_CFG):
        w = params[f"conv{i}_w"]
        h = lax.conv_general_dilated(h, w, (s, s), "VALID",
                                     dimension_numbers=("NCHW", "OIHW", "NCHW"))
        h = h + params[f"conv{i}_b"][None, :, None, None]
        mean = jnp.mean(h, axis=(0, 2, 3), keepdims=True)
        var = jnp.mean(jnp.square(h - mean), axis=(0, 2, 3), keepdims=True)
        h = (h - mean) / jnp.sqrt(var + EPS)
        h = h * params[f"bn{i}_g"][None, :, None, None] + params[f"bn{i}_b"][None, :, None, None]
        h = jnp.maximum(h, 0.0)
    B = h.shape[0]
    flat = h.reshape(B, -1)
    ha = jnp.maximum(flat @ params["w1a"] + params["b1a"], 0.0)
    adv = ha @ params["w2a"] + params["b2a"]
    hv = jnp.maximum(flat @ params["w1v"] + params["b1v"], 0.0)
    val = hv @ params["w2v"] + params["b2v"]
    return val + adv - jnp.mean(adv, axis=1, keepdims=True)


if __name__ == "__main__":
    # (36-8)/4+1=8 -> (8-4)/2+1=3 -> 3-3+1=1  => conv_out=64. B=8 keeps batch-BN stats
    # well conditioned and gives 8-row (sublane-aligned) blocks everywhere.
    B, C, H, W = 8, 4, 36, 36
    n_actions = 8

    root = jax.random.PRNGKey(0)
    kx, kp = jax.random.split(root)
    x = jax.random.normal(kx, (B, C, H, W), jnp.float32)
    params = init_params(kp, C, H, n_actions)
    ops = prepare_operands(params)                 # one-time weight preprocessing

    fwd = jax.jit(functools.partial(dueling_dqn_forward, n_actions=n_actions))
    out = jax.block_until_ready(fwd(x, ops))
    ref = jax.block_until_ready(reference_forward(x, params))

    assert out.shape == (B, n_actions), out.shape
    err = float(jnp.max(jnp.abs(out - ref)))
    # bf16 GEMM inputs (f32 accumulation / BN); tolerance sized for that.
    assert err < 2.5e-2, f"max abs err {err}"
    print("KERNEL_OK")
</pallas_src>

<mosaic_0001>
module attributes {stable_mosaic.version = 11 : i64} {
  func.func @kernel(%arg0: memref<512x256xbf16, #tpu.memory_space<vmem>>, %arg1: memref<256x32xbf16, #tpu.memory_space<vmem>>, %arg2: memref<2x32xf32, #tpu.memory_space<vmem>>, %arg3: memref<512x64xbf16, #tpu.memory_space<vmem>>, %arg4: memref<2x64xf32, #tpu.memory_space<vmem>>, %arg5: memref<576x64xbf16, #tpu.memory_space<vmem>>, %arg6: memref<2x64xf32, #tpu.memory_space<vmem>>, %arg7: memref<64x1024xbf16, #tpu.memory_space<vmem>>, %arg8: memref<1x1024xf32, #tpu.memory_space<vmem>>, %arg9: memref<1024x128xbf16, #tpu.memory_space<vmem>>, %arg10: memref<1x128xf32, #tpu.memory_space<vmem>>, %arg11: memref<8x128xf32, #tpu.memory_space<vmem>>, %arg12: memref<8x8x8x32xf32, #tpu.memory_space<vmem>>) attributes {dimension_semantics = [], scalar_prefetch = 0 : i64, scratch_operands = 1 : i64, tpu.core_type = #tpu.core_type<tc>} {
    %c0 = arith.constant 0 : index
    %c0_0 = arith.constant 0 : index
    %0 = vector.load %arg0[%c0, %c0_0] : memref<512x256xbf16, #tpu.memory_space<vmem>>, vector<512x256xbf16>
    %c0_1 = arith.constant 0 : index
    %c0_2 = arith.constant 0 : index
    %1 = vector.load %arg1[%c0_1, %c0_2] : memref<256x32xbf16, #tpu.memory_space<vmem>>, vector<256x32xbf16>
    %cst = arith.constant dense<0.000000e+00> : vector<512x32xf32>
    %2 = tpu.matmul %0, %1, %cst {dimension_numbers = #tpu.dot_dimension_numbers<[1], [0], [0], [1], [0, 0, 1, 1], [], []>} : vector<512x256xbf16>, vector<256x32xbf16>, vector<512x32xf32> -> vector<512x32xf32>
    %c0_3 = arith.constant 0 : index
    %c0_4 = arith.constant 0 : index
    %3 = vector.load %arg2[%c0_3, %c0_4] : memref<2x32xf32, #tpu.memory_space<vmem>>, vector<2x32xf32>
    %cst_5 = arith.constant dense<0.000000e+00> : vector<32xf32>
    %4 = vector.multi_reduction <add>, %2, %cst_5 [0] : vector<512x32xf32> to vector<32xf32>
    %5 = vector.shape_cast %4 : vector<32xf32> to vector<1x32xf32>
    %cst_6 = arith.constant 5.120000e+02 : f32
    %6 = vector.broadcast %cst_6 : f32 to vector<1x32xf32>
    %7 = arith.divf %5, %6 : vector<1x32xf32>
    %8 = vector.broadcast %7 : vector<1x32xf32> to vector<512x32xf32>
    %9 = arith.subf %2, %8 : vector<512x32xf32>
    %10 = arith.mulf %9, %9 : vector<512x32xf32>
    %cst_7 = arith.constant dense<0.000000e+00> : vector<32xf32>
    %11 = vector.multi_reduction <add>, %10, %cst_7 [0] : vector<512x32xf32> to vector<32xf32>
    %12 = vector.shape_cast %11 : vector<32xf32> to vector<1x32xf32>
    %cst_8 = arith.constant 5.120000e+02 : f32
    %13 = vector.broadcast %cst_8 : f32 to vector<1x32xf32>
    %14 = arith.divf %12, %13 : vector<1x32xf32>
    %cst_9 = arith.constant 9.99999974E-6 : f32
    %15 = vector.broadcast %cst_9 : f32 to vector<1x32xf32>
    %16 = arith.addf %14, %15 : vector<1x32xf32>
    %17 = math.rsqrt %16 : vector<1x32xf32>
    %18 = vector.broadcast %17 : vector<1x32xf32> to vector<512x32xf32>
    %19 = arith.mulf %9, %18 : vector<512x32xf32>
    %20 = vector.extract_strided_slice %3 {offsets = [0, 0], sizes = [1, 32], strides = [1, 1]} : vector<2x32xf32> to vector<1x32xf32>
    %21 = vector.broadcast %20 : vector<1x32xf32> to vector<512x32xf32>
    %22 = arith.mulf %19, %21 : vector<512x32xf32>
    %23 = vector.extract_strided_slice %3 {offsets = [1, 0], sizes = [1, 32], strides = [1, 1]} : vector<2x32xf32> to vector<1x32xf32>
    %24 = vector.broadcast %23 : vector<1x32xf32> to vector<512x32xf32>
    %25 = arith.addf %22, %24 : vector<512x32xf32>
    %cst_10 = arith.constant 0.000000e+00 : f32
    %26 = vector.broadcast %cst_10 : f32 to vector<512x32xf32>
    %27 = arith.maximumf %25, %26 : vector<512x32xf32>
    %28 = vector.shape_cast %27 : vector<512x32xf32> to vector<8x8x8x32xf32>
    %c0_11 = arith.constant 0 : index
    %c0_12 = arith.constant 0 : index
    %c0_13 = arith.constant 0 : index
    %c0_14 = arith.constant 0 : index
    %29 = vector.load %arg12[%c0_11, %c0_12, %c0_13, %c0_14] : memref<8x8x8x32xf32, #tpu.memory_space<vmem>>, vector<8x8x8x32xf32>
    tpu.vector_store %arg12[%c0_11, %c0_12, %c0_13, %c0_14], %28 {strides = array<i32>} : memref<8x8x8x32xf32, #tpu.memory_space<vmem>>, vector<8x8x8x32xf32>,
    %c0_15 = arith.constant 0 : index
    %c0_16 = arith.constant 0 : index
    %c0_17 = arith.constant 0 : index
    %c0_18 = arith.constant 0 : index
    %30 = vector.load %arg12[%c0_15, %c0_16, %c0_17, %c0_18] : memref<8x8x8x32xf32, #tpu.memory_space<vmem>>, vector<8x1x1x32xf32>
    %31 = vector.shape_cast %30 : vector<8x1x1x32xf32> to vector<8x32xf32>
    %c0_19 = arith.constant 0 : index
    %c0_20 = arith.constant 0 : index
    %c1 = arith.constant 1 : index
    %c0_21 = arith.constant 0 : index
    %32 = vector.load %arg12[%c0_19, %c0_20, %c1, %c0_21] : memref<8x8x8x32xf32, #tpu.memory_space<vmem>>, vector<8x1x1x32xf32>
    %33 = vector.shape_cast %32 : vector<8x1x1x32xf32> to vector<8x32xf32>
    %c0_22 = arith.constant 0 : index
    %c0_23 = arith.constant 0 : index
    %c2 = arith.constant 2 : index
    %c0_24 = arith.constant 0 : index
    %34 = vector.load %arg12[%c0_22, %c0_23, %c2, %c0_24] : memref<8x8x8x32xf32, #tpu.memory_space<vmem>>, vector<8x1x1x32xf32>
    %35 = vector.shape_cast %34 : vector<8x1x1x32xf32> to vector<8x32xf32>
    %c0_25 = arith.constant 0 : index
    %c0_26 = arith.constant 0 : index
    %c3 = arith.constant 3 : index
    %c0_27 = arith.constant 0 : index
    %36 = vector.load %arg12[%c0_25, %c0_26, %c3, %c0_27] : memref<8x8x8x32xf32, #tpu.memory_space<vmem>>, vector<8x1x1x32xf32>
    %37 = vector.shape_cast %36 : vector<8x1x1x32xf32> to vector<8x32xf32>
    %c0_28 = arith.constant 0 : index
    %c1_29 = arith.constant 1 : index
    %c0_30 = arith.constant 0 : index
    %c0_31 = arith.constant 0 : index
    %38 = vector.load %arg12[%c0_28, %c1_29, %c0_30, %c0_31] : memref<8x8x8x32xf32, #tpu.memory_space<vmem>>, vector<8x1x1x32xf32>
    %39 = vector.shape_cast %38 : vector<8x1x1x32xf32> to vector<8x32xf32>
    %c0_32 = arith.constant 0 : index
    %c1_33 = arith.constant 1 : index
    %c1_34 = arith.constant 1 : index
    %c0_35 = arith.constant 0 : index
    %40 = vector.load %arg12[%c0_32, %c1_33, %c1_34, %c0_35] : memref<8x8x8x32xf32, #tpu.memory_space<vmem>>, vector<8x1x1x32xf32>
    %41 = vector.shape_cast %40 : vector<8x1x1x32xf32> to vector<8x32xf32>
    %c0_36 = arith.constant 0 : index
    %c1_37 = arith.constant 1 : index
    %c2_38 = arith.constant 2 : index
    %c0_39 = arith.constant 0 : index
    %42 = vector.load %arg12[%c0_36, %c1_37, %c2_38, %c0_39] : memref<8x8x8x32xf32, #tpu.memory_space<vmem>>, vector<8x1x1x32xf32>
    %43 = vector.shape_cast %42 : vector<8x1x1x32xf32> to vector<8x32xf32>
    %c0_40 = arith.constant 0 : index
    %c1_41 = arith.constant 1 : index
    %c3_42 = arith.constant 3 : index
    %c0_43 = arith.constant 0 : index
    %44 = vector.load %arg12[%c0_40, %c1_41, %c3_42, %c0_43] : memref<8x8x8x32xf32, #tpu.memory_space<vmem>>, vector<8x1x1x32xf32>
    %45 = vector.shape_cast %44 : vector<8x1x1x32xf32> to vector<8x32xf32>
    %c0_44 = arith.constant 0 : index
    %c2_45 = arith.constant 2 : index
    %c0_46 = arith.constant 0 : index
    %c0_47 = arith.constant 0 : index
    %46 = vector.load %arg12[%c0_44, %c2_45, %c0_46, %c0_47] : memref<8x8x8x32xf32, #tpu.memory_space<vmem>>, vector<8x1x1x32xf32>
    %47 = vector.shape_cast %46 : vector<8x1x1x32xf32> to vector<8x32xf32>
    %c0_48 = arith.constant 0 : index
    %c2_49 = arith.constant 2 : index
    %c1_50 = arith.constant 1 : index
    %c0_51 = arith.constant 0 : index
    %48 = vector.load %arg12[%c0_48, %c2_49, %c1_50, %c0_51] : memref<8x8x8x32xf32, #tpu.memory_space<vmem>>, vector<8x1x1x32xf32>
    %49 = vector.shape_cast %48 : vector<8x1x1x32xf32> to vector<8x32xf32>
    %c0_52 = arith.constant 0 : index
    %c2_53 = arith.constant 2 : index
    %c2_54 = arith.constant 2 : index
    %c0_55 = arith.constant 0 : index
    %50 = vector.load %arg12[%c0_52, %c2_53, %c2_54, %c0_55] : memref<8x8x8x32xf32, #tpu.memory_space<vmem>>, vector<8x1x1x32xf32>
    %51 = vector.shape_cast %50 : vector<8x1x1x32xf32> to vector<8x32xf32>
    %c0_56 = arith.constant 0 : index
    %c2_57 = arith.constant 2 : index
    %c3_58 = arith.constant 3 : index
    %c0_59 = arith.constant 0 : index
    %52 = vector.load %arg12[%c0_56, %c2_57, %c3_58, %c0_59] : memref<8x8x8x32xf32, #tpu.memory_space<vmem>>, vector<8x1x1x32xf32>
    %53 = vector.shape_cast %52 : vector<8x1x1x32xf32> to vector<8x32xf32>
    %c0_60 = arith.constant 0 : index
    %c3_61 = arith.constant 3 : index
    %c0_62 = arith.constant 0 : index
    %c0_63 = arith.constant 0 : index
    %54 = vector.load %arg12[%c0_60, %c3_61, %c0_62, %c0_63] : memref<8x8x8x32xf32, #tpu.memory_space<vmem>>, vector<8x1x1x32xf32>
    %55 = vector.shape_cast %54 : vector<8x1x1x32xf32> to vector<8x32xf32>
    %c0_64 = arith.constant 0 : index
    %c3_65 = arith.constant 3 : index
    %c1_66 = arith.constant 1 : index
    %c0_67 = arith.constant 0 : index
    %56 = vector.load %arg12[%c0_64, %c3_65, %c1_66, %c0_67] : memref<8x8x8x32xf32, #tpu.memory_space<vmem>>, vector<8x1x1x32xf32>
    %57 = vector.shape_cast %56 : vector<8x1x1x32xf32> to vector<8x32xf32>
    %c0_68 = arith.constant 0 : index
    %c3_69 = arith.constant 3 : index
    %c2_70 = arith.constant 2 : index
    %c0_71 = arith.constant 0 : index
    %58 = vector.load %arg12[%c0_68, %c3_69, %c2_70, %c0_71] : memref<8x8x8x32xf32, #tpu.memory_space<vmem>>, vector<8x1x1x32xf32>
    %59 = vector.shape_cast %58 : vector<8x1x1x32xf32> to vector<8x32xf32>
    %c0_72 = arith.constant 0 : index
    %c3_73 = arith.constant 3 : index
    %c3_74 = arith.constant 3 : index
    %c0_75 = arith.constant 0 : index
    %60 = vector.load %arg12[%c0_72, %c3_73, %c3_74, %c0_75] : memref<8x8x8x32xf32, #tpu.memory_space<vmem>>, vector<8x1x1x32xf32>
    %61 = vector.shape_cast %60 : vector<8x1x1x32xf32> to vector<8x32xf32>
    %62 = tpu.concatenate %31, %33, %35, %37, %39, %41, %43, %45, %47, %49, %51, %53, %55, %57, %59, %61 in 1 : vector<8x32xf32>, vector<8x32xf32>, vector<8x32xf32>, vector<8x32xf32>, vector<8x32xf32>, vector<8x32xf32>, vector<8x32xf32>, vector<8x32xf32>, vector<8x32xf32>, vector<8x32xf32>, vector<8x32xf32>, vector<8x32xf32>, vector<8x32xf32>, vector<8x32xf32>, vector<8x32xf32>, vector<8x32xf32> -> vector<8x512xf32>
    %c0_76 = arith.constant 0 : index
    %c0_77 = arith.constant 0 : index
    %c2_78 = arith.constant 2 : index
    %c0_79 = arith.constant 0 : index
    %63 = vector.load %arg12[%c0_76, %c0_77, %c2_78, %c0_79] : memref<8x8x8x32xf32, #tpu.memory_space<vmem>>, vector<8x1x1x32xf32>
    %64 = vector.shape_cast %63 : vector<8x1x1x32xf32> to vector<8x32xf32>
    %c0_80 = arith.constant 0 : index
    %c0_81 = arith.constant 0 : index
    %c3_82 = arith.constant 3 : index
    %c0_83 = arith.constant 0 : index
    %65 = vector.load %arg12[%c0_80, %c0_81, %c3_82, %c0_83] : memref<8x8x8x32xf32, #tpu.memory_space<vmem>>, vector<8x1x1x32xf32>
    %66 = vector.shape_cast %65 : vector<8x1x1x32xf32> to vector<8x32xf32>
    %c0_84 = arith.constant 0 : index
    %c0_85 = arith.constant 0 : index
    %c4 = arith.constant 4 : index
    %c0_86 = arith.constant 0 : index
    %67 = vector.load %arg12[%c0_84, %c0_85, %c4, %c0_86] : memref<8x8x8x32xf32, #tpu.memory_space<vmem>>, vector<8x1x1x32xf32>
    %68 = vector.shape_cast %67 : vector<8x1x1x32xf32> to vector<8x32xf32>
    %c0_87 = arith.constant 0 : index
    %c0_88 = arith.constant 0 : index
    %c5 = arith.constant 5 : index
    %c0_89 = arith.constant 0 : index
    %69 = vector.load %arg12[%c0_87, %c0_88, %c5, %c0_89] : memref<8x8x8x32xf32, #tpu.memory_space<vmem>>, vector<8x1x1x32xf32>
    %70 = vector.shape_cast %69 : vector<8x1x1x32xf32> to vector<8x32xf32>
    %c0_90 = arith.constant 0 : index
    %c1_91 = arith.constant 1 : index
    %c2_92 = arith.constant 2 : index
    %c0_93 = arith.constant 0 : index
    %71 = vector.load %arg12[%c0_90, %c1_91, %c2_92, %c0_93] : memref<8x8x8x32xf32, #tpu.memory_space<vmem>>, vector<8x1x1x32xf32>
    %72 = vector.shape_cast %71 : vector<8x1x1x32xf32> to vector<8x32xf32>
    %c0_94 = arith.constant 0 : index
    %c1_95 = arith.constant 1 : index
    %c3_96 = arith.constant 3 : index
    %c0_97 = arith.constant 0 : index
    %73 = vector.load %arg12[%c0_94, %c1_95, %c3_96, %c0_97] : memref<8x8x8x32xf32, #tpu.memory_space<vmem>>, vector<8x1x1x32xf32>
    %74 = vector.shape_cast %73 : vector<8x1x1x32xf32> to vector<8x32xf32>
    %c0_98 = arith.constant 0 : index
    %c1_99 = arith.constant 1 : index
    %c4_100 = arith.constant 4 : index
    %c0_101 = arith.constant 0 : index
    %75 = vector.load %arg12[%c0_98, %c1_99, %c4_100, %c0_101] : memref<8x8x8x32xf32, #tpu.memory_space<vmem>>, vector<8x1x1x32xf32>
    %76 = vector.shape_cast %75 : vector<8x1x1x32xf32> to vector<8x32xf32>
    %c0_102 = arith.constant 0 : index
    %c1_103 = arith.constant 1 : index
    %c5_104 = arith.constant 5 : index
    %c0_105 = arith.constant 0 : index
    %77 = vector.load %arg12[%c0_102, %c1_103, %c5_104, %c0_105] : memref<8x8x8x32xf32, #tpu.memory_space<vmem>>, vector<8x1x1x32xf32>
    %78 = vector.shape_cast %77 : vector<8x1x1x32xf32> to vector<8x32xf32>
    %c0_106 = arith.constant 0 : index
    %c2_107 = arith.constant 2 : index
    %c2_108 = arith.constant 2 : index
    %c0_109 = arith.constant 0 : index
    %79 = vector.load %arg12[%c0_106, %c2_107, %c2_108, %c0_109] : memref<8x8x8x32xf32, #tpu.memory_space<vmem>>, vector<8x1x1x32xf32>
    %80 = vector.shape_cast %79 : vector<8x1x1x32xf32> to vector<8x32xf32>
    %c0_110 = arith.constant 0 : index
    %c2_111 = arith.constant 2 : index
    %c3_112 = arith.constant 3 : index
    %c0_113 = arith.constant 0 : index
    %81 = vector.load %arg12[%c0_110, %c2_111, %c3_112, %c0_113] : memref<8x8x8x32xf32, #tpu.memory_space<vmem>>, vector<8x1x1x32xf32>
    %82 = vector.shape_cast %81 : vector<8x1x1x32xf32> to vector<8x32xf32>
    %c0_114 = arith.constant 0 : index
    %c2_115 = arith.constant 2 : index
    %c4_116 = arith.constant 4 : index
    %c0_117 = arith.constant 0 : index
    %83 = vector.load %arg12[%c0_114, %c2_115, %c4_116, %c0_117] : memref<8x8x8x32xf32, #tpu.memory_space<vmem>>, vector<8x1x1x32xf32>
    %84 = vector.shape_cast %83 : vector<8x1x1x32xf32> to vector<8x32xf32>
    %c0_118 = arith.constant 0 : index
    %c2_119 = arith.constant 2 : index
    %c5_120 = arith.constant 5 : index
    %c0_121 = arith.constant 0 : index
    %85 = vector.load %arg12[%c0_118, %c2_119, %c5_120, %c0_121] : memref<8x8x8x32xf32, #tpu.memory_space<vmem>>, vector<8x1x1x32xf32>
    %86 = vector.shape_cast %85 : vector<8x1x1x32xf32> to vector<8x32xf32>
    %c0_122 = arith.constant 0 : index
    %c3_123 = arith.constant 3 : index
    %c2_124 = arith.constant 2 : index
    %c0_125 = arith.constant 0 : index
    %87 = vector.load %arg12[%c0_122, %c3_123, %c2_124, %c0_125] : memref<8x8x8x32xf32, #tpu.memory_space<vmem>>, vector<8x1x1x32xf32>
    %88 = vector.shape_cast %87 : vector<8x1x1x32xf32> to vector<8x32xf32>
    %c0_126 = arith.constant 0 : index
    %c3_127 = arith.constant 3 : index
    %c3_128 = arith.constant 3 : index
    %c0_129 = arith.constant 0 : index
    %89 = vector.load %arg12[%c0_126, %c3_127, %c3_128, %c0_129] : memref<8x8x8x32xf32, #tpu.memory_space<vmem>>, vector<8x1x1x32xf32>
    %90 = vector.shape_cast %89 : vector<8x1x1x32xf32> to vector<8x32xf32>
    %c0_130 = arith.constant 0 : index
    %c3_131 = arith.constant 3 : index
    %c4_132 = arith.constant 4 : index
    %c0_133 = arith.constant 0 : index
    %91 = vector.load %arg12[%c0_130, %c3_131, %c4_132, %c0_133] : memref<8x8x8x32xf32, #tpu.memory_space<vmem>>, vector<8x1x1x32xf32>
    %92 = vector.shape_cast %91 : vector<8x1x1x32xf32> to vector<8x32xf32>
    %c0_134 = arith.constant 0 : index
    %c3_135 = arith.constant 3 : index
    %c5_136 = arith.constant 5 : index
    %c0_137 = arith.constant 0 : index
    %93 = vector.load %arg12[%c0_134, %c3_135, %c5_136, %c0_137] : memref<8x8x8x32xf32, #tpu.memory_space<vmem>>, vector<8x1x1x32xf32>
    %94 = vector.shape_cast %93 : vector<8x1x1x32xf32> to vector<8x32xf32>
    %95 = tpu.concatenate %64, %66, %68, %70, %72, %74, %76, %78, %80, %82, %84, %86, %88, %90, %92, %94 in 1 : vector<8x32xf32>, vector<8x32xf32>, vector<8x32xf32>, vector<8x32xf32>, vector<8x32xf32>, vector<8x32xf32>, vector<8x32xf32>, vector<8x32xf32>, vector<8x32xf32>, vector<8x32xf32>, vector<8x32xf32>, vector<8x32xf32>, vector<8x32xf32>, vector<8x32xf32>, vector<8x32xf32>, vector<8x32xf32> -> vector<8x512xf32>
    %c0_138 = arith.constant 0 : index
    %c0_139 = arith.constant 0 : index
    %c4_140 = arith.constant 4 : index
    %c0_141 = arith.constant 0 : index
    %96 = vector.load %arg12[%c0_138, %c0_139, %c4_140, %c0_141] : memref<8x8x8x32xf32, #tpu.memory_space<vmem>>, vector<8x1x1x32xf32>
    %97 = vector.shape_cast %96 : vector<8x1x1x32xf32> to vector<8x32xf32>
    %c0_142 = arith.constant 0 : index
    %c0_143 = arith.constant 0 : index
    %c5_144 = arith.constant 5 : index
    %c0_145 = arith.constant 0 : index
    %98 = vector.load %arg12[%c0_142, %c0_143, %c5_144, %c0_145] : memref<8x8x8x32xf32, #tpu.memory_space<vmem>>, vector<8x1x1x32xf32>
    %99 = vector.shape_cast %98 : vector<8x1x1x32xf32> to vector<8x32xf32>
    %c0_146 = arith.constant 0 : index
    %c0_147 = arith.constant 0 : index
    %c6 = arith.constant 6 : index
    %c0_148 = arith.constant 0 : index
    %100 = vector.load %arg12[%c0_146, %c0_147, %c6, %c0_148] : memref<8x8x8x32xf32, #tpu.memory_space<vmem>>, vector<8x1x1x32xf32>
    %101 = vector.shape_cast %100 : vector<8x1x1x32xf32> to vector<8x32xf32>
    %c0_149 = arith.constant 0 : index
    %c0_150 = arith.constant 0 : index
    %c7 = arith.constant 7 : index
    %c0_151 = arith.constant 0 : index
    %102 = vector.load %arg12[%c0_149, %c0_150, %c7, %c0_151] : memref<8x8x8x32xf32, #tpu.memory_space<vmem>>, vector<8x1x1x32xf32>
    %103 = vector.shape_cast %102 : vector<8x1x1x32xf32> to vector<8x32xf32>
    %c0_152 = arith.constant 0 : index
    %c1_153 = arith.constant 1 : index
    %c4_154 = arith.constant 4 : index
    %c0_155 = arith.constant 0 : index
    %104 = vector.load %arg12[%c0_152, %c1_153, %c4_154, %c0_155] : memref<8x8x8x32xf32, #tpu.memory_space<vmem>>, vector<8x1x1x32xf32>
    %105 = vector.shape_cast %104 : vector<8x1x1x32xf32> to vector<8x32xf32>
    %c0_156 = arith.constant 0 : index
    %c1_157 = arith.constant 1 : index
    %c5_158 = arith.constant 5 : index
    %c0_159 = arith.constant 0 : index
    %106 = vector.load %arg12[%c0_156, %c1_157, %c5_158, %c0_159] : memref<8x8x8x32xf32, #tpu.memory_space<vmem>>, vector<8x1x1x32xf32>
    %107 = vector.shape_cast %106 : vector<8x1x1x32xf32> to vector<8x32xf32>
    %c0_160 = arith.constant 0 : index
    %c1_161 = arith.constant 1 : index
    %c6_162 = arith.constant 6 : index
    %c0_163 = arith.constant 0 : index
    %108 = vector.load %arg12[%c0_160, %c1_161, %c6_162, %c0_163] : memref<8x8x8x32xf32, #tpu.memory_space<vmem>>, vector<8x1x1x32xf32>
    %109 = vector.shape_cast %108 : vector<8x1x1x32xf32> to vector<8x32xf32>
    %c0_164 = arith.constant 0 : index
    %c1_165 = arith.constant 1 : index
    %c7_166 = arith.constant 7 : index
    %c0_167 = arith.constant 0 : index
    %110 = vector.load %arg12[%c0_164, %c1_165, %c7_166, %c0_167] : memref<8x8x8x32xf32, #tpu.memory_space<vmem>>, vector<8x1x1x32xf32>
    %111 = vector.shape_cast %110 : vector<8x1x1x32xf32> to vector<8x32xf32>
    %c0_168 = arith.constant 0 : index
    %c2_169 = arith.constant 2 : index
    %c4_170 = arith.constant 4 : index
    %c0_171 = arith.constant 0 : index
    %112 = vector.load %arg12[%c0_168, %c2_169, %c4_170, %c0_171] : memref<8x8x8x32xf32, #tpu.memory_space<vmem>>, vector<8x1x1x32xf32>
    %113 = vector.shape_cast %112 : vector<8x1x1x32xf32> to vector<8x32xf32>
    %c0_172 = arith.constant 0 : index
    %c2_173 = arith.constant 2 : index
    %c5_174 = arith.constant 5 : index
    %c0_175 = arith.constant 0 : index
    %114 = vector.load %arg12[%c0_172, %c2_173, %c5_174, %c0_175] : memref<8x8x8x32xf32, #tpu.memory_space<vmem>>, vector<8x1x1x32xf32>
    %115 = vector.shape_cast %114 : vector<8x1x1x32xf32> to vector<8x32xf32>
    %c0_176 = arith.constant 0 : index
    %c2_177 = arith.constant 2 : index
    %c6_178 = arith.constant 6 : index
    %c0_179 = arith.constant 0 : index
    %116 = vector.load %arg12[%c0_176, %c2_177, %c6_178, %c0_179] : memref<8x8x8x32xf32, #tpu.memory_space<vmem>>, vector<8x1x1x32xf32>
    %117 = vector.shape_cast %116 : vector<8x1x1x32xf32> to vector<8x32xf32>
    %c0_180 = arith.constant 0 : index
    %c2_181 = arith.constant 2 : index
    %c7_182 = arith.constant 7 : index
    %c0_183 = arith.constant 0 : index
    %118 = vector.load %arg12[%c0_180, %c2_181, %c7_182, %c0_183] : memref<8x8x8x32xf32, #tpu.memory_space<vmem>>, vector<8x1x1x32xf32>
    %119 = vector.shape_cast %118 : vector<8x1x1x32xf32> to vector<8x32xf32>
    %c0_184 = arith.constant 0 : index
    %c3_185 = arith.constant 3 : index
    %c4_186 = arith.constant 4 : index
    %c0_187 = arith.constant 0 : index
    %120 = vector.load %arg12[%c0_184, %c3_185, %c4_186, %c0_187] : memref<8x8x8x32xf32, #tpu.memory_space<vmem>>, vector<8x1x1x32xf32>
    %121 = vector.shape_cast %120 : vector<8x1x1x32xf32> to vector<8x32xf32>
    %c0_188 = arith.constant 0 : index
    %c3_189 = arith.constant 3 : index
    %c5_190 = arith.constant 5 : index
    %c0_191 = arith.constant 0 : index
    %122 = vector.load %arg12[%c0_188, %c3_189, %c5_190, %c0_191] : memref<8x8x8x32xf32, #tpu.memory_space<vmem>>, vector<8x1x1x32xf32>
    %123 = vector.shape_cast %122 : vector<8x1x1x32xf32> to vector<8x32xf32>
    %c0_192 = arith.constant 0 : index
    %c3_193 = arith.constant 3 : index
    %c6_194 = arith.constant 6 : index
    %c0_195 = arith.constant 0 : index
    %124 = vector.load %arg12[%c0_192, %c3_193, %c6_194, %c0_195] : memref<8x8x8x32xf32, #tpu.memory_space<vmem>>, vector<8x1x1x32xf32>
    %125 = vector.shape_cast %124 : vector<8x1x1x32xf32> to vector<8x32xf32>
    %c0_196 = arith.constant 0 : index
    %c3_197 = arith.constant 3 : index
    %c7_198 = arith.constant 7 : index
    %c0_199 = arith.constant 0 : index
    %126 = vector.load %arg12[%c0_196, %c3_197, %c7_198, %c0_199] : memref<8x8x8x32xf32, #tpu.memory_space<vmem>>, vector<8x1x1x32xf32>
    %127 = vector.shape_cast %126 : vector<8x1x1x32xf32> to vector<8x32xf32>
    %128 = tpu.concatenate %97, %99, %101, %103, %105, %107, %109, %111, %113, %115, %117, %119, %121, %123, %125, %127 in 1 : vector<8x32xf32>, vector<8x32xf32>, vector<8x32xf32>, vector<8x32xf32>, vector<8x32xf32>, vector<8x32xf32>, vector<8x32xf32>, vector<8x32xf32>, vector<8x32xf32>, vector<8x32xf32>, vector<8x32xf32>, vector<8x32xf32>, vector<8x32xf32>, vector<8x32xf32>, vector<8x32xf32>, vector<8x32xf32> -> vector<8x512xf32>
    %c0_200 = arith.constant 0 : index
    %c2_201 = arith.constant 2 : index
    %c0_202 = arith.constant 0 : index
    %c0_203 = arith.constant 0 : index
    %129 = vector.load %arg12[%c0_200, %c2_201, %c0_202, %c0_203] : memref<8x8x8x32xf32, #tpu.memory_space<vmem>>, vector<8x1x1x32xf32>
    %130 = vector.shape_cast %129 : vector<8x1x1x32xf32> to vector<8x32xf32>
    %c0_204 = arith.constant 0 : index
    %c2_205 = arith.constant 2 : index
    %c1_206 = arith.constant 1 : index
    %c0_207 = arith.constant 0 : index
    %131 = vector.load %arg12[%c0_204, %c2_205, %c1_206, %c0_207] : memref<8x8x8x32xf32, #tpu.memory_space<vmem>>, vector<8x1x1x32xf32>
    %132 = vector.shape_cast %131 : vector<8x1x1x32xf32> to vector<8x32xf32>
    %c0_208 = arith.constant 0 : index
    %c2_209 = arith.constant 2 : index
    %c2_210 = arith.constant 2 : index
    %c0_211 = arith.constant 0 : index
    %133 = vector.load %arg12[%c0_208, %c2_209, %c2_210, %c0_211] : memref<8x8x8x32xf32, #tpu.memory_space<vmem>>, vector<8x1x1x32xf32>
    %134 = vector.shape_cast %133 : vector<8x1x1x32xf32> to vector<8x32xf32>
    %c0_212 = arith.constant 0 : index
    %c2_213 = arith.constant 2 : index
    %c3_214 = arith.constant 3 : index
    %c0_215 = arith.constant 0 : index
    %135 = vector.load %arg12[%c0_212, %c2_213, %c3_214, %c0_215] : memref<8x8x8x32xf32, #tpu.memory_space<vmem>>, vector<8x1x1x32xf32>
    %136 = vector.shape_cast %135 : vector<8x1x1x32xf32> to vector<8x32xf32>
    %c0_216 = arith.constant 0 : index
    %c3_217 = arith.constant 3 : index
    %c0_218 = arith.constant 0 : index
    %c0_219 = arith.constant 0 : index
    %137 = vector.load %arg12[%c0_216, %c3_217, %c0_218, %c0_219] : memref<8x8x8x32xf32, #tpu.memory_space<vmem>>, vector<8x1x1x32xf32>
    %138 = vector.shape_cast %137 : vector<8x1x1x32xf32> to vector<8x32xf32>
    %c0_220 = arith.constant 0 : index
    %c3_221 = arith.constant 3 : index
    %c1_222 = arith.constant 1 : index
    %c0_223 = arith.constant 0 : index
    %139 = vector.load %arg12[%c0_220, %c3_221, %c1_222, %c0_223] : memref<8x8x8x32xf32, #tpu.memory_space<vmem>>, vector<8x1x1x32xf32>
    %140 = vector.shape_cast %139 : vector<8x1x1x32xf32> to vector<8x32xf32>
    %c0_224 = arith.constant 0 : index
    %c3_225 = arith.constant 3 : index
    %c2_226 = arith.constant 2 : index
    %c0_227 = arith.constant 0 : index
    %141 = vector.load %arg12[%c0_224, %c3_225, %c2_226, %c0_227] : memref<8x8x8x32xf32, #tpu.memory_space<vmem>>, vector<8x1x1x32xf32>
    %142 = vector.shape_cast %141 : vector<8x1x1x32xf32> to vector<8x32xf32>
    %c0_228 = arith.constant 0 : index
    %c3_229 = arith.constant 3 : index
    %c3_230 = arith.constant 3 : index
    %c0_231 = arith.constant 0 : index
    %143 = vector.load %arg12[%c0_228, %c3_229, %c3_230, %c0_231] : memref<8x8x8x32xf32, #tpu.memory_space<vmem>>, vector<8x1x1x32xf32>
    %144 = vector.shape_cast %143 : vector<8x1x1x32xf32> to vector<8x32xf32>
    %c0_232 = arith.constant 0 : index
    %c4_233 = arith.constant 4 : index
    %c0_234 = arith.constant 0 : index
    %c0_235 = arith.constant 0 : index
    %145 = vector.load %arg12[%c0_232, %c4_233, %c0_234, %c0_235] : memref<8x8x8x32xf32, #tpu.memory_space<vmem>>, vector<8x1x1x32xf32>
    %146 = vector.shape_cast %145 : vector<8x1x1x32xf32> to vector<8x32xf32>
    %c0_236 = arith.constant 0 : index
    %c4_237 = arith.constant 4 : index
    %c1_238 = arith.constant 1 : index
    %c0_239 = arith.constant 0 : index
    %147 = vector.load %arg12[%c0_236, %c4_237, %c1_238, %c0_239] : memref<8x8x8x32xf32, #tpu.memory_space<vmem>>, vector<8x1x1x32xf32>
    %148 = vector.shape_cast %147 : vector<8x1x1x32xf32> to vector<8x32xf32>
    %c0_240 = arith.constant 0 : index
    %c4_241 = arith.constant 4 : index
    %c2_242 = arith.constant 2 : index
    %c0_243 = arith.constant 0 : index
    %149 = vector.load %arg12[%c0_240, %c4_241, %c2_242, %c0_243] : memref<8x8x8x32xf32, #tpu.memory_space<vmem>>, vector<8x1x1x32xf32>
    %150 = vector.shape_cast %149 : vector<8x1x1x32xf32> to vector<8x32xf32>
    %c0_244 = arith.constant 0 : index
    %c4_245 = arith.constant 4 : index
    %c3_246 = arith.constant 3 : index
    %c0_247 = arith.constant 0 : index
    %151 = vector.load %arg12[%c0_244, %c4_245, %c3_246, %c0_247] : memref<8x8x8x32xf32, #tpu.memory_space<vmem>>, vector<8x1x1x32xf32>
    %152 = vector.shape_cast %151 : vector<8x1x1x32xf32> to vector<8x32xf32>
    %c0_248 = arith.constant 0 : index
    %c5_249 = arith.constant 5 : index
    %c0_250 = arith.constant 0 : index
    %c0_251 = arith.constant 0 : index
    %153 = vector.load %arg12[%c0_248, %c5_249, %c0_250, %c0_251] : memref<8x8x8x32xf32, #tpu.memory_space<vmem>>, vector<8x1x1x32xf32>
    %154 = vector.shape_cast %153 : vector<8x1x1x32xf32> to vector<8x32xf32>
    %c0_252 = arith.constant 0 : index
    %c5_253 = arith.constant 5 : index
    %c1_254 = arith.constant 1 : index
    %c0_255 = arith.constant 0 : index
    %155 = vector.load %arg12[%c0_252, %c5_253, %c1_254, %c0_255] : memref<8x8x8x32xf32, #tpu.memory_space<vmem>>, vector<8x1x1x32xf32>
    %156 = vector.shape_cast %155 : vector<8x1x1x32xf32> to vector<8x32xf32>
    %c0_256 = arith.constant 0 : index
    %c5_257 = arith.constant 5 : index
    %c2_258 = arith.constant 2 : index
    %c0_259 = arith.constant 0 : index
    %157 = vector.load %arg12[%c0_256, %c5_257, %c2_258, %c0_259] : memref<8x8x8x32xf32, #tpu.memory_space<vmem>>, vector<8x1x1x32xf32>
    %158 = vector.shape_cast %157 : vector<8x1x1x32xf32> to vector<8x32xf32>
    %c0_260 = arith.constant 0 : index
    %c5_261 = arith.constant 5 : index
    %c3_262 = arith.constant 3 : index
    %c0_263 = arith.constant 0 : index
    %159 = vector.load %arg12[%c0_260, %c5_261, %c3_262, %c0_263] : memref<8x8x8x32xf32, #tpu.memory_space<vmem>>, vector<8x1x1x32xf32>
    %160 = vector.shape_cast %159 : vector<8x1x1x32xf32> to vector<8x32xf32>
    %161 = tpu.concatenate %130, %132, %134, %136, %138, %140, %142, %144, %146, %148, %150, %152, %154, %156, %158, %160 in 1 : vector<8x32xf32>, vector<8x32xf32>, vector<8x32xf32>, vector<8x32xf32>, vector<8x32xf32>, vector<8x32xf32>, vector<8x32xf32>, vector<8x32xf32>, vector<8x32xf32>, vector<8x32xf32>, vector<8x32xf32>, vector<8x32xf32>, vector<8x32xf32>, vector<8x32xf32>, vector<8x32xf32>, vector<8x32xf32> -> vector<8x512xf32>
    %c0_264 = arith.constant 0 : index
    %c2_265 = arith.constant 2 : index
    %c2_266 = arith.constant 2 : index
    %c0_267 = arith.constant 0 : index
    %162 = vector.load %arg12[%c0_264, %c2_265, %c2_266, %c0_267] : memref<8x8x8x32xf32, #tpu.memory_space<vmem>>, vector<8x1x1x32xf32>
    %163 = vector.shape_cast %162 : vector<8x1x1x32xf32> to vector<8x32xf32>
    %c0_268 = arith.constant 0 : index
    %c2_269 = arith.constant 2 : index
    %c3_270 = arith.constant 3 : index
    %c0_271 = arith.constant 0 : index
    %164 = vector.load %arg12[%c0_268, %c2_269, %c3_270, %c0_271] : memref<8x8x8x32xf32, #tpu.memory_space<vmem>>, vector<8x1x1x32xf32>
    %165 = vector.shape_cast %164 : vector<8x1x1x32xf32> to vector<8x32xf32>
    %c0_272 = arith.constant 0 : index
    %c2_273 = arith.constant 2 : index
    %c4_274 = arith.constant 4 : index
    %c0_275 = arith.constant 0 : index
    %166 = vector.load %arg12[%c0_272, %c2_273, %c4_274, %c0_275] : memref<8x8x8x32xf32, #tpu.memory_space<vmem>>, vector<8x1x1x32xf32>
    %167 = vector.shape_cast %166 : vector<8x1x1x32xf32> to vector<8x32xf32>
    %c0_276 = arith.constant 0 : index
    %c2_277 = arith.constant 2 : index
    %c5_278 = arith.constant 5 : index
    %c0_279 = arith.constant 0 : index
    %168 = vector.load %arg12[%c0_276, %c2_277, %c5_278, %c0_279] : memref<8x8x8x32xf32, #tpu.memory_space<vmem>>, vector<8x1x1x32xf32>
    %169 = vector.shape_cast %168 : vector<8x1x1x32xf32> to vector<8x32xf32>
    %c0_280 = arith.constant 0 : index
    %c3_281 = arith.constant 3 : index
    %c2_282 = arith.constant 2 : index
    %c0_283 = arith.constant 0 : index
    %170 = vector.load %arg12[%c0_280, %c3_281, %c2_282, %c0_283] : memref<8x8x8x32xf32, #tpu.memory_space<vmem>>, vector<8x1x1x32xf32>
    %171 = vector.shape_cast %170 : vector<8x1x1x32xf32> to vector<8x32xf32>
    %c0_284 = arith.constant 0 : index
    %c3_285 = arith.constant 3 : index
    %c3_286 = arith.constant 3 : index
    %c0_287 = arith.constant 0 : index
    %172 = vector.load %arg12[%c0_284, %c3_285, %c3_286, %c0_287] : memref<8x8x8x32xf32, #tpu.memory_space<vmem>>, vector<8x1x1x32xf32>
    %173 = vector.shape_cast %172 : vector<8x1x1x32xf32> to vector<8x32xf32>
    %c0_288 = arith.constant 0 : index
    %c3_289 = arith.constant 3 : index
    %c4_290 = arith.constant 4 : index
    %c0_291 = arith.constant 0 : index
    %174 = vector.load %arg12[%c0_288, %c3_289, %c4_290, %c0_291] : memref<8x8x8x32xf32, #tpu.memory_space<vmem>>, vector<8x1x1x32xf32>
    %175 = vector.shape_cast %174 : vector<8x1x1x32xf32> to vector<8x32xf32>
    %c0_292 = arith.constant 0 : index
    %c3_293 = arith.constant 3 : index
    %c5_294 = arith.constant 5 : index
    %c0_295 = arith.constant 0 : index
    %176 = vector.load %arg12[%c0_292, %c3_293, %c5_294, %c0_295] : memref<8x8x8x32xf32, #tpu.memory_space<vmem>>, vector<8x1x1x32xf32>
    %177 = vector.shape_cast %176 : vector<8x1x1x32xf32> to vector<8x32xf32>
    %c0_296 = arith.constant 0 : index
    %c4_297 = arith.constant 4 : index
    %c2_298 = arith.constant 2 : index
    %c0_299 = arith.constant 0 : index
    %178 = vector.load %arg12[%c0_296, %c4_297, %c2_298, %c0_299] : memref<8x8x8x32xf32, #tpu.memory_space<vmem>>, vector<8x1x1x32xf32>
    %179 = vector.shape_cast %178 : vector<8x1x1x32xf32> to vector<8x32xf32>
    %c0_300 = arith.constant 0 : index
    %c4_301 = arith.constant 4 : index
    %c3_302 = arith.constant 3 : index
    %c0_303 = arith.constant 0 : index
    %180 = vector.load %arg12[%c0_300, %c4_301, %c3_302, %c0_303] : memref<8x8x8x32xf32, #tpu.memory_space<vmem>>, vector<8x1x1x32xf32>
    %181 = vector.shape_cast %180 : vector<8x1x1x32xf32> to vector<8x32xf32>
    %c0_304 = arith.constant 0 : index
    %c4_305 = arith.constant 4 : index
    %c4_306 = arith.constant 4 : index
    %c0_307 = arith.constant 0 : index
    %182 = vector.load %arg12[%c0_304, %c4_305, %c4_306, %c0_307] : memref<8x8x8x32xf32, #tpu.memory_space<vmem>>, vector<8x1x1x32xf32>
    %183 = vector.shape_cast %182 : vector<8x1x1x32xf32> to vector<8x32xf32>
    %c0_308 = arith.constant 0 : index
    %c4_309 = arith.constant 4 : index
    %c5_310 = arith.constant 5 : index
    %c0_311 = arith.constant 0 : index
    %184 = vector.load %arg12[%c0_308, %c4_309, %c5_310, %c0_311] : memref<8x8x8x32xf32, #tpu.memory_space<vmem>>, vector<8x1x1x32xf32>
    %185 = vector.shape_cast %184 : vector<8x1x1x32xf32> to vector<8x32xf32>
    %c0_312 = arith.constant 0 : index
    %c5_313 = arith.constant 5 : index
    %c2_314 = arith.constant 2 : index
    %c0_315 = arith.constant 0 : index
    %186 = vector.load %arg12[%c0_312, %c5_313, %c2_314, %c0_315] : memref<8x8x8x32xf32, #tpu.memory_space<vmem>>, vector<8x1x1x32xf32>
    %187 = vector.shape_cast %186 : vector<8x1x1x32xf32> to vector<8x32xf32>
    %c0_316 = arith.constant 0 : index
    %c5_317 = arith.constant 5 : index
    %c3_318 = arith.constant 3 : index
    %c0_319 = arith.constant 0 : index
    %188 = vector.load %arg12[%c0_316, %c5_317, %c3_318, %c0_319] : memref<8x8x8x32xf32, #tpu.memory_space<vmem>>, vector<8x1x1x32xf32>
    %189 = vector.shape_cast %188 : vector<8x1x1x32xf32> to vector<8x32xf32>
    %c0_320 = arith.constant 0 : index
    %c5_321 = arith.constant 5 : index
    %c4_322 = arith.constant 4 : index
    %c0_323 = arith.constant 0 : index
    %190 = vector.load %arg12[%c0_320, %c5_321, %c4_322, %c0_323] : memref<8x8x8x32xf32, #tpu.memory_space<vmem>>, vector<8x1x1x32xf32>
    %191 = vector.shape_cast %190 : vector<8x1x1x32xf32> to vector<8x32xf32>
    %c0_324 = arith.constant 0 : index
    %c5_325 = arith.constant 5 : index
    %c5_326 = arith.constant 5 : index
    %c0_327 = arith.constant 0 : index
    %192 = vector.load %arg12[%c0_324, %c5_325, %c5_326, %c0_327] : memref<8x8x8x32xf32, #tpu.memory_space<vmem>>, vector<8x1x1x32xf32>
    %193 = vector.shape_cast %192 : vector<8x1x1x32xf32> to vector<8x32xf32>
    %194 = tpu.concatenate %163, %165, %167, %169, %171, %173, %175, %177, %179, %181, %183, %185, %187, %189, %191, %193 in 1 : vector<8x32xf32>, vector<8x32xf32>, vector<8x32xf32>, vector<8x32xf32>, vector<8x32xf32>, vector<8x32xf32>, vector<8x32xf32>, vector<8x32xf32>, vector<8x32xf32>, vector<8x32xf32>, vector<8x32xf32>, vector<8x32xf32>, vector<8x32xf32>, vector<8x32xf32>, vector<8x32xf32>, vector<8x32xf32> -> vector<8x512xf32>
    %c0_328 = arith.constant 0 : index
    %c2_329 = arith.constant 2 : index
    %c4_330 = arith.constant 4 : index
    %c0_331 = arith.constant 0 : index
    %195 = vector.load %arg12[%c0_328, %c2_329, %c4_330, %c0_331] : memref<8x8x8x32xf32, #tpu.memory_space<vmem>>, vector<8x1x1x32xf32>
    %196 = vector.shape_cast %195 : vector<8x1x1x32xf32> to vector<8x32xf32>
    %c0_332 = arith.constant 0 : index
    %c2_333 = arith.constant 2 : index
    %c5_334 = arith.constant 5 : index
    %c0_335 = arith.constant 0 : index
    %197 = vector.load %arg12[%c0_332, %c2_333, %c5_334, %c0_335] : memref<8x8x8x32xf32, #tpu.memory_space<vmem>>, vector<8x1x1x32xf32>
    %198 = vector.shape_cast %197 : vector<8x1x1x32xf32> to vector<8x32xf32>
    %c0_336 = arith.constant 0 : index
    %c2_337 = arith.constant 2 : index
    %c6_338 = arith.constant 6 : index
    %c0_339 = arith.constant 0 : index
    %199 = vector.load %arg12[%c0_336, %c2_337, %c6_338, %c0_339] : memref<8x8x8x32xf32, #tpu.memory_space<vmem>>, vector<8x1x1x32xf32>
    %200 = vector.shape_cast %199 : vector<8x1x1x32xf32> to vector<8x32xf32>
    %c0_340 = arith.constant 0 : index
    %c2_341 = arith.constant 2 : index
    %c7_342 = arith.constant 7 : index
    %c0_343 = arith.constant 0 : index
    %201 = vector.load %arg12[%c0_340, %c2_341, %c7_342, %c0_343] : memref<8x8x8x32xf32, #tpu.memory_space<vmem>>, vector<8x1x1x32xf32>
    %202 = vector.shape_cast %201 : vector<8x1x1x32xf32> to vector<8x32xf32>
    %c0_344 = arith.constant 0 : index
    %c3_345 = arith.constant 3 : index
    %c4_346 = arith.constant 4 : index
    %c0_347 = arith.constant 0 : index
    %203 = vector.load %arg12[%c0_344, %c3_345, %c4_346, %c0_347] : memref<8x8x8x32xf32, #tpu.memory_space<vmem>>, vector<8x1x1x32xf32>
    %204 = vector.shape_cast %203 : vector<8x1x1x32xf32> to vector<8x32xf32>
    %c0_348 = arith.constant 0 : index
    %c3_349 = arith.constant 3 : index
    %c5_350 = arith.constant 5 : index
    %c0_351 = arith.constant 0 : index
    %205 = vector.load %arg12[%c0_348, %c3_349, %c5_350, %c0_351] : memref<8x8x8x32xf32, #tpu.memory_space<vmem>>, vector<8x1x1x32xf32>
    %206 = vector.shape_cast %205 : vector<8x1x1x32xf32> to vector<8x32xf32>
    %c0_352 = arith.constant 0 : index
    %c3_353 = arith.constant 3 : index
    %c6_354 = arith.constant 6 : index
    %c0_355 = arith.constant 0 : index
    %207 = vector.load %arg12[%c0_352, %c3_353, %c6_354, %c0_355] : memref<8x8x8x32xf32, #tpu.memory_space<vmem>>, vector<8x1x1x32xf32>
    %208 = vector.shape_cast %207 : vector<8x1x1x32xf32> to vector<8x32xf32>
    %c0_356 = arith.constant 0 : index
    %c3_357 = arith.constant 3 : index
    %c7_358 = arith.constant 7 : index
    %c0_359 = arith.constant 0 : index
    %209 = vector.load %arg12[%c0_356, %c3_357, %c7_358, %c0_359] : memref<8x8x8x32xf32, #tpu.memory_space<vmem>>, vector<8x1x1x32xf32>
    %210 = vector.shape_cast %209 : vector<8x1x1x32xf32> to vector<8x32xf32>
    %c0_360 = arith.constant 0 : index
    %c4_361 = arith.constant 4 : index
    %c4_362 = arith.constant 4 : index
    %c0_363 = arith.constant 0 : index
    %211 = vector.load %arg12[%c0_360, %c4_361, %c4_362, %c0_363] : memref<8x8x8x32xf32, #tpu.memory_space<vmem>>, vector<8x1x1x32xf32>
    %212 = vector.shape_cast %211 : vector<8x1x1x32xf32> to vector<8x32xf32>
    %c0_364 = arith.constant 0 : index
    %c4_365 = arith.constant 4 : index
    %c5_366 = arith.constant 5 : index
    %c0_367 = arith.constant 0 : index
    %213 = vector.load %arg12[%c0_364, %c4_365, %c5_366, %c0_367] : memref<8x8x8x32xf32, #tpu.memory_space<vmem>>, vector<8x1x1x32xf32>
    %214 = vector.shape_cast %213 : vector<8x1x1x32xf32> to vector<8x32xf32>
    %c0_368 = arith.constant 0 : index
    %c4_369 = arith.constant 4 : index
    %c6_370 = arith.constant 6 : index
    %c0_371 = arith.constant 0 : index
    %215 = vector.load %arg12[%c0_368, %c4_369, %c6_370, %c0_371] : memref<8x8x8x32xf32, #tpu.memory_space<vmem>>, vector<8x1x1x32xf32>
    %216 = vector.shape_cast %215 : vector<8x1x1x32xf32> to vector<8x32xf32>
    %c0_372 = arith.constant 0 : index
    %c4_373 = arith.constant 4 : index
    %c7_374 = arith.constant 7 : index
    %c0_375 = arith.constant 0 : index
    %217 = vector.load %arg12[%c0_372, %c4_373, %c7_374, %c0_375] : memref<8x8x8x32xf32, #tpu.memory_space<vmem>>, vector<8x1x1x32xf32>
    %218 = vector.shape_cast %217 : vector<8x1x1x32xf32> to vector<8x32xf32>
    %c0_376 = arith.constant 0 : index
    %c5_377 = arith.constant 5 : index
    %c4_378 = arith.constant 4 : index
    %c0_379 = arith.constant 0 : index
    %219 = vector.load %arg12[%c0_376, %c5_377, %c4_378, %c0_379] : memref<8x8x8x32xf32, #tpu.memory_space<vmem>>, vector<8x1x1x32xf32>
    %220 = vector.shape_cast %219 : vector<8x1x1x32xf32> to vector<8x32xf32>
    %c0_380 = arith.constant 0 : index
    %c5_381 = arith.constant 5 : index
    %c5_382 = arith.constant 5 : index
    %c0_383 = arith.constant 0 : index
    %221 = vector.load %arg12[%c0_380, %c5_381, %c5_382, %c0_383] : memref<8x8x8x32xf32, #tpu.memory_space<vmem>>, vector<8x1x1x32xf32>
    %222 = vector.shape_cast %221 : vector<8x1x1x32xf32> to vector<8x32xf32>
    %c0_384 = arith.constant 0 : index
    %c5_385 = arith.constant 5 : index
    %c6_386 = arith.constant 6 : index
    %c0_387 = arith.constant 0 : index
    %223 = vector.load %arg12[%c0_384, %c5_385, %c6_386, %c0_387] : memref<8x8x8x32xf32, #tpu.memory_space<vmem>>, vector<8x1x1x32xf32>
    %224 = vector.shape_cast %223 : vector<8x1x1x32xf32> to vector<8x32xf32>
    %c0_388 = arith.constant 0 : index
    %c5_389 = arith.constant 5 : index
    %c7_390 = arith.constant 7 : index
    %c0_391 = arith.constant 0 : index
    %225 = vector.load %arg12[%c0_388, %c5_389, %c7_390, %c0_391] : memref<8x8x8x32xf32, #tpu.memory_space<vmem>>, vector<8x1x1x32xf32>
    %226 = vector.shape_cast %225 : vector<8x1x1x32xf32> to vector<8x32xf32>
    %227 = tpu.concatenate %196, %198, %200, %202, %204, %206, %208, %210, %212, %214, %216, %218, %220, %222, %224, %226 in 1 : vector<8x32xf32>, vector<8x32xf32>, vector<8x32xf32>, vector<8x32xf32>, vector<8x32xf32>, vector<8x32xf32>, vector<8x32xf32>, vector<8x32xf32>, vector<8x32xf32>, vector<8x32xf32>, vector<8x32xf32>, vector<8x32xf32>, vector<8x32xf32>, vector<8x32xf32>, vector<8x32xf32>, vector<8x32xf32> -> vector<8x512xf32>
    %c0_392 = arith.constant 0 : index
    %c4_393 = arith.constant 4 : index
    %c0_394 = arith.constant 0 : index
    %c0_395 = arith.constant 0 : index
    %228 = vector.load %arg12[%c0_392, %c4_393, %c0_394, %c0_395] : memref<8x8x8x32xf32, #tpu.memory_space<vmem>>, vector<8x1x1x32xf32>
    %229 = vector.shape_cast %228 : vector<8x1x1x32xf32> to vector<8x32xf32>
    %c0_396 = arith.constant 0 : index
    %c4_397 = arith.constant 4 : index
    %c1_398 = arith.constant 1 : index
    %c0_399 = arith.constant 0 : index
    %230 = vector.load %arg12[%c0_396, %c4_397, %c1_398, %c0_399] : memref<8x8x8x32xf32, #tpu.memory_space<vmem>>, vector<8x1x1x32xf32>
    %231 = vector.shape_cast %230 : vector<8x1x1x32xf32> to vector<8x32xf32>
    %c0_400 = arith.constant 0 : index
    %c4_401 = arith.constant 4 : index
    %c2_402 = arith.constant 2 : index
    %c0_403 = arith.constant 0 : index
    %232 = vector.load %arg12[%c0_400, %c4_401, %c2_402, %c0_403] : memref<8x8x8x32xf32, #tpu.memory_space<vmem>>, vector<8x1x1x32xf32>
    %233 = vector.shape_cast %232 : vector<8x1x1x32xf32> to vector<8x32xf32>
    %c0_404 = arith.constant 0 : index
    %c4_405 = arith.constant 4 : index
    %c3_406 = arith.constant 3 : index
    %c0_407 = arith.constant 0 : index
    %234 = vector.load %arg12[%c0_404, %c4_405, %c3_406, %c0_407] : memref<8x8x8x32xf32, #tpu.memory_space<vmem>>, vector<8x1x1x32xf32>
    %235 = vector.shape_cast %234 : vector<8x1x1x32xf32> to vector<8x32xf32>
    %c0_408 = arith.constant 0 : index
    %c5_409 = arith.constant 5 : index
    %c0_410 = arith.constant 0 : index
    %c0_411 = arith.constant 0 : index
    %236 = vector.load %arg12[%c0_408, %c5_409, %c0_410, %c0_411] : memref<8x8x8x32xf32, #tpu.memory_space<vmem>>, vector<8x1x1x32xf32>
    %237 = vector.shape_cast %236 : vector<8x1x1x32xf32> to vector<8x32xf32>
    %c0_412 = arith.constant 0 : index
    %c5_413 = arith.constant 5 : index
    %c1_414 = arith.constant 1 : index
    %c0_415 = arith.constant 0 : index
    %238 = vector.load %arg12[%c0_412, %c5_413, %c1_414, %c0_415] : memref<8x8x8x32xf32, #tpu.memory_space<vmem>>, vector<8x1x1x32xf32>
    %239 = vector.shape_cast %238 : vector<8x1x1x32xf32> to vector<8x32xf32>
    %c0_416 = arith.constant 0 : index
    %c5_417 = arith.constant 5 : index
    %c2_418 = arith.constant 2 : index
    %c0_419 = arith.constant 0 : index
    %240 = vector.load %arg12[%c0_416, %c5_417, %c2_418, %c0_419] : memref<8x8x8x32xf32, #tpu.memory_space<vmem>>, vector<8x1x1x32xf32>
    %241 = vector.shape_cast %240 : vector<8x1x1x32xf32> to vector<8x32xf32>
    %c0_420 = arith.constant 0 : index
    %c5_421 = arith.constant 5 : index
    %c3_422 = arith.constant 3 : index
    %c0_423 = arith.constant 0 : index
    %242 = vector.load %arg12[%c0_420, %c5_421, %c3_422, %c0_423] : memref<8x8x8x32xf32, #tpu.memory_space<vmem>>, vector<8x1x1x32xf32>
    %243 = vector.shape_cast %242 : vector<8x1x1x32xf32> to vector<8x32xf32>
    %c0_424 = arith.constant 0 : index
    %c6_425 = arith.constant 6 : index
    %c0_426 = arith.constant 0 : index
    %c0_427 = arith.constant 0 : index
    %244 = vector.load %arg12[%c0_424, %c6_425, %c0_426, %c0_427] : memref<8x8x8x32xf32, #tpu.memory_space<vmem>>, vector<8x1x1x32xf32>
    %245 = vector.shape_cast %244 : vector<8x1x1x32xf32> to vector<8x32xf32>
    %c0_428 = arith.constant 0 : index
    %c6_429 = arith.constant 6 : index
    %c1_430 = arith.constant 1 : index
    %c0_431 = arith.constant 0 : index
    %246 = vector.load %arg12[%c0_428, %c6_429, %c1_430, %c0_431] : memref<8x8x8x32xf32, #tpu.memory_space<vmem>>, vector<8x1x1x32xf32>
    %247 = vector.shape_cast %246 : vector<8x1x1x32xf32> to vector<8x32xf32>
    %c0_432 = arith.constant 0 : index
    %c6_433 = arith.constant 6 : index
    %c2_434 = arith.constant 2 : index
    %c0_435 = arith.constant 0 : index
    %248 = vector.load %arg12[%c0_432, %c6_433, %c2_434, %c0_435] : memref<8x8x8x32xf32, #tpu.memory_space<vmem>>, vector<8x1x1x32xf32>
    %249 = vector.shape_cast %248 : vector<8x1x1x32xf32> to vector<8x32xf32>
    %c0_436 = arith.constant 0 : index
    %c6_437 = arith.constant 6 : index
    %c3_438 = arith.constant 3 : index
    %c0_439 = arith.constant 0 : index
    %250 = vector.load %arg12[%c0_436, %c6_437, %c3_438, %c0_439] : memref<8x8x8x32xf32, #tpu.memory_space<vmem>>, vector<8x1x1x32xf32>
    %251 = vector.shape_cast %250 : vector<8x1x1x32xf32> to vector<8x32xf32>
    %c0_440 = arith.constant 0 : index
    %c7_441 = arith.constant 7 : index
    %c0_442 = arith.constant 0 : index
    %c0_443 = arith.constant 0 : index
    %252 = vector.load %arg12[%c0_440, %c7_441, %c0_442, %c0_443] : memref<8x8x8x32xf32, #tpu.memory_space<vmem>>, vector<8x1x1x32xf32>
    %253 = vector.shape_cast %252 : vector<8x1x1x32xf32> to vector<8x32xf32>
    %c0_444 = arith.constant 0 : index
    %c7_445 = arith.constant 7 : index
    %c1_446 = arith.constant 1 : index
    %c0_447 = arith.constant 0 : index
    %254 = vector.load %arg12[%c0_444, %c7_445, %c1_446, %c0_447] : memref<8x8x8x32xf32, #tpu.memory_space<vmem>>, vector<8x1x1x32xf32>
    %255 = vector.shape_cast %254 : vector<8x1x1x32xf32> to vector<8x32xf32>
    %c0_448 = arith.constant 0 : index
    %c7_449 = arith.constant 7 : index
    %c2_450 = arith.constant 2 : index
    %c0_451 = arith.constant 0 : index
    %256 = vector.load %arg12[%c0_448, %c7_449, %c2_450, %c0_451] : memref<8x8x8x32xf32, #tpu.memory_space<vmem>>, vector<8x1x1x32xf32>
    %257 = vector.shape_cast %256 : vector<8x1x1x32xf32> to vector<8x32xf32>
    %c0_452 = arith.constant 0 : index
    %c7_453 = arith.constant 7 : index
    %c3_454 = arith.constant 3 : index
    %c0_455 = arith.constant 0 : index
    %258 = vector.load %arg12[%c0_452, %c7_453, %c3_454, %c0_455] : memref<8x8x8x32xf32, #tpu.memory_space<vmem>>, vector<8x1x1x32xf32>
    %259 = vector.shape_cast %258 : vector<8x1x1x32xf32> to vector<8x32xf32>
    %260 = tpu.concatenate %229, %231, %233, %235, %237, %239, %241, %243, %245, %247, %249, %251, %253, %255, %257, %259 in 1 : vector<8x32xf32>, vector<8x32xf32>, vector<8x32xf32>, vector<8x32xf32>, vector<8x32xf32>, vector<8x32xf32>, vector<8x32xf32>, vector<8x32xf32>, vector<8x32xf32>, vector<8x32xf32>, vector<8x32xf32>, vector<8x32xf32>, vector<8x32xf32>, vector<8x32xf32>, vector<8x32xf32>, vector<8x32xf32> -> vector<8x512xf32>
    %c0_456 = arith.constant 0 : index
    %c4_457 = arith.constant 4 : index
    %c2_458 = arith.constant 2 : index
    %c0_459 = arith.constant 0 : index
    %261 = vector.load %arg12[%c0_456, %c4_457, %c2_458, %c0_459] : memref<8x8x8x32xf32, #tpu.memory_space<vmem>>, vector<8x1x1x32xf32>
    %262 = vector.shape_cast %261 : vector<8x1x1x32xf32> to vector<8x32xf32>
    %c0_460 = arith.constant 0 : index
    %c4_461 = arith.constant 4 : index
    %c3_462 = arith.constant 3 : index
    %c0_463 = arith.constant 0 : index
    %263 = vector.load %arg12[%c0_460, %c4_461, %c3_462, %c0_463] : memref<8x8x8x32xf32, #tpu.memory_space<vmem>>, vector<8x1x1x32xf32>
    %264 = vector.shape_cast %263 : vector<8x1x1x32xf32> to vector<8x32xf32>
    %c0_464 = arith.constant 0 : index
    %c4_465 = arith.constant 4 : index
    %c4_466 = arith.constant 4 : index
    %c0_467 = arith.constant 0 : index
    %265 = vector.load %arg12[%c0_464, %c4_465, %c4_466, %c0_467] : memref<8x8x8x32xf32, #tpu.memory_space<vmem>>, vector<8x1x1x32xf32>
    %266 = vector.shape_cast %265 : vector<8x1x1x32xf32> to vector<8x32xf32>
    %c0_468 = arith.constant 0 : index
    %c4_469 = arith.constant 4 : index
    %c5_470 = arith.constant 5 : index
    %c0_471 = arith.constant 0 : index
    %267 = vector.load %arg12[%c0_468, %c4_469, %c5_470, %c0_471] : memref<8x8x8x32xf32, #tpu.memory_space<vmem>>, vector<8x1x1x32xf32>
    %268 = vector.shape_cast %267 : vector<8x1x1x32xf32> to vector<8x32xf32>
    %c0_472 = arith.constant 0 : index
    %c5_473 = arith.constant 5 : index
    %c2_474 = arith.constant 2 : index
    %c0_475 = arith.constant 0 : index
    %269 = vector.load %arg12[%c0_472, %c5_473, %c2_474, %c0_475] : memref<8x8x8x32xf32, #tpu.memory_space<vmem>>, vector<8x1x1x32xf32>
    %270 = vector.shape_cast %269 : vector<8x1x1x32xf32> to vector<8x32xf32>
    %c0_476 = arith.constant 0 : index
    %c5_477 = arith.constant 5 : index
    %c3_478 = arith.constant 3 : index
    %c0_479 = arith.constant 0 : index
    %271 = vector.load %arg12[%c0_476, %c5_477, %c3_478, %c0_479] : memref<8x8x8x32xf32, #tpu.memory_space<vmem>>, vector<8x1x1x32xf32>
    %272 = vector.shape_cast %271 : vector<8x1x1x32xf32> to vector<8x32xf32>
    %c0_480 = arith.constant 0 : index
    %c5_481 = arith.constant 5 : index
    %c4_482 = arith.constant 4 : index
    %c0_483 = arith.constant 0 : index
    %273 = vector.load %arg12[%c0_480, %c5_481, %c4_482, %c0_483] : memref<8x8x8x32xf32, #tpu.memory_space<vmem>>, vector<8x1x1x32xf32>
    %274 = vector.shape_cast %273 : vector<8x1x1x32xf32> to vector<8x32xf32>
    %c0_484 = arith.constant 0 : index
    %c5_485 = arith.constant 5 : index
    %c5_486 = arith.constant 5 : index
    %c0_487 = arith.constant 0 : index
    %275 = vector.load %arg12[%c0_484, %c5_485, %c5_486, %c0_487] : memref<8x8x8x32xf32, #tpu.memory_space<vmem>>, vector<8x1x1x32xf32>
    %276 = vector.shape_cast %275 : vector<8x1x1x32xf32> to vector<8x32xf32>
    %c0_488 = arith.constant 0 : index
    %c6_489 = arith.constant 6 : index
    %c2_490 = arith.constant 2 : index
    %c0_491 = arith.constant 0 : index
    %277 = vector.load %arg12[%c0_488, %c6_489, %c2_490, %c0_491] : memref<8x8x8x32xf32, #tpu.memory_space<vmem>>, vector<8x1x1x32xf32>
    %278 = vector.shape_cast %277 : vector<8x1x1x32xf32> to vector<8x32xf32>
    %c0_492 = arith.constant 0 : index
    %c6_493 = arith.constant 6 : index
    %c3_494 = arith.constant 3 : index
    %c0_495 = arith.constant 0 : index
    %279 = vector.load %arg12[%c0_492, %c6_493, %c3_494, %c0_495] : memref<8x8x8x32xf32, #tpu.memory_space<vmem>>, vector<8x1x1x32xf32>
    %280 = vector.shape_cast %279 : vector<8x1x1x32xf32> to vector<8x32xf32>
    %c0_496 = arith.constant 0 : index
    %c6_497 = arith.constant 6 : index
    %c4_498 = arith.constant 4 : index
    %c0_499 = arith.constant 0 : index
    %281 = vector.load %arg12[%c0_496, %c6_497, %c4_498, %c0_499] : memref<8x8x8x32xf32, #tpu.memory_space<vmem>>, vector<8x1x1x32xf32>
    %282 = vector.shape_cast %281 : vector<8x1x1x32xf32> to vector<8x32xf32>
    %c0_500 = arith.constant 0 : index
    %c6_501 = arith.constant 6 : index
    %c5_502 = arith.constant 5 : index
    %c0_503 = arith.constant 0 : index
    %283 = vector.load %arg12[%c0_500, %c6_501, %c5_502, %c0_503] : memref<8x8x8x32xf32, #tpu.memory_space<vmem>>, vector<8x1x1x32xf32>
    %284 = vector.shape_cast %283 : vector<8x1x1x32xf32> to vector<8x32xf32>
    %c0_504 = arith.constant 0 : index
    %c7_505 = arith.constant 7 : index
    %c2_506 = arith.constant 2 : index
    %c0_507 = arith.constant 0 : index
    %285 = vector.load %arg12[%c0_504, %c7_505, %c2_506, %c0_507] : memref<8x8x8x32xf32, #tpu.memory_space<vmem>>, vector<8x1x1x32xf32>
    %286 = vector.shape_cast %285 : vector<8x1x1x32xf32> to vector<8x32xf32>
    %c0_508 = arith.constant 0 : index
    %c7_509 = arith.constant 7 : index
    %c3_510 = arith.constant 3 : index
    %c0_511 = arith.constant 0 : index
    %287 = vector.load %arg12[%c0_508, %c7_509, %c3_510, %c0_511] : memref<8x8x8x32xf32, #tpu.memory_space<vmem>>, vector<8x1x1x32xf32>
    %288 = vector.shape_cast %287 : vector<8x1x1x32xf32> to vector<8x32xf32>
    %c0_512 = arith.constant 0 : index
    %c7_513 = arith.constant 7 : index
    %c4_514 = arith.constant 4 : index
    %c0_515 = arith.constant 0 : index
    %289 = vector.load %arg12[%c0_512, %c7_513, %c4_514, %c0_515] : memref<8x8x8x32xf32, #tpu.memory_space<vmem>>, vector<8x1x1x32xf32>
    %290 = vector.shape_cast %289 : vector<8x1x1x32xf32> to vector<8x32xf32>
    %c0_516 = arith.constant 0 : index
    %c7_517 = arith.constant 7 : index
    %c5_518 = arith.constant 5 : index
    %c0_519 = arith.constant 0 : index
    %291 = vector.load %arg12[%c0_516, %c7_517, %c5_518, %c0_519] : memref<8x8x8x32xf32, #tpu.memory_space<vmem>>, vector<8x1x1x32xf32>
    %292 = vector.shape_cast %291 : vector<8x1x1x32xf32> to vector<8x32xf32>
    %293 = tpu.concatenate %262, %264, %266, %268, %270, %272, %274, %276, %278, %280, %282, %284, %286, %288, %290, %292 in 1 : vector<8x32xf32>, vector<8x32xf32>, vector<8x32xf32>, vector<8x32xf32>, vector<8x32xf32>, vector<8x32xf32>, vector<8x32xf32>, vector<8x32xf32>, vector<8x32xf32>, vector<8x32xf32>, vector<8x32xf32>, vector<8x32xf32>, vector<8x32xf32>, vector<8x32xf32>, vector<8x32xf32>, vector<8x32xf32> -> vector<8x512xf32>
    %c0_520 = arith.constant 0 : index
    %c4_521 = arith.constant 4 : index
    %c4_522 = arith.constant 4 : index
    %c0_523 = arith.constant 0 : index
    %294 = vector.load %arg12[%c0_520, %c4_521, %c4_522, %c0_523] : memref<8x8x8x32xf32, #tpu.memory_space<vmem>>, vector<8x1x1x32xf32>
    %295 = vector.shape_cast %294 : vector<8x1x1x32xf32> to vector<8x32xf32>
    %c0_524 = arith.constant 0 : index
    %c4_525 = arith.constant 4 : index
    %c5_526 = arith.constant 5 : index
    %c0_527 = arith.constant 0 : index
    %296 = vector.load %arg12[%c0_524, %c4_525, %c5_526, %c0_527] : memref<8x8x8x32xf32, #tpu.memory_space<vmem>>, vector<8x1x1x32xf32>
    %297 = vector.shape_cast %296 : vector<8x1x1x32xf32> to vector<8x32xf32>
    %c0_528 = arith.constant 0 : index
    %c4_529 = arith.constant 4 : index
    %c6_530 = arith.constant 6 : index
    %c0_531 = arith.constant 0 : index
    %298 = vector.load %arg12[%c0_528, %c4_529, %c6_530, %c0_531] : memref<8x8x8x32xf32, #tpu.memory_space<vmem>>, vector<8x1x1x32xf32>
    %299 = vector.shape_cast %298 : vector<8x1x1x32xf32> to vector<8x32xf32>
    %c0_532 = arith.constant 0 : index
    %c4_533 = arith.constant 4 : index
    %c7_534 = arith.constant 7 : index
    %c0_535 = arith.constant 0 : index
    %300 = vector.load %arg12[%c0_532, %c4_533, %c7_534, %c0_535] : memref<8x8x8x32xf32, #tpu.memory_space<vmem>>, vector<8x1x1x32xf32>
    %301 = vector.shape_cast %300 : vector<8x1x1x32xf32> to vector<8x32xf32>
    %c0_536 = arith.constant 0 : index
    %c5_537 = arith.constant 5 : index
    %c4_538 = arith.constant 4 : index
    %c0_539 = arith.constant 0 : index
    %302 = vector.load %arg12[%c0_536, %c5_537, %c4_538, %c0_539] : memref<8x8x8x32xf32, #tpu.memory_space<vmem>>, vector<8x1x1x32xf32>
    %303 = vector.shape_cast %302 : vector<8x1x1x32xf32> to vector<8x32xf32>
    %c0_540 = arith.constant 0 : index
    %c5_541 = arith.constant 5 : index
    %c5_542 = arith.constant 5 : index
    %c0_543 = arith.constant 0 : index
    %304 = vector.load %arg12[%c0_540, %c5_541, %c5_542, %c0_543] : memref<8x8x8x32xf32, #tpu.memory_space<vmem>>, vector<8x1x1x32xf32>
    %305 = vector.shape_cast %304 : vector<8x1x1x32xf32> to vector<8x32xf32>
    %c0_544 = arith.constant 0 : index
    %c5_545 = arith.constant 5 : index
    %c6_546 = arith.constant 6 : index
    %c0_547 = arith.constant 0 : index
    %306 = vector.load %arg12[%c0_544, %c5_545, %c6_546, %c0_547] : memref<8x8x8x32xf32, #tpu.memory_space<vmem>>, vector<8x1x1x32xf32>
    %307 = vector.shape_cast %306 : vector<8x1x1x32xf32> to vector<8x32xf32>
    %c0_548 = arith.constant 0 : index
    %c5_549 = arith.constant 5 : index
    %c7_550 = arith.constant 7 : index
    %c0_551 = arith.constant 0 : index
    %308 = vector.load %arg12[%c0_548, %c5_549, %c7_550, %c0_551] : memref<8x8x8x32xf32, #tpu.memory_space<vmem>>, vector<8x1x1x32xf32>
    %309 = vector.shape_cast %308 : vector<8x1x1x32xf32> to vector<8x32xf32>
    %c0_552 = arith.constant 0 : index
    %c6_553 = arith.constant 6 : index
    %c4_554 = arith.constant 4 : index
    %c0_555 = arith.constant 0 : index
    %310 = vector.load %arg12[%c0_552, %c6_553, %c4_554, %c0_555] : memref<8x8x8x32xf32, #tpu.memory_space<vmem>>, vector<8x1x1x32xf32>
    %311 = vector.shape_cast %310 : vector<8x1x1x32xf32> to vector<8x32xf32>
    %c0_556 = arith.constant 0 : index
    %c6_557 = arith.constant 6 : index
    %c5_558 = arith.constant 5 : index
    %c0_559 = arith.constant 0 : index
    %312 = vector.load %arg12[%c0_556, %c6_557, %c5_558, %c0_559] : memref<8x8x8x32xf32, #tpu.memory_space<vmem>>, vector<8x1x1x32xf32>
    %313 = vector.shape_cast %312 : vector<8x1x1x32xf32> to vector<8x32xf32>
    %c0_560 = arith.constant 0 : index
    %c6_561 = arith.constant 6 : index
    %c6_562 = arith.constant 6 : index
    %c0_563 = arith.constant 0 : index
    %314 = vector.load %arg12[%c0_560, %c6_561, %c6_562, %c0_563] : memref<8x8x8x32xf32, #tpu.memory_space<vmem>>, vector<8x1x1x32xf32>
    %315 = vector.shape_cast %314 : vector<8x1x1x32xf32> to vector<8x32xf32>
    %c0_564 = arith.constant 0 : index
    %c6_565 = arith.constant 6 : index
    %c7_566 = arith.constant 7 : index
    %c0_567 = arith.constant 0 : index
    %316 = vector.load %arg12[%c0_564, %c6_565, %c7_566, %c0_567] : memref<8x8x8x32xf32, #tpu.memory_space<vmem>>, vector<8x1x1x32xf32>
    %317 = vector.shape_cast %316 : vector<8x1x1x32xf32> to vector<8x32xf32>
    %c0_568 = arith.constant 0 : index
    %c7_569 = arith.constant 7 : index
    %c4_570 = arith.constant 4 : index
    %c0_571 = arith.constant 0 : index
    %318 = vector.load %arg12[%c0_568, %c7_569, %c4_570, %c0_571] : memref<8x8x8x32xf32, #tpu.memory_space<vmem>>, vector<8x1x1x32xf32>
    %319 = vector.shape_cast %318 : vector<8x1x1x32xf32> to vector<8x32xf32>
    %c0_572 = arith.constant 0 : index
    %c7_573 = arith.constant 7 : index
    %c5_574 = arith.constant 5 : index
    %c0_575 = arith.constant 0 : index
    %320 = vector.load %arg12[%c0_572, %c7_573, %c5_574, %c0_575] : memref<8x8x8x32xf32, #tpu.memory_space<vmem>>, vector<8x1x1x32xf32>
    %321 = vector.shape_cast %320 : vector<8x1x1x32xf32> to vector<8x32xf32>
    %c0_576 = arith.constant 0 : index
    %c7_577 = arith.constant 7 : index
    %c6_578 = arith.constant 6 : index
    %c0_579 = arith.constant 0 : index
    %322 = vector.load %arg12[%c0_576, %c7_577, %c6_578, %c0_579] : memref<8x8x8x32xf32, #tpu.memory_space<vmem>>, vector<8x1x1x32xf32>
    %323 = vector.shape_cast %322 : vector<8x1x1x32xf32> to vector<8x32xf32>
    %c0_580 = arith.constant 0 : index
    %c7_581 = arith.constant 7 : index
    %c7_582 = arith.constant 7 : index
    %c0_583 = arith.constant 0 : index
    %324 = vector.load %arg12[%c0_580, %c7_581, %c7_582, %c0_583] : memref<8x8x8x32xf32, #tpu.memory_space<vmem>>, vector<8x1x1x32xf32>
    %325 = vector.shape_cast %324 : vector<8x1x1x32xf32> to vector<8x32xf32>
    %326 = tpu.concatenate %295, %297, %299, %301, %303, %305, %307, %309, %311, %313, %315, %317, %319, %321, %323, %325 in 1 : vector<8x32xf32>, vector<8x32xf32>, vector<8x32xf32>, vector<8x32xf32>, vector<8x32xf32>, vector<8x32xf32>, vector<8x32xf32>, vector<8x32xf32>, vector<8x32xf32>, vector<8x32xf32>, vector<8x32xf32>, vector<8x32xf32>, vector<8x32xf32>, vector<8x32xf32>, vector<8x32xf32>, vector<8x32xf32> -> vector<8x512xf32>
    %327 = tpu.concatenate %62, %95, %128, %161, %194, %227, %260, %293, %326 in 0 : vector<8x512xf32>, vector<8x512xf32>, vector<8x512xf32>, vector<8x512xf32>, vector<8x512xf32>, vector<8x512xf32>, vector<8x512xf32>, vector<8x512xf32>, vector<8x512xf32> -> vector<72x512xf32>
    %328 = arith.truncf %327 : vector<72x512xf32> to vector<72x512xbf16>
    %c0_584 = arith.constant 0 : index
    %c0_585 = arith.constant 0 : index
    %329 = vector.load %arg3[%c0_584, %c0_585] : memref<512x64xbf16, #tpu.memory_space<vmem>>, vector<512x64xbf16>
    %cst_586 = arith.constant dense<0.000000e+00> : vector<72x64xf32>
    %330 = tpu.matmul %328, %329, %cst_586 {dimension_numbers = #tpu.dot_dimension_numbers<[1], [0], [0], [1], [0, 0, 1, 1], [], []>} : vector<72x512xbf16>, vector<512x64xbf16>, vector<72x64xf32> -> vector<72x64xf32>
    %c0_587 = arith.constant 0 : index
    %c0_588 = arith.constant 0 : index
    %331 = vector.load %arg4[%c0_587, %c0_588] : memref<2x64xf32, #tpu.memory_space<vmem>>, vector<2x64xf32>
    %cst_589 = arith.constant dense<0.000000e+00> : vector<64xf32>
    %332 = vector.multi_reduction <add>, %330, %cst_589 [0] : vector<72x64xf32> to vector<64xf32>
    %333 = vector.shape_cast %332 : vector<64xf32> to vector<1x64xf32>
    %cst_590 = arith.constant 7.200000e+01 : f32
    %334 = vector.broadcast %cst_590 : f32 to vector<1x64xf32>
    %335 = arith.divf %333, %334 : vector<1x64xf32>
    %336 = vector.broadcast %335 : vector<1x64xf32> to vector<72x64xf32>
    %337 = arith.subf %330, %336 : vector<72x64xf32>
    %338 = arith.mulf %337, %337 : vector<72x64xf32>
    %cst_591 = arith.constant dense<0.000000e+00> : vector<64xf32>
    %339 = vector.multi_reduction <add>, %338, %cst_591 [0] : vector<72x64xf32> to vector<64xf32>
    %340 = vector.shape_cast %339 : vector<64xf32> to vector<1x64xf32>
    %cst_592 = arith.constant 7.200000e+01 : f32
    %341 = vector.broadcast %cst_592 : f32 to vector<1x64xf32>
    %342 = arith.divf %340, %341 : vector<1x64xf32>
    %cst_593 = arith.constant 9.99999974E-6 : f32
    %343 = vector.broadcast %cst_593 : f32 to vector<1x64xf32>
    %344 = arith.addf %342, %343 : vector<1x64xf32>
    %345 = math.rsqrt %344 : vector<1x64xf32>
    %346 = vector.broadcast %345 : vector<1x64xf32> to vector<72x64xf32>
    %347 = arith.mulf %337, %346 : vector<72x64xf32>
    %348 = vector.extract_strided_slice %331 {offsets = [0, 0], sizes = [1, 64], strides = [1, 1]} : vector<2x64xf32> to vector<1x64xf32>
    %349 = vector.broadcast %348 : vector<1x64xf32> to vector<72x64xf32>
    %350 = arith.mulf %347, %349 : vector<72x64xf32>
    %351 = vector.extract_strided_slice %331 {offsets = [1, 0], sizes = [1, 64], strides = [1, 1]} : vector<2x64xf32> to vector<1x64xf32>
    %352 = vector.broadcast %351 : vector<1x64xf32> to vector<72x64xf32>
    %353 = arith.addf %350, %352 : vector<72x64xf32>
    %cst_594 = arith.constant 0.000000e+00 : f32
    %354 = vector.broadcast %cst_594 : f32 to vector<72x64xf32>
    %355 = arith.maximumf %353, %354 : vector<72x64xf32>
    %356 = vector.extract_strided_slice %355 {offsets = [0, 0], sizes = [8, 64], strides = [1, 1]} : vector<72x64xf32> to vector<8x64xf32>
    %357 = vector.extract_strided_slice %355 {offsets = [8, 0], sizes = [8, 64], strides = [1, 1]} : vector<72x64xf32> to vector<8x64xf32>
    %358 = vector.extract_strided_slice %355 {offsets = [16, 0], sizes = [8, 64], strides = [1, 1]} : vector<72x64xf32> to vector<8x64xf32>
    %359 = vector.extract_strided_slice %355 {offsets = [24, 0], sizes = [8, 64], strides = [1, 1]} : vector<72x64xf32> to vector<8x64xf32>
    %360 = vector.extract_strided_slice %355 {offsets = [32, 0], sizes = [8, 64], strides = [1, 1]} : vector<72x64xf32> to vector<8x64xf32>
    %361 = vector.extract_strided_slice %355 {offsets = [40, 0], sizes = [8, 64], strides = [1, 1]} : vector<72x64xf32> to vector<8x64xf32>
    %362 = vector.extract_strided_slice %355 {offsets = [48, 0], sizes = [8, 64], strides = [1, 1]} : vector<72x64xf32> to vector<8x64xf32>
    %363 = vector.extract_strided_slice %355 {offsets = [56, 0], sizes = [8, 64], strides = [1, 1]} : vector<72x64xf32> to vector<8x64xf32>
    %364 = vector.extract_strided_slice %355 {offsets = [64, 0], sizes = [8, 64], strides = [1, 1]} : vector<72x64xf32> to vector<8x64xf32>
    %365 = tpu.concatenate %356, %357, %358, %359, %360, %361, %362, %363, %364 in 1 : vector<8x64xf32>, vector<8x64xf32>, vector<8x64xf32>, vector<8x64xf32>, vector<8x64xf32>, vector<8x64xf32>, vector<8x64xf32>, vector<8x64xf32>, vector<8x64xf32> -> vector<8x576xf32>
    %366 = arith.truncf %365 : vector<8x576xf32> to vector<8x576xbf16>
    %c0_595 = arith.constant 0 : index
    %c0_596 = arith.constant 0 : index
    %367 = vector.load %arg5[%c0_595, %c0_596] : memref<576x64xbf16, #tpu.memory_space<vmem>>, vector<576x64xbf16>
    %cst_597 = arith.constant dense<0.000000e+00> : vector<8x64xf32>
    %368 = tpu.matmul %366, %367, %cst_597 {dimension_numbers = #tpu.dot_dimension_numbers<[1], [0], [0], [1], [0, 0, 1, 1], [], []>} : vector<8x576xbf16>, vector<576x64xbf16>, vector<8x64xf32> -> vector<8x64xf32>
    %c0_598 = arith.constant 0 : index
    %c0_599 = arith.constant 0 : index
    %369 = vector.load %arg6[%c0_598, %c0_599] : memref<2x64xf32, #tpu.memory_space<vmem>>, vector<2x64xf32>
    %cst_600 = arith.constant dense<0.000000e+00> : vector<64xf32>
    %370 = vector.multi_reduction <add>, %368, %cst_600 [0] : vector<8x64xf32> to vector<64xf32>
    %371 = vector.shape_cast %370 : vector<64xf32> to vector<1x64xf32>
    %cst_601 = arith.constant 8.000000e+00 : f32
    %372 = vector.broadcast %cst_601 : f32 to vector<1x64xf32>
    %373 = arith.divf %371, %372 : vector<1x64xf32>
    %374 = vector.broadcast %373 : vector<1x64xf32> to vector<8x64xf32>
    %375 = arith.subf %368, %374 : vector<8x64xf32>
    %376 = arith.mulf %375, %375 : vector<8x64xf32>
    %cst_602 = arith.constant dense<0.000000e+00> : vector<64xf32>
    %377 = vector.multi_reduction <add>, %376, %cst_602 [0] : vector<8x64xf32> to vector<64xf32>
    %378 = vector.shape_cast %377 : vector<64xf32> to vector<1x64xf32>
    %cst_603 = arith.constant 8.000000e+00 : f32
    %379 = vector.broadcast %cst_603 : f32 to vector<1x64xf32>
    %380 = arith.divf %378, %379 : vector<1x64xf32>
    %cst_604 = arith.constant 9.99999974E-6 : f32
    %381 = vector.broadcast %cst_604 : f32 to vector<1x64xf32>
    %382 = arith.addf %380, %381 : vector<1x64xf32>
    %383 = math.rsqrt %382 : vector<1x64xf32>
    %384 = vector.broadcast %383 : vector<1x64xf32> to vector<8x64xf32>
    %385 = arith.mulf %375, %384 : vector<8x64xf32>
    %386 = vector.extract_strided_slice %369 {offsets = [0, 0], sizes = [1, 64], strides = [1, 1]} : vector<2x64xf32> to vector<1x64xf32>
    %387 = vector.broadcast %386 : vector<1x64xf32> to vector<8x64xf32>
    %388 = arith.mulf %385, %387 : vector<8x64xf32>
    %389 = vector.extract_strided_slice %369 {offsets = [1, 0], sizes = [1, 64], strides = [1, 1]} : vector<2x64xf32> to vector<1x64xf32>
    %390 = vector.broadcast %389 : vector<1x64xf32> to vector<8x64xf32>
    %391 = arith.addf %388, %390 : vector<8x64xf32>
    %cst_605 = arith.constant 0.000000e+00 : f32
    %392 = vector.broadcast %cst_605 : f32 to vector<8x64xf32>
    %393 = arith.maximumf %391, %392 : vector<8x64xf32>
    %394 = arith.truncf %393 : vector<8x64xf32> to vector<8x64xbf16>
    %c0_606 = arith.constant 0 : index
    %c0_607 = arith.constant 0 : index
    %395 = vector.load %arg7[%c0_606, %c0_607] : memref<64x1024xbf16, #tpu.memory_space<vmem>>, vector<64x1024xbf16>
    %cst_608 = arith.constant dense<0.000000e+00> : vector<8x1024xf32>
    %396 = tpu.matmul %394, %395, %cst_608 {dimension_numbers = #tpu.dot_dimension_numbers<[1], [0], [0], [1], [0, 0, 1, 1], [], []>} : vector<8x64xbf16>, vector<64x1024xbf16>, vector<8x1024xf32> -> vector<8x1024xf32>
    %c0_609 = arith.constant 0 : index
    %c0_610 = arith.constant 0 : index
    %397 = vector.load %arg8[%c0_609, %c0_610] : memref<1x1024xf32, #tpu.memory_space<vmem>>, vector<1x1024xf32>
    %398 = vector.broadcast %397 : vector<1x1024xf32> to vector<8x1024xf32>
    %399 = arith.addf %396, %398 : vector<8x1024xf32>
    %cst_611 = arith.constant 0.000000e+00 : f32
    %400 = vector.broadcast %cst_611 : f32 to vector<8x1024xf32>
    %401 = arith.maximumf %399, %400 : vector<8x1024xf32>
    %402 = arith.truncf %401 : vector<8x1024xf32> to vector<8x1024xbf16>
    %c0_612 = arith.constant 0 : index
    %c0_613 = arith.constant 0 : index
    %403 = vector.load %arg9[%c0_612, %c0_613] : memref<1024x128xbf16, #tpu.memory_space<vmem>>, vector<1024x128xbf16>
    %cst_614 = arith.constant dense<0.000000e+00> : vector<8x128xf32>
    %404 = tpu.matmul %402, %403, %cst_614 {dimension_numbers = #tpu.dot_dimension_numbers<[1], [0], [0], [1], [0, 0, 1, 1], [], []>} : vector<8x1024xbf16>, vector<1024x128xbf16>, vector<8x128xf32> -> vector<8x128xf32>
    %c0_615 = arith.constant 0 : index
    %c0_616 = arith.constant 0 : index
    %405 = vector.load %arg10[%c0_615, %c0_616] : memref<1x128xf32, #tpu.memory_space<vmem>>, vector<1x128xf32>
    %406 = vector.broadcast %405 : vector<1x128xf32> to vector<8x128xf32>
    %407 = arith.addf %404, %406 : vector<8x128xf32>
    %c0_617 = arith.constant 0 : index
    %c0_618 = arith.constant 0 : index
    %408 = vector.load %arg11[%c0_617, %c0_618] : memref<8x128xf32, #tpu.memory_space<vmem>>, vector<8x128xf32>
    tpu.vector_store %arg11[%c0_617, %c0_618], %407 {strides = array<i32>} : memref<8x128xf32, #tpu.memory_space<vmem>>, vector<8x128xf32>,
    return
  }
}

</mosaic_0001>

<bundles_post_ra>
// kernel: dueling_dqn_forward.1
= control target key start
LH: loop header
LB: loop body
LE: loop exit
PB: predicated region body
PF: predicated region fallthrough
CT: control target
= control target key end

     0   :  { %s10914_s0 = inlined_call_operand.vmem [shape: bf16[512,256], index: 0, kind: input, shape index: {}]   ;;  %s10915_s1 = inlined_call_operand.vmem [shape: bf16[256,32], index: 1, kind: input, shape index: {}]   ;;  %s10916_s2 = inlined_call_operand.vmem [shape: f32[2,32], index: 2, kind: input, shape index: {}]   ;;  %s10917_s3 = inlined_call_operand.vmem [shape: bf16[512,64], index: 3, kind: input, shape index: {}]   ;;  %s10918_s4 = inlined_call_operand.vmem [shape: f32[2,64], index: 4, kind: input, shape index: {}]   ;;  %s10919_s5 = inlined_call_operand.vmem [shape: bf16[576,64], index: 5, kind: input, shape index: {}]   ;;  %s10920_s6 = inlined_call_operand.vmem [shape: f32[2,64], index: 6, kind: input, shape index: {}]   ;;  %s10921_s7 = inlined_call_operand.vmem [shape: bf16[64,1024], index: 7, kind: input, shape index: {}]   ;;  %s10922_s8 = inlined_call_operand.vmem [shape: f32[1,1024], index: 8, kind: input, shape index: {}]   ;;  %s10923_s9 = inlined_call_operand.vmem [shape: bf16[1024,128], index: 9, kind: input, shape index: {}]   ;;  %s10924_s10 = inlined_call_operand.vmem [shape: f32[1,128], index: 10, kind: input, shape index: {}]   ;;  %s10925_s11 = inlined_call_operand.hbm [shape: f32[8,128], index: 11, kind: output, shape index: {}]  }
   0x1   :  { %v6858_v0 = vld [vmem:[%s10915_s1 + $0x38] sm:$0xff]  ;;  %v6857_v2 = vld [vmem:[%s10915_s1 + $0x30] sm:$0xff]  ;;  %v6856_v4 = vld [vmem:[%s10915_s1 + $0x28] sm:$0xff] }
   0x2   :  { %v6866_v1 = vld [vmem:[%s10915_s1 + $0x78] sm:$0xff]  ;;  %552 = vmatpush.bf16.msra.mxu0 %v6858_v0  ;;  %v6865_v3 = vld [vmem:[%s10915_s1 + $0x70] sm:$0xff]  ;;  %7031 = vmatpush.bf16.msra.mxu3 %v6858_v0  ;;  %v6864_v5 = vld [vmem:[%s10915_s1 + $0x68] sm:$0xff] }
   0x3   :  { %721 = vmatpush.bf16.msra.mxu1 %v6866_v1  ;;  %7039 = vmatpush.bf16.msra.mxu2 %v6866_v1 }
   0x6   :  { %553 = vmatpush.bf16.msra.mxu0 %v6857_v2  ;;  %7032 = vmatpush.bf16.msra.mxu3 %v6857_v2 }
   0x7   :  { %722 = vmatpush.bf16.msra.mxu1 %v6865_v3  ;;  %7040 = vmatpush.bf16.msra.mxu2 %v6865_v3 }
   0x8   :  { %16 = vsyncpa [#allocation4], 0  ;;  %v6855_v6 = vld [vmem:[%s10915_s1 + $0x20] sm:$0xff]  ;;  %v6854_v8 = vld [vmem:[%s10915_s1 + $0x18] sm:$0xff]  ;;  %vm891_vm0 = vcmask 261120   ;;  %vm1768_vm5 = vcmask 1041409  }
   0x9   :  { %v6863_v7 = vld [vmem:[%s10915_s1 + $0x60] sm:$0xff]  ;;  %v6862_v9 = vld [vmem:[%s10915_s1 + $0x58] sm:$0xff]  ;;  %v6853_v10 = vld [vmem:[%s10915_s1 + $0x10] sm:$0xff]  ;;  %vm1771_vm6 = vcmask 1042434   ;;  %vm1774_vm7 = vcmask 1043459   ;;  %vm1777_vm8 = vcmask 1044484  }
   0xa   :  { %554 = vmatpush.bf16.msra.mxu0 %v6856_v4  ;;  %7033 = vmatpush.bf16.msra.mxu3 %v6856_v4  ;;  %v6861_v11 = vld [vmem:[%s10915_s1 + $0x50] sm:$0xff]  ;;  %v6852_v12 = vld [vmem:[%s10915_s1 + $0x8] sm:$0xff]  ;;  %v6851_v14 = vld [vmem:[%s10915_s1] sm:$0xff]  ;;  %vm1780_vm9 = vcmask 1045509   ;;  %vm1783_vm10 = vcmask 1046534   ;;  %vm1786_vm11 = vcmask 1047559  }
   0xb   :  { %723 = vmatpush.bf16.msra.mxu1 %v6864_v5  ;;  %7041 = vmatpush.bf16.msra.mxu2 %v6864_v5  ;;  %v6860_v13 = vld [vmem:[%s10915_s1 + $0x48] sm:$0xff]  ;;  %v6859_v15 = vld [vmem:[%s10915_s1 + $0x40] sm:$0xff]  ;;  %v5812_v22 = vld [vmem:[%s10914_s0 + $0x10] sm:$0xf]  ;;  %s7280_s27 = smov 96   ;;  %s7281_s28 = smov 32  }
   0xc   :  { %v5804_v16 = vld [vmem:[%s10914_s0] sm:$0xf]  ;;  %v6788_v17 = vld [vmem:[%s10914_s0 + $0x4] sm:$0xf0]  ;;  %v6787_v18 = vld [vmem:[%s10914_s0 + $0x4] sm:$0xf] }
   0xd   :  { %v5806_v19 = vld [vmem:[%s10914_s0 + $0x8] sm:$0xf0]  ;;  %v5805_v20 = vor.u32 %v6788_v17, %v5804_v16  ;;  %v6790_v23 = vld [vmem:[%s10914_s0 + $0x14] sm:$0xf0]  ;;  %v6789_v24 = vld [vmem:[%s10914_s0 + $0x14] sm:$0xf] }
   0xe   :  { %555 = vmatpush.bf16.msra.mxu0 %v6855_v6  ;;  %7034 = vmatpush.bf16.msra.mxu3 %v6855_v6  ;;  %v5809_v21 = vor.u32 %v6787_v18, %v5806_v19  ;;  %v5814_v25 = vld [vmem:[%s10914_s0 + $0x18] sm:$0xf0]  ;;  %v5813_v26 = vor.u32 %v6790_v23, %v5812_v22  ;;  %v5820_v28 = vld [vmem:[%s10914_s0 + $0x20] sm:$0xf]  ;;  %v6792_v29 = vld [vmem:[%s10914_s0 + $0x24] sm:$0xf0] }
   0xf   :  { %724 = vmatpush.bf16.msra.mxu1 %v6863_v7  ;;  %7042 = vmatpush.bf16.msra.mxu2 %v6863_v7  ;;  %v5817_v27 = vor.u32 %v6789_v24, %v5814_v25  ;;  %v6791_v30 = vld [vmem:[%s10914_s0 + $0x24] sm:$0xf]  ;;  %v5822_v31 = vld [vmem:[%s10914_s0 + $0x28] sm:$0xf0]  ;;  %v5821_v32 = vor.u32 %v6792_v29, %v5820_v28  ;;  %v5828_v34 = vld [vmem:[%s10914_s0 + $0x30] sm:$0xf] }
  0x10   :  { %v5825_v33 = vor.u32 %v6791_v30, %v5822_v31  ;;  %v6794_v35 = vld [vmem:[%s10914_s0 + $0x34] sm:$0xf0]  ;;  %v6793_v36 = vld [vmem:[%s10914_s0 + $0x34] sm:$0xf]  ;;  %v5830_v37 = vld [vmem:[%s10914_s0 + $0x38] sm:$0xf0] }
  0x11   :  { %v5829_v38 = vor.u32 %v6794_v35, %v5828_v34  ;;  %v5833_v39 = vor.u32 %v6793_v36, %v5830_v37  ;;  %v5836_v40 = vld [vmem:[%s10914_s0 + $0x40] sm:$0xf]  ;;  %v6796_v41 = vld [vmem:[%s10914_s0 + $0x44] sm:$0xf0]  ;;  %v6795_v42 = vld [vmem:[%s10914_s0 + $0x44] sm:$0xf] }
  0x12   :  { %556 = vmatpush.bf16.msra.mxu0 %v6854_v8  ;;  %7035 = vmatpush.bf16.msra.mxu3 %v6854_v8  ;;  %v5838_v43 = vld [vmem:[%s10914_s0 + $0x48] sm:$0xf0]  ;;  %v5837_v44 = vor.u32 %v6796_v41, %v5836_v40  ;;  %v5844_v46 = vld [vmem:[%s10914_s0 + $0x50] sm:$0xf]  ;;  %v6798_v47 = vld [vmem:[%s10914_s0 + $0x54] sm:$0xf0] }
  0x13   :  { %725 = vmatpush.bf16.msra.mxu1 %v6862_v9  ;;  %7043 = vmatpush.bf16.msra.mxu2 %v6862_v9  ;;  %v5841_v45 = vor.u32 %v6795_v42, %v5838_v43  ;;  %v6797_v48 = vld [vmem:[%s10914_s0 + $0x54] sm:$0xf]  ;;  %v5846_v49 = vld [vmem:[%s10914_s0 + $0x58] sm:$0xf0]  ;;  %v5845_v50 = vor.u32 %v6798_v47, %v5844_v46  ;;  %v5852_v52 = vld [vmem:[%s10914_s0 + $0x60] sm:$0xf] }
  0x14   :  { %v5849_v51 = vor.u32 %v6797_v48, %v5846_v49  ;;  %v6800_v53 = vld [vmem:[%s10914_s0 + $0x64] sm:$0xf0]  ;;  %v6799_v54 = vld [vmem:[%s10914_s0 + $0x64] sm:$0xf]  ;;  %v5854_v55 = vld [vmem:[%s10914_s0 + $0x68] sm:$0xf0] }
  0x15   :  { %v5853_v56 = vor.u32 %v6800_v53, %v5852_v52  ;;  %v5857_v57 = vor.u32 %v6799_v54, %v5854_v55  ;;  %v5860_v58 = vld [vmem:[%s10914_s0 + $0x70] sm:$0xf]  ;;  %v6802_v59 = vld [vmem:[%s10914_s0 + $0x74] sm:$0xf0]  ;;  %v6801_v60 = vld [vmem:[%s10914_s0 + $0x74] sm:$0xf] }
  0x16   :  { %557 = vmatpush.bf16.msra.mxu0 %v6853_v10  ;;  %7036 = vmatpush.bf16.msra.mxu3 %v6853_v10  ;;  %v5862_v61 = vld [vmem:[%s10914_s0 + $0x78] sm:$0xf0]  ;;  %v5861_v62 = vor.u32 %v6802_v59, %v5860_v58  ;;  %v5868_v0 = vld [vmem:[%s10914_s0 + $0x80] sm:$0xf]  ;;  %v6804_v1 = vld [vmem:[%s10914_s0 + $0x84] sm:$0xf0] }
  0x17   :  { %726 = vmatpush.bf16.msra.mxu1 %v6861_v11  ;;  %7044 = vmatpush.bf16.msra.mxu2 %v6861_v11  ;;  %v5865_v63 = vor.u32 %v6801_v60, %v5862_v61  ;;  %v6803_v2 = vld [vmem:[%s10914_s0 + $0x84] sm:$0xf]  ;;  %v5870_v3 = vld [vmem:[%s10914_s0 + $0x88] sm:$0xf0]  ;;  %v5869_v4 = vor.u32 %v6804_v1, %v5868_v0  ;;  %v5884_v24 = vld [vmem:[%s10914_s0 + $0xa0] sm:$0xf] }
  0x18   :  { %v5873_v5 = vor.u32 %v6803_v2, %v5870_v3  ;;  %v6808_v25 = vld [vmem:[%s10914_s0 + $0xa4] sm:$0xf0]  ;;  %v5892_v36 = vld [vmem:[%s10914_s0 + $0xb0] sm:$0xf]  ;;  %v6810_v37 = vld [vmem:[%s10914_s0 + $0xb4] sm:$0xf0] }
  0x19   :  { %v5885_v28 = vor.u32 %v6808_v25, %v5884_v24  ;;  %v5893_v40 = vor.u32 %v6810_v37, %v5892_v36  ;;  %v5900_v48 = vld [vmem:[%s10914_s0 + $0xc0] sm:$0xf]  ;;  %v6812_v49 = vld [vmem:[%s10914_s0 + $0xc4] sm:$0xf0]  ;;  %v5908_v60 = vld [vmem:[%s10914_s0 + $0xd0] sm:$0xf] }
  0x1a   :  { %558 = vmatpush.bf16.msra.mxu0 %v6852_v12  ;;  %7037 = vmatpush.bf16.msra.mxu3 %v6852_v12  ;;  %v5876_v12 = vld [vmem:[%s10914_s0 + $0x90] sm:$0xf]  ;;  %v5901_v52 = vor.u32 %v6812_v49, %v5900_v48  ;;  %v6814_v61 = vld [vmem:[%s10914_s0 + $0xd4] sm:$0xf0]  ;;  %vm2159_vm12 = vcmask 523264   ;;  %vm2161_vm13 = vcmask 785408  }
  0x1b   :  { %727 = vmatpush.bf16.msra.mxu1 %v6860_v13  ;;  %7045 = vmatpush.bf16.msra.mxu2 %v6860_v13  ;;  %v6806_v13 = vld [vmem:[%s10914_s0 + $0x94] sm:$0xf0]  ;;  %v5909_v0 = vor.u32 %v6814_v61, %v5908_v60  ;;  %v5924_v24 = vld [vmem:[%s10914_s0 + $0xf0] sm:$0xf]  ;;  %s5793_s12 = sshll.u32 %s10925_s11, 4  ;;  %s5794_s12 = int_to_ptr.hbm [resolvable:$true] %s5793_s12 }
  0x1c   :  { %v5877_v16 = vor.u32 %v6806_v13, %v5876_v12  ;;  %v6815_v12 = vld [vmem:[%s10914_s0 + $0xe4] sm:$0xf]  ;;  %v5918_v13 = vld [vmem:[%s10914_s0 + $0xe8] sm:$0xf0]  ;;  %v6818_v25 = vld [vmem:[%s10914_s0 + $0xf4] sm:$0xf0] }
  0x1e   :  { %559 = vmatpush.bf16.msra.mxu0 %v6851_v14  ;;  %7038 = vmatpush.bf16.msra.mxu3 %v6851_v14  ;;  %v6805_v14 = vld [vmem:[%s10914_s0 + $0x94] sm:$0xf] }
  0x1f   :  { %728 = vmatpush.bf16.msra.mxu1 %v6859_v15  ;;  %7046 = vmatpush.bf16.msra.mxu2 %v6859_v15  ;;  %v5878_v15 = vld [vmem:[%s10914_s0 + $0x98] sm:$0xf0] }
  0x20   :  { %v5881_v17 = vor.u32 %v6805_v14, %v5878_v15  ;;  %v5921_v15 = vor.u32 %v6815_v12, %v5918_v13 }
  0x21   :  { %560 = vmatmul.bf16.vlgmr.msra.gmra.mxu0 %v5805_v20 }
  0x22   :  { %729 = vmatmul.bf16.vlgmr.msra.gmra.mxu1 %v5809_v21 }
  0x31   :  { %565 = vmatmul.bf16.gmra.mxu0 %v5813_v26  ;;  %v6807_v26 = vld [vmem:[%s10914_s0 + $0xa4] sm:$0xf] }
  0x32   :  { %734 = vmatmul.bf16.gmra.mxu1 %v5817_v27  ;;  %v5886_v27 = vld [vmem:[%s10914_s0 + $0xa8] sm:$0xf0] }
  0x33   :  { %v5889_v29 = vor.u32 %v6807_v26, %v5886_v27  ;;  %v6817_v26 = vld [vmem:[%s10914_s0 + $0xf4] sm:$0xf]  ;;  %v5926_v27 = vld [vmem:[%s10914_s0 + $0xf8] sm:$0xf0] }
  0x41   :  { %570 = vmatmul.bf16.gmra.mxu0 %v5821_v32 }
  0x42   :  { %739 = vmatmul.bf16.gmra.mxu1 %v5825_v33 }
  0x51   :  { %575 = vmatmul.bf16.gmra.mxu0 %v5829_v38  ;;  %v6809_v38 = vld [vmem:[%s10914_s0 + $0xb4] sm:$0xf] }
  0x52   :  { %744 = vmatmul.bf16.gmra.mxu1 %v5833_v39  ;;  %v5894_v39 = vld [vmem:[%s10914_s0 + $0xb8] sm:$0xf0] }
  0x53   :  { %v5897_v41 = vor.u32 %v6809_v38, %v5894_v39  ;;  %v5932_v38 = vld [vmem:[%s10914_s0 + $0x100] sm:$0xf]  ;;  %v6820_v39 = vld [vmem:[%s10914_s0 + $0x104] sm:$0xf0] }
  0x61   :  { %580 = vmatmul.bf16.gmra.mxu0 %v5837_v44 }
  0x62   :  { %749 = vmatmul.bf16.gmra.mxu1 %v5841_v45 }
  0x71   :  { %585 = vmatmul.bf16.gmra.mxu0 %v5845_v50  ;;  %v6811_v50 = vld [vmem:[%s10914_s0 + $0xc4] sm:$0xf] }
  0x72   :  { %754 = vmatmul.bf16.gmra.mxu1 %v5849_v51  ;;  %v5902_v51 = vld [vmem:[%s10914_s0 + $0xc8] sm:$0xf0] }
  0x73   :  { %v5905_v53 = vor.u32 %v6811_v50, %v5902_v51 }
  0x81   :  { %590 = vmatmul.bf16.gmra.mxu0 %v5853_v56 }
  0x82   :  { %759 = vmatmul.bf16.gmra.mxu1 %v5857_v57 }
  0x91   :  { %595 = vmatmul.bf16.gmra.mxu0 %v5861_v62  ;;  %v6813_v62 = vld [vmem:[%s10914_s0 + $0xd4] sm:$0xf] }
  0x92   :  { %764 = vmatmul.bf16.gmra.mxu1 %v5865_v63  ;;  %v5910_v63 = vld [vmem:[%s10914_s0 + $0xd8] sm:$0xf0] }
  0x93   :  { %v5913_v1 = vor.u32 %v6813_v62, %v5910_v63 }
  0x9e   :  { %v561_v6 = vpop.f32.mrf.mxu0 }
  0x9f   :  { %v730_v7 = vpop.f32.mrf.mxu1 }
  0xa0   :  { %v7501_v8 = vadd.f32 %v730_v7, %v561_v6 }
  0xa1   :  { %600 = vmatmul.bf16.gmra.mxu0 %v5869_v4 }
  0xa2   :  { %769 = vmatmul.bf16.gmra.mxu1 %v5873_v5 }
  0xa6   :  { %v563_v9 = vpop.f32.mrf.mxu0 }
  0xa7   :  { %v732_v10 = vpop.f32.mrf.mxu1 }
  0xa8   :  { %v7503_v11 = vadd.f32 %v732_v10, %v563_v9  ;;  %v5916_v9 = vld [vmem:[%s10914_s0 + $0xe0] sm:$0xf]  ;;  %v6816_v10 = vld [vmem:[%s10914_s0 + $0xe4] sm:$0xf0] }
  0xa9   :  { %v5917_v14 = vor.u32 %v6816_v10, %v5916_v9 }
  0xae   :  { %v566_v18 = vpop.f32.mrf.mxu0 }
  0xaf   :  { %v735_v19 = vpop.f32.mrf.mxu1 }
  0xb0   :  { %v7517_v20 = vadd.f32 %v735_v19, %v566_v18 }
  0xb1   :  { %605 = vmatmul.bf16.gmra.mxu0 %v5877_v16 }
  0xb2   :  { %774 = vmatmul.bf16.gmra.mxu1 %v5881_v17 }
  0xb6   :  { %v568_v21 = vpop.f32.mrf.mxu0 }
  0xb7   :  { %v737_v22 = vpop.f32.mrf.mxu1 }
  0xb8   :  { %v7519_v23 = vadd.f32 %v737_v22, %v568_v21 }
  0xbe   :  { %v571_v30 = vpop.f32.mrf.mxu0 }
  0xbf   :  { %v740_v31 = vpop.f32.mrf.mxu1 }
  0xc0   :  { %v7533_v32 = vadd.f32 %v740_v31, %v571_v30 }
  0xc1   :  { %610 = vmatmul.bf16.gmra.mxu0 %v5885_v28  ;;  %v5925_v28 = vor.u32 %v6818_v25, %v5924_v24  ;;  %v6825_v24 = vld [vmem:[%s10914_s0 + $0x134] sm:$0xf]  ;;  %v5958_v25 = vld [vmem:[%s10914_s0 + $0x138] sm:$0xf0] }
  0xc2   :  { %779 = vmatmul.bf16.gmra.mxu1 %v5889_v29  ;;  %v5929_v29 = vor.u32 %v6817_v26, %v5926_v27  ;;  %v5961_v27 = vor.u32 %v6825_v24, %v5958_v25 }
  0xc6   :  { %v573_v33 = vpop.f32.mrf.mxu0 }
  0xc7   :  { %v742_v34 = vpop.f32.mrf.mxu1 }
  0xc8   :  { %v7535_v35 = vadd.f32 %v742_v34, %v573_v33 }
  0xce   :  { %v576_v42 = vpop.f32.mrf.mxu0 }
  0xcf   :  { %v745_v43 = vpop.f32.mrf.mxu1 }
  0xd0   :  { %v7549_v44 = vadd.f32 %v745_v43, %v576_v42  ;;  %v5933_v42 = vor.u32 %v6820_v39, %v5932_v38  ;;  %v5964_v38 = vld [vmem:[%s10914_s0 + $0x140] sm:$0xf]  ;;  %v6828_v39 = vld [vmem:[%s10914_s0 + $0x144] sm:$0xf0] }
  0xd1   :  { %615 = vmatmul.bf16.gmra.mxu0 %v5893_v40  ;;  %v6819_v40 = vld [vmem:[%s10914_s0 + $0x104] sm:$0xf] }
  0xd2   :  { %784 = vmatmul.bf16.gmra.mxu1 %v5897_v41  ;;  %v5934_v41 = vld [vmem:[%s10914_s0 + $0x108] sm:$0xf0] }
  0xd3   :  { %v5937_v43 = vor.u32 %v6819_v40, %v5934_v41  ;;  %v6827_v40 = vld [vmem:[%s10914_s0 + $0x144] sm:$0xf]  ;;  %v5966_v41 = vld [vmem:[%s10914_s0 + $0x148] sm:$0xf0] }
  0xd6   :  { %v578_v45 = vpop.f32.mrf.mxu0 }
  0xd7   :  { %v747_v46 = vpop.f32.mrf.mxu1 }
  0xd8   :  { %v7551_v47 = vadd.f32 %v747_v46, %v578_v45 }
  0xde   :  { %v581_v54 = vpop.f32.mrf.mxu0 }
  0xdf   :  { %v750_v55 = vpop.f32.mrf.mxu1 }
  0xe0   :  { %v7565_v56 = vadd.f32 %v750_v55, %v581_v54  ;;  %v6821_v54 = vld [vmem:[%s10914_s0 + $0x114] sm:$0xf]  ;;  %v5942_v55 = vld [vmem:[%s10914_s0 + $0x118] sm:$0xf0] }
  0xe1   :  { %620 = vmatmul.bf16.gmra.mxu0 %v5901_v52  ;;  %v5940_v52 = vld [vmem:[%s10914_s0 + $0x110] sm:$0xf] }
  0xe2   :  { %789 = vmatmul.bf16.gmra.mxu1 %v5905_v53  ;;  %v6822_v53 = vld [vmem:[%s10914_s0 + $0x114] sm:$0xf0] }
  0xe6   :  { %v583_v57 = vpop.f32.mrf.mxu0 }
  0xe7   :  { %v752_v58 = vpop.f32.mrf.mxu1 }
  0xe8   :  { %v7567_v59 = vadd.f32 %v752_v58, %v583_v57  ;;  %v5941_v57 = vor.u32 %v6822_v53, %v5940_v52  ;;  %v5945_v58 = vor.u32 %v6821_v54, %v5942_v55  ;;  %v5972_v54 = vld [vmem:[%s10914_s0 + $0x150] sm:$0xf]  ;;  %v6830_v55 = vld [vmem:[%s10914_s0 + $0x154] sm:$0xf0] }
  0xee   :  { %v586_v2 = vpop.f32.mrf.mxu0 }
  0xef   :  { %v755_v3 = vpop.f32.mrf.mxu1 }
  0xf0   :  { %v7581_v4 = vadd.f32 %v755_v3, %v586_v2  ;;  %v5948_v2 = vld [vmem:[%s10914_s0 + $0x120] sm:$0xf]  ;;  %v6824_v3 = vld [vmem:[%s10914_s0 + $0x124] sm:$0xf0] }
  0xf1   :  { %625 = vmatmul.bf16.gmra.mxu0 %v5909_v0  ;;  %v5949_v9 = vor.u32 %v6824_v3, %v5948_v2 }
  0xf2   :  { %794 = vmatmul.bf16.gmra.mxu1 %v5913_v1 }
  0xf6   :  { %v588_v5 = vpop.f32.mrf.mxu0 }
  0xf7   :  { %v757_v6 = vpop.f32.mrf.mxu1 }
  0xf8   :  { %v7583_v7 = vadd.f32 %v757_v6, %v588_v5  ;;  %v6823_v5 = vld [vmem:[%s10914_s0 + $0x124] sm:$0xf]  ;;  %v5950_v6 = vld [vmem:[%s10914_s0 + $0x128] sm:$0xf0] }
  0xf9   :  { %v5953_v10 = vor.u32 %v6823_v5, %v5950_v6 }
  0xfe   :  { %v591_v16 = vpop.f32.mrf.mxu0 }
  0xff   :  { %v760_v17 = vpop.f32.mrf.mxu1 }
 0x100   :  { %v7597_v18 = vadd.f32 %v760_v17, %v591_v16 }
 0x101   :  { %630 = vmatmul.bf16.gmra.mxu0 %v5917_v14 }
 0x102   :  { %799 = vmatmul.bf16.gmra.mxu1 %v5921_v15 }
 0x106   :  { %v593_v19 = vpop.f32.mrf.mxu0 }
 0x107   :  { %v762_v21 = vpop.f32.mrf.mxu1 }
 0x108   :  { %v7599_v22 = vadd.f32 %v762_v21, %v593_v19  ;;  %v5956_v19 = vld [vmem:[%s10914_s0 + $0x130] sm:$0xf]  ;;  %v6826_v21 = vld [vmem:[%s10914_s0 + $0x134] sm:$0xf0] }
 0x109   :  { %v5957_v26 = vor.u32 %v6826_v21, %v5956_v19 }
 0x10e   :  { %v596_v30 = vpop.f32.mrf.mxu0 }
 0x10f   :  { %v765_v31 = vpop.f32.mrf.mxu1 }
 0x110   :  { %v7613_v33 = vadd.f32 %v765_v31, %v596_v30 }
 0x111   :  { %635 = vmatmul.bf16.gmra.mxu0 %v5925_v28 }
 0x112   :  { %804 = vmatmul.bf16.gmra.mxu1 %v5929_v29 }
 0x116   :  { %v598_v34 = vpop.f32.mrf.mxu0 }
 0x117   :  { %v767_v36 = vpop.f32.mrf.mxu1 }
 0x118   :  { %v7615_v37 = vadd.f32 %v767_v36, %v598_v34 }
 0x11e   :  { %v601_v45 = vpop.f32.mrf.mxu0 }
 0x11f   :  { %v770_v46 = vpop.f32.mrf.mxu1 }
 0x120   :  { %v7629_v48 = vadd.f32 %v770_v46, %v601_v45 }
 0x121   :  { %640 = vmatmul.bf16.gmra.mxu0 %v5933_v42  ;;  %v5965_v42 = vor.u32 %v6828_v39, %v5964_v38 }
 0x122   :  { %809 = vmatmul.bf16.gmra.mxu1 %v5937_v43  ;;  %v5969_v43 = vor.u32 %v6827_v40, %v5966_v41 }
 0x126   :  { %v603_v49 = vpop.f32.mrf.mxu0 }
 0x127   :  { %v772_v50 = vpop.f32.mrf.mxu1 }
 0x128   :  { %v7631_v51 = vadd.f32 %v772_v50, %v603_v49 }
 0x12e   :  { %v606_v60 = vpop.f32.mrf.mxu0 }
 0x12f   :  { %v775_v61 = vpop.f32.mrf.mxu1 }
 0x130   :  { %v7645_v62 = vadd.f32 %v775_v61, %v606_v60  ;;  %v5973_v60 = vor.u32 %v6830_v55, %v5972_v54  ;;  %v6835_v54 = vld [vmem:[%s10914_s0 + $0x184] sm:$0xf]  ;;  %v5998_v55 = vld [vmem:[%s10914_s0 + $0x188] sm:$0xf0] }
 0x131   :  { %645 = vmatmul.bf16.gmra.mxu0 %v5941_v57  ;;  %v6829_v57 = vld [vmem:[%s10914_s0 + $0x154] sm:$0xf] }
 0x132   :  { %814 = vmatmul.bf16.gmra.mxu1 %v5945_v58  ;;  %v5974_v58 = vld [vmem:[%s10914_s0 + $0x158] sm:$0xf0] }
 0x133   :  { %v5977_v61 = vor.u32 %v6829_v57, %v5974_v58  ;;  %v6036_v57 = vld [vmem:[%s10914_s0 + $0x1d0] sm:$0xf]  ;;  %v6846_v58 = vld [vmem:[%s10914_s0 + $0x1d4] sm:$0xf0] }
 0x136   :  { %v608_v63 = vpop.f32.mrf.mxu0 }
 0x137   :  { %v777_v0 = vpop.f32.mrf.mxu1 }
 0x138   :  { %v7647_v1 = vadd.f32 %v777_v0, %v608_v63 }
 0x13e   :  { %v611_v12 = vpop.f32.mrf.mxu0 }
 0x13f   :  { %v780_v13 = vpop.f32.mrf.mxu1 }
 0x140   :  { %v7661_v14 = vadd.f32 %v780_v13, %v611_v12  ;;  %v6831_v12 = vld [vmem:[%s10914_s0 + $0x164] sm:$0xf]  ;;  %v5982_v13 = vld [vmem:[%s10914_s0 + $0x168] sm:$0xf0] }
 0x141   :  { %650 = vmatmul.bf16.gmra.mxu0 %v5949_v9  ;;  %v5980_v9 = vld [vmem:[%s10914_s0 + $0x160] sm:$0xf] }
 0x142   :  { %819 = vmatmul.bf16.gmra.mxu1 %v5953_v10  ;;  %v6832_v10 = vld [vmem:[%s10914_s0 + $0x164] sm:$0xf0] }
 0x146   :  { %v613_v15 = vpop.f32.mrf.mxu0 }
 0x147   :  { %v782_v16 = vpop.f32.mrf.mxu1 }
 0x148   :  { %v7663_v17 = vadd.f32 %v782_v16, %v613_v15  ;;  %v5981_v15 = vor.u32 %v6832_v10, %v5980_v9  ;;  %v5985_v16 = vor.u32 %v6831_v12, %v5982_v13 }
 0x14e   :  { %v616_v28 = vpop.f32.mrf.mxu0 }
 0x14f   :  { %v785_v29 = vpop.f32.mrf.mxu1 }
 0x150   :  { %v7677_v30 = vadd.f32 %v785_v29, %v616_v28  ;;  %v5988_v28 = vld [vmem:[%s10914_s0 + $0x170] sm:$0xf]  ;;  %v6834_v29 = vld [vmem:[%s10914_s0 + $0x174] sm:$0xf0] }
 0x151   :  { %655 = vmatmul.bf16.gmra.mxu0 %v5957_v26  ;;  %v5989_v38 = vor.u32 %v6834_v29, %v5988_v28  ;;  %v6044_v28 = vld [vmem:[%s10914_s0 + $0x1e0] sm:$0xf]  ;;  %v6848_v29 = vld [vmem:[%s10914_s0 + $0x1e4] sm:$0xf0] }
 0x152   :  { %10971 = vst [vmem:[#allocation6_spill] sm:$0xff] %v7677_v30  ;;  %824 = vmatmul.bf16.gmra.mxu1 %v5961_v27 }
 0x156   :  { %v618_v31 = vpop.f32.mrf.mxu0 }
 0x157   :  { %v787_v34 = vpop.f32.mrf.mxu1 }
 0x158   :  { %v7679_v36 = vadd.f32 %v787_v34, %v618_v31  ;;  %v6833_v31 = vld [vmem:[%s10914_s0 + $0x174] sm:$0xf]  ;;  %v5990_v34 = vld [vmem:[%s10914_s0 + $0x178] sm:$0xf0] }
 0x159   :  { %v5993_v39 = vor.u32 %v6833_v31, %v5990_v34  ;;  %v6847_v31 = vld [vmem:[%s10914_s0 + $0x1e4] sm:$0xf] }
 0x15a   :  { %10972 = vst [vmem:[#allocation7_spill] sm:$0xff] %v7679_v36 }
 0x15e   :  { %v621_v45 = vpop.f32.mrf.mxu0 }
 0x15f   :  { %v790_v46 = vpop.f32.mrf.mxu1 }
 0x160   :  { %v7693_v49 = vadd.f32 %v790_v46, %v621_v45 }
 0x161   :  { %660 = vmatmul.bf16.gmra.mxu0 %v5965_v42 }
 0x162   :  { %10973 = vst [vmem:[#allocation8_spill] sm:$0xff] %v7693_v49  ;;  %829 = vmatmul.bf16.gmra.mxu1 %v5969_v43 }
 0x166   :  { %v623_v50 = vpop.f32.mrf.mxu0 }
 0x167   :  { %v792_v52 = vpop.f32.mrf.mxu1 }
 0x168   :  { %v7695_v53 = vadd.f32 %v792_v52, %v623_v50  ;;  %v5996_v50 = vld [vmem:[%s10914_s0 + $0x180] sm:$0xf]  ;;  %v6836_v52 = vld [vmem:[%s10914_s0 + $0x184] sm:$0xf0] }
 0x16e   :  { %v626_v63 = vpop.f32.mrf.mxu0 }
 0x16f   :  { %v795_v0 = vpop.f32.mrf.mxu1 }
 0x170   :  { %v7709_v2 = vadd.f32 %v795_v0, %v626_v63  ;;  %v6001_v63 = vor.u32 %v6835_v54, %v5998_v55  ;;  %v6037_v0 = vor.u32 %v6846_v58, %v6036_v57  ;;  %v6012_v57 = vld [vmem:[%s10914_s0 + $0x1a0] sm:$0xf]  ;;  %v6840_v58 = vld [vmem:[%s10914_s0 + $0x1a4] sm:$0xf0] }
 0x171   :  { %665 = vmatmul.bf16.gmra.mxu0 %v5973_v60  ;;  %v6845_v60 = vld [vmem:[%s10914_s0 + $0x1d4] sm:$0xf] }
 0x172   :  { %834 = vmatmul.bf16.gmra.mxu1 %v5977_v61  ;;  %v5997_v61 = vor.u32 %v6836_v52, %v5996_v50  ;;  %705 = vmatmul.bf16.vlgmr.msra.gmra.mxu3 %v6037_v0  ;;  %v6850_v0 = vld [vmem:[%s10914_s0 + $0x1f4] sm:$0xf0] }
 0x176   :  { %v628_v3 = vpop.f32.mrf.mxu0 }
 0x177   :  { %v797_v5 = vpop.f32.mrf.mxu1 }
 0x178   :  { %v7711_v6 = vadd.f32 %v797_v5, %v628_v3  ;;  %v6038_v3 = vld [vmem:[%s10914_s0 + $0x1d8] sm:$0xf0] }
 0x179   :  { %v6041_v10 = vor.u32 %v6845_v60, %v6038_v3  ;;  %v6839_v60 = vld [vmem:[%s10914_s0 + $0x1a4] sm:$0xf]  ;;  %v6849_v3 = vld [vmem:[%s10914_s0 + $0x1f4] sm:$0xf] }
 0x17a   :  { %10974 = vst [vmem:[#allocation9_spill] sm:$0xff] %v7711_v6 }
 0x17b   :  { %874 = vmatmul.bf16.vlgmr.msra.gmra.mxu2 %v6041_v10 }
 0x17e   :  { %v631_v19 = vpop.f32.mrf.mxu0 }
 0x17f   :  { %v800_v21 = vpop.f32.mrf.mxu1 }
 0x180   :  { %v7725_v24 = vadd.f32 %v800_v21, %v631_v19  ;;  %v6004_v19 = vld [vmem:[%s10914_s0 + $0x190] sm:$0xf]  ;;  %v6838_v21 = vld [vmem:[%s10914_s0 + $0x194] sm:$0xf0] }
 0x181   :  { %670 = vmatmul.bf16.gmra.mxu0 %v5981_v15  ;;  %v6005_v34 = vor.u32 %v6838_v21, %v6004_v19 }
 0x182   :  { %10975 = vst [vmem:[#allocation10_spill] sm:$0xff] %v7725_v24  ;;  %839 = vmatmul.bf16.gmra.mxu1 %v5985_v16 }
 0x186   :  { %v633_v25 = vpop.f32.mrf.mxu0 }
 0x187   :  { %v802_v26 = vpop.f32.mrf.mxu1 }
 0x188   :  { %v7727_v27 = vadd.f32 %v802_v26, %v633_v25  ;;  %v6837_v25 = vld [vmem:[%s10914_s0 + $0x194] sm:$0xf]  ;;  %v6006_v26 = vld [vmem:[%s10914_s0 + $0x198] sm:$0xf0] }
 0x18e   :  { %v636_v40 = vpop.f32.mrf.mxu0 }
 0x18f   :  { %v805_v41 = vpop.f32.mrf.mxu1 }
 0x190   :  { %v7741_v42 = vadd.f32 %v805_v41, %v636_v40  ;;  %v6046_v40 = vld [vmem:[%s10914_s0 + $0x1e8] sm:$0xf0] }
 0x191   :  { %675 = vmatmul.bf16.gmra.mxu0 %v5989_v38  ;;  %v6009_v38 = vor.u32 %v6837_v25, %v6006_v26 }
 0x192   :  { %844 = vmatmul.bf16.gmra.mxu1 %v5993_v39  ;;  %v6045_v39 = vor.u32 %v6848_v29, %v6044_v28 }
 0x194   :  { %710 = vmatmul.bf16.gmra.mxu3 %v6045_v39  ;;  %v6022_v39 = vld [vmem:[%s10914_s0 + $0x1b8] sm:$0xf0] }
 0x196   :  { %v638_v43 = vpop.f32.mrf.mxu0 }
 0x197   :  { %v807_v45 = vpop.f32.mrf.mxu1 }
 0x198   :  { %v7743_v46 = vadd.f32 %v807_v45, %v638_v43  ;;  %v6049_v45 = vor.u32 %v6847_v31, %v6046_v40  ;;  %v6020_v31 = vld [vmem:[%s10914_s0 + $0x1b0] sm:$0xf] }
 0x19a   :  { %10976 = vst [vmem:[#allocation11_spill] sm:$0xff] %v7743_v46  ;;  %879 = vmatmul.bf16.gmra.mxu2 %v6049_v45 }
 0x19e   :  { %v641_v5 = vpop.f32.mrf.mxu0 }
 0x19f   :  { %v810_v9 = vpop.f32.mrf.mxu1 }
 0x1a0   :  { %v7769_v12 = vadd.f32 %v810_v9, %v641_v5  ;;  %v6013_v5 = vor.u32 %v6840_v58, %v6012_v57 }
 0x1a1   :  { %680 = vmatmul.bf16.gmra.mxu0 %v5997_v61  ;;  %v6014_v61 = vld [vmem:[%s10914_s0 + $0x1a8] sm:$0xf0] }
 0x1a2   :  { %10977 = vst [vmem:[#allocation12_spill] sm:$0xff] %v7769_v12  ;;  %849 = vmatmul.bf16.gmra.mxu1 %v6001_v63  ;;  %v6052_v63 = vld [vmem:[%s10914_s0 + $0x1f0] sm:$0xf]  ;;  %v6017_v9 = vor.u32 %v6839_v60, %v6014_v61  ;;  %v6028_v60 = vld [vmem:[%s10914_s0 + $0x1c0] sm:$0xf] }
 0x1a3   :  { %v6053_v10 = vor.u32 %v6850_v0, %v6052_v63  ;;  %v6844_v61 = vld [vmem:[%s10914_s0 + $0x1c4] sm:$0xf0]  ;;  %v6843_v63 = vld [vmem:[%s10914_s0 + $0x1c4] sm:$0xf]  ;;  %v6030_v0 = vld [vmem:[%s10914_s0 + $0x1c8] sm:$0xf0] }
 0x1a5   :  { %715 = vmatmul.bf16.gmra.mxu3 %v6053_v10 }
 0x1a6   :  { %v643_v13 = vpop.f32.mrf.mxu0 }
 0x1a7   :  { %v812_v15 = vpop.f32.mrf.mxu1 }
 0x1a8   :  { %v7771_v16 = vadd.f32 %v812_v15, %v643_v13  ;;  %v6054_v13 = vld [vmem:[%s10914_s0 + $0x1f8] sm:$0xf0] }
 0x1a9   :  { %v6057_v21 = vor.u32 %v6849_v3, %v6054_v13  ;;  %v6029_v3 = vor.u32 %v6844_v61, %v6028_v60  ;;  %v899_v60 = vsel %vm891_vm0, %v7533_v32, 0.0 }
 0x1aa   :  { %10978 = vst [vmem:[#allocation13_spill] sm:$0xff] %v7771_v16 }
 0x1ab   :  { %884 = vmatmul.bf16.gmra.mxu2 %v6057_v21 }
 0x1ae   :  { %v646_v41 = vpop.f32.mrf.mxu0 }
 0x1af   :  { %v815_v43 = vpop.f32.mrf.mxu1 }
 0x1b0   :  { %v7797_v50 = vadd.f32 %v815_v43, %v646_v41 }
 0x1b1   :  { %685 = vmatmul.bf16.gmra.mxu0 %v6005_v34  ;;  %v6842_v34 = vld [vmem:[%s10914_s0 + $0x1b4] sm:$0xf0] }
 0x1b2   :  { %10979 = vst [vmem:[#allocation14_spill] sm:$0xff] %v7797_v50  ;;  %854 = vmatmul.bf16.gmra.mxu1 %v6009_v38  ;;  %v6841_v38 = vld [vmem:[%s10914_s0 + $0x1b4] sm:$0xf]  ;;  %v6021_v40 = vor.u32 %v6842_v34, %v6020_v31 }
 0x1b3   :  { %v6025_v41 = vor.u32 %v6841_v38, %v6022_v39  ;;  %v893_v39 = vsel %vm891_vm0, %v7503_v11, 0.0 }
 0x1b6   :  { %v648_v52 = vpop.f32.mrf.mxu0 }
 0x1b7   :  { %v817_v54 = vpop.f32.mrf.mxu1 }
 0x1b8   :  { %v7799_v55 = vadd.f32 %v817_v54, %v648_v52 }
 0x1ba   :  { %10980 = vst [vmem:[#allocation15_spill] sm:$0xff] %v7799_v55 }
 0x1be   :  { %v651_v15 = vpop.f32.mrf.mxu0 }
 0x1bf   :  { %v820_v19 = vpop.f32.mrf.mxu1 }
 0x1c0   :  { %v7825_v25 = vadd.f32 %v820_v19, %v651_v15 }
 0x1c1   :  { %690 = vmatmul.bf16.gmra.mxu0 %v6013_v5  ;;  %v6033_v5 = vor.u32 %v6843_v63, %v6030_v0 }
 0x1c2   :  { %10981 = vst [vmem:[#allocation16_spill] sm:$0xff] %v7825_v25  ;;  %859 = vmatmul.bf16.gmra.mxu1 %v6017_v9 }
 0x1c6   :  { %v653_v26 = vpop.f32.mrf.mxu0 }
 0x1c7   :  { %v822_v28 = vpop.f32.mrf.mxu1 }
 0x1c8   :  { %v7827_v29 = vadd.f32 %v822_v28, %v653_v26 }
 0x1ce   :  { %v656_v43 = vpop.f32.mrf.mxu0 }
 0x1cf   :  { %v825_v45 = vpop.f32.mrf.mxu1 }
 0x1d0   :  { %v7841_v52 = vadd.f32 %v825_v45, %v656_v43  ;;  %v895_v43 = vsel %vm891_vm0, %v7517_v20, 0.0 }
 0x1d1   :  { %695 = vmatmul.bf16.gmra.mxu0 %v6021_v40 }
 0x1d2   :  { %10982 = vst [vmem:[#allocation17_spill] sm:$0xff] %v7841_v52  ;;  %864 = vmatmul.bf16.gmra.mxu1 %v6025_v41  ;;  %v892_v41 = vsel %vm891_vm0, %v7501_v8, 0.0 }
 0x1d3   :  { %v894_v45 = vadd.f32 %v893_v39, %v892_v41  ;;  %v909_v41 = vsel %vm891_vm0, %v7567_v59, 0.0 }
 0x1d6   :  { %v658_v54 = vpop.f32.mrf.mxu0 }
 0x1d7   :  { %v827_v57 = vpop.f32.mrf.mxu1 }
 0x1d8   :  { %v7843_v58 = vadd.f32 %v827_v57, %v658_v54  ;;  %v897_v54 = vsel %vm891_vm0, %v7519_v23, 0.0  ;;  %v896_v57 = vadd.f32 %v895_v43, %v894_v45 }
 0x1da   :  { %10983 = vst [vmem:[#allocation18_spill] sm:$0xff] %v7843_v58  ;;  %v898_v61 = vadd.f32 %v897_v54, %v896_v57  ;;  %v911_v54 = vsel %vm891_vm0, %v7581_v4, 0.0 }
 0x1de   :  { %v661_v9 = vpop.f32.mrf.mxu0 }
 0x1df   :  { %v830_v10 = vpop.f32.mrf.mxu1 }
 0x1e0   :  { %v7857_v13 = vadd.f32 %v830_v10, %v661_v9  ;;  %v900_v9 = vadd.f32 %v899_v60, %v898_v61  ;;  %v903_v10 = vsel %vm891_vm0, %v7549_v44, 0.0  ;;  %v913_v60 = vsel %vm891_vm0, %v7583_v7, 0.0 }
 0x1e1   :  { %700 = vmatmul.bf16.gmra.mxu0 %v6029_v3  ;;  %v901_v3 = vsel %vm891_vm0, %v7535_v35, 0.0 }
 0x1e2   :  { %10984 = vst [vmem:[#allocation19_spill] sm:$0xff] %v7857_v13  ;;  %869 = vmatmul.bf16.gmra.mxu1 %v6033_v5 }
 0x1e6   :  { %v663_v15 = vpop.f32.mrf.mxu0 }
 0x1e7   :  { %v832_v19 = vpop.f32.mrf.mxu1 }
 0x1e8   :  { %v7859_v21 = vadd.f32 %v832_v19, %v663_v15  ;;  %v902_v15 = vadd.f32 %v901_v3, %v900_v9  ;;  %v905_v19 = vsel %vm891_vm0, %v7551_v47, 0.0 }
 0x1ee   :  { %v666_v26 = vpop.f32.mrf.mxu0 }
 0x1ef   :  { %v835_v28 = vpop.f32.mrf.mxu1 }
 0x1f0   :  { %v7861_v31 = vadd.f32 %v835_v28, %v666_v26  ;;  %v904_v26 = vadd.f32 %v903_v10, %v902_v15  ;;  %v907_v28 = vsel %vm891_vm0, %v7565_v56, 0.0  ;;  %v917_v10 = vsel %vm891_vm0, %v7599_v22, 0.0 }
 0x1f2   :  { %10985 = vst [vmem:[#allocation20_spill] sm:$0xff] %v7861_v31 }
 0x1f6   :  { %v668_v34 = vpop.f32.mrf.mxu0 }
 0x1f7   :  { %v837_v38 = vpop.f32.mrf.mxu1 }
 0x1f8   :  { %v7865_v40 = vadd.f32 %v837_v38, %v668_v34  ;;  %v906_v34 = vadd.f32 %v905_v19, %v904_v26  ;;  %v919_v26 = vsel %vm891_vm0, %v7613_v33, 0.0 }
 0x1fa   :  { %v908_v45 = vadd.f32 %v907_v28, %v906_v34  ;;  %v921_v34 = vsel %vm891_vm0, %v7615_v37, 0.0 }
 0x1fc   :  { %v910_v57 = vadd.f32 %v909_v41, %v908_v45 }
 0x1fe   :  { %v671_v63 = vpop.f32.mrf.mxu0  ;;  %v912_v61 = vadd.f32 %v911_v54, %v910_v57  ;;  %v925_v57 = vsel %vm891_vm0, %v7631_v51, 0.0 }
 0x1ff   :  { %v840_v0 = vpop.f32.mrf.mxu1 }
 0x200   :  { %v7877_v5 = vadd.f32 %v840_v0, %v671_v63  ;;  %v915_v63 = vsel %vm891_vm0, %v7597_v18, 0.0  ;;  %v914_v0 = vadd.f32 %v913_v60, %v912_v61  ;;  %v927_v61 = vsel %vm891_vm0, %v7645_v62, 0.0 }
 0x202   :  { %v916_v19 = vadd.f32 %v915_v63, %v914_v0  ;;  %v929_v0 = vsel %vm891_vm0, %v7647_v1, 0.0 }
 0x204   :  { %v918_v28 = vadd.f32 %v917_v10, %v916_v19 }
 0x206   :  { %v673_v38 = vpop.f32.mrf.mxu0 }
 0x207   :  { %v842_v39 = vpop.f32.mrf.mxu1 }
 0x208   :  { %v7887_v43 = vadd.f32 %v842_v39, %v673_v38  ;;  %v920_v38 = vadd.f32 %v919_v26, %v918_v28  ;;  %v923_v39 = vsel %vm891_vm0, %v7629_v48, 0.0  ;;  %v933_v28 = vsel %vm891_vm0, %v7663_v17, 0.0 }
 0x20a   :  { %10986 = vst [vmem:[#allocation21_spill] sm:$0xff] %v7887_v43  ;;  %v922_v41 = vadd.f32 %v921_v34, %v920_v38  ;;  %v935_v38 = vsel %vm891_vm0, %v7677_v30, 0.0 }
 0x20c   :  { %v924_v60 = vadd.f32 %v923_v39, %v922_v41  ;;  %v937_v41 = vsel %vm891_vm0, %v7679_v36, 0.0  ;;  %v949_v36 = vsel %vm891_vm0, %v7727_v27, 0.0 }
 0x20e   :  { %v676_v3 = vpop.f32.mrf.mxu0  ;;  %v926_v63 = vadd.f32 %v925_v57, %v924_v60  ;;  %v939_v60 = vsel %vm891_vm0, %v7693_v49, 0.0 }
 0x20f   :  { %v845_v9 = vpop.f32.mrf.mxu1 }
 0x210   :  { %v7897_v15 = vadd.f32 %v845_v9, %v676_v3  ;;  %v928_v3 = vadd.f32 %v927_v61, %v926_v63  ;;  %v931_v9 = vsel %vm891_vm0, %v7661_v14, 0.0 }
 0x212   :  { %10987 = vst [vmem:[#allocation22_spill] sm:$0xff] %v7897_v15  ;;  %v930_v10 = vadd.f32 %v929_v0, %v928_v3  ;;  %v941_v3 = vsel %vm891_vm0, %v7695_v53, 0.0 }
 0x214   :  { %v932_v34 = vadd.f32 %v931_v9, %v930_v10  ;;  %v943_v10 = vsel %vm891_vm0, %v7709_v2, 0.0 }
 0x216   :  { %v7905_v45 = vpop.f32.mrf.mxu0  ;;  %v934_v39 = vadd.f32 %v933_v28, %v932_v34  ;;  %v945_v34 = vsel %vm891_vm0, %v7711_v6, 0.0 }
 0x217   :  { %v7907_v54 = vpop.f32.mrf.mxu1 }
 0x218   :  { %v936_v57 = vadd.f32 %v935_v38, %v934_v39  ;;  %v947_v39 = vsel %vm891_vm0, %v7725_v24, 0.0 }
 0x21a   :  { %v938_v61 = vadd.f32 %v937_v41, %v936_v57 }
 0x21c   :  { %v940_v9 = vadd.f32 %v939_v60, %v938_v61  ;;  %v951_v60 = vsel %vm891_vm0, %v7741_v42, 0.0 }
 0x21e   :  { %v7917_v19 = vpop.f32.mrf.mxu0  ;;  %v942_v28 = vadd.f32 %v941_v3, %v940_v9  ;;  %v953_v3 = vsel %vm891_vm0, %v7743_v46, 0.0 }
 0x21f   :  { %v7919_v26 = vpop.f32.mrf.mxu1 }
 0x220   :  { %v944_v38 = vadd.f32 %v943_v10, %v942_v28  ;;  %v955_v10 = vsel %vm891_vm0, %v7769_v12, 0.0 }
 0x222   :  { %v946_v41 = vadd.f32 %v945_v34, %v944_v38  ;;  %v957_v38 = vsel %vm891_vm0, %v7771_v16, 0.0 }
 0x224   :  { %v948_v30 = vadd.f32 %v947_v39, %v946_v41  ;;  %v959_v39 = vsel %vm891_vm0, %v7797_v50, 0.0 }
 0x226   :  { %v7929_v63 = vpop.f32.mrf.mxu0  ;;  %v950_v61 = vadd.f32 %v949_v36, %v948_v30  ;;  %v961_v30 = vsel %vm891_vm0, %v7799_v55, 0.0  ;;  %v7955_v36 = vpop.f32.mrf.mxu3  ;;  %v969_v55 = vsel %vm891_vm0, %v7843_v58, 0.0 }
 0x227   :  { %v7931_v0 = vpop.f32.mrf.mxu1 }
 0x228   :  { %v952_v9 = vadd.f32 %v951_v60, %v950_v61  ;;  %v7957_v60 = vpop.f32.mrf.mxu2 }
 0x22a   :  { %v954_v28 = vadd.f32 %v953_v3, %v952_v9  ;;  %v963_v3 = vsel %vm891_vm0, %v7825_v25, 0.0 }
 0x22c   :  { %v956_v6 = vadd.f32 %v955_v10, %v954_v28  ;;  %v965_v10 = vsel %vm891_vm0, %v7827_v29, 0.0 }
 0x22e   :  { %v686_v57 = vpop.f32.mrf.mxu0  ;;  %v958_v41 = vadd.f32 %v957_v38, %v956_v6  ;;  %v967_v6 = vsel %vm891_vm0, %v7841_v52, 0.0 }
 0x22f   :  { %v855_v49 = vpop.f32.mrf.mxu1 }
 0x230   :  { %v960_v61 = vadd.f32 %v959_v39, %v958_v41  ;;  %v971_v39 = vsel %vm891_vm0, %v7857_v13, 0.0  ;;  %v7969_v41 = vpop.f32.mrf.mxu3  ;;  %v979_v13 = vsel %vm891_vm0, %v7877_v5, 0.0 }
 0x232   :  { %v962_v9 = vadd.f32 %v961_v30, %v960_v61  ;;  %v7971_v30 = vpop.f32.mrf.mxu2 }
 0x234   :  { %v964_v28 = vadd.f32 %v963_v3, %v962_v9  ;;  %v973_v3 = vsel %vm891_vm0, %v7859_v21, 0.0 }
 0x236   :  { %v688_v24 = vpop.f32.mrf.mxu0  ;;  %v966_v38 = vadd.f32 %v965_v10, %v964_v28  ;;  %v975_v10 = vsel %vm891_vm0, %v7861_v31, 0.0 }
 0x237   :  { %v857_v34 = vpop.f32.mrf.mxu1 }
 0x238   :  { %v968_v50 = vadd.f32 %v967_v6, %v966_v38  ;;  %v977_v6 = vsel %vm891_vm0, %v7865_v40, 0.0  ;;  %v711_v31 = vpop.f32.mrf.mxu3 }
 0x23a   :  { %v970_v61 = vadd.f32 %v969_v55, %v968_v50  ;;  %v981_v55 = vsel %vm891_vm0, %v7887_v43, 0.0 }
 0x23c   :  { %v972_v9 = vadd.f32 %v971_v39, %v970_v61  ;;  %v7985_v39 = vadd.f32 %v7907_v54, %v7905_v45 }
 0x23e   :  { %v691_v12 = vpop.f32.mrf.mxu0  ;;  %v974_v28 = vadd.f32 %v973_v3, %v972_v9  ;;  %v880_v3 = vpop.f32.mrf.mxu2  ;;  %v983_v9 = vsel %vm891_vm0, %v7897_v15, 0.0 }
 0x23f   :  { %v860_v46 = vpop.f32.mrf.mxu1 }
 0x240   :  { %v976_v38 = vadd.f32 %v975_v10, %v974_v28  ;;  %v7991_v10 = vadd.f32 %v7919_v26, %v7917_v19  ;;  %v8005_v26 = vadd.f32 %v857_v34, %v688_v24 }
 0x242   :  { %v978_v58 = vadd.f32 %v977_v6, %v976_v38  ;;  %v985_v6 = vsel %vm891_vm0, %v7985_v39, 0.0  ;;  %v7997_v38 = vadd.f32 %v7931_v0, %v7929_v63  ;;  %10988 = vst [vmem:[#allocation23_spill] sm:$0xff] %v8005_v26  ;;  %v8009_v63 = vadd.f32 %v860_v46, %v691_v12 }
 0x244   :  { %v980_v61 = vadd.f32 %v979_v13, %v978_v58  ;;  %v987_v58 = vsel %vm891_vm0, %v7991_v10, 0.0  ;;  %v8001_v13 = vadd.f32 %v855_v49, %v686_v57  ;;  %v989_v19 = vsel %vm891_vm0, %v7997_v38, 0.0  ;;  %10989 = vst [vmem:[#allocation24_spill] sm:$0xff] %v8009_v63 }
 0x245   :  { %v993_v49 = vsel %vm891_vm0, %v8005_v26, 0.0 }
 0x246   :  { %v693_v25 = vpop.f32.mrf.mxu0  ;;  %v982_v28 = vadd.f32 %v981_v55, %v980_v61  ;;  %v991_v61 = vsel %vm891_vm0, %v8001_v13, 0.0 }
 0x247   :  { %v862_v16 = vpop.f32.mrf.mxu1 }
 0x248   :  { %v984_v45 = vadd.f32 %v983_v9, %v982_v28  ;;  %v713_v9 = vpop.f32.mrf.mxu3  ;;  %v882_v28 = vpop.f32.mrf.mxu2  ;;  %v8013_v57 = vadd.f32 %v862_v16, %v693_v25 }
 0x24a   :  { %v986_v54 = vadd.f32 %v985_v6, %v984_v45  ;;  %10990 = vst [vmem:[#allocation25_spill] sm:$0xff] %v8013_v57  ;;  %v995_v45 = vsel %vm891_vm0, %v8009_v63, 0.0  ;;  %v997_v46 = vsel %vm891_vm0, %v8013_v57, 0.0  ;;  %v8027_v57 = vadd.f32 %v7957_v60, %v7955_v36 }
 0x24b   :  { %v8040_v36 = vadd.f32 %v882_v28, %v713_v9  ;;  %v7278_v9 = vmov 512.0  }
 0x24c   :  { %v988_v55 = vadd.f32 %v987_v58, %v986_v54  ;;  %7240 = vrcp.f32 %v7278_v9 }
 0x24e   :  { %v696_v52 = vpop.f32.mrf.mxu0  ;;  %v990_v0 = vadd.f32 %v989_v19, %v988_v55 }
 0x24f   :  { %v865_v50 = vpop.f32.mrf.mxu1 }
 0x250   :  { %v992_v6 = vadd.f32 %v991_v61, %v990_v0  ;;  %v8017_v24 = vadd.f32 %v865_v50, %v696_v52  ;;  %v716_v0 = vpop.f32.mrf.mxu3  ;;  %v885_v63 = vpop.f32.mrf.mxu2 }
 0x252   :  { %v994_v34 = vadd.f32 %v993_v49, %v992_v6  ;;  %v999_v55 = vsel %vm891_vm0, %v8017_v24, 0.0 }
 0x254   :  { %v996_v19 = vadd.f32 %v995_v45, %v994_v34  ;;  %v8031_v45 = vadd.f32 %v7971_v30, %v7969_v41  ;;  %v8044_v30 = vadd.f32 %v885_v63, %v716_v0  ;;  %v7241_v63 = vpop.eup %7240 }
 0x255   :  { %vm1030_vm1 = vweird.f32 %v7241_v63 }
 0x256   :  { %v698_v15 = vpop.f32.mrf.mxu0  ;;  %v998_v16 = vadd.f32 %v997_v46, %v996_v19  ;;  %v8036_v46 = vadd.f32 %v880_v3, %v711_v31 }
 0x257   :  { %v867_v43 = vpop.f32.mrf.mxu1 }
 0x258   :  { %v868_v12 = vadd.f32 %v867_v43, %v698_v15  ;;  %v1000_v61 = vadd.f32 %v999_v55, %v998_v16  ;;  %v1009_v55 = vsel %vm891_vm0, %v8031_v45, 0.0  ;;  %v718_v16 = vpop.f32.mrf.mxu3  ;;  %v1011_v41 = vsel %vm891_vm0, %v8036_v46, 0.0 }
 0x25a   :  { %v1001_v25 = vsel %vm891_vm0, %v868_v12, 0.0 }
 0x25b   :  { %v1002_v50 = vadd.f32 %v1001_v25, %v1000_v61  ;;  %v887_v25 = vpop.f32.mrf.mxu2 }
 0x25c   :  { %v8048_v31 = vadd.f32 %v887_v25, %v718_v16 }
 0x25e   :  { %v701_v58 = vpop.f32.mrf.mxu0 }
 0x25f   :  { %v870_v54 = vpop.f32.mrf.mxu1 }
 0x260   :  { %v871_v26 = vadd.f32 %v870_v54, %v701_v58  ;;  %v1007_v54 = vsel %vm891_vm0, %v8027_v57, 0.0 }
 0x262   :  { %v1003_v52 = vsel %vm891_vm0, %v871_v26, 0.0 }
 0x263   :  { %v1004_v15 = vadd.f32 %v1003_v52, %v1002_v50  ;;  %v1013_v52 = vsel %vm891_vm0, %v8040_v36, 0.0  ;;  %v1015_v50 = vsel %vm891_vm0, %v8044_v30, 0.0 }
 0x266   :  { %v703_v49 = vpop.f32.mrf.mxu0 }
 0x267   :  { %v872_v6 = vpop.f32.mrf.mxu1 }
 0x268   :  { %v873_v43 = vadd.f32 %v872_v6, %v703_v49  ;;  %v1017_v49 = vsel %vm891_vm0, %v8048_v31, 0.0 }
 0x26a   :  { %v1005_v34 = vsel %vm891_vm0, %v873_v43, 0.0 }
 0x26b   :  { %v1006_v58 = vadd.f32 %v1005_v34, %v1004_v15  ;;  %v1026_v34 = vmul.f32 512.0, %v7241_v63 }
 0x26d   :  { %v1008_v19 = vadd.f32 %v1007_v54, %v1006_v58  ;;  %v1027_v54 = vsub.f32 1.0, %v1026_v34 }
 0x26f   :  { %v1010_v60 = vadd.f32 %v1009_v55, %v1008_v19  ;;  %v1028_v55 = vmul.f32 %v7241_v63, %v1027_v54 }
 0x271   :  { %v1012_v61 = vadd.f32 %v1011_v41, %v1010_v60  ;;  %v1029_v16 = vadd.f32 %v7241_v63, %v1028_v55 }
 0x273   :  { %v1014_v3 = vadd.f32 %v1013_v52, %v1012_v61  ;;  %v8054_v41 = vsel %vm1030_vm1, %v7241_v63, %v1029_v16 }
 0x275   :  { %v1016_v28 = vadd.f32 %v1015_v50, %v1014_v3 }
 0x277   :  { %v1018_v6 = vadd.f32 %v1017_v49, %v1016_v28 }
 0x279   :  { %v1019_v15 = vrot.slane %v1018_v6, 4 }
 0x27b   :  { %v1020_v0 = vadd.f32 %v1019_v15, %v1018_v6 }
 0x27d   :  { %v1021_v58 = vrot.slane %v1020_v0, 2 }
 0x27f   :  { %v1022_v19 = vadd.f32 %v1021_v58, %v1020_v0 }
 0x281   :  { %v1023_v60 = vrot.slane %v1022_v19, 1 }
 0x283   :  { %v1024_v25 = vadd.f32 %v1023_v60, %v1022_v19 }
 0x285   :  { %v8057_v61 = vmul.f32 %v8054_v41, %v1024_v25 }
 0x287   :  { %v8060_v52 = vsub.f32 %v868_v12, %v8057_v61  ;;  %v8063_v3 = vsub.f32 %v871_v26, %v8057_v61  ;;  %v8066_v50 = vsub.f32 %v873_v43, %v8057_v61  ;;  %v8070_v9 = vsub.f32 %v7501_v8, %v8057_v61 }
 0x288   :  { %v8074_v28 = vsub.f32 %v7503_v11, %v8057_v61  ;;  %v8078_v49 = vsub.f32 %v7517_v20, %v8057_v61  ;;  %v8082_v12 = vsub.f32 %v7519_v23, %v8057_v61  ;;  %v8090_v8 = vsub.f32 %v7533_v32, %v8057_v61 }
 0x289   :  { %v1097_v26 = vmul.f32 %v8070_v9, %v8070_v9  ;;  %v8096_v20 = vsub.f32 %v7535_v35, %v8057_v61  ;;  %v8104_v0 = vsub.f32 %v7549_v44, %v8057_v61  ;;  %v8111_v35 = vsub.f32 %v7551_v47, %v8057_v61 }
 0x28a   :  { %v1098_v43 = vmul.f32 %v8074_v28, %v8074_v28  ;;  %v1099_v11 = vmul.f32 %v8078_v49, %v8078_v49  ;;  %v1100_v23 = vmul.f32 %v8082_v12, %v8082_v12  ;;  %v1101_v32 = vmul.f32 %v8090_v8, %v8090_v8 }
 0x28b   :  { %v1161_v6 = vsel %vm891_vm0, %v1097_v26, 0.0  ;;  %v1102_v54 = vmul.f32 %v8096_v20, %v8096_v20  ;;  %v8118_v44 = vsub.f32 %v7565_v56, %v8057_v61  ;;  %v1103_v60 = vmul.f32 %v8104_v0, %v8104_v0 }
 0x28c   :  { %v1162_v15 = vsel %vm891_vm0, %v1098_v43, 0.0  ;;  %v1164_v34 = vsel %vm891_vm0, %v1099_v11, 0.0  ;;  %v1166_v19 = vsel %vm891_vm0, %v1100_v23, 0.0  ;;  %v1168_v16 = vsel %vm891_vm0, %v1101_v32, 0.0 }
 0x28d   :  { %v1163_v63 = vadd.f32 %v1162_v15, %v1161_v6  ;;  %v8125_v47 = vsub.f32 %v7567_v59, %v8057_v61  ;;  %v1104_v26 = vmul.f32 %v8111_v35, %v8111_v35  ;;  %v1170_v43 = vsel %vm891_vm0, %v1102_v54, 0.0 }
 0x28e   :  { %v8132_v56 = vsub.f32 %v7581_v4, %v8057_v61  ;;  %v1105_v23 = vmul.f32 %v8118_v44, %v8118_v44  ;;  %v1172_v6 = vsel %vm891_vm0, %v1103_v60, 0.0  ;;  %v8139_v59 = vsub.f32 %v7583_v7, %v8057_v61 }
 0x28f   :  { %v1165_v58 = vadd.f32 %v1164_v34, %v1163_v63  ;;  %v1106_v63 = vmul.f32 %v8125_v47, %v8125_v47  ;;  %v1174_v32 = vsel %vm891_vm0, %v1104_v26, 0.0  ;;  %v8146_v4 = vsub.f32 %v7597_v18, %v8057_v61 }
 0x290   :  { %v1176_v54 = vsel %vm891_vm0, %v1105_v23, 0.0  ;;  %v8153_v7 = vsub.f32 %v7599_v22, %v8057_v61  ;;  %v8160_v18 = vsub.f32 %v7613_v33, %v8057_v61  ;;  %v8167_v22 = vsub.f32 %v7615_v37, %v8057_v61 }
 0x291   :  { %v1167_v55 = vadd.f32 %v1166_v19, %v1165_v58  ;;  %v1107_v58 = vmul.f32 %v8132_v56, %v8132_v56  ;;  %v1178_v60 = vsel %vm891_vm0, %v1106_v63, 0.0  ;;  %v8174_v33 = vsub.f32 %v7629_v48, %v8057_v61 }
 0x292   :  { %v8181_v37 = vsub.f32 %v7631_v51, %v8057_v61  ;;  %v8188_v48 = vsub.f32 %v7645_v62, %v8057_v61  ;;  %v8195_v51 = vsub.f32 %v7647_v1, %v8057_v61  ;;  %v8202_v62 = vsub.f32 %v7661_v14, %v8057_v61 }
 0x293   :  { %v1169_v25 = vadd.f32 %v1168_v16, %v1167_v55  ;;  %v1108_v55 = vmul.f32 %v8139_v59, %v8139_v59  ;;  %v1180_v26 = vsel %vm891_vm0, %v1107_v58, 0.0  ;;  %v8209_v1 = vsub.f32 %v7663_v17, %v8057_v61 }
 0x295   :  { %v1171_v11 = vadd.f32 %v1170_v43, %v1169_v25  ;;  %v1109_v25 = vmul.f32 %v8146_v4, %v8146_v4  ;;  %v1182_v23 = vsel %vm891_vm0, %v1108_v55, 0.0 }
 0x297   :  { %v1173_v15 = vadd.f32 %v1172_v6, %v1171_v11  ;;  %v1110_v11 = vmul.f32 %v8153_v7, %v8153_v7  ;;  %v1184_v63 = vsel %vm891_vm0, %v1109_v25, 0.0 }
 0x299   :  { %v1175_v34 = vadd.f32 %v1174_v32, %v1173_v15  ;;  %v1111_v15 = vmul.f32 %v8160_v18, %v8160_v18  ;;  %v1186_v58 = vsel %vm891_vm0, %v1110_v11, 0.0 }
 0x29b   :  { %v1177_v19 = vadd.f32 %v1176_v54, %v1175_v34  ;;  %v1112_v34 = vmul.f32 %v8167_v22, %v8167_v22  ;;  %v1188_v55 = vsel %vm891_vm0, %v1111_v15, 0.0 }
 0x29d   :  { %v1179_v16 = vadd.f32 %v1178_v60, %v1177_v19  ;;  %v1113_v19 = vmul.f32 %v8174_v33, %v8174_v33  ;;  %v1190_v25 = vsel %vm891_vm0, %v1112_v34, 0.0  ;;  %v1117_v34 = vmul.f32 %v8202_v62, %v8202_v62 }
 0x29f   :  { %v1181_v43 = vadd.f32 %v1180_v26, %v1179_v16  ;;  %v1114_v16 = vmul.f32 %v8181_v37, %v8181_v37  ;;  %v1192_v11 = vsel %vm891_vm0, %v1113_v19, 0.0  ;;  %v10992_v19 = vld [vmem:[#allocation7_spill] sm:$0xff] }
 0x2a0   :  { %v8223_v17 = vsub.f32 %v10992_v19, %v8057_v61 }
 0x2a1   :  { %v1183_v6 = vadd.f32 %v1182_v23, %v1181_v43  ;;  %v1115_v43 = vmul.f32 %v8188_v48, %v8188_v48  ;;  %v1194_v15 = vsel %vm891_vm0, %v1114_v16, 0.0 }
 0x2a3   :  { %v1185_v32 = vadd.f32 %v1184_v63, %v1183_v6  ;;  %v1116_v6 = vmul.f32 %v8195_v51, %v8195_v51 }
 0x2a5   :  { %v1187_v54 = vadd.f32 %v1186_v58, %v1185_v32  ;;  %v10991_v32 = vld [vmem:[#allocation6_spill] sm:$0xff]  ;;  %v1196_v58 = vsel %vm891_vm0, %v1115_v43, 0.0  ;;  %v1200_v43 = vsel %vm891_vm0, %v1117_v34, 0.0 }
 0x2a6   :  { %v8216_v14 = vsub.f32 %v10991_v32, %v8057_v61 }
 0x2a7   :  { %v1189_v60 = vadd.f32 %v1188_v55, %v1187_v54  ;;  %v1118_v55 = vmul.f32 %v8209_v1, %v8209_v1 }
 0x2a9   :  { %v1191_v26 = vadd.f32 %v1190_v25, %v1189_v60  ;;  %v1198_v60 = vsel %vm891_vm0, %v1116_v6, 0.0  ;;  %v10993_v25 = vld [vmem:[#allocation8_spill] sm:$0xff]  ;;  %v1202_v6 = vsel %vm891_vm0, %v1118_v55, 0.0 }
 0x2ab   :  { %v1193_v23 = vadd.f32 %v1192_v11, %v1191_v26  ;;  %v8230_v26 = vsub.f32 %v10993_v25, %v8057_v61  ;;  %v1119_v11 = vmul.f32 %v8216_v14, %v8216_v14 }
 0x2ad   :  { %v1195_v63 = vadd.f32 %v1194_v15, %v1193_v23  ;;  %v8237_v15 = vsub.f32 %v7695_v53, %v8057_v61  ;;  %v1204_v34 = vsel %vm891_vm0, %v1119_v11, 0.0 }
 0x2af   :  { %v1197_v54 = vadd.f32 %v1196_v58, %v1195_v63  ;;  %v1120_v63 = vmul.f32 %v8223_v17, %v8223_v17  ;;  %v8244_v58 = vsub.f32 %v7709_v2, %v8057_v61 }
 0x2b1   :  { %v1199_v16 = vadd.f32 %v1198_v60, %v1197_v54  ;;  %v1121_v54 = vmul.f32 %v8230_v26, %v8230_v26  ;;  %v10994_v60 = vld [vmem:[#allocation9_spill] sm:$0xff]  ;;  %v1206_v55 = vsel %vm891_vm0, %v1120_v63, 0.0 }
 0x2b2   :  { %v8251_v53 = vsub.f32 %v10994_v60, %v8057_v61  ;;  %v8272_v60 = vsub.f32 %v7741_v42, %v8057_v61 }
 0x2b3   :  { %v1201_v23 = vadd.f32 %v1200_v43, %v1199_v16  ;;  %v1122_v16 = vmul.f32 %v8237_v15, %v8237_v15  ;;  %v10995_v43 = vld [vmem:[#allocation10_spill] sm:$0xff]  ;;  %v1208_v11 = vsel %vm891_vm0, %v1121_v54, 0.0 }
 0x2b4   :  { %v8258_v2 = vsub.f32 %v10995_v43, %v8057_v61  ;;  %10998 = vst [vmem:[#allocation8_spill] sm:$0xff] %v8272_v60  ;;  %v10999_v43 = vld [vmem:[#allocation11_spill] sm:$0xff] }
 0x2b5   :  { %v1203_v32 = vadd.f32 %v1202_v6, %v1201_v23  ;;  %v1123_v23 = vmul.f32 %v8244_v58, %v8244_v58  ;;  %v1210_v63 = vsel %vm891_vm0, %v1122_v16, 0.0 }
 0x2b6   :  { %10996 = vst [vmem:[#allocation6_spill] sm:$0xff] %v8258_v2 }
 0x2b7   :  { %v1205_v19 = vadd.f32 %v1204_v34, %v1203_v32  ;;  %v8265_v32 = vsub.f32 %v7727_v27, %v8057_v61  ;;  %v1124_v34 = vmul.f32 %v8251_v53, %v8251_v53  ;;  %v1212_v54 = vsel %vm891_vm0, %v1123_v23, 0.0 }
 0x2b8   :  { %v8279_v27 = vsub.f32 %v10999_v43, %v8057_v61 }
 0x2b9   :  { %v1207_v25 = vadd.f32 %v1206_v55, %v1205_v19  ;;  %10997 = vst [vmem:[#allocation7_spill] sm:$0xff] %v8265_v32  ;;  %v1125_v55 = vmul.f32 %v8258_v2, %v8258_v2  ;;  %v1214_v16 = vsel %vm891_vm0, %v1124_v34, 0.0  ;;  %v1127_v2 = vmul.f32 %v8272_v60, %v8272_v60 }
 0x2ba   :  { %11000 = vst [vmem:[#allocation9_spill] sm:$0xff] %v8279_v27 }
 0x2bb   :  { %v1209_v6 = vadd.f32 %v1208_v11, %v1207_v25  ;;  %v1126_v11 = vmul.f32 %v8265_v32, %v8265_v32  ;;  %v1216_v23 = vsel %vm891_vm0, %v1125_v55, 0.0  ;;  %v1128_v32 = vmul.f32 %v8279_v27, %v8279_v27 }
 0x2bc   :  { %v1220_v55 = vsel %vm891_vm0, %v1127_v2, 0.0 }
 0x2bd   :  { %v1211_v19 = vadd.f32 %v1210_v63, %v1209_v6  ;;  %v11001_v63 = vld [vmem:[#allocation12_spill] sm:$0xff]  ;;  %v1218_v34 = vsel %vm891_vm0, %v1126_v11, 0.0  ;;  %v1222_v11 = vsel %vm891_vm0, %v1128_v32, 0.0 }
 0x2be   :  { %v8286_v42 = vsub.f32 %v11001_v63, %v8057_v61 }
 0x2bf   :  { %v1213_v25 = vadd.f32 %v1212_v54, %v1211_v19  ;;  %v11003_v54 = vld [vmem:[#allocation13_spill] sm:$0xff] }
 0x2c0   :  { %11002 = vst [vmem:[#allocation10_spill] sm:$0xff] %v8286_v42  ;;  %v8293_v43 = vsub.f32 %v11003_v54, %v8057_v61  ;;  %v1129_v60 = vmul.f32 %v8286_v42, %v8286_v42 }
 0x2c1   :  { %v1215_v6 = vadd.f32 %v1214_v16, %v1213_v25  ;;  %v11004_v16 = vld [vmem:[#allocation14_spill] sm:$0xff] }
 0x2c2   :  { %v8300_v63 = vsub.f32 %v11004_v16, %v8057_v61  ;;  %v1130_v27 = vmul.f32 %v8293_v43, %v8293_v43  ;;  %v1224_v2 = vsel %vm891_vm0, %v1129_v60, 0.0 }
 0x2c3   :  { %v1217_v19 = vadd.f32 %v1216_v23, %v1215_v6  ;;  %v11006_v23 = vld [vmem:[#allocation15_spill] sm:$0xff] }
 0x2c4   :  { %11005 = vst [vmem:[#allocation11_spill] sm:$0xff] %v8300_v63  ;;  %v8307_v54 = vsub.f32 %v11006_v23, %v8057_v61  ;;  %v1131_v42 = vmul.f32 %v8300_v63, %v8300_v63  ;;  %v1226_v32 = vsel %vm891_vm0, %v1130_v27, 0.0 }
 0x2c5   :  { %v1219_v25 = vadd.f32 %v1218_v34, %v1217_v19  ;;  %v11008_v34 = vld [vmem:[#allocation16_spill] sm:$0xff] }
 0x2c6   :  { %11007 = vst [vmem:[#allocation12_spill] sm:$0xff] %v8307_v54  ;;  %v8314_v16 = vsub.f32 %v11008_v34, %v8057_v61  ;;  %v1132_v23 = vmul.f32 %v8307_v54, %v8307_v54  ;;  %v1228_v60 = vsel %vm891_vm0, %v1131_v42, 0.0 }
 0x2c7   :  { %v1221_v6 = vadd.f32 %v1220_v55, %v1219_v25  ;;  %v8321_v55 = vsub.f32 %v7827_v29, %v8057_v61 }
 0x2c8   :  { %11009 = vst [vmem:[#allocation13_spill] sm:$0xff] %v8314_v16  ;;  %v1133_v63 = vmul.f32 %v8314_v16, %v8314_v16  ;;  %v1230_v27 = vsel %vm891_vm0, %v1132_v23, 0.0 }
 0x2c9   :  { %v1223_v19 = vadd.f32 %v1222_v11, %v1221_v6  ;;  %v11010_v11 = vld [vmem:[#allocation17_spill] sm:$0xff]  ;;  %v1134_v54 = vmul.f32 %v8321_v55, %v8321_v55 }
 0x2ca   :  { %v8328_v34 = vsub.f32 %v11010_v11, %v8057_v61  ;;  %v1232_v42 = vsel %vm891_vm0, %v1133_v63, 0.0 }
 0x2cb   :  { %v1225_v25 = vadd.f32 %v1224_v2, %v1223_v19  ;;  %v11012_v2 = vld [vmem:[#allocation18_spill] sm:$0xff]  ;;  %v1234_v23 = vsel %vm891_vm0, %v1134_v54, 0.0 }
 0x2cc   :  { %11011 = vst [vmem:[#allocation14_spill] sm:$0xff] %v8328_v34  ;;  %v8335_v29 = vsub.f32 %v11012_v2, %v8057_v61  ;;  %v1135_v16 = vmul.f32 %v8328_v34, %v8328_v34 }
 0x2cd   :  { %v1227_v6 = vadd.f32 %v1226_v32, %v1225_v25  ;;  %v11013_v32 = vld [vmem:[#allocation19_spill] sm:$0xff] }
 0x2ce   :  { %v8342_v11 = vsub.f32 %v11013_v32, %v8057_v61  ;;  %v1136_v2 = vmul.f32 %v8335_v29, %v8335_v29  ;;  %v1236_v63 = vsel %vm891_vm0, %v1135_v16, 0.0 }
 0x2cf   :  { %v1229_v19 = vadd.f32 %v1228_v60, %v1227_v6  ;;  %v8349_v60 = vsub.f32 %v7859_v21, %v8057_v61  ;;  %v8363_v21 = vsub.f32 %v7865_v40, %v8057_v61 }
 0x2d0   :  { %v1137_v34 = vmul.f32 %v8342_v11, %v8342_v11  ;;  %v1238_v54 = vsel %vm891_vm0, %v1136_v2, 0.0 }
 0x2d1   :  { %v1231_v25 = vadd.f32 %v1230_v27, %v1229_v19  ;;  %11014 = vst [vmem:[#allocation15_spill] sm:$0xff] %v8349_v60  ;;  %v11015_v27 = vld [vmem:[#allocation20_spill] sm:$0xff] }
 0x2d2   :  { %v8356_v32 = vsub.f32 %v11015_v27, %v8057_v61  ;;  %v1240_v16 = vsel %vm891_vm0, %v1137_v34, 0.0 }
 0x2d3   :  { %v1233_v6 = vadd.f32 %v1232_v42, %v1231_v25  ;;  %v1138_v42 = vmul.f32 %v8349_v60, %v8349_v60  ;;  %v1140_v60 = vmul.f32 %v8363_v21, %v8363_v21 }
 0x2d4   :  { %11016 = vst [vmem:[#allocation16_spill] sm:$0xff] %v8356_v32  ;;  %v1139_v27 = vmul.f32 %v8356_v32, %v8356_v32 }
 0x2d5   :  { %v1235_v19 = vadd.f32 %v1234_v23, %v1233_v6  ;;  %v8370_v23 = vsub.f32 %v7877_v5, %v8057_v61  ;;  %v1242_v2 = vsel %vm891_vm0, %v1138_v42, 0.0  ;;  %v1246_v42 = vsel %vm891_vm0, %v1140_v60, 0.0 }
 0x2d6   :  { %v1244_v34 = vsel %vm891_vm0, %v1139_v27, 0.0 }
 0x2d7   :  { %v1237_v25 = vadd.f32 %v1236_v63, %v1235_v19  ;;  %v11017_v63 = vld [vmem:[#allocation21_spill] sm:$0xff]  ;;  %v1141_v32 = vmul.f32 %v8370_v23, %v8370_v23 }
 0x2d8   :  { %v8377_v40 = vsub.f32 %v11017_v63, %v8057_v61 }
 0x2d9   :  { %v1239_v6 = vadd.f32 %v1238_v54, %v1237_v25  ;;  %v11018_v54 = vld [vmem:[#allocation22_spill] sm:$0xff]  ;;  %v1248_v27 = vsel %vm891_vm0, %v1141_v32, 0.0 }
 0x2da   :  { %v8384_v5 = vsub.f32 %v11018_v54, %v8057_v61  ;;  %v1142_v63 = vmul.f32 %v8377_v40, %v8377_v40 }
 0x2db   :  { %v1241_v19 = vadd.f32 %v1240_v16, %v1239_v6  ;;  %v8391_v16 = vsub.f32 %v7985_v39, %v8057_v61  ;;  %v8405_v39 = vsub.f32 %v7997_v38, %v8057_v61 }
 0x2dc   :  { %v1143_v54 = vmul.f32 %v8384_v5, %v8384_v5  ;;  %v1250_v60 = vsel %vm891_vm0, %v1142_v63, 0.0 }
 0x2dd   :  { %v1243_v25 = vadd.f32 %v1242_v2, %v1241_v19  ;;  %11019 = vst [vmem:[#allocation17_spill] sm:$0xff] %v8391_v16  ;;  %v8398_v2 = vsub.f32 %v7991_v10, %v8057_v61  ;;  %v8412_v10 = vsub.f32 %v8001_v13, %v8057_v61 }
 0x2de   :  { %11021 = vst [vmem:[#allocation19_spill] sm:$0xff] %v8405_v39  ;;  %v1252_v32 = vsel %vm891_vm0, %v1143_v54, 0.0 }
 0x2df   :  { %v1245_v6 = vadd.f32 %v1244_v34, %v1243_v25  ;;  %11020 = vst [vmem:[#allocation18_spill] sm:$0xff] %v8398_v2  ;;  %v1144_v34 = vmul.f32 %v8391_v16, %v8391_v16  ;;  %v1146_v16 = vmul.f32 %v8405_v39, %v8405_v39 }
 0x2e0   :  { %11022 = vst [vmem:[#allocation20_spill] sm:$0xff] %v8412_v10 }
 0x2e1   :  { %v1247_v19 = vadd.f32 %v1246_v42, %v1245_v6  ;;  %v1145_v42 = vmul.f32 %v8398_v2, %v8398_v2  ;;  %v1254_v63 = vsel %vm891_vm0, %v1144_v34, 0.0  ;;  %v1147_v2 = vmul.f32 %v8412_v10, %v8412_v10 }
 0x2e2   :  { %v1258_v34 = vsel %vm891_vm0, %v1146_v16, 0.0 }
 0x2e3   :  { %v1249_v25 = vadd.f32 %v1248_v27, %v1247_v19  ;;  %v11023_v27 = vld [vmem:[#allocation23_spill] sm:$0xff]  ;;  %v1256_v54 = vsel %vm891_vm0, %v1145_v42, 0.0  ;;  %v1260_v42 = vsel %vm891_vm0, %v1147_v2, 0.0  ;;  %v8456_v2 = vsub.f32 %v8027_v57, %v8057_v61 }
 0x2e4   :  { %v8419_v38 = vsub.f32 %v11023_v27, %v8057_v61  ;;  %v8470_v57 = vsub.f32 %v8036_v46, %v8057_v61  ;;  %v8484_v46 = vsub.f32 %v8044_v30, %v8057_v61 }
 0x2e5   :  { %v1251_v6 = vadd.f32 %v1250_v60, %v1249_v25  ;;  %v11025_v60 = vld [vmem:[#allocation24_spill] sm:$0xff] }
 0x2e6   :  { %11024 = vst [vmem:[#allocation21_spill] sm:$0xff] %v8419_v38  ;;  %v8426_v13 = vsub.f32 %v11025_v60, %v8057_v61  ;;  %v1148_v39 = vmul.f32 %v8419_v38, %v8419_v38 }
 0x2e7   :  { %v1253_v19 = vadd.f32 %v1252_v32, %v1251_v6  ;;  %v11027_v32 = vld [vmem:[#allocation25_spill] sm:$0xff]  ;;  %11029 = vst [vmem:[#allocation24_spill] sm:$0xff] %v8470_v57 }
 0x2e8   :  { %11026 = vst [vmem:[#allocation22_spill] sm:$0xff] %v8426_v13  ;;  %v8433_v27 = vsub.f32 %v11027_v32, %v8057_v61  ;;  %v1149_v60 = vmul.f32 %v8426_v13, %v8426_v13  ;;  %v1262_v32 = vsel %vm891_vm0, %v1148_v39, 0.0  ;;  %v1153_v39 = vmul.f32 %v8063_v3, %v8063_v3 }
 0x2e9   :  { %v1255_v25 = vadd.f32 %v1254_v63, %v1253_v19  ;;  %v8440_v63 = vsub.f32 %v8017_v24, %v8057_v61  ;;  %v1152_v24 = vmul.f32 %v8060_v52, %v8060_v52  ;;  %11031 = vst [vmem:[#allocation26_spill] sm:$0xff] %v8484_v46 }
 0x2eb   :  { %v1257_v6 = vadd.f32 %v1256_v54, %v1255_v25  ;;  %v1150_v54 = vmul.f32 %v8433_v27, %v8433_v27  ;;  %v1151_v16 = vmul.f32 %v8440_v63, %v8440_v63 }
 0x2ed   :  { %v1259_v19 = vadd.f32 %v1258_v34, %v1257_v6  ;;  %v1264_v6 = vsel %vm891_vm0, %v1149_v60, 0.0  ;;  %v1266_v13 = vsel %vm891_vm0, %v1150_v54, 0.0  ;;  %v8463_v60 = vsub.f32 %v8031_v45, %v8057_v61 }
 0x2ee   :  { %v1155_v54 = vmul.f32 %v8456_v2, %v8456_v2  ;;  %v8477_v45 = vsub.f32 %v8040_v36, %v8057_v61  ;;  %v1096_v36 = vsub.f32 %v8048_v31, %v8057_v61 }
 0x2ef   :  { %v1261_v25 = vadd.f32 %v1260_v42, %v1259_v19  ;;  %v1268_v19 = vsel %vm891_vm0, %v1151_v16, 0.0  ;;  %11028 = vst [vmem:[#allocation23_spill] sm:$0xff] %v8463_v60  ;;  %v1156_v16 = vmul.f32 %v8463_v60, %v8463_v60 }
 0x2f0   :  { %11030 = vst [vmem:[#allocation25_spill] sm:$0xff] %v8477_v45 }
 0x2f1   :  { %v1263_v10 = vadd.f32 %v1262_v32, %v1261_v25  ;;  %v1270_v25 = vsel %vm891_vm0, %v1152_v24, 0.0  ;;  %v1272_v32 = vsel %vm891_vm0, %v1153_v39, 0.0  ;;  %v1157_v24 = vmul.f32 %v8470_v57, %v8470_v57 }
 0x2f2   :  { %v1276_v39 = vsel %vm891_vm0, %v1155_v54, 0.0 }
 0x2f3   :  { %v1265_v34 = vadd.f32 %v1264_v6, %v1263_v10  ;;  %v1154_v10 = vmul.f32 %v8066_v50, %v8066_v50  ;;  %v1280_v30 = vsel %vm891_vm0, %v1157_v24, 0.0 }
 0x2f5   :  { %v1267_v38 = vadd.f32 %v1266_v13, %v1265_v34  ;;  %v1274_v6 = vsel %vm891_vm0, %v1154_v10, 0.0 }
 0x2f7   :  { %v1269_v42 = vadd.f32 %v1268_v19, %v1267_v38 }
 0x2f9   :  { %v1271_v13 = vadd.f32 %v1270_v25, %v1269_v42  ;;  %v1158_v42 = vmul.f32 %v8477_v45, %v8477_v45  ;;  %v1278_v25 = vsel %vm891_vm0, %v1156_v16, 0.0 }
 0x2fb   :  { %v1273_v38 = vadd.f32 %v1272_v32, %v1271_v13  ;;  %v1159_v13 = vmul.f32 %v8484_v46, %v8484_v46 }
 0x2fd   :  { %v1275_v34 = vadd.f32 %v1274_v6, %v1273_v38  ;;  %v1160_v38 = vmul.f32 %v1096_v36, %v1096_v36  ;;  %v1282_v6 = vsel %vm891_vm0, %v1158_v42, 0.0 }
 0x2ff   :  { %v1277_v19 = vadd.f32 %v1276_v39, %v1275_v34  ;;  %v1284_v34 = vsel %vm891_vm0, %v1159_v13, 0.0  ;;  %v1286_v31 = vsel %vm891_vm0, %v1160_v38, 0.0  ;;  %v890_v13 = vld [vmem:[%s10916_s2] sm:$0x3]  ;;  %s7279_s2 = smov 64  }
 0x301   :  { %v1279_v10 = vadd.f32 %v1278_v25, %v1277_v19 }
 0x303   :  { %v1281_v32 = vadd.f32 %v1280_v30, %v1279_v10 }
 0x305   :  { %v1283_v54 = vadd.f32 %v1282_v6, %v1281_v32 }
 0x307   :  { %v1285_v39 = vadd.f32 %v1284_v34, %v1283_v54 }
 0x309   :  { %v1287_v61 = vadd.f32 %v1286_v31, %v1285_v39 }
 0x30b   :  { %v1288_v45 = vrot.slane %v1287_v61, 4 }
 0x30d   :  { %v1289_v57 = vadd.f32 %v1288_v45, %v1287_v61  ;;  %v8504_v45 = vperm.slane %v890_v13, 0 }
 0x30f   :  { %v1290_v16 = vrot.slane %v1289_v57, 2 }
 0x311   :  { %v1291_v19 = vadd.f32 %v1290_v16, %v1289_v57 }
 0x313   :  { %v1292_v25 = vrot.slane %v1291_v19, 1 }
 0x315   :  { %v1293_v60 = vadd.f32 %v1292_v25, %v1291_v19 }
 0x317   :  { %v1294_v46 = vmul.f32 %v1293_v60, %v8054_v41  ;;  %v8508_v41 = vperm.slane %v890_v13, 1 }
 0x319   :  { %v1295_v24 = vadd.f32 1e-05, %v1294_v46 }
 0x31b   :  { %7242 = vrsqrt.f32 %v1295_v24  ;;  %vm1302_vm3 = vweird.f32 %v1295_v24 }
 0x321   :  { %v7243_v10 = vpop.eup %7242 }
 0x322   :  { %v1297_v30 = vmul.f32 %v7243_v10, %v1295_v24  ;;  %vm1303_vm2 = vweird.f32 %v7243_v10 }
 0x323   :  { %vm1304_vm4 = vmor %vm1302_vm3, %vm1303_vm2 }
 0x324   :  { %v1298_v42 = vmul.f32 %v7243_v10, %v1297_v30  ;;  %v11036_v30 = vld [vmem:[#allocation10_spill] sm:$0xff] }
 0x326   :  { %v1299_v32 = vmul.f32 0.5, %v1298_v42 }
 0x328   :  { %v1300_v38 = vsub.f32 1.5, %v1299_v32  ;;  %v11037_v32 = vld [vmem:[#allocation11_spill] sm:$0xff] }
 0x32a   :  { %v1301_v6 = vmul.f32 %v7243_v10, %v1300_v38  ;;  %v11038_v38 = vld [vmem:[#allocation12_spill] sm:$0xff] }
 0x32c   :  { %v8506_v57 = vsel %vm1304_vm4, %v7243_v10, %v1301_v6 }
 0x32d   :  { %v1369_v60 = vmul.f32 %v8506_v57, %v1096_v36  ;;  %v8513_v46 = vmul.f32 %v8506_v57, %v8070_v9  ;;  %v1307_v54 = vmul.f32 %v8506_v57, %v8074_v28  ;;  %v8520_v39 = vmul.f32 %v8506_v57, %v8078_v49 }
 0x32e   :  { %v8524_v31 = vmul.f32 %v8506_v57, %v8082_v12  ;;  %v8528_v36 = vmul.f32 %v8506_v57, %v8090_v8  ;;  %v8532_v9 = vmul.f32 %v8506_v57, %v8096_v20  ;;  %v8536_v28 = vmul.f32 %v8506_v57, %v8104_v0 }
 0x32f   :  { %v1434_v34 = vmul.f32 %v8504_v45, %v1369_v60  ;;  %v8540_v49 = vmul.f32 %v8506_v57, %v8111_v35  ;;  %v8544_v12 = vmul.f32 %v8506_v57, %v8118_v44  ;;  %v1315_v8 = vmul.f32 %v8506_v57, %v8125_v47  ;;  %v11039_v60 = vld [vmem:[#allocation13_spill] sm:$0xff] }
 0x330   :  { %v8551_v20 = vmul.f32 %v8506_v57, %v8132_v56  ;;  %v8555_v0 = vmul.f32 %v8506_v57, %v8139_v59  ;;  %v8559_v35 = vmul.f32 %v8506_v57, %v8146_v4  ;;  %v8563_v44 = vmul.f32 %v8506_v57, %v8153_v7 }
 0x331   :  { %v1499_v61 = vadd.f32 %v8508_v41, %v1434_v34  ;;  %v8567_v16 = vmul.f32 %v8506_v57, %v8160_v18  ;;  %v8571_v47 = vmul.f32 %v8506_v57, %v8167_v22  ;;  %v8575_v59 = vmul.f32 %v8506_v57, %v8174_v33 }
 0x332   :  { %v1323_v4 = vmul.f32 %v8506_v57, %v8181_v37  ;;  %v8581_v7 = vmul.f32 %v8506_v57, %v8188_v48  ;;  %v8585_v18 = vmul.f32 %v8506_v57, %v8195_v51  ;;  %v8589_v22 = vmul.f32 %v8506_v57, %v8202_v62 }
 0x333   :  { %v1563_v56 = vmax.f32 %v1499_v61, 0.0  ;;  %v8593_v19 = vmul.f32 %v8506_v57, %v8209_v1  ;;  %v8597_v33 = vmul.f32 %v8506_v57, %v8216_v14  ;;  %v8602_v37 = vmul.f32 %v8506_v57, %v8223_v17  ;;  %v11032_v14 = vld [vmem:[#allocation6_spill] sm:$0xff]  ;;  %v11033_v17 = vld [vmem:[#allocation7_spill] sm:$0xff] }
 0x334   :  { %v8606_v48 = vmul.f32 %v8506_v57, %v8230_v26  ;;  %v1331_v51 = vmul.f32 %v8506_v57, %v8237_v15  ;;  %v8612_v62 = vmul.f32 %v8506_v57, %v8244_v58  ;;  %v8616_v1 = vmul.f32 %v8506_v57, %v8251_v53  ;;  %v11034_v26 = vld [vmem:[#allocation8_spill] sm:$0xff]  ;;  %v11035_v15 = vld [vmem:[#allocation9_spill] sm:$0xff] }
 0x335   :  { %1627 = vst.msk [vmem:[#allocation2 + $0x1f8] sm:$0xff] %vm891_vm0, %v1563_v56  ;;  %v8620_v25 = vmul.f32 %v8506_v57, %v11032_v14  ;;  %v8624_v24 = vmul.f32 %v8506_v57, %v11033_v17  ;;  %v8628_v10 = vmul.f32 %v8506_v57, %v11034_v26  ;;  %v8632_v58 = vmul.f32 %v8506_v57, %v11035_v15  ;;  %v11040_v56 = vld [vmem:[#allocation14_spill] sm:$0xff]  ;;  %v11041_v26 = vld [vmem:[#allocation15_spill] sm:$0xff] }
 0x336   :  { %v8636_v53 = vmul.f32 %v8506_v57, %v11036_v30  ;;  %v1339_v42 = vmul.f32 %v8506_v57, %v8293_v43  ;;  %v8642_v13 = vmul.f32 %v8506_v57, %v11037_v32  ;;  %v8646_v6 = vmul.f32 %v8506_v57, %v11038_v38  ;;  %v11042_v30 = vld [vmem:[#allocation16_spill] sm:$0xff] }
 0x337   :  { %v8650_v34 = vmul.f32 %v8506_v57, %v11039_v60  ;;  %v8654_v61 = vmul.f32 %v8506_v57, %v8321_v55  ;;  %v8658_v14 = vmul.f32 %v8506_v57, %v11040_v56  ;;  %v8662_v43 = vmul.f32 %v8506_v57, %v8335_v29  ;;  %v11047_v60 = vld [vmem:[#allocation17_spill] sm:$0xff] }
 0x338   :  { %v8666_v17 = vmul.f32 %v8506_v57, %v8342_v11  ;;  %v1347_v15 = vmul.f32 %v8506_v57, %v11041_v26  ;;  %v8672_v32 = vmul.f32 %v8506_v57, %v11042_v30  ;;  %v8676_v55 = vmul.f32 %v8506_v57, %v8363_v21  ;;  %v11048_v26 = vld [vmem:[#allocation18_spill] sm:$0xff]  ;;  %v11049_v30 = vld [vmem:[#allocation19_spill] sm:$0xff] }
 0x339   :  { %v8680_v38 = vmul.f32 %v8506_v57, %v8370_v23  ;;  %v8684_v29 = vmul.f32 %v8506_v57, %v8377_v40  ;;  %v8688_v11 = vmul.f32 %v8506_v57, %v8384_v5  ;;  %v8692_v56 = vmul.f32 %v8506_v57, %v11047_v60  ;;  %v11052_v40 = vld [vmem:[#allocation21_spill] sm:$0xff]  ;;  %v11053_v5 = vld [vmem:[#allocation22_spill] sm:$0xff] }
 0x33a   :  { %11043 = vst [vmem:[#allocation6_spill] sm:$0xff] %v8672_v32  ;;  %v8696_v21 = vmul.f32 %v8506_v57, %v11048_v26  ;;  %v1355_v23 = vmul.f32 %v8506_v57, %v11049_v30  ;;  %v11050_v32 = vld [vmem:[#allocation20_spill] sm:$0xff]  ;;  %v8714_v60 = vmul.f32 %v8506_v57, %v8433_v27  ;;  %v1363_v26 = vmul.f32 %v8506_v57, %v8066_v50 }
 0x33b   :  { %11044 = vst [vmem:[#allocation7_spill] sm:$0xff] %v8680_v38  ;;  %v8702_v38 = vmul.f32 %v8506_v57, %v11050_v32  ;;  %v8720_v30 = vmul.f32 %v8506_v57, %v8440_v63  ;;  %v8724_v32 = vmul.f32 %v8506_v57, %v8060_v52  ;;  %v1380_v27 = vmul.f32 %v8504_v45, %v1315_v8 }
 0x33c   :  { %11045 = vst [vmem:[#allocation8_spill] sm:$0xff] %v8684_v29  ;;  %v8706_v29 = vmul.f32 %v8506_v57, %v11052_v40  ;;  %v8728_v40 = vmul.f32 %v8506_v57, %v8063_v3  ;;  %v1396_v50 = vmul.f32 %v8504_v45, %v1331_v51  ;;  %v1412_v63 = vmul.f32 %v8504_v45, %v1347_v15 }
 0x33d   :  { %11046 = vst [vmem:[#allocation9_spill] sm:$0xff] %v8688_v11  ;;  %v8710_v11 = vmul.f32 %v8506_v57, %v11053_v5  ;;  %v1372_v5 = vmul.f32 %v8504_v45, %v1307_v54  ;;  %v1428_v52 = vmul.f32 %v8504_v45, %v1363_v26  ;;  %v1445_v3 = vadd.f32 %v8508_v41, %v1380_v27 }
 0x33e   :  { %11051 = vst [vmem:[#allocation10_spill] sm:$0xff] %v8702_v38  ;;  %v1388_v38 = vmul.f32 %v8504_v45, %v1323_v4  ;;  %v1461_v8 = vadd.f32 %v8508_v41, %v1396_v50  ;;  %v1477_v51 = vadd.f32 %v8508_v41, %v1412_v63  ;;  %v11060_v50 = vld [vmem:[#allocation24_spill] sm:$0xff]  ;;  %v11061_v63 = vld [vmem:[#allocation25_spill] sm:$0xff] }
 0x33f   :  { %11054 = vst [vmem:[#allocation11_spill] sm:$0xff] %v8710_v11  ;;  %v1493_v15 = vadd.f32 %v8508_v41, %v1428_v52  ;;  %v1509_v26 = vmax.f32 %v1445_v3, 0.0  ;;  %v11059_v11 = vld [vmem:[#allocation23_spill] sm:$0xff] }
 0x340   :  { %11055 = vst [vmem:[#allocation12_spill] sm:$0xff] %v8714_v60  ;;  %v1404_v60 = vmul.f32 %v8504_v45, %v1339_v42  ;;  %v1453_v54 = vadd.f32 %v8508_v41, %v1388_v38  ;;  %v1525_v27 = vmax.f32 %v1461_v8, 0.0  ;;  %v8752_v38 = vmul.f32 %v8506_v57, %v11059_v11 }
 0x341   :  { %11056 = vst [vmem:[#allocation13_spill] sm:$0xff] %v8720_v30  ;;  %v1420_v30 = vmul.f32 %v8504_v45, %v1355_v23  ;;  %v8748_v23 = vmul.f32 %v8506_v57, %v8456_v2  ;;  %v11062_v2 = vld [vmem:[#allocation26_spill] sm:$0xff]  ;;  %v1541_v3 = vmax.f32 %v1477_v51, 0.0  ;;  %v1557_v8 = vmax.f32 %v1493_v15, 0.0 }
 0x342   :  { %11057 = vst [vmem:[#allocation14_spill] sm:$0xff] %v8724_v32  ;;  %v1437_v32 = vadd.f32 %v8508_v41, %v1372_v5  ;;  %v1469_v4 = vadd.f32 %v8508_v41, %v1404_v60  ;;  %v1517_v5 = vmax.f32 %v1453_v54, 0.0  ;;  %v8756_v60 = vmul.f32 %v8506_v57, %v11060_v50 }
 0x343   :  { %11058 = vst [vmem:[#allocation15_spill] sm:$0xff] %v8728_v40  ;;  %v1485_v42 = vadd.f32 %v8508_v41, %v1420_v30  ;;  %v8760_v30 = vmul.f32 %v8506_v57, %v11061_v63  ;;  %v8765_v52 = vmul.f32 %v8506_v57, %v11062_v2  ;;  %v8771_v11 = vmul.f32 %v8504_v45, %v8513_v46 }
 0x344   :  { %v1501_v40 = vmax.f32 %v1437_v32, 0.0  ;;  %v1533_v32 = vmax.f32 %v1469_v4, 0.0  ;;  %1573 = vst.msk [vmem:[#allocation2 + $0x48] sm:$0xff] %vm891_vm0, %v1509_v26  ;;  %v8776_v57 = vmul.f32 %v8504_v45, %v8524_v31  ;;  %v8784_v4 = vmul.f32 %v8504_v45, %v8532_v9 }
 0x345   :  { %v1549_v54 = vmax.f32 %v1485_v42, 0.0  ;;  %1581 = vst.msk [vmem:[#allocation2 + $0x88] sm:$0xff] %vm891_vm0, %v1517_v5  ;;  %v8788_v51 = vmul.f32 %v8504_v45, %v8536_v28  ;;  %v8793_v46 = vmul.f32 %v8504_v45, %v8520_v39  ;;  %v8797_v31 = vmul.f32 %v8504_v45, %v8540_v49 }
 0x346   :  { %1565 = vst.msk [vmem:[#allocation2 + $0x8] sm:$0xff] %vm891_vm0, %v1501_v40  ;;  %v8780_v40 = vmul.f32 %v8504_v45, %v8528_v36  ;;  %v8801_v36 = vmul.f32 %v8504_v45, %v8544_v12  ;;  %v8805_v9 = vmul.f32 %v8504_v45, %v8555_v0  ;;  %v8810_v28 = vmul.f32 %v8504_v45, %v8559_v35 }
 0x347   :  { %1589 = vst.msk [vmem:[#allocation2 + $0xc8] sm:$0xff] %vm891_vm0, %v1525_v27  ;;  %v8814_v39 = vmul.f32 %v8504_v45, %v8563_v44  ;;  %v8818_v49 = vmul.f32 %v8504_v45, %v8567_v16  ;;  %v8822_v12 = vmul.f32 %v8504_v45, %v8571_v47  ;;  %v8827_v0 = vmul.f32 %v8504_v45, %v8551_v20 }
 0x348   :  { %1597 = vst.msk [vmem:[#allocation2 + $0x108] sm:$0xff] %vm891_vm0, %v1533_v32  ;;  %v8831_v35 = vmul.f32 %v8504_v45, %v8575_v59  ;;  %v8835_v44 = vmul.f32 %v8504_v45, %v8585_v18  ;;  %v8839_v16 = vmul.f32 %v8504_v45, %v8589_v22  ;;  %v8844_v47 = vmul.f32 %v8504_v45, %v8581_v7 }
 0x349   :  { %1605 = vst.msk [vmem:[#allocation2 + $0x148] sm:$0xff] %vm891_vm0, %v1541_v3  ;;  %v8848_v20 = vmul.f32 %v8504_v45, %v8593_v19  ;;  %v8852_v59 = vmul.f32 %v8504_v45, %v8597_v33  ;;  %v8856_v18 = vmul.f32 %v8504_v45, %v8602_v37  ;;  %v8860_v7 = vmul.f32 %v8504_v45, %v8606_v48 }
 0x34a   :  { %1613 = vst.msk [vmem:[#allocation2 + $0x188] sm:$0xff] %vm891_vm0, %v1549_v54  ;;  %v8864_v19 = vmul.f32 %v8504_v45, %v8616_v1  ;;  %v8868_v33 = vmul.f32 %v8504_v45, %v8620_v25  ;;  %v8872_v37 = vmul.f32 %v8504_v45, %v8624_v24  ;;  %v8876_v48 = vmul.f32 %v8504_v45, %v8628_v10 }
 0x34b   :  { %1621 = vst.msk [vmem:[#allocation2 + $0x1c8] sm:$0xff] %vm891_vm0, %v1557_v8  ;;  %v1678_v42 = vld [vmem:[#allocation2 + $0x4a] sm:$0x1]  ;;  %v2189_v26 = vld [vmem:[#allocation2 + $0x4c] sm:$0x1]  ;;  %v8880_v1 = vmul.f32 %v8504_v45, %v8632_v58  ;;  %v8884_v24 = vmul.f32 %v8504_v45, %v8612_v62  ;;  %v8888_v54 = vmul.f32 %v8504_v45, %v8636_v53 }
 0x34c   :  { %11063 = vst [vmem:[#allocation16_spill] sm:$0xff] %v8852_v59  ;;  %v1679_v5 = vld [vmem:[#allocation2 + $0x8a] sm:$0x1]  ;;  %v1920_v27 = vrot.slane %v1678_v42, 7  ;;  %v2190_v50 = vld [vmem:[#allocation2 + $0x8c] sm:$0x1] }
 0x34d   :  { %11064 = vst [vmem:[#allocation17_spill] sm:$0xff] %v8856_v18  ;;  %v1677_v22 = vld [vmem:[#allocation2 + $0xa] sm:$0x1]  ;;  %v2188_v15 = vld [vmem:[#allocation2 + $0xc] sm:$0x1]  ;;  %v2302_v63 = vrot.slane %v2189_v26, 7 }
 0x34e   :  { %11065 = vst [vmem:[#allocation18_spill] sm:$0xff] %v8864_v19  ;;  %v1680_v32 = vld [vmem:[#allocation2 + $0xca] sm:$0x1]  ;;  %v1922_v2 = vrot.slane %v1679_v5, 6  ;;  %v2191_v25 = vld [vmem:[#allocation2 + $0xcc] sm:$0x1]  ;;  %v1921_v10 = vsel %vm1768_vm5, %v1920_v27, %v1677_v22 }
 0x34f   :  { %11066 = vst [vmem:[#allocation19_spill] sm:$0xff] %v8868_v33  ;;  %v2304_v3 = vrot.slane %v2190_v50, 6  ;;  %v1681_v8 = vld [vmem:[#allocation2 + $0x10a] sm:$0x1]  ;;  %v1924_v42 = vrot.slane %v1680_v32, 5  ;;  %v2303_v58 = vsel %vm1768_vm5, %v2302_v63, %v2188_v15 }
 0x350   :  { %11067 = vst [vmem:[#allocation20_spill] sm:$0xff] %v8872_v37  ;;  %v2192_v26 = vld [vmem:[#allocation2 + $0x10c] sm:$0x1]  ;;  %v1923_v5 = vsel %vm1771_vm6, %v1922_v2, %v1921_v10  ;;  %v1926_v50 = vrot.slane %v1681_v8, 4 }
 0x351   :  { %11068 = vst [vmem:[#allocation21_spill] sm:$0xff] %v8876_v48  ;;  %v1682_v48 = vld [vmem:[#allocation2 + $0x14a] sm:$0x1]  ;;  %v2193_v37 = vld [vmem:[#allocation2 + $0x14c] sm:$0x1]  ;;  %v2305_v62 = vsel %vm1771_vm6, %v2304_v3, %v2303_v58  ;;  %v2308_v33 = vrot.slane %v2192_v26, 4  ;;  %v1925_v53 = vsel %vm1774_vm7, %v1924_v42, %v1923_v5  ;;  %v8930_v5 = vmul.f32 %v8504_v45, %v8662_v43 }
 0x352   :  { %11069 = vst [vmem:[#allocation22_spill] sm:$0xff] %v8880_v1  ;;  %v2306_v1 = vrot.slane %v2191_v25, 5  ;;  %v1683_v19 = vld [vmem:[#allocation2 + $0x18a] sm:$0x1]  ;;  %v1928_v18 = vrot.slane %v1682_v48, 3  ;;  %v2310_v27 = vrot.slane %v2193_v37, 3  ;;  %v1927_v15 = vsel %vm1777_vm8, %v1926_v50, %v1925_v53 }
 0x353   :  { %v2194_v59 = vld [vmem:[#allocation2 + $0x18c] sm:$0x1]  ;;  %v1684_v32 = vld [vmem:[#allocation2 + $0x1ca] sm:$0x1]  ;;  %v1930_v63 = vrot.slane %v1683_v19, 2  ;;  %v8904_v37 = vmul.f32 %v8504_v45, %v8646_v6  ;;  %v8908_v19 = vmul.f32 %v8504_v45, %v8650_v34  ;;  %v1405_v34 = vmul.f32 %v8504_v45, %v8642_v13  ;;  %v11073_v53 = vld [vmem:[#allocation8_spill] sm:$0xff] }
 0x354   :  { %v2307_v22 = vsel %vm1774_vm7, %v2306_v1, %v2305_v62  ;;  %v2195_v25 = vld [vmem:[#allocation2 + $0x1cc] sm:$0x1]  ;;  %v2312_v8 = vrot.slane %v2194_v59, 2  ;;  %v1929_v10 = vsel %vm1780_vm9, %v1928_v18, %v1927_v15  ;;  %v1932_v3 = vrot.slane %v1684_v32, 1  ;;  %v11072_v62 = vld [vmem:[#allocation7_spill] sm:$0xff]  ;;  %v11074_v13 = vld [vmem:[#allocation9_spill] sm:$0xff] }
 0x355   :  { %v2309_v2 = vsel %vm1777_vm8, %v2308_v33, %v2307_v22  ;;  %v2314_v58 = vrot.slane %v2195_v25, 1  ;;  %v1931_v48 = vsel %vm1783_vm10, %v1930_v63, %v1929_v10  ;;  %v8918_v33 = vmul.f32 %v8504_v45, %v8654_v61  ;;  %v11075_v43 = vld [vmem:[#allocation6_spill] sm:$0xff]  ;;  %v11076_v63 = vld [vmem:[#allocation11_spill] sm:$0xff]  ;;  %v11078_v10 = vld [vmem:[#allocation13_spill] sm:$0xff] }
 0x356   :  { %v2311_v26 = vsel %vm1780_vm9, %v2310_v27, %v2309_v2  ;;  %v8911_v59 = vsel %vm1786_vm11, %v1932_v3, %v1931_v48  ;;  %v8922_v1 = vmul.f32 %v8504_v45, %v8658_v14  ;;  %v1411_v50 = vmul.f32 %v8504_v45, %v8666_v17  ;;  %v11077_v2 = vld [vmem:[#allocation12_spill] sm:$0xff] }
 0x357   :  { %v2313_v42 = vsel %vm1783_vm10, %v2312_v8, %v2311_v26  ;;  %11070 = vst [vmem:[#allocation23_spill] sm:$0xff] %v8911_v59  ;;  %v8936_v61 = vmul.f32 %v8504_v45, %v8676_v55  ;;  %v8940_v14 = vmul.f32 %v8504_v45, %v11072_v62  ;;  %v8944_v22 = vmul.f32 %v8504_v45, %v11073_v53 }
 0x358   :  { %v8914_v18 = vsel %vm1786_vm11, %v2314_v58, %v2313_v42  ;;  %v8948_v27 = vmul.f32 %v8504_v45, %v11074_v13  ;;  %v1413_v17 = vmul.f32 %v8504_v45, %v11075_v43  ;;  %v8955_v55 = vmul.f32 %v8504_v45, %v8692_v56  ;;  %v11079_v56 = vld [vmem:[#allocation14_spill] sm:$0xff]  ;;  %v11081_v58 = vld [vmem:[#allocation15_spill] sm:$0xff] }
 0x359   :  { %11071 = vst [vmem:[#allocation24_spill] sm:$0xff] %v8914_v18  ;;  %v7074_v6 = vpack.i.bf16 %v8914_v18, %v8911_v59  ;;  %v1419_v32 = vmul.f32 %v8504_v45, %v8696_v21  ;;  %v8961_v15 = vmul.f32 %v8504_v45, %v8706_v29  ;;  %v8965_v25 = vmul.f32 %v8504_v45, %v11076_v63  ;;  %v11080_v21 = vld [vmem:[#allocation10_spill] sm:$0xff] }
 0x35a   :  { %v8969_v8 = vmul.f32 %v8504_v45, %v11077_v2  ;;  %v8973_v3 = vmul.f32 %v8504_v45, %v11078_v10  ;;  %v8977_v26 = vmul.f32 %v8504_v45, %v11079_v56  ;;  %v1421_v29 = vmul.f32 %v8504_v45, %v11080_v21 }
 0x35b   :  { %7075 = vrot.lane.b32.xlu2 %v7074_v6, %s7279_s2  ;;  %v1427_v48 = vmul.f32 %v8504_v45, %v11081_v58  ;;  %v8985_v42 = vmul.f32 %v8504_v45, %v8752_v38  ;;  %v8989_v6 = vmul.f32 %v8504_v45, %v8756_v60  ;;  %v8993_v62 = vmul.f32 %v8504_v45, %v8760_v30 }
 0x35c   :  { %v8997_v53 = vmul.f32 %v8504_v45, %v8765_v52  ;;  %v1436_v13 = vadd.f32 %v8508_v41, %v8771_v11  ;;  %v1438_v43 = vadd.f32 %v8508_v41, %v8793_v46  ;;  %v1429_v38 = vmul.f32 %v8504_v45, %v8748_v23 }
 0x35d   :  { %v1444_v60 = vadd.f32 %v8508_v41, %v8801_v36  ;;  %v1446_v30 = vadd.f32 %v8508_v41, %v8827_v0  ;;  %v1452_v63 = vadd.f32 %v8508_v41, %v8831_v35  ;;  %v1454_v52 = vadd.f32 %v8508_v41, %v8844_v47 }
 0x35e   :  { %v1460_v11 = vadd.f32 %v8508_v41, %v8860_v7  ;;  %v1462_v46 = vadd.f32 %v8508_v41, %v8884_v24  ;;  %v1468_v45 = vadd.f32 %v8508_v41, %v8888_v54  ;;  %v1470_v23 = vadd.f32 %v8508_v41, %v1405_v34 }
 0x35f   :  { %v9021_v36 = vadd.f32 %v8508_v41, %v1411_v50  ;;  %v9024_v0 = vadd.f32 %v8508_v41, %v1413_v17  ;;  %v9027_v35 = vadd.f32 %v8508_v41, %v1419_v32  ;;  %v9030_v47 = vadd.f32 %v8508_v41, %v1421_v29 }
 0x360   :  { %v9033_v7 = vadd.f32 %v8508_v41, %v1427_v48  ;;  %v1500_v24 = vmax.f32 %v1436_v13, 0.0  ;;  %v1502_v2 = vmax.f32 %v1438_v43, 0.0  ;;  %v9036_v54 = vadd.f32 %v8508_v41, %v1429_v38 }
 0x361   :  { %v1508_v34 = vmax.f32 %v1444_v60, 0.0  ;;  %v1510_v50 = vmax.f32 %v1446_v30, 0.0  ;;  %v1516_v10 = vmax.f32 %v1452_v63, 0.0  ;;  %v1518_v56 = vmax.f32 %v1454_v52, 0.0 }
 0x362   :  { %v1524_v17 = vmax.f32 %v1460_v11, 0.0  ;;  %v1526_v21 = vmax.f32 %v1462_v46, 0.0  ;;  %v1532_v58 = vmax.f32 %v1468_v45, 0.0  ;;  %1564 = vst.msk [vmem:[#allocation2] sm:$0xff] %vm891_vm0, %v1500_v24  ;;  %v1534_v32 = vmax.f32 %v1470_v23, 0.0 }
 0x363   :  { %v1540_v29 = vmax.f32 %v9021_v36, 0.0  ;;  %v1542_v48 = vmax.f32 %v9024_v0, 0.0  ;;  %v1548_v13 = vmax.f32 %v9027_v35, 0.0  ;;  %1566 = vst.msk [vmem:[#allocation2 + $0x10] sm:$0xff] %vm891_vm0, %v1502_v2  ;;  %v1550_v43 = vmax.f32 %v9030_v47, 0.0  ;;  %v11087_v35 = vld [vmem:[#allocation21_spill] sm:$0xff] }
 0x364   :  { %v1556_v38 = vmax.f32 %v9033_v7, 0.0  ;;  %1572 = vst.msk [vmem:[#allocation2 + $0x40] sm:$0xff] %vm891_vm0, %v1508_v34  ;;  %v9048_v60 = vadd.f32 %v8508_v41, %v8776_v57  ;;  %v9052_v30 = vadd.f32 %v8508_v41, %v8780_v40  ;;  %v9057_v63 = vadd.f32 %v8508_v41, %v8784_v4  ;;  %v11088_v2 = vld [vmem:[#allocation22_spill] sm:$0xff] }
 0x365   :  { %1574 = vst.msk [vmem:[#allocation2 + $0x50] sm:$0xff] %vm891_vm0, %v1510_v50  ;;  %v9061_v52 = vadd.f32 %v8508_v41, %v8788_v51  ;;  %v9065_v11 = vadd.f32 %v8508_v41, %v8797_v31  ;;  %v9069_v57 = vadd.f32 %v8508_v41, %v8805_v9  ;;  %v9074_v40 = vadd.f32 %v8508_v41, %v8810_v28 }
 0x366   :  { %1580 = vst.msk [vmem:[#allocation2 + $0x80] sm:$0xff] %vm891_vm0, %v1516_v10  ;;  %v9078_v4 = vadd.f32 %v8508_v41, %v8814_v39  ;;  %v9082_v51 = vadd.f32 %v8508_v41, %v8818_v49  ;;  %v9086_v31 = vadd.f32 %v8508_v41, %v8822_v12  ;;  %v9091_v9 = vadd.f32 %v8508_v41, %v8835_v44  ;;  %v11082_v49 = vld [vmem:[#allocation16_spill] sm:$0xff]  ;;  %v11083_v12 = vld [vmem:[#allocation17_spill] sm:$0xff]  ;;  %v11084_v44 = vld [vmem:[#allocation18_spill] sm:$0xff] }
 0x367   :  { %1582 = vst.msk [vmem:[#allocation2 + $0x90] sm:$0xff] %vm891_vm0, %v1518_v56  ;;  %v9095_v28 = vadd.f32 %v8508_v41, %v8839_v16  ;;  %v9099_v39 = vadd.f32 %v8508_v41, %v8848_v20  ;;  %v9103_v46 = vadd.f32 %v8508_v41, %v11082_v49  ;;  %v9108_v45 = vadd.f32 %v8508_v41, %v11083_v12  ;;  %v11085_v16 = vld [vmem:[#allocation19_spill] sm:$0xff]  ;;  %v11086_v20 = vld [vmem:[#allocation20_spill] sm:$0xff] }
 0x368   :  { %1588 = vst.msk [vmem:[#allocation2 + $0xc0] sm:$0xff] %vm891_vm0, %v1524_v17  ;;  %v9112_v23 = vadd.f32 %v8508_v41, %v11084_v44  ;;  %v9116_v36 = vadd.f32 %v8508_v41, %v11085_v16  ;;  %v9120_v0 = vadd.f32 %v8508_v41, %v11086_v20  ;;  %v9125_v24 = vadd.f32 %v8508_v41, %v11087_v35 }
 0x369   :  { %1590 = vst.msk [vmem:[#allocation2 + $0xd0] sm:$0xff] %vm891_vm0, %v1526_v21  ;;  %v9129_v34 = vadd.f32 %v8508_v41, %v11088_v2  ;;  %v9133_v50 = vadd.f32 %v8508_v41, %v8904_v37  ;;  %v9137_v10 = vadd.f32 %v8508_v41, %v8908_v19  ;;  %v9142_v56 = vadd.f32 %v8508_v41, %v8918_v33  ;;  %v1652_v44 = vld [vmem:[#allocation2 + $0x3] sm:$0x1] }
 0x36a   :  { %1596 = vst.msk [vmem:[#allocation2 + $0x100] sm:$0xff] %vm891_vm0, %v1532_v58  ;;  %v9146_v17 = vadd.f32 %v8508_v41, %v8922_v1  ;;  %v9150_v21 = vadd.f32 %v8508_v41, %v8930_v5  ;;  %v9154_v37 = vadd.f32 %v8508_v41, %v8936_v61  ;;  %v2180_v58 = vld [vmem:[#allocation2 + $0x5] sm:$0x1]  ;;  %v9159_v33 = vadd.f32 %v8508_v41, %v8940_v14  ;;  %v1702_v7 = vld [vmem:[#allocation2 + $0x11] sm:$0x1] }
 0x36b   :  { %1598 = vst.msk [vmem:[#allocation2 + $0x110] sm:$0xff] %vm891_vm0, %v1534_v32  ;;  %v1653_v19 = vld [vmem:[#allocation2 + $0x43] sm:$0x1]  ;;  %v2181_v49 = vld [vmem:[#allocation2 + $0x45] sm:$0x1]  ;;  %v9163_v1 = vadd.f32 %v8508_v41, %v8944_v22  ;;  %v9167_v5 = vadd.f32 %v8508_v41, %v8948_v27  ;;  %v9171_v61 = vadd.f32 %v8508_v41, %v8955_v55  ;;  %v9176_v14 = vadd.f32 %v8508_v41, %v8961_v15 }
 0x36c   :  { %1604 = vst.msk [vmem:[#allocation2 + $0x140] sm:$0xff] %vm891_vm0, %v1540_v29  ;;  %v1847_v32 = vrot.slane %v1653_v19, 7  ;;  %v2273_v12 = vrot.slane %v2181_v49, 7  ;;  %v9180_v22 = vadd.f32 %v8508_v41, %v8965_v25  ;;  %v1558_v27 = vmax.f32 %v9036_v54, 0.0  ;;  %v1703_v25 = vld [vmem:[#allocation2 + $0x51] sm:$0x1] }
 0x36d   :  { %1606 = vst.msk [vmem:[#allocation2 + $0x150] sm:$0xff] %vm891_vm0, %v1542_v48  ;;  %v1654_v16 = vld [vmem:[#allocation2 + $0x83] sm:$0x1]  ;;  %v2182_v55 = vld [vmem:[#allocation2 + $0x85] sm:$0x1]  ;;  %v9186_v29 = vadd.f32 %v8508_v41, %v8969_v8  ;;  %v9190_v20 = vadd.f32 %v8508_v41, %v8973_v3  ;;  %v9194_v15 = vadd.f32 %v8508_v41, %v8977_v26  ;;  %v9204_v19 = vadd.f32 %v8508_v41, %v8985_v42 }
 0x36e   :  { %1612 = vst.msk [vmem:[#allocation2 + $0x180] sm:$0xff] %vm891_vm0, %v1548_v13  ;;  %v1849_v54 = vrot.slane %v1654_v16, 6  ;;  %v2274_v48 = vsel %vm1768_vm5, %v2273_v12, %v2180_v58  ;;  %v2275_v35 = vrot.slane %v2182_v55, 6  ;;  %v1848_v2 = vsel %vm1768_vm5, %v1847_v32, %v1652_v44  ;;  %v1638_v18 = vld [vmem:[#allocation2 + $0x81] sm:$0x1] }
 0x36f   :  { %1614 = vst.msk [vmem:[#allocation2 + $0x190] sm:$0xff] %vm891_vm0, %v1550_v43  ;;  %v1655_v8 = vld [vmem:[#allocation2 + $0xc3] sm:$0x1]  ;;  %v2183_v3 = vld [vmem:[#allocation2 + $0xc5] sm:$0x1]  ;;  %v9208_v26 = vadd.f32 %v8508_v41, %v8989_v6  ;;  %v1993_v32 = vrot.slane %v1703_v25, 7  ;;  %v9218_v12 = vadd.f32 %v8508_v41, %v8993_v62  ;;  %v9222_v6 = vadd.f32 %v8508_v41, %v8997_v53 }
 0x370   :  { %1620 = vst.msk [vmem:[#allocation2 + $0x1c0] sm:$0xff] %vm891_vm0, %v1556_v38  ;;  %v1851_v13 = vrot.slane %v1655_v8, 5  ;;  %v2276_v58 = vsel %vm1771_vm6, %v2275_v35, %v2274_v48  ;;  %v2277_v47 = vrot.slane %v2183_v3, 5  ;;  %v1850_v43 = vsel %vm1771_vm6, %v1849_v54, %v1848_v2  ;;  %v1704_v38 = vld [vmem:[#allocation2 + $0x91] sm:$0x1] }
 0x371   :  { %11089 = vst [vmem:[#allocation25_spill] sm:$0xff] %v9208_v26  ;;  %v1656_v49 = vld [vmem:[#allocation2 + $0x103] sm:$0x1]  ;;  %v2184_v42 = vld [vmem:[#allocation2 + $0x105] sm:$0x1] }
 0x372   :  { %1622 = vst.msk [vmem:[#allocation2 + $0x1d0] sm:$0xff] %vm891_vm0, %v1558_v27  ;;  %v1853_v44 = vrot.slane %v1656_v49, 4  ;;  %v2278_v16 = vsel %vm1774_vm7, %v2277_v47, %v2276_v58  ;;  %v2279_v55 = vrot.slane %v2184_v42, 4  ;;  %v1852_v54 = vsel %vm1774_vm7, %v1851_v13, %v1850_v43  ;;  %v1636_v27 = vld [vmem:[#allocation2 + $0x1] sm:$0x1] }
 0x373   :  { %11090 = vst [vmem:[#allocation26_spill] sm:$0xff] %v9218_v12  ;;  %v1637_v48 = vld [vmem:[#allocation2 + $0x41] sm:$0x1]  ;;  %v1657_v25 = vld [vmem:[#allocation2 + $0x143] sm:$0x1]  ;;  %v1994_v58 = vsel %vm1768_vm5, %v1993_v32, %v1702_v7  ;;  %v1995_v13 = vrot.slane %v1704_v38, 6 }
 0x374   :  { %11091 = vst [vmem:[#allocation7_spill] sm:$0xff] %v9222_v6  ;;  %v2185_v35 = vld [vmem:[#allocation2 + $0x145] sm:$0x1]  ;;  %v1797_v2 = vrot.slane %v1637_v48, 7  ;;  %v9226_v8 = vld [vmem:[#allocation2 + $0xd1] sm:$0x1]  ;;  %v2280_v3 = vsel %vm1777_vm8, %v2279_v55, %v2278_v16  ;;  %v1854_v53 = vsel %vm1777_vm8, %v1853_v44, %v1852_v54 }
 0x375   :  { %v1855_v62 = vrot.slane %v1657_v25, 3  ;;  %v2281_v41 = vrot.slane %v2185_v35, 3  ;;  %v1658_v49 = vld [vmem:[#allocation2 + $0x183] sm:$0x1]  ;;  %v9230_v59 = vld [vmem:[#allocation2 + $0x111] sm:$0x1] }
 0x376   :  { %v2186_v47 = vld [vmem:[#allocation2 + $0x185] sm:$0x1]  ;;  %v1798_v43 = vsel %vm1768_vm5, %v1797_v2, %v1636_v27  ;;  %v1799_v42 = vrot.slane %v1638_v18, 6  ;;  %v9234_v48 = vld [vmem:[#allocation2 + $0x151] sm:$0x1]  ;;  %v1857_v6 = vrot.slane %v1658_v49, 2 }
 0x377   :  { %v2282_v25 = vsel %vm1780_vm9, %v2281_v41, %v2280_v3  ;;  %v2283_v16 = vrot.slane %v2186_v47, 2  ;;  %v1856_v55 = vsel %vm1780_vm9, %v1855_v62, %v1854_v53  ;;  %v1639_v44 = vld [vmem:[#allocation2 + $0xc1] sm:$0x1]  ;;  %v1659_v54 = vld [vmem:[#allocation2 + $0x1c3] sm:$0x1]  ;;  %v9244_v3 = vsel %vm1771_vm6, %v1995_v13, %v1994_v58 }
 0x378   :  { %v2187_v35 = vld [vmem:[#allocation2 + $0x1c5] sm:$0x1]  ;;  %v1800_v12 = vsel %vm1771_vm6, %v1799_v42, %v1798_v43  ;;  %v1801_v26 = vrot.slane %v1639_v44, 5  ;;  %v9239_v32 = vld [vmem:[#allocation2 + $0x191] sm:$0x1]  ;;  %v1859_v7 = vrot.slane %v1659_v54, 1  ;;  %v1858_v27 = vsel %vm1783_vm10, %v1857_v6, %v1856_v55 }
 0x379   :  { %v2284_v38 = vsel %vm1783_vm10, %v2283_v16, %v2282_v25  ;;  %v2285_v18 = vrot.slane %v2187_v35, 1  ;;  %v1640_v2 = vld [vmem:[#allocation2 + $0x101] sm:$0x1]  ;;  %v9248_v43 = vld [vmem:[#allocation2 + $0x1d1] sm:$0x1]  ;;  %v1503_v35 = vmax.f32 %v9048_v60, 0.0 }
 0x37a   :  { %v1641_v41 = vld [vmem:[#allocation2 + $0x141] sm:$0x1]  ;;  %v1802_v49 = vsel %vm1774_vm7, %v1801_v26, %v1800_v12  ;;  %v1803_v47 = vrot.slane %v1640_v2, 4  ;;  %v1860_v6 = vsel %vm1786_vm11, %v1859_v7, %v1858_v27  ;;  %v1504_v2 = vmax.f32 %v9052_v30, 0.0  ;;  %v9293_v58 = vld [vmem:[#allocation2 + $0x14b] sm:$0x1] }
 0x37b   :  { %v1642_v53 = vld [vmem:[#allocation2 + $0x181] sm:$0x1]  ;;  %v9252_v25 = vsel %vm1786_vm11, %v2285_v18, %v2284_v38  ;;  %v1805_v55 = vrot.slane %v1641_v41, 3  ;;  %v1505_v27 = vmax.f32 %v9057_v63, 0.0  ;;  %v1511_v60 = vmax.f32 %v9069_v57, 0.0  ;;  %1567 = vst.msk [vmem:[#allocation2 + $0x18] sm:$0xff] %vm891_vm0, %v1503_v35 }
 0x37c   :  { %v1643_v16 = vld [vmem:[#allocation2 + $0x1c1] sm:$0x1]  ;;  %v7064_v13 = vpack.i.bf16 %v9252_v25, %v1860_v6  ;;  %v1804_v44 = vsel %vm1777_vm8, %v1803_v47, %v1802_v49  ;;  %v1807_v54 = vrot.slane %v1642_v53, 2  ;;  %v1506_v53 = vmax.f32 %v9061_v52, 0.0  ;;  %1568 = vst.msk [vmem:[#allocation2 + $0x20] sm:$0xff] %vm891_vm0, %v1504_v2 }
 0x37d   :  { %v1806_v26 = vsel %vm1780_vm9, %v1805_v55, %v1804_v44  ;;  %v1809_v12 = vrot.slane %v1643_v16, 1  ;;  %v1507_v49 = vmax.f32 %v9065_v11, 0.0  ;;  %v1512_v47 = vmax.f32 %v9074_v40, 0.0  ;;  %v1687_v35 = vld [vmem:[#allocation2 + $0x8b] sm:$0x1]  ;;  %1569 = vst.msk [vmem:[#allocation2 + $0x28] sm:$0xff] %vm891_vm0, %v1505_v27 }
 0x37e   :  { %7065 = vrot.lane.b32.xlu1 %v7064_v13, %s7280_s27  ;;  %v1808_v18 = vsel %vm1783_vm10, %v1807_v54, %v1806_v26  ;;  %v1513_v16 = vmax.f32 %v9078_v4, 0.0  ;;  %v1514_v55 = vmax.f32 %v9082_v51, 0.0  ;;  %v1688_v2 = vld [vmem:[#allocation2 + $0xcb] sm:$0x1]  ;;  %v2197_v54 = vld [vmem:[#allocation2 + $0x4d] sm:$0x1] }
 0x37f   :  { %v1810_v41 = vsel %vm1786_vm11, %v1809_v12, %v1808_v18  ;;  %v1686_v12 = vld [vmem:[#allocation2 + $0x4b] sm:$0x1]  ;;  %1570 = vst.msk [vmem:[#allocation2 + $0x30] sm:$0xff] %vm891_vm0, %v1506_v53  ;;  %v2199_v7 = vld [vmem:[#allocation2 + $0xcd] sm:$0x1]  ;;  %v11092_v57 = vld [vmem:[#allocation25_spill] sm:$0xff] }
 0x380   :  { %v7054_v30 = vpack.i.bf16 %v1860_v6, %v1810_v41  ;;  %v1689_v38 = vld [vmem:[#allocation2 + $0x10b] sm:$0x1]  ;;  %1571 = vst.msk [vmem:[#allocation2 + $0x38] sm:$0xff] %vm891_vm0, %v1507_v49  ;;  %v2200_v4 = vld [vmem:[#allocation2 + $0x10d] sm:$0x1]  ;;  %v1945_v11 = vrot.slane %v1686_v12, 7 }
 0x381   :  { %v9295_v44 = vld [vmem:[#allocation2 + $0x18b] sm:$0x1]  ;;  %v2201_v27 = vld [vmem:[#allocation2 + $0x14d] sm:$0x1]  ;;  %1575 = vst.msk [vmem:[#allocation2 + $0x58] sm:$0xff] %vm891_vm0, %v1511_v60  ;;  %v1947_v26 = vrot.slane %v1687_v35, 6 }
 0x382   :  { %7055 = vrot.lane.b32.xlu0 %v7054_v30, %s7281_s28  ;;  %v9302_v6 = vld [vmem:[#allocation2 + $0x1cb] sm:$0x1]  ;;  %v2198_v30 = vld [vmem:[#allocation2 + $0x8d] sm:$0x1]  ;;  %1576 = vst.msk [vmem:[#allocation2 + $0x60] sm:$0xff] %vm891_vm0, %v1512_v47  ;;  %v1949_v52 = vrot.slane %v1688_v2, 5 }
 0x383   :  { %v1685_v62 = vld [vmem:[#allocation2 + $0xb] sm:$0x1]  ;;  %v2202_v42 = vld [vmem:[#allocation2 + $0x18d] sm:$0x1]  ;;  %1577 = vst.msk [vmem:[#allocation2 + $0x68] sm:$0xff] %vm891_vm0, %v1513_v16  ;;  %v1951_v60 = vrot.slane %v1689_v38, 4 }
 0x384   :  { %v11093_v51 = vld [vmem:[#allocation26_spill] sm:$0xff]  ;;  %v1953_v41 = vrot.slane %v9293_v58, 3  ;;  %v1955_v18 = vrot.slane %v9295_v44, 2  ;;  %v2327_v40 = vrot.slane %v2197_v54, 7  ;;  %1578 = vst.msk [vmem:[#allocation2 + $0x70] sm:$0xff] %vm891_vm0, %v1514_v55  ;;  %v1946_v49 = vsel %vm1768_vm5, %v1945_v11, %v1685_v62 }
 0x385   :  { %v2196_v13 = vld [vmem:[#allocation2 + $0xd] sm:$0x1]  ;;  %v1957_v47 = vrot.slane %v9302_v6, 1  ;;  %v2329_v53 = vrot.slane %v2198_v30, 6  ;;  %v2331_v12 = vrot.slane %v2199_v7, 5  ;;  %v11094_v35 = vmax.f32 %v9086_v31, 0.0 }
 0x386   :  { %v2203_v63 = vld [vmem:[#allocation2 + $0x1cd] sm:$0x1]  ;;  %v1948_v38 = vsel %vm1771_vm6, %v1947_v26, %v1946_v49  ;;  %v2328_v58 = vsel %vm1768_vm5, %v2327_v40, %v2196_v13  ;;  %v2333_v16 = vrot.slane %v2200_v4, 4  ;;  %v2335_v44 = vrot.slane %v2201_v27, 3  ;;  %v1670_v62 = vld [vmem:[#allocation2 + $0x49] sm:$0x1] }
 0x387   :  { %1579 = vst.msk [vmem:[#allocation2 + $0x78] sm:$0xff] %vm891_vm0, %v11094_v35  ;;  %v11095_v54 = vmax.f32 %v9091_v9, 0.0  ;;  %v1950_v55 = vsel %vm1774_vm7, %v1949_v52, %v1948_v38  ;;  %v2330_v11 = vsel %vm1771_vm6, %v2329_v53, %v2328_v58  ;;  %v2337_v7 = vrot.slane %v2202_v42, 2  ;;  %v1669_v6 = vld [vmem:[#allocation2 + $0x9] sm:$0x1] }
 0x388   :  { %v11096_v31 = vmax.f32 %v9095_v28, 0.0  ;;  %v1671_v26 = vld [vmem:[#allocation2 + $0x89] sm:$0x1]  ;;  %v1952_v13 = vsel %vm1777_vm8, %v1951_v60, %v1950_v55  ;;  %v2332_v40 = vsel %vm1774_vm7, %v2331_v12, %v2330_v11  ;;  %v2339_v9 = vrot.slane %v2203_v63, 1  ;;  %v1645_v58 = vld [vmem:[#allocation2 + $0x42] sm:$0x1] }
 0x389   :  { %1583 = vst.msk [vmem:[#allocation2 + $0x98] sm:$0xff] %vm891_vm0, %v11095_v54  ;;  %v1672_v2 = vld [vmem:[#allocation2 + $0xc9] sm:$0x1]  ;;  %v11097_v4 = vmax.f32 %v9099_v39, 0.0  ;;  %v1895_v30 = vrot.slane %v1670_v62, 7  ;;  %v11098_v42 = vrot.slane %v9226_v8, 5  ;;  %v1954_v27 = vsel %vm1780_vm9, %v1953_v41, %v1952_v13 }
 0x38a   :  { %1584 = vst.msk [vmem:[#allocation2 + $0xa0] sm:$0xff] %vm891_vm0, %v11096_v31  ;;  %v1673_v52 = vld [vmem:[#allocation2 + $0x109] sm:$0x1]  ;;  %v2334_v53 = vsel %vm1777_vm8, %v2333_v16, %v2332_v40  ;;  %v11099_v49 = vmax.f32 %v9103_v46, 0.0  ;;  %v1897_v39 = vrot.slane %v1671_v26, 6  ;;  %v1956_v12 = vsel %vm1783_vm10, %v1955_v18, %v1954_v27 }
 0x38b   :  { %1585 = vst.msk [vmem:[#allocation2 + $0xa8] sm:$0xff] %vm891_vm0, %v11097_v4  ;;  %v1998_v28 = vsel %vm1774_vm7, %v11098_v42, %v9244_v3  ;;  %v1674_v63 = vld [vmem:[#allocation2 + $0x149] sm:$0x1]  ;;  %v2336_v35 = vsel %vm1780_vm9, %v2335_v44, %v2334_v53  ;;  %v11100_v38 = vmax.f32 %v9108_v45, 0.0  ;;  %v1896_v3 = vsel %vm1768_vm5, %v1895_v30, %v1669_v6  ;;  %v1646_v62 = vld [vmem:[#allocation2 + $0x82] sm:$0x1] }
 0x38c   :  { %1586 = vst.msk [vmem:[#allocation2 + $0xb0] sm:$0xff] %vm891_vm0, %v11099_v49  ;;  %v1675_v60 = vld [vmem:[#allocation2 + $0x189] sm:$0x1]  ;;  %v1899_v41 = vrot.slane %v1672_v2, 5  ;;  %v1958_v46 = vsel %vm1786_vm11, %v1957_v47, %v1956_v12  ;;  %v2338_v16 = vsel %vm1783_vm10, %v2337_v7, %v2336_v35  ;;  %v11101_v54 = vmax.f32 %v9112_v23, 0.0 }
 0x38d   :  { %1587 = vst.msk [vmem:[#allocation2 + $0xb8] sm:$0xff] %vm891_vm0, %v11100_v38  ;;  %v1676_v8 = vld [vmem:[#allocation2 + $0x1c9] sm:$0x1]  ;;  %v1898_v18 = vsel %vm1771_vm6, %v1897_v39, %v1896_v3  ;;  %v1901_v44 = vrot.slane %v1673_v52, 4  ;;  %v1647_v45 = vld [vmem:[#allocation2 + $0xc2] sm:$0x1]  ;;  %v9362_v55 = vsel %vm1786_vm11, %v2339_v9, %v2338_v16 }
 0x38e   :  { %1591 = vst.msk [vmem:[#allocation2 + $0xd8] sm:$0xff] %vm891_vm0, %v11101_v54  ;;  %v11102_v11 = vmax.f32 %v9116_v36, 0.0  ;;  %v1900_v47 = vsel %vm1774_vm7, %v1899_v41, %v1898_v18  ;;  %v1903_v31 = vrot.slane %v1674_v63, 3  ;;  %v1905_v7 = vrot.slane %v1675_v60, 2  ;;  %v1648_v6 = vld [vmem:[#allocation2 + $0x102] sm:$0x1] }
 0x38f   :  { %v11103_v23 = vrot.slane %v9230_v59, 4  ;;  %v7079_v2 = vpack.i.bf16 %v9362_v55, %v1958_v46  ;;  %v11104_v13 = vmax.f32 %v9120_v0, 0.0  ;;  %v1902_v40 = vsel %vm1777_vm8, %v1901_v44, %v1900_v47  ;;  %v1649_v9 = vld [vmem:[#allocation2 + $0x142] sm:$0x1]  ;;  %v2173_v3 = vld [vmem:[#allocation2 + $0x44] sm:$0x1] }
 0x390   :  { %1592 = vst.msk [vmem:[#allocation2 + $0xe0] sm:$0xff] %vm891_vm0, %v11102_v11  ;;  %v1907_v36 = vrot.slane %v1676_v8, 1  ;;  %v1650_v4 = vld [vmem:[#allocation2 + $0x182] sm:$0x1]  ;;  %v11105_v52 = vmax.f32 %v9125_v24, 0.0  ;;  %v1904_v30 = vsel %vm1780_vm9, %v1903_v31, %v1902_v40  ;;  %v1822_v42 = vrot.slane %v1645_v58, 7 }
 0x391   :  { %v2000_v26 = vsel %vm1777_vm8, %v11103_v23, %v1998_v28  ;;  %1593 = vst.msk [vmem:[#allocation2 + $0xe8] sm:$0xff] %vm891_vm0, %v11104_v13  ;;  %v1651_v59 = vld [vmem:[#allocation2 + $0x1c2] sm:$0x1]  ;;  %v1824_v28 = vrot.slane %v1646_v62, 6  ;;  %v1826_v27 = vrot.slane %v1647_v45, 5  ;;  %7080 = vrot.lane.b32.xlu2 %v7079_v2, %s7280_s27  ;;  %v11106_v0 = vmax.f32 %v9129_v34, 0.0 }
 0x392   :  { %1594 = vst.msk [vmem:[#allocation2 + $0xf0] sm:$0xff] %vm891_vm0, %v11105_v52  ;;  %v1906_v53 = vsel %vm1783_vm10, %v1905_v7, %v1904_v30  ;;  %v1644_v49 = vld [vmem:[#allocation2 + $0x2] sm:$0x1]  ;;  %v1828_v63 = vrot.slane %v1648_v6, 4  ;;  %v1830_v60 = vrot.slane %v1649_v9, 3  ;;  %v1832_v24 = vrot.slane %v1650_v4, 2 }
 0x393   :  { %1595 = vst.msk [vmem:[#allocation2 + $0xf8] sm:$0xff] %vm891_vm0, %v11106_v0  ;;  %v11107_v39 = vmax.f32 %v9133_v50, 0.0  ;;  %v1908_v12 = vsel %vm1786_vm11, %v1907_v36, %v1906_v53  ;;  %v1823_v35 = vsel %vm1768_vm5, %v1822_v42, %v1644_v49  ;;  %v1834_v38 = vrot.slane %v1651_v59, 1  ;;  %v2172_v8 = vld [vmem:[#allocation2 + $0x4] sm:$0x1] }
 0x394   :  { %v2174_v34 = vld [vmem:[#allocation2 + $0x84] sm:$0x1]  ;;  %v11108_v41 = vmax.f32 %v9137_v10, 0.0  ;;  %v7069_v58 = vpack.i.bf16 %v1958_v46, %v1908_v12  ;;  %v1825_v16 = vsel %vm1771_vm6, %v1824_v28, %v1823_v35  ;;  %v2248_v50 = vrot.slane %v2173_v3, 7  ;;  %v1718_v30 = vld [vmem:[#allocation2 + $0x13] sm:$0x1] }
 0x395   :  { %1599 = vst.msk [vmem:[#allocation2 + $0x118] sm:$0xff] %vm891_vm0, %v11107_v39  ;;  %v2175_v54 = vld [vmem:[#allocation2 + $0xc4] sm:$0x1]  ;;  %v11109_v44 = vrot.slane %v9234_v48, 3  ;;  %v11110_v45 = vmax.f32 %v9142_v56, 0.0  ;;  %v1827_v11 = vsel %vm1774_vm7, %v1826_v27, %v1825_v16  ;;  %v2250_v31 = vrot.slane %v2174_v34, 6 }
 0x396   :  { %1600 = vst.msk [vmem:[#allocation2 + $0x120] sm:$0xff] %vm891_vm0, %v11108_v41  ;;  %v2176_v18 = vld [vmem:[#allocation2 + $0x104] sm:$0x1]  ;;  %v11111_v46 = vmax.f32 %v9146_v17, 0.0  ;;  %7070 = vrot.lane.b32.xlu1 %v7069_v58, %s7281_s28  ;;  %v1829_v7 = vsel %vm1777_vm8, %v1828_v63, %v1827_v11  ;;  %v2249_v6 = vsel %vm1768_vm5, %v2248_v50, %v2172_v8  ;;  %v2252_v23 = vrot.slane %v2175_v54, 5  ;;  %v11117_v35 = vld [vmem:[#allocation7_spill] sm:$0xff] }
 0x397   :  { %v2002_v62 = vsel %vm1780_vm9, %v11109_v44, %v2000_v26  ;;  %1601 = vst.msk [vmem:[#allocation2 + $0x128] sm:$0xff] %vm891_vm0, %v11110_v45  ;;  %v2177_v47 = vld [vmem:[#allocation2 + $0x144] sm:$0x1]  ;;  %v2254_v56 = vrot.slane %v2176_v18, 4  ;;  %v11112_v26 = vmax.f32 %v9150_v21, 0.0  ;;  %v1831_v2 = vsel %vm1780_vm9, %v1830_v60, %v1829_v7 }
 0x398   :  { %v2178_v10 = vld [vmem:[#allocation2 + $0x184] sm:$0x1]  ;;  %1602 = vst.msk [vmem:[#allocation2 + $0x130] sm:$0xff] %vm891_vm0, %v11111_v46  ;;  %v2251_v13 = vsel %vm1771_vm6, %v2250_v31, %v2249_v6  ;;  %v2256_v17 = vrot.slane %v2177_v47, 3  ;;  %v11113_v36 = vmax.f32 %v9154_v37, 0.0  ;;  %v1833_v9 = vsel %vm1783_vm10, %v1832_v24, %v1831_v2 }
 0x399   :  { %v2179_v48 = vld [vmem:[#allocation2 + $0x1c4] sm:$0x1]  ;;  %1603 = vst.msk [vmem:[#allocation2 + $0x138] sm:$0xff] %vm891_vm0, %v11112_v26  ;;  %v2258_v40 = vrot.slane %v2178_v10, 2  ;;  %v2253_v4 = vsel %vm1774_vm7, %v2252_v23, %v2251_v13  ;;  %v1719_v59 = vld [vmem:[#allocation2 + $0x53] sm:$0x1]  ;;  %v9428_v60 = vsel %vm1786_vm11, %v1834_v38, %v1833_v9 }
 0x39a   :  { %1607 = vst.msk [vmem:[#allocation2 + $0x158] sm:$0xff] %vm891_vm0, %v11113_v36  ;;  %v2260_v52 = vrot.slane %v2179_v48, 1  ;;  %v1720_v21 = vld [vmem:[#allocation2 + $0x93] sm:$0x1]  ;;  %v11114_v42 = vmax.f32 %v9159_v33, 0.0  ;;  %v2255_v28 = vsel %vm1777_vm8, %v2254_v56, %v2253_v4  ;;  %v2043_v53 = vrot.slane %v1719_v59, 7 }
 0x39b   :  { %v1721_v27 = vld [vmem:[#allocation2 + $0xd3] sm:$0x1]  ;;  %v11115_v37 = vrot.slane %v9239_v32, 2  ;;  %v11116_v63 = vmax.f32 %v9163_v1, 0.0  ;;  %v2257_v33 = vsel %vm1780_vm9, %v2256_v17, %v2255_v28  ;;  %v2045_v12 = vrot.slane %v1720_v21, 6 }
 0x39c   :  { %1608 = vst.msk [vmem:[#allocation2 + $0x160] sm:$0xff] %vm891_vm0, %v11114_v42  ;;  %v1722_v0 = vld [vmem:[#allocation2 + $0x113] sm:$0x1]  ;;  %v1562_v8 = vmax.f32 %v11117_v35, 0.0  ;;  %v11118_v3 = vmax.f32 %v9167_v5, 0.0  ;;  %v2259_v32 = vsel %vm1783_vm10, %v2258_v40, %v2257_v33  ;;  %v2044_v1 = vsel %vm1768_vm5, %v2043_v53, %v1718_v30 }
 0x39d   :  { %v2004_v49 = vsel %vm1783_vm10, %v11115_v37, %v2002_v62  ;;  %1609 = vst.msk [vmem:[#allocation2 + $0x168] sm:$0xff] %vm891_vm0, %v11116_v63  ;;  %v1723_v24 = vld [vmem:[#allocation2 + $0x153] sm:$0x1]  ;;  %v2047_v34 = vrot.slane %v1721_v27, 5  ;;  %v11119_v41 = vmax.f32 %v9171_v61, 0.0  ;;  %v9441_v38 = vsel %vm1786_vm11, %v2260_v52, %v2259_v32 }
 0x39e   :  { %v1724_v39 = vld [vmem:[#allocation2 + $0x193] sm:$0x1]  ;;  %1610 = vst.msk [vmem:[#allocation2 + $0x170] sm:$0xff] %vm891_vm0, %v11118_v3  ;;  %v2046_v16 = vsel %vm1771_vm6, %v2045_v12, %v2044_v1  ;;  %v2049_v54 = vrot.slane %v1722_v0, 4  ;;  %v2051_v18 = vrot.slane %v1723_v24, 3  ;;  %v11120_v5 = vmax.f32 %v9176_v14, 0.0 }
 0x39f   :  { %1611 = vst.msk [vmem:[#allocation2 + $0x178] sm:$0xff] %vm891_vm0, %v11119_v41  ;;  %v1725_v58 = vld [vmem:[#allocation2 + $0x1d3] sm:$0x1]  ;;  %v7059_v50 = vpack.i.bf16 %v9441_v38, %v9428_v60  ;;  %v2048_v44 = vsel %vm1774_vm7, %v2047_v34, %v2046_v16  ;;  %v2053_v61 = vrot.slane %v1724_v39, 2  ;;  %v2472_v62 = vld [vmem:[#allocation2 + $0x7] sm:$0x1] }
 0x3a0   :  { %1615 = vst.msk [vmem:[#allocation2 + $0x198] sm:$0xff] %vm891_vm0, %v11120_v5  ;;  %v2473_v45 = vld [vmem:[#allocation2 + $0x47] sm:$0x1]  ;;  %v11121_v47 = vmax.f32 %v9180_v22, 0.0  ;;  %v2050_v10 = vsel %vm1777_vm8, %v2049_v54, %v2048_v44  ;;  %v11122_v7 = vrot.slane %v9248_v43, 1  ;;  %v11123_v6 = vmax.f32 %v9186_v29, 0.0 }
 0x3a1   :  { %v2474_v11 = vld [vmem:[#allocation2 + $0x87] sm:$0x1]  ;;  %v2565_v14 = vrot.slane %v2473_v45, 7  ;;  %7060 = vrot.lane.b32.xlu0 %v7059_v50, %s7279_s2  ;;  %v2052_v23 = vsel %vm1780_vm9, %v2051_v18, %v2050_v10  ;;  %v11124_v2 = vmax.f32 %v9190_v20, 0.0  ;;  %v2055_v43 = vrot.slane %v1725_v58, 1  ;;  %1626 = vst.msk [vmem:[#allocation2 + $0x1f0] sm:$0xff] %vm891_vm0, %v1562_v8 }
 0x3a2   :  { %1616 = vst.msk [vmem:[#allocation2 + $0x1a0] sm:$0xff] %vm891_vm0, %v11121_v47  ;;  %v2475_v31 = vld [vmem:[#allocation2 + $0xc7] sm:$0x1]  ;;  %v2006_v48 = vsel %vm1786_vm11, %v11122_v7, %v2004_v49  ;;  %v2567_v26 = vrot.slane %v2474_v11, 6  ;;  %v2054_v13 = vsel %vm1783_vm10, %v2053_v61, %v2052_v23  ;;  %v11125_v36 = vmax.f32 %v9194_v15, 0.0 }
 0x3a3   :  { %v2476_v46 = vld [vmem:[#allocation2 + $0x107] sm:$0x1]  ;;  %1617 = vst.msk [vmem:[#allocation2 + $0x1a8] sm:$0xff] %vm891_vm0, %v11123_v6  ;;  %v2566_v40 = vsel %vm1768_vm5, %v2565_v14, %v2472_v62  ;;  %v2569_v29 = vrot.slane %v2475_v31, 5  ;;  %v11126_v20 = vmax.f32 %v9204_v19, 0.0  ;;  %v11127_v0 = vmax.f32 %v11092_v57, 0.0 }
 0x3a4   :  { %v2477_v22 = vld [vmem:[#allocation2 + $0x147] sm:$0x1]  ;;  %1618 = vst.msk [vmem:[#allocation2 + $0x1b0] sm:$0xff] %vm891_vm0, %v11124_v2  ;;  %v2568_v9 = vsel %vm1771_vm6, %v2567_v26, %v2566_v40  ;;  %v2571_v4 = vrot.slane %v2476_v46, 4  ;;  %v1710_v42 = vld [vmem:[#allocation2 + $0x12] sm:$0x1]  ;;  %v7084_v63 = vpack.i.bf16 %v9252_v25, %v2006_v48  ;;  %v9484_v33 = vsel %vm1786_vm11, %v2055_v43, %v2054_v13 }
 0x3a5   :  { %v2478_v56 = vld [vmem:[#allocation2 + $0x187] sm:$0x1]  ;;  %1619 = vst.msk [vmem:[#allocation2 + $0x1b8] sm:$0xff] %vm891_vm0, %v11125_v36  ;;  %v2573_v52 = vrot.slane %v2477_v22, 3  ;;  %v2570_v59 = vsel %vm1774_vm7, %v2569_v29, %v2568_v9  ;;  %v1711_v28 = vld [vmem:[#allocation2 + $0x52] sm:$0x1] }
 0x3a6   :  { %v2479_v17 = vld [vmem:[#allocation2 + $0x1c7] sm:$0x1]  ;;  %v2575_v30 = vrot.slane %v2478_v56, 2  ;;  %1623 = vst.msk [vmem:[#allocation2 + $0x1d8] sm:$0xff] %vm891_vm0, %v11126_v20  ;;  %v1712_v27 = vld [vmem:[#allocation2 + $0x92] sm:$0x1]  ;;  %v2572_v15 = vsel %vm1777_vm8, %v2571_v4, %v2570_v59 }
 0x3a7   :  { %v2577_v21 = vrot.slane %v2479_v17, 1  ;;  %1624 = vst.msk [vmem:[#allocation2 + $0x1e0] sm:$0xff] %vm891_vm0, %v11127_v0  ;;  %v1713_v53 = vld [vmem:[#allocation2 + $0xd2] sm:$0x1]  ;;  %v2018_v49 = vrot.slane %v1711_v28, 7  ;;  %v11128_v19 = vmax.f32 %v11093_v51, 0.0  ;;  %v2574_v24 = vsel %vm1780_vm9, %v2573_v52, %v2572_v15 }
 0x3a8   :  { %v1714_v37 = vld [vmem:[#allocation2 + $0x112] sm:$0x1]  ;;  %v2020_v12 = vrot.slane %v1712_v27, 6  ;;  %v2576_v35 = vsel %vm1783_vm10, %v2575_v30, %v2574_v24  ;;  %v2022_v25 = vrot.slane %v1713_v53, 5  ;;  %v2464_v16 = vld [vmem:[#allocation2 + $0x6] sm:$0x1] }
 0x3a9   :  { %1625 = vst.msk [vmem:[#allocation2 + $0x1e8] sm:$0xff] %vm891_vm0, %v11128_v19  ;;  %v1715_v39 = vld [vmem:[#allocation2 + $0x152] sm:$0x1]  ;;  %v2019_v32 = vsel %vm1768_vm5, %v2018_v49, %v1710_v42  ;;  %v2024_v1 = vrot.slane %v1714_v37, 4  ;;  %v2578_v51 = vsel %vm1786_vm11, %v2577_v21, %v2576_v35  ;;  %v2465_v54 = vld [vmem:[#allocation2 + $0x46] sm:$0x1]  ;;  %7085 = vrot.lane.b32.xlu0 %v7084_v63, %s7281_s28 }
 0x3aa   :  { %v1716_v57 = vld [vmem:[#allocation2 + $0x192] sm:$0x1]  ;;  %v2021_v34 = vsel %vm1771_vm6, %v2020_v12, %v2019_v32  ;;  %v2026_v41 = vrot.slane %v1715_v39, 3  ;;  %v7094_v18 = vpack.i.bf16 %v2578_v51, %v9484_v33  ;;  %v2466_v50 = vld [vmem:[#allocation2 + $0x86] sm:$0x1]  ;;  %v2540_v61 = vrot.slane %v2465_v54, 7 }
 0x3ab   :  { %v1717_v3 = vld [vmem:[#allocation2 + $0x1d2] sm:$0x1]  ;;  %v2028_v58 = vrot.slane %v1716_v57, 2  ;;  %v2023_v5 = vsel %vm1774_vm7, %v2022_v25, %v2021_v34  ;;  %v2467_v44 = vld [vmem:[#allocation2 + $0xc6] sm:$0x1]  ;;  %v2542_v14 = vrot.slane %v2466_v50, 6 }
 0x3ac   :  { %v2030_v8 = vrot.slane %v1717_v3, 1  ;;  %v2025_v62 = vsel %vm1777_vm8, %v2024_v1, %v2023_v5  ;;  %v2468_v45 = vld [vmem:[#allocation2 + $0x106] sm:$0x1]  ;;  %7095 = vrot.lane.b32.xlu2 %v7094_v18, %s7280_s27  ;;  %v2541_v46 = vsel %vm1768_vm5, %v2540_v61, %v2464_v16  ;;  %v2544_v7 = vrot.slane %v2467_v44, 5  ;;  %v1751_v56 = vld [vmem:[#allocation2 + $0x1b] sm:$0x1] }
 0x3ad   :  { %v2469_v11 = vld [vmem:[#allocation2 + $0x146] sm:$0x1]  ;;  %v2027_v10 = vsel %vm1780_vm9, %v2026_v41, %v2025_v62  ;;  %v2546_v6 = vrot.slane %v2468_v45, 4  ;;  %v1752_v26 = vld [vmem:[#allocation2 + $0x5b] sm:$0x1]  ;;  %v2543_v2 = vsel %vm1771_vm6, %v2542_v14, %v2541_v46 }
 0x3ae   :  { %v2470_v47 = vld [vmem:[#allocation2 + $0x186] sm:$0x1]  ;;  %v2029_v48 = vsel %vm1783_vm10, %v2028_v58, %v2027_v10  ;;  %v2548_v23 = vrot.slane %v2469_v11, 3  ;;  %v1753_v43 = vld [vmem:[#allocation2 + $0x9b] sm:$0x1]  ;;  %v2141_v40 = vrot.slane %v1752_v26, 7  ;;  %v2545_v36 = vsel %vm1774_vm7, %v2544_v7, %v2543_v2 }
 0x3af   :  { %v2471_v31 = vld [vmem:[#allocation2 + $0x1c6] sm:$0x1]  ;;  %v2550_v22 = vrot.slane %v2470_v47, 2  ;;  %v1754_v17 = vld [vmem:[#allocation2 + $0xdb] sm:$0x1]  ;;  %v9502_v29 = vsel %vm1786_vm11, %v2030_v8, %v2029_v48  ;;  %v2547_v30 = vsel %vm1777_vm8, %v2546_v6, %v2545_v36  ;;  %v2143_v21 = vrot.slane %v1753_v43, 6 }
 0x3b0   :  { %v2552_v13 = vrot.slane %v2471_v31, 1  ;;  %v1755_v9 = vld [vmem:[#allocation2 + $0x11b] sm:$0x1]  ;;  %v2142_v59 = vsel %vm1768_vm5, %v2141_v40, %v1751_v56  ;;  %v2145_v42 = vrot.slane %v1754_v17, 5  ;;  %v2549_v28 = vsel %vm1780_vm9, %v2548_v23, %v2547_v30  ;;  %v2488_v53 = vld [vmem:[#allocation2 + $0xf] sm:$0x1] }
 0x3b1   :  { %v1756_v4 = vld [vmem:[#allocation2 + $0x15b] sm:$0x1]  ;;  %v2147_v27 = vrot.slane %v1755_v9, 4  ;;  %v2489_v37 = vld [vmem:[#allocation2 + $0x4f] sm:$0x1]  ;;  %v2551_v49 = vsel %vm1783_vm10, %v2550_v22, %v2549_v28  ;;  %v2144_v63 = vsel %vm1771_vm6, %v2143_v21, %v2142_v59 }
 0x3b2   :  { %v1757_v52 = vld [vmem:[#allocation2 + $0x19b] sm:$0x1]  ;;  %v2149_v0 = vrot.slane %v1756_v4, 3  ;;  %v2490_v24 = vld [vmem:[#allocation2 + $0x8f] sm:$0x1]  ;;  %v2619_v57 = vrot.slane %v2489_v37, 7  ;;  %v2553_v12 = vsel %vm1786_vm11, %v2552_v13, %v2551_v49  ;;  %v2146_v35 = vsel %vm1774_vm7, %v2145_v42, %v2144_v63 }
 0x3b3   :  { %v1758_v20 = vld [vmem:[#allocation2 + $0x1db] sm:$0x1]  ;;  %v2151_v15 = vrot.slane %v1757_v52, 2  ;;  %v2491_v39 = vld [vmem:[#allocation2 + $0xcf] sm:$0x1]  ;;  %v7089_v1 = vpack.i.bf16 %v2553_v12, %v9502_v29  ;;  %v2148_v51 = vsel %vm1777_vm8, %v2147_v27, %v2146_v35  ;;  %v2621_v58 = vrot.slane %v2490_v24, 6 }
 0x3b4   :  { %v2153_v19 = vrot.slane %v1758_v20, 1  ;;  %v2492_v3 = vld [vmem:[#allocation2 + $0x10f] sm:$0x1]  ;;  %v2620_v41 = vsel %vm1768_vm5, %v2619_v57, %v2488_v53  ;;  %v2150_v16 = vsel %vm1780_vm9, %v2149_v0, %v2148_v51  ;;  %v2623_v54 = vrot.slane %v2491_v39, 5  ;;  %v1744_v8 = vld [vmem:[#allocation2 + $0x5a] sm:$0x1] }
 0x3b5   :  { %v2493_v32 = vld [vmem:[#allocation2 + $0x14f] sm:$0x1]  ;;  %v2625_v18 = vrot.slane %v2492_v3, 4  ;;  %7090 = vrot.lane.b32.xlu1 %v7089_v1, %s7279_s2  ;;  %v2152_v50 = vsel %vm1783_vm10, %v2151_v15, %v2150_v16  ;;  %v2622_v44 = vsel %vm1771_vm6, %v2621_v58, %v2620_v41  ;;  %v1745_v45 = vld [vmem:[#allocation2 + $0x9a] sm:$0x1]  ;;  %v2116_v6 = vrot.slane %v1744_v8, 7 }
 0x3b6   :  { %v2494_v25 = vld [vmem:[#allocation2 + $0x18f] sm:$0x1]  ;;  %v2627_v5 = vrot.slane %v2493_v32, 3  ;;  %v1746_v11 = vld [vmem:[#allocation2 + $0xda] sm:$0x1]  ;;  %v2624_v47 = vsel %vm1774_vm7, %v2623_v54, %v2622_v44  ;;  %v9521_v14 = vsel %vm1786_vm11, %v2153_v19, %v2152_v50  ;;  %v2118_v23 = vrot.slane %v1745_v45, 6 }
 0x3b7   :  { %v2495_v34 = vld [vmem:[#allocation2 + $0x1cf] sm:$0x1]  ;;  %v2629_v61 = vrot.slane %v2494_v25, 2  ;;  %v1747_v10 = vld [vmem:[#allocation2 + $0x11a] sm:$0x1]  ;;  %v2626_v7 = vsel %vm1777_vm8, %v2625_v18, %v2624_v47  ;;  %v2120_v26 = vrot.slane %v1746_v11, 5 }
 0x3b8   :  { %v2631_v62 = vrot.slane %v2495_v34, 1  ;;  %v1748_v31 = vld [vmem:[#allocation2 + $0x15a] sm:$0x1]  ;;  %v2628_v22 = vsel %vm1780_vm9, %v2627_v5, %v2626_v7  ;;  %v2122_v2 = vrot.slane %v1747_v10, 4  ;;  %v2481_v9 = vld [vmem:[#allocation2 + $0x4e] sm:$0x1] }
 0x3b9   :  { %v1749_v46 = vld [vmem:[#allocation2 + $0x19a] sm:$0x1]  ;;  %v2124_v13 = vrot.slane %v1748_v31, 3  ;;  %v2630_v43 = vsel %vm1783_vm10, %v2629_v61, %v2628_v22  ;;  %v2482_v4 = vld [vmem:[#allocation2 + $0x8e] sm:$0x1]  ;;  %v2594_v15 = vrot.slane %v2481_v9, 7 }
 0x3ba   :  { %v1750_v48 = vld [vmem:[#allocation2 + $0x1da] sm:$0x1]  ;;  %v2126_v40 = vrot.slane %v1749_v46, 2  ;;  %v2632_v52 = vsel %vm1786_vm11, %v2631_v62, %v2630_v43  ;;  %v2483_v20 = vld [vmem:[#allocation2 + $0xce] sm:$0x1]  ;;  %v2596_v53 = vrot.slane %v2482_v4, 6 }
 0x3bb   :  { %v1743_v56 = vld [vmem:[#allocation2 + $0x1a] sm:$0x1]  ;;  %v2128_v36 = vrot.slane %v1750_v48, 1  ;;  %v2484_v59 = vld [vmem:[#allocation2 + $0x10e] sm:$0x1]  ;;  %v7109_v42 = vpack.i.bf16 %v2632_v52, %v9521_v14  ;;  %v2598_v63 = vrot.slane %v2483_v20, 5 }
 0x3bc   :  { %v2117_v17 = vsel %vm1768_vm5, %v2116_v6, %v1743_v56  ;;  %v2485_v21 = vld [vmem:[#allocation2 + $0x14e] sm:$0x1]  ;;  %v2600_v19 = vrot.slane %v2484_v59, 4  ;;  %v1736_v3 = vld [vmem:[#allocation2 + $0x59] sm:$0x1] }
 0x3bd   :  { %v2119_v30 = vsel %vm1771_vm6, %v2118_v23, %v2117_v17  ;;  %v2486_v27 = vld [vmem:[#allocation2 + $0x18e] sm:$0x1]  ;;  %v2602_v24 = vrot.slane %v2485_v21, 3  ;;  %7110 = vrot.lane.b32.xlu2 %v7109_v42, %s7280_s27  ;;  %v1737_v32 = vld [vmem:[#allocation2 + $0x99] sm:$0x1]  ;;  %v2091_v5 = vrot.slane %v1736_v3, 7 }
 0x3be   :  { %v2121_v28 = vsel %vm1774_vm7, %v2120_v26, %v2119_v30  ;;  %v2487_v0 = vld [vmem:[#allocation2 + $0x1ce] sm:$0x1]  ;;  %v2604_v12 = vrot.slane %v2486_v27, 2  ;;  %v1738_v51 = vld [vmem:[#allocation2 + $0xd9] sm:$0x1]  ;;  %v2093_v8 = vrot.slane %v1737_v32, 6 }
 0x3bf   :  { %v2123_v37 = vsel %vm1777_vm8, %v2122_v2, %v2121_v28  ;;  %v2480_v49 = vld [vmem:[#allocation2 + $0xe] sm:$0x1]  ;;  %v2606_v35 = vrot.slane %v2487_v0, 1  ;;  %v1739_v34 = vld [vmem:[#allocation2 + $0x119] sm:$0x1]  ;;  %v2095_v61 = vrot.slane %v1738_v51, 5 }
 0x3c0   :  { %v2125_v39 = vsel %vm1780_vm9, %v2124_v13, %v2123_v37  ;;  %v2595_v57 = vsel %vm1768_vm5, %v2594_v15, %v2480_v49  ;;  %v1740_v41 = vld [vmem:[#allocation2 + $0x159] sm:$0x1]  ;;  %v2097_v62 = vrot.slane %v1739_v34, 4  ;;  %v2213_v46 = vld [vmem:[#allocation2 + $0x55] sm:$0x1] }
 0x3c1   :  { %v2127_v25 = vsel %vm1783_vm10, %v2126_v40, %v2125_v39  ;;  %v2597_v1 = vsel %vm1771_vm6, %v2596_v53, %v2595_v57  ;;  %v1741_v54 = vld [vmem:[#allocation2 + $0x199] sm:$0x1]  ;;  %v2099_v45 = vrot.slane %v1740_v41, 3  ;;  %v2214_v7 = vld [vmem:[#allocation2 + $0x95] sm:$0x1]  ;;  %v2381_v17 = vrot.slane %v2213_v46, 7 }
 0x3c2   :  { %v9538_v58 = vsel %vm1786_vm11, %v2128_v36, %v2127_v25  ;;  %v2599_v16 = vsel %vm1774_vm7, %v2598_v63, %v2597_v1  ;;  %v1742_v18 = vld [vmem:[#allocation2 + $0x1d9] sm:$0x1]  ;;  %v2101_v10 = vrot.slane %v1741_v54, 2  ;;  %v2215_v23 = vld [vmem:[#allocation2 + $0xd5] sm:$0x1]  ;;  %v2383_v40 = vrot.slane %v2214_v7, 6 }
 0x3c3   :  { %v2601_v50 = vsel %vm1777_vm8, %v2600_v19, %v2599_v16  ;;  %v1735_v44 = vld [vmem:[#allocation2 + $0x19] sm:$0x1]  ;;  %v2103_v31 = vrot.slane %v1742_v18, 1  ;;  %v2216_v22 = vld [vmem:[#allocation2 + $0x115] sm:$0x1]  ;;  %v2385_v52 = vrot.slane %v2215_v23, 5 }
 0x3c4   :  { %v2603_v11 = vsel %vm1780_vm9, %v2602_v24, %v2601_v50  ;;  %v2092_v47 = vsel %vm1768_vm5, %v2091_v5, %v1735_v44  ;;  %v2217_v56 = vld [vmem:[#allocation2 + $0x155] sm:$0x1]  ;;  %v2387_v30 = vrot.slane %v2216_v22, 4  ;;  %v2505_v20 = vld [vmem:[#allocation2 + $0x57] sm:$0x1] }
 0x3c5   :  { %v2605_v48 = vsel %vm1783_vm10, %v2604_v12, %v2603_v11  ;;  %v2094_v6 = vsel %vm1771_vm6, %v2093_v8, %v2092_v47  ;;  %v2218_v13 = vld [vmem:[#allocation2 + $0x195] sm:$0x1]  ;;  %v2389_v42 = vrot.slane %v2217_v56, 3  ;;  %v2504_v27 = vld [vmem:[#allocation2 + $0x17] sm:$0x1]  ;;  %v2673_v24 = vrot.slane %v2505_v20, 7 }
 0x3c6   :  { %v2607_v26 = vsel %vm1786_vm11, %v2606_v35, %v2605_v48  ;;  %v2096_v2 = vsel %vm1774_vm7, %v2095_v61, %v2094_v6  ;;  %v2219_v43 = vld [vmem:[#allocation2 + $0x1d5] sm:$0x1]  ;;  %v2391_v28 = vrot.slane %v2218_v13, 2  ;;  %v2506_v0 = vld [vmem:[#allocation2 + $0x97] sm:$0x1] }
 0x3c7   :  { %v7104_v36 = vpack.i.bf16 %v2607_v26, %v9538_v58  ;;  %v2098_v9 = vsel %vm1777_vm8, %v2097_v62, %v2096_v2  ;;  %v2212_v4 = vld [vmem:[#allocation2 + $0x15] sm:$0x1]  ;;  %v2507_v15 = vld [vmem:[#allocation2 + $0xd7] sm:$0x1]  ;;  %v2393_v49 = vrot.slane %v2219_v43, 1  ;;  %v2675_v3 = vrot.slane %v2506_v0, 6 }
 0x3c8   :  { %v2100_v59 = vsel %vm1780_vm9, %v2099_v45, %v2098_v9  ;;  %v2382_v21 = vsel %vm1768_vm5, %v2381_v17, %v2212_v4  ;;  %v2508_v63 = vld [vmem:[#allocation2 + $0x117] sm:$0x1]  ;;  %v2677_v32 = vrot.slane %v2507_v15, 5  ;;  %v2674_v51 = vsel %vm1768_vm5, %v2673_v24, %v2504_v27  ;;  %v2205_v41 = vld [vmem:[#allocation2 + $0x54] sm:$0x1] }
 0x3c9   :  { %7105 = vrot.lane.b32.xlu1 %v7104_v36, %s7279_s2  ;;  %v2102_v53 = vsel %vm1783_vm10, %v2101_v10, %v2100_v59  ;;  %v2384_v37 = vsel %vm1771_vm6, %v2383_v40, %v2382_v21  ;;  %v2509_v19 = vld [vmem:[#allocation2 + $0x157] sm:$0x1]  ;;  %v2679_v34 = vrot.slane %v2508_v63, 4  ;;  %v2676_v54 = vsel %vm1771_vm6, %v2675_v3, %v2674_v51  ;;  %v2204_v8 = vld [vmem:[#allocation2 + $0x14] sm:$0x1] }
 0x3ca   :  { %v2104_v39 = vsel %vm1786_vm11, %v2103_v31, %v2102_v53  ;;  %v2386_v57 = vsel %vm1774_vm7, %v2385_v52, %v2384_v37  ;;  %v2510_v12 = vld [vmem:[#allocation2 + $0x197] sm:$0x1]  ;;  %v2681_v18 = vrot.slane %v2509_v19, 3  ;;  %v2206_v50 = vld [vmem:[#allocation2 + $0x94] sm:$0x1]  ;;  %v2356_v47 = vrot.slane %v2205_v41, 7 }
 0x3cb   :  { %v2511_v35 = vld [vmem:[#allocation2 + $0x1d7] sm:$0x1]  ;;  %v7099_v25 = vpack.i.bf16 %v9362_v55, %v2104_v39  ;;  %v2388_v1 = vsel %vm1777_vm8, %v2387_v30, %v2386_v57  ;;  %v2683_v5 = vrot.slane %v2510_v12, 2  ;;  %v2207_v44 = vld [vmem:[#allocation2 + $0xd4] sm:$0x1]  ;;  %v2678_v55 = vsel %vm1774_vm7, %v2677_v32, %v2676_v54 }
 0x3cc   :  { %v2390_v16 = vsel %vm1780_vm9, %v2389_v42, %v2388_v1  ;;  %v2685_v62 = vrot.slane %v2511_v35, 1  ;;  %v2208_v45 = vld [vmem:[#allocation2 + $0x114] sm:$0x1]  ;;  %v2680_v31 = vsel %vm1777_vm8, %v2679_v34, %v2678_v55  ;;  %v2358_v48 = vrot.slane %v2206_v50, 6  ;;  %v2497_v2 = vld [vmem:[#allocation2 + $0x56] sm:$0x1] }
 0x3cd   :  { %7100 = vrot.lane.b32.xlu0 %v7099_v25, %s7281_s28  ;;  %v2392_v61 = vsel %vm1783_vm10, %v2391_v28, %v2390_v16  ;;  %v2209_v11 = vld [vmem:[#allocation2 + $0x154] sm:$0x1]  ;;  %v2360_v6 = vrot.slane %v2207_v44, 5  ;;  %v2682_v23 = vsel %vm1780_vm9, %v2681_v18, %v2680_v31  ;;  %v2357_v22 = vsel %vm1768_vm5, %v2356_v47, %v2204_v8  ;;  %v2498_v36 = vld [vmem:[#allocation2 + $0x96] sm:$0x1] }
 0x3ce   :  { %v2394_v10 = vsel %vm1786_vm11, %v2393_v49, %v2392_v61  ;;  %v2210_v46 = vld [vmem:[#allocation2 + $0x194] sm:$0x1]  ;;  %v2362_v56 = vrot.slane %v2208_v45, 4  ;;  %v2364_v26 = vrot.slane %v2209_v11, 3  ;;  %v2684_v13 = vsel %vm1783_vm10, %v2683_v5, %v2682_v23  ;;  %v2499_v9 = vld [vmem:[#allocation2 + $0xd6] sm:$0x1] }
 0x3cf   :  { %v2211_v7 = vld [vmem:[#allocation2 + $0x1d4] sm:$0x1]  ;;  %v2359_v43 = vsel %vm1771_vm6, %v2358_v48, %v2357_v22  ;;  %v2366_v17 = vrot.slane %v2210_v46, 2  ;;  %v2686_v4 = vsel %vm1786_vm11, %v2685_v62, %v2684_v13  ;;  %v2500_v30 = vld [vmem:[#allocation2 + $0x116] sm:$0x1]  ;;  %v7114_v21 = vpack.i.bf16 %v2394_v10, %v9484_v33 }
 0x3d0   :  { %v2368_v40 = vrot.slane %v2211_v7, 1  ;;  %v2361_v52 = vsel %vm1774_vm7, %v2360_v6, %v2359_v43  ;;  %v2501_v20 = vld [vmem:[#allocation2 + $0x156] sm:$0x1]  ;;  %v7124_v42 = vpack.i.bf16 %v2686_v4, %v2394_v10  ;;  %v2648_v15 = vrot.slane %v2497_v2, 7  ;;  %v2229_v24 = vld [vmem:[#allocation2 + $0x5d] sm:$0x1] }
 0x3d1   :  { %v2502_v59 = vld [vmem:[#allocation2 + $0x196] sm:$0x1]  ;;  %v2363_v28 = vsel %vm1777_vm8, %v2362_v56, %v2361_v52  ;;  %v2650_v53 = vrot.slane %v2498_v36, 6  ;;  %v2652_v49 = vrot.slane %v2499_v9, 5  ;;  %v2654_v63 = vrot.slane %v2500_v30, 4 }
 0x3d2   :  { %v2496_v27 = vld [vmem:[#allocation2 + $0x16] sm:$0x1]  ;;  %v2365_v37 = vsel %vm1780_vm9, %v2364_v26, %v2363_v28  ;;  %v2656_v19 = vrot.slane %v2501_v20, 3  ;;  %7125 = vrot.lane.b32.xlu2 %v7124_v42, %s7280_s27  ;;  %v2658_v33 = vrot.slane %v2502_v59, 2  ;;  %v2230_v35 = vld [vmem:[#allocation2 + $0x9d] sm:$0x1] }
 0x3d3   :  { %v2503_v0 = vld [vmem:[#allocation2 + $0x1d6] sm:$0x1]  ;;  %v2367_v39 = vsel %vm1783_vm10, %v2366_v17, %v2365_v37  ;;  %v2649_v57 = vsel %vm1768_vm5, %v2648_v15, %v2496_v27  ;;  %v2231_v3 = vld [vmem:[#allocation2 + $0xdd] sm:$0x1]  ;;  %v2435_v54 = vrot.slane %v2229_v24, 7  ;;  %v2437_v18 = vrot.slane %v2230_v35, 6 }
 0x3d4   :  { %v2660_v12 = vrot.slane %v2503_v0, 1  ;;  %v2651_v32 = vsel %vm1771_vm6, %v2650_v53, %v2649_v57  ;;  %v2232_v25 = vld [vmem:[#allocation2 + $0x11d] sm:$0x1]  ;;  %v9582_v34 = vsel %vm1786_vm11, %v2368_v40, %v2367_v39  ;;  %v2439_v50 = vrot.slane %v2231_v3, 5  ;;  %v2521_v47 = vld [vmem:[#allocation2 + $0x5f] sm:$0x1] }
 0x3d5   :  { %7115 = vrot.lane.b32.xlu0 %v7114_v21, %s7281_s28  ;;  %v2233_v1 = vld [vmem:[#allocation2 + $0x15d] sm:$0x1]  ;;  %v2653_v41 = vsel %vm1774_vm7, %v2652_v49, %v2651_v32  ;;  %v2441_v44 = vrot.slane %v2232_v25, 4  ;;  %v2522_v10 = vld [vmem:[#allocation2 + $0x9f] sm:$0x1]  ;;  %v2727_v2 = vrot.slane %v2521_v47, 7 }
 0x3d6   :  { %v2234_v51 = vld [vmem:[#allocation2 + $0x19d] sm:$0x1]  ;;  %v2655_v5 = vsel %vm1777_vm8, %v2654_v63, %v2653_v41  ;;  %v2443_v61 = vrot.slane %v2233_v1, 3  ;;  %v2523_v7 = vld [vmem:[#allocation2 + $0xdf] sm:$0x1]  ;;  %v2729_v13 = vrot.slane %v2522_v10, 6 }
 0x3d7   :  { %v2235_v16 = vld [vmem:[#allocation2 + $0x1dd] sm:$0x1]  ;;  %v2657_v55 = vsel %vm1780_vm9, %v2656_v19, %v2655_v5  ;;  %v2445_v45 = vrot.slane %v2234_v51, 2  ;;  %v2524_v48 = vld [vmem:[#allocation2 + $0x11f] sm:$0x1]  ;;  %v2731_v36 = vrot.slane %v2523_v7, 5 }
 0x3d8   :  { %v2228_v8 = vld [vmem:[#allocation2 + $0x1d] sm:$0x1]  ;;  %v2447_v11 = vrot.slane %v2235_v16, 1  ;;  %v2659_v31 = vsel %vm1783_vm10, %v2658_v33, %v2657_v55  ;;  %v2525_v6 = vld [vmem:[#allocation2 + $0x15f] sm:$0x1]  ;;  %v2733_v9 = vrot.slane %v2524_v48, 4 }
 0x3d9   :  { %v2436_v62 = vsel %vm1768_vm5, %v2435_v54, %v2228_v8  ;;  %v2661_v23 = vsel %vm1786_vm11, %v2660_v12, %v2659_v31  ;;  %v2526_v56 = vld [vmem:[#allocation2 + $0x19f] sm:$0x1]  ;;  %v2221_v4 = vld [vmem:[#allocation2 + $0x5c] sm:$0x1]  ;;  %v2735_v20 = vrot.slane %v2525_v6, 3 }
 0x3da   :  { %v2438_v46 = vsel %vm1771_vm6, %v2437_v18, %v2436_v62  ;;  %v2527_v26 = vld [vmem:[#allocation2 + $0x1df] sm:$0x1]  ;;  %v7119_v43 = vpack.i.bf16 %v2661_v23, %v9582_v34  ;;  %v2737_v59 = vrot.slane %v2526_v56, 2  ;;  %v2220_v21 = vld [vmem:[#allocation2 + $0x1c] sm:$0x1]  ;;  %v2410_v49 = vrot.slane %v2221_v4, 7 }
 0x3db   :  { %v2440_v22 = vsel %vm1774_vm7, %v2439_v50, %v2438_v46  ;;  %v2520_v40 = vld [vmem:[#allocation2 + $0x1f] sm:$0x1]  ;;  %v2222_v42 = vld [vmem:[#allocation2 + $0x9c] sm:$0x1]  ;;  %v2739_v15 = vrot.slane %v2527_v26, 1 }
 0x3dc   :  { %v2442_v17 = vsel %vm1777_vm8, %v2441_v44, %v2440_v22  ;;  %v2728_v30 = vsel %vm1768_vm5, %v2727_v2, %v2520_v40  ;;  %v2223_v28 = vld [vmem:[#allocation2 + $0xdc] sm:$0x1]  ;;  %7120 = vrot.lane.b32.xlu1 %v7119_v43, %s7279_s2  ;;  %v2412_v57 = vrot.slane %v2222_v42, 6  ;;  %v2411_v35 = vsel %vm1768_vm5, %v2410_v49, %v2220_v21  ;;  %v2513_v25 = vld [vmem:[#allocation2 + $0x5e] sm:$0x1] }
 0x3dd   :  { %v2444_v52 = vsel %vm1780_vm9, %v2443_v61, %v2442_v17  ;;  %v2730_v0 = vsel %vm1771_vm6, %v2729_v13, %v2728_v30  ;;  %v2224_v53 = vld [vmem:[#allocation2 + $0x11c] sm:$0x1]  ;;  %v2414_v33 = vrot.slane %v2223_v28, 5  ;;  %v2514_v54 = vld [vmem:[#allocation2 + $0x9e] sm:$0x1]  ;;  %v2702_v10 = vrot.slane %v2513_v25, 7 }
 0x3de   :  { %v2446_v27 = vsel %vm1783_vm10, %v2445_v45, %v2444_v52  ;;  %v2225_v37 = vld [vmem:[#allocation2 + $0x15c] sm:$0x1]  ;;  %v2732_v19 = vsel %vm1774_vm7, %v2731_v36, %v2730_v0  ;;  %v2416_v3 = vrot.slane %v2224_v53, 4  ;;  %v2413_v51 = vsel %vm1771_vm6, %v2412_v57, %v2411_v35  ;;  %v2515_v18 = vld [vmem:[#allocation2 + $0xde] sm:$0x1] }
 0x3df   :  { %v2448_v63 = vsel %vm1786_vm11, %v2447_v11, %v2446_v27  ;;  %v2226_v24 = vld [vmem:[#allocation2 + $0x19c] sm:$0x1]  ;;  %v2734_v12 = vsel %vm1777_vm8, %v2733_v9, %v2732_v19  ;;  %v2418_v32 = vrot.slane %v2225_v37, 3  ;;  %v2415_v8 = vsel %vm1774_vm7, %v2414_v33, %v2413_v51  ;;  %v2516_v50 = vld [vmem:[#allocation2 + $0x11e] sm:$0x1] }
 0x3e0   :  { %v2227_v39 = vld [vmem:[#allocation2 + $0x1dc] sm:$0x1]  ;;  %v2736_v1 = vsel %vm1780_vm9, %v2735_v20, %v2734_v12  ;;  %v2420_v41 = vrot.slane %v2226_v24, 2  ;;  %v2517_v44 = vld [vmem:[#allocation2 + $0x15e] sm:$0x1]  ;;  %v7129_v55 = vpack.i.bf16 %v2448_v63, %v9521_v14  ;;  %v2417_v45 = vsel %vm1777_vm8, %v2416_v3, %v2415_v8 }
 0x3e1   :  { %v2422_v16 = vrot.slane %v2227_v39, 1  ;;  %v2738_v5 = vsel %vm1783_vm10, %v2737_v59, %v2736_v1  ;;  %v2518_v61 = vld [vmem:[#allocation2 + $0x19e] sm:$0x1]  ;;  %v2704_v31 = vrot.slane %v2514_v54, 6  ;;  %v2419_v7 = vsel %vm1780_vm9, %v2418_v32, %v2417_v45  ;;  %v2782_v23 = vld [vmem:[#allocation2 + $0x63] sm:$0x1] }
 0x3e2   :  { %v2740_v62 = vsel %vm1786_vm11, %v2739_v15, %v2738_v5  ;;  %v2512_v11 = vld [vmem:[#allocation2 + $0x1e] sm:$0x1]  ;;  %v2706_v48 = vrot.slane %v2515_v18, 5  ;;  %v2708_v6 = vrot.slane %v2516_v50, 4  ;;  %7130 = vrot.lane.b32.xlu0 %v7129_v55, %s7281_s28  ;;  %v2783_v22 = vld [vmem:[#allocation2 + $0xa3] sm:$0x1]  ;;  %v2421_v56 = vsel %vm1783_vm10, %v2420_v41, %v2419_v7 }
 0x3e3   :  { %v2519_v47 = vld [vmem:[#allocation2 + $0x1de] sm:$0x1]  ;;  %v7139_v46 = vpack.i.bf16 %v2740_v62, %v2448_v63  ;;  %v2703_v14 = vsel %vm1768_vm5, %v2702_v10, %v2512_v11  ;;  %v2710_v26 = vrot.slane %v2517_v44, 3  ;;  %v2712_v2 = vrot.slane %v2518_v61, 2  ;;  %v2781_v13 = vld [vmem:[#allocation2 + $0x23] sm:$0x1] }
 0x3e4   :  { %v2784_v43 = vld [vmem:[#allocation2 + $0xe3] sm:$0x1]  ;;  %v9616_v40 = vsel %vm1786_vm11, %v2422_v16, %v2421_v56  ;;  %v2705_v36 = vsel %vm1771_vm6, %v2704_v31, %v2703_v14  ;;  %v2714_v9 = vrot.slane %v2519_v47, 1  ;;  %v2903_v30 = vrot.slane %v2782_v23, 7  ;;  %v3032_v37 = vld [vmem:[#allocation2 + $0x25] sm:$0x1] }
 0x3e5   :  { %v2785_v17 = vld [vmem:[#allocation2 + $0x123] sm:$0x1]  ;;  %7140 = vrot.lane.b32.xlu2 %v7139_v46, %s7280_s27  ;;  %v2707_v20 = vsel %vm1774_vm7, %v2706_v48, %v2705_v36  ;;  %v2905_v21 = vrot.slane %v2783_v22, 6  ;;  %v2907_v42 = vrot.slane %v2784_v43, 5  ;;  %v3033_v49 = vld [vmem:[#allocation2 + $0x65] sm:$0x1] }
 0x3e6   :  { %v2786_v4 = vld [vmem:[#allocation2 + $0x163] sm:$0x1]  ;;  %v2909_v28 = vrot.slane %v2785_v17, 4  ;;  %v2709_v27 = vsel %vm1777_vm8, %v2708_v6, %v2707_v20  ;;  %v2904_v0 = vsel %vm1768_vm5, %v2903_v30, %v2781_v13  ;;  %v3034_v39 = vld [vmem:[#allocation2 + $0xa5] sm:$0x1]  ;;  %v3093_v33 = vrot.slane %v3033_v49, 7 }
 0x3e7   :  { %v2787_v52 = vld [vmem:[#allocation2 + $0x1a3] sm:$0x1]  ;;  %v2911_v15 = vrot.slane %v2786_v4, 3  ;;  %v2711_v63 = vsel %vm1780_vm9, %v2710_v26, %v2709_v27  ;;  %v2906_v19 = vsel %vm1771_vm6, %v2905_v21, %v2904_v0  ;;  %v3035_v57 = vld [vmem:[#allocation2 + $0xe5] sm:$0x1]  ;;  %v3095_v54 = vrot.slane %v3034_v39, 6 }
 0x3e8   :  { %v2788_v59 = vld [vmem:[#allocation2 + $0x1e3] sm:$0x1]  ;;  %v2913_v53 = vrot.slane %v2787_v52, 2  ;;  %v2713_v12 = vsel %vm1783_vm10, %v2712_v2, %v2711_v63  ;;  %v2908_v35 = vsel %vm1774_vm7, %v2907_v42, %v2906_v19  ;;  %v3036_v3 = vld [vmem:[#allocation2 + $0x125] sm:$0x1]  ;;  %v3094_v16 = vsel %vm1768_vm5, %v3093_v33, %v3032_v37 }
 0x3e9   :  { %v2915_v24 = vrot.slane %v2788_v59, 1  ;;  %v3037_v32 = vld [vmem:[#allocation2 + $0x165] sm:$0x1]  ;;  %v2715_v1 = vsel %vm1786_vm11, %v2714_v9, %v2713_v12  ;;  %v2910_v51 = vsel %vm1777_vm8, %v2909_v28, %v2908_v35  ;;  %v3097_v8 = vrot.slane %v3035_v57, 5  ;;  %v2774_v44 = vld [vmem:[#allocation2 + $0x62] sm:$0x1] }
 0x3ea   :  { %v3038_v25 = vld [vmem:[#allocation2 + $0x1a5] sm:$0x1]  ;;  %v7134_v18 = vpack.i.bf16 %v2715_v1, %v9616_v40  ;;  %v2912_v5 = vsel %vm1780_vm9, %v2911_v15, %v2910_v51  ;;  %v3099_v50 = vrot.slane %v3036_v3, 4  ;;  %v2775_v61 = vld [vmem:[#allocation2 + $0xa2] sm:$0x1]  ;;  %v3096_v62 = vsel %vm1771_vm6, %v3095_v54, %v3094_v16 }
 0x3eb   :  { %v3039_v41 = vld [vmem:[#allocation2 + $0x1e5] sm:$0x1]  ;;  %v2914_v55 = vsel %vm1783_vm10, %v2913_v53, %v2912_v5  ;;  %v3101_v45 = vrot.slane %v3037_v32, 3  ;;  %v3103_v11 = vrot.slane %v3038_v25, 2  ;;  %v2773_v47 = vld [vmem:[#allocation2 + $0x22] sm:$0x1]  ;;  %v3098_v7 = vsel %vm1774_vm7, %v3097_v8, %v3096_v62 }
 0x3ec   :  { %v2776_v10 = vld [vmem:[#allocation2 + $0xe2] sm:$0x1]  ;;  %7135 = vrot.lane.b32.xlu1 %v7134_v18, %s7279_s2  ;;  %v9635_v46 = vsel %vm1786_vm11, %v2915_v24, %v2914_v55  ;;  %v3105_v48 = vrot.slane %v3039_v41, 1  ;;  %v2878_v22 = vrot.slane %v2774_v44, 7  ;;  %v3100_v56 = vsel %vm1777_vm8, %v3099_v50, %v3098_v7  ;;  %v3024_v4 = vld [vmem:[#allocation2 + $0x24] sm:$0x1] }
 0x3ed   :  { %v2777_v31 = vld [vmem:[#allocation2 + $0x122] sm:$0x1]  ;;  %v2880_v26 = vrot.slane %v2775_v61, 6  ;;  %v2882_v2 = vrot.slane %v2776_v10, 5  ;;  %v3102_v43 = vsel %vm1780_vm9, %v3101_v45, %v3100_v56  ;;  %v3025_v52 = vld [vmem:[#allocation2 + $0x64] sm:$0x1] }
 0x3ee   :  { %v2778_v6 = vld [vmem:[#allocation2 + $0x162] sm:$0x1]  ;;  %v2884_v13 = vrot.slane %v2777_v31, 4  ;;  %v2879_v17 = vsel %vm1768_vm5, %v2878_v22, %v2773_v47  ;;  %v3104_v30 = vsel %vm1783_vm10, %v3103_v11, %v3102_v43  ;;  %v3026_v21 = vld [vmem:[#allocation2 + $0xa4] sm:$0x1]  ;;  %v3068_v28 = vrot.slane %v3025_v52, 7 }
 0x3ef   :  { %v2779_v23 = vld [vmem:[#allocation2 + $0x1a2] sm:$0x1]  ;;  %v2886_v36 = vrot.slane %v2778_v6, 3  ;;  %v2881_v20 = vsel %vm1771_vm6, %v2880_v26, %v2879_v17  ;;  %v3027_v42 = vld [vmem:[#allocation2 + $0xe4] sm:$0x1]  ;;  %v9644_v27 = vsel %vm1786_vm11, %v3105_v48, %v3104_v30  ;;  %v3070_v24 = vrot.slane %v3026_v21, 6 }
 0x3f0   :  { %v2780_v14 = vld [vmem:[#allocation2 + $0x1e2] sm:$0x1]  ;;  %v2888_v9 = vrot.slane %v2779_v23, 2  ;;  %v2883_v0 = vsel %vm1774_vm7, %v2882_v2, %v2881_v20  ;;  %v3028_v15 = vld [vmem:[#allocation2 + $0x124] sm:$0x1]  ;;  %v7154_v49 = vpack.i.bf16 %v9644_v27, %v9635_v46  ;;  %v3069_v19 = vsel %vm1768_vm5, %v3068_v28, %v3024_v4 }
 0x3f1   :  { %v2890_v59 = vrot.slane %v2780_v14, 1  ;;  %v3029_v53 = vld [vmem:[#allocation2 + $0x164] sm:$0x1]  ;;  %v2885_v63 = vsel %vm1777_vm8, %v2884_v13, %v2883_v0  ;;  %v3072_v33 = vrot.slane %v3027_v42, 5  ;;  %v3074_v12 = vrot.slane %v3028_v15, 4 }
 0x3f2   :  { %v3030_v37 = vld [vmem:[#allocation2 + $0x1a4] sm:$0x1]  ;;  %v2887_v39 = vsel %vm1780_vm9, %v2886_v36, %v2885_v63  ;;  %v2766_v35 = vld [vmem:[#allocation2 + $0x61] sm:$0x1]  ;;  %7155 = vrot.lane.b32.xlu2 %v7154_v49, %s7280_s27  ;;  %v3071_v32 = vsel %vm1771_vm6, %v3070_v24, %v3069_v19  ;;  %v3076_v25 = vrot.slane %v3029_v53, 3 }
 0x3f3   :  { %v3031_v57 = vld [vmem:[#allocation2 + $0x1e4] sm:$0x1]  ;;  %v2889_v3 = vsel %vm1783_vm10, %v2888_v9, %v2887_v39  ;;  %v3078_v1 = vrot.slane %v3030_v37, 2  ;;  %v2767_v51 = vld [vmem:[#allocation2 + $0xa1] sm:$0x1]  ;;  %v3073_v16 = vsel %vm1774_vm7, %v3072_v33, %v3071_v32  ;;  %v2853_v44 = vrot.slane %v2766_v35, 7 }
 0x3f4   :  { %v2768_v41 = vld [vmem:[#allocation2 + $0xe1] sm:$0x1]  ;;  %v3075_v8 = vsel %vm1777_vm8, %v3074_v12, %v3073_v16  ;;  %v3080_v50 = vrot.slane %v3031_v57, 1  ;;  %v2855_v61 = vrot.slane %v2767_v51, 6  ;;  %v9658_v55 = vsel %vm1786_vm11, %v2890_v59, %v2889_v3  ;;  %v2815_v23 = vld [vmem:[#allocation2 + $0x6b] sm:$0x1] }
 0x3f5   :  { %v2769_v54 = vld [vmem:[#allocation2 + $0x121] sm:$0x1]  ;;  %v3077_v62 = vsel %vm1780_vm9, %v3076_v25, %v3075_v8  ;;  %v2857_v47 = vrot.slane %v2768_v41, 5  ;;  %v2816_v22 = vld [vmem:[#allocation2 + $0xab] sm:$0x1]  ;;  %v3001_v4 = vrot.slane %v2815_v23, 7 }
 0x3f6   :  { %v2770_v18 = vld [vmem:[#allocation2 + $0x161] sm:$0x1]  ;;  %v2859_v10 = vrot.slane %v2769_v54, 4  ;;  %v3079_v31 = vsel %vm1783_vm10, %v3078_v1, %v3077_v62  ;;  %v2817_v26 = vld [vmem:[#allocation2 + $0xeb] sm:$0x1]  ;;  %v3003_v52 = vrot.slane %v2816_v22, 6 }
 0x3f7   :  { %v2771_v5 = vld [vmem:[#allocation2 + $0x1a1] sm:$0x1]  ;;  %v2861_v48 = vrot.slane %v2770_v18, 3  ;;  %v9664_v56 = vsel %vm1786_vm11, %v3080_v50, %v3079_v31  ;;  %v2818_v2 = vld [vmem:[#allocation2 + $0x12b] sm:$0x1]  ;;  %v3005_v21 = vrot.slane %v2817_v26, 5 }
 0x3f8   :  { %v2765_v45 = vld [vmem:[#allocation2 + $0x21] sm:$0x1]  ;;  %v2863_v6 = vrot.slane %v2771_v5, 2  ;;  %v2819_v13 = vld [vmem:[#allocation2 + $0x16b] sm:$0x1]  ;;  %v7149_v43 = vpack.i.bf16 %v9664_v56, %v9658_v55  ;;  %v3007_v42 = vrot.slane %v2818_v2, 4 }
 0x3f9   :  { %v2772_v11 = vld [vmem:[#allocation2 + $0x1e1] sm:$0x1]  ;;  %v2854_v7 = vsel %vm1768_vm5, %v2853_v44, %v2765_v45  ;;  %v2814_v36 = vld [vmem:[#allocation2 + $0x2b] sm:$0x1]  ;;  %v3009_v15 = vrot.slane %v2819_v13, 3 }
 0x3fa   :  { %v2856_v14 = vsel %vm1771_vm6, %v2855_v61, %v2854_v7  ;;  %v2820_v9 = vld [vmem:[#allocation2 + $0x1ab] sm:$0x1]  ;;  %v2865_v20 = vrot.slane %v2772_v11, 1  ;;  %7150 = vrot.lane.b32.xlu1 %v7149_v43, %s7279_s2  ;;  %v3002_v0 = vsel %vm1768_vm5, %v3001_v4, %v2814_v36  ;;  %v3049_v37 = vld [vmem:[#allocation2 + $0x6d] sm:$0x1] }
 0x3fb   :  { %v2858_v17 = vsel %vm1774_vm7, %v2857_v47, %v2856_v14  ;;  %v2821_v59 = vld [vmem:[#allocation2 + $0x1eb] sm:$0x1]  ;;  %v3011_v53 = vrot.slane %v2820_v9, 2  ;;  %v3050_v49 = vld [vmem:[#allocation2 + $0xad] sm:$0x1]  ;;  %v3004_v19 = vsel %vm1771_vm6, %v3003_v52, %v3002_v0  ;;  %v3147_v32 = vrot.slane %v3049_v37, 7 }
 0x3fc   :  { %v2860_v30 = vsel %vm1777_vm8, %v2859_v10, %v2858_v17  ;;  %v3051_v24 = vld [vmem:[#allocation2 + $0xed] sm:$0x1]  ;;  %v3006_v12 = vsel %vm1774_vm7, %v3005_v21, %v3004_v19  ;;  %v3149_v25 = vrot.slane %v3050_v49, 6  ;;  %v3013_v41 = vrot.slane %v2821_v59, 1  ;;  %v2807_v18 = vld [vmem:[#allocation2 + $0x6a] sm:$0x1] }
 0x3fd   :  { %v2862_v28 = vsel %vm1780_vm9, %v2861_v48, %v2860_v30  ;;  %v3052_v39 = vld [vmem:[#allocation2 + $0x12d] sm:$0x1]  ;;  %v3008_v51 = vsel %vm1777_vm8, %v3007_v42, %v3006_v12  ;;  %v3151_v54 = vrot.slane %v3051_v24, 5  ;;  %v2806_v61 = vld [vmem:[#allocation2 + $0x2a] sm:$0x1]  ;;  %v2976_v7 = vrot.slane %v2807_v18, 7 }
 0x3fe   :  { %v2864_v63 = vsel %vm1783_vm10, %v2863_v6, %v2862_v28  ;;  %v3053_v57 = vld [vmem:[#allocation2 + $0x16d] sm:$0x1]  ;;  %v3010_v5 = vsel %vm1780_vm9, %v3009_v15, %v3008_v51  ;;  %v3153_v50 = vrot.slane %v3052_v39, 4  ;;  %v2808_v62 = vld [vmem:[#allocation2 + $0xaa] sm:$0x1] }
 0x3ff   :  { %v2866_v33 = vsel %vm1786_vm11, %v2865_v20, %v2864_v63  ;;  %v3048_v35 = vld [vmem:[#allocation2 + $0x2d] sm:$0x1]  ;;  %v3155_v44 = vrot.slane %v3053_v57, 3  ;;  %v2809_v45 = vld [vmem:[#allocation2 + $0xea] sm:$0x1]  ;;  %v3012_v11 = vsel %vm1783_vm10, %v3011_v53, %v3010_v5  ;;  %v2978_v14 = vrot.slane %v2808_v62, 6 }
 0x400   :  { %v3054_v3 = vld [vmem:[#allocation2 + $0x1ad] sm:$0x1]  ;;  %v7144_v1 = vpack.i.bf16 %v9635_v46, %v2866_v33  ;;  %v3148_v8 = vsel %vm1768_vm5, %v3147_v32, %v3048_v35  ;;  %v2810_v10 = vld [vmem:[#allocation2 + $0x12a] sm:$0x1]  ;;  %v9687_v26 = vsel %vm1786_vm11, %v3013_v41, %v3012_v11  ;;  %v2977_v13 = vsel %vm1768_vm5, %v2976_v7, %v2806_v61  ;;  %v3041_v17 = vld [vmem:[#allocation2 + $0x6c] sm:$0x1] }
 0x401   :  { %v3055_v16 = vld [vmem:[#allocation2 + $0x1ed] sm:$0x1]  ;;  %v3150_v46 = vsel %vm1771_vm6, %v3149_v25, %v3148_v8  ;;  %v3157_v47 = vrot.slane %v3054_v3, 2  ;;  %v2811_v31 = vld [vmem:[#allocation2 + $0x16a] sm:$0x1]  ;;  %v2980_v43 = vrot.slane %v2809_v45, 5  ;;  %v2979_v9 = vsel %vm1771_vm6, %v2978_v14, %v2977_v13 }
 0x402   :  { %7145 = vrot.lane.b32.xlu0 %v7144_v1, %s7281_s28  ;;  %v3152_v48 = vsel %vm1774_vm7, %v3151_v54, %v3150_v46  ;;  %v3159_v6 = vrot.slane %v3055_v16, 1  ;;  %v2812_v23 = vld [vmem:[#allocation2 + $0x1aa] sm:$0x1]  ;;  %v2982_v4 = vrot.slane %v2810_v10, 4  ;;  %v2984_v52 = vrot.slane %v2811_v31, 3 }
 0x403   :  { %v2813_v22 = vld [vmem:[#allocation2 + $0x1ea] sm:$0x1]  ;;  %v3154_v2 = vsel %vm1777_vm8, %v3153_v50, %v3152_v48  ;;  %v3042_v30 = vld [vmem:[#allocation2 + $0xac] sm:$0x1]  ;;  %v2981_v59 = vsel %vm1774_vm7, %v2980_v43, %v2979_v9  ;;  %v2986_v21 = vrot.slane %v2812_v23, 2  ;;  %v3122_v19 = vrot.slane %v3041_v17, 7 }
 0x404   :  { %v3156_v36 = vsel %vm1780_vm9, %v3155_v44, %v3154_v2  ;;  %v2988_v42 = vrot.slane %v2813_v22, 1  ;;  %v3040_v28 = vld [vmem:[#allocation2 + $0x2c] sm:$0x1]  ;;  %v2983_v37 = vsel %vm1777_vm8, %v2982_v4, %v2981_v59  ;;  %v3124_v24 = vrot.slane %v3042_v30, 6  ;;  %v2799_v12 = vld [vmem:[#allocation2 + $0x69] sm:$0x1] }
 0x405   :  { %v3158_v20 = vsel %vm1783_vm10, %v3157_v47, %v3156_v36  ;;  %v3043_v0 = vld [vmem:[#allocation2 + $0xec] sm:$0x1]  ;;  %v2985_v57 = vsel %vm1780_vm9, %v2984_v52, %v2983_v37  ;;  %v2800_v35 = vld [vmem:[#allocation2 + $0xa9] sm:$0x1]  ;;  %v3123_v32 = vsel %vm1768_vm5, %v3122_v19, %v3040_v28  ;;  %v2951_v50 = vrot.slane %v2799_v12, 7 }
 0x406   :  { %v3044_v15 = vld [vmem:[#allocation2 + $0x12c] sm:$0x1]  ;;  %v9696_v53 = vsel %vm1786_vm11, %v3159_v6, %v3158_v20  ;;  %v2987_v3 = vsel %vm1783_vm10, %v2986_v21, %v2985_v57  ;;  %v3126_v25 = vrot.slane %v3043_v0, 5  ;;  %v2798_v51 = vld [vmem:[#allocation2 + $0x29] sm:$0x1]  ;;  %v3125_v54 = vsel %vm1771_vm6, %v3124_v24, %v3123_v32 }
 0x407   :  { %v3045_v49 = vld [vmem:[#allocation2 + $0x16c] sm:$0x1]  ;;  %v7169_v39 = vpack.i.bf16 %v9696_v53, %v9687_v26  ;;  %v3128_v1 = vrot.slane %v3044_v15, 4  ;;  %v2801_v41 = vld [vmem:[#allocation2 + $0xe9] sm:$0x1]  ;;  %v9707_v44 = vsel %vm1786_vm11, %v2988_v42, %v2987_v3  ;;  %v2953_v46 = vrot.slane %v2800_v35, 6 }
 0x408   :  { %v3046_v63 = vld [vmem:[#allocation2 + $0x1ac] sm:$0x1]  ;;  %v2802_v16 = vld [vmem:[#allocation2 + $0x129] sm:$0x1]  ;;  %v3130_v18 = vrot.slane %v3045_v49, 3  ;;  %v3127_v61 = vsel %vm1774_vm7, %v3126_v25, %v3125_v54  ;;  %v2952_v10 = vsel %vm1768_vm5, %v2951_v50, %v2798_v51  ;;  %v2955_v31 = vrot.slane %v2801_v41, 5 }
 0x409   :  { %v3047_v33 = vld [vmem:[#allocation2 + $0x1ec] sm:$0x1]  ;;  %7170 = vrot.lane.b32.xlu2 %v7169_v39, %s7280_s27  ;;  %v3132_v5 = vrot.slane %v3046_v63, 2  ;;  %v2803_v8 = vld [vmem:[#allocation2 + $0x169] sm:$0x1]  ;;  %v3129_v47 = vsel %vm1777_vm8, %v3128_v1, %v3127_v61  ;;  %v2957_v7 = vrot.slane %v2802_v16, 4  ;;  %v2954_v23 = vsel %vm1771_vm6, %v2953_v46, %v2952_v10 }
 0x40a   :  { %v3134_v62 = vrot.slane %v3047_v33, 1  ;;  %v2804_v45 = vld [vmem:[#allocation2 + $0x1a9] sm:$0x1]  ;;  %v3179_v48 = vld [vmem:[#allocation2 + $0x67] sm:$0x1]  ;;  %v3131_v6 = vsel %vm1780_vm9, %v3130_v18, %v3129_v47  ;;  %v2959_v22 = vrot.slane %v2803_v8, 3  ;;  %v2956_v13 = vsel %vm1774_vm7, %v2955_v31, %v2954_v23 }
 0x40b   :  { %v2805_v11 = vld [vmem:[#allocation2 + $0x1e9] sm:$0x1]  ;;  %v3239_v14 = vrot.slane %v3179_v48, 7  ;;  %v3133_v2 = vsel %vm1783_vm10, %v3132_v5, %v3131_v6  ;;  %v2961_v43 = vrot.slane %v2804_v45, 2  ;;  %v3178_v36 = vld [vmem:[#allocation2 + $0x27] sm:$0x1]  ;;  %v2958_v52 = vsel %vm1777_vm8, %v2957_v7, %v2956_v13 }
 0x40c   :  { %v2963_v17 = vrot.slane %v2805_v11, 1  ;;  %v3180_v9 = vld [vmem:[#allocation2 + $0xa7] sm:$0x1]  ;;  %v9717_v4 = vsel %vm1786_vm11, %v3134_v62, %v3133_v2  ;;  %v2960_v42 = vsel %vm1780_vm9, %v2959_v22, %v2958_v52  ;;  %v3195_v15 = vld [vmem:[#allocation2 + $0x6f] sm:$0x1] }
 0x40d   :  { %v3181_v30 = vld [vmem:[#allocation2 + $0xe7] sm:$0x1]  ;;  %v7164_v21 = vpack.i.bf16 %v9717_v4, %v9707_v44  ;;  %v2962_v37 = vsel %vm1783_vm10, %v2961_v43, %v2960_v42  ;;  %v3196_v49 = vld [vmem:[#allocation2 + $0xaf] sm:$0x1]  ;;  %v3240_v24 = vsel %vm1768_vm5, %v3239_v14, %v3178_v36  ;;  %v3241_v12 = vrot.slane %v3180_v9, 6 }
 0x40e   :  { %v3182_v20 = vld [vmem:[#allocation2 + $0x127] sm:$0x1]  ;;  %v3197_v63 = vld [vmem:[#allocation2 + $0xef] sm:$0x1]  ;;  %v2964_v39 = vsel %vm1786_vm11, %v2963_v17, %v2962_v37  ;;  %v3243_v3 = vrot.slane %v3181_v30, 5  ;;  %v3293_v54 = vrot.slane %v3195_v15, 7 }
 0x40f   :  { %v3183_v59 = vld [vmem:[#allocation2 + $0x167] sm:$0x1]  ;;  %v3198_v19 = vld [vmem:[#allocation2 + $0x12f] sm:$0x1]  ;;  %7165 = vrot.lane.b32.xlu1 %v7164_v21, %s7279_s2  ;;  %v7159_v35 = vpack.i.bf16 %v9687_v26, %v2964_v39  ;;  %v3245_v32 = vrot.slane %v3182_v20, 4  ;;  %v3242_v41 = vsel %vm1771_vm6, %v3241_v12, %v3240_v24  ;;  %v3295_v18 = vrot.slane %v3196_v49, 6 }
 0x410   :  { %v3184_v28 = vld [vmem:[#allocation2 + $0x1a7] sm:$0x1]  ;;  %v3199_v57 = vld [vmem:[#allocation2 + $0x16f] sm:$0x1]  ;;  %v3247_v25 = vrot.slane %v3183_v59, 3  ;;  %v3244_v8 = vsel %vm1774_vm7, %v3243_v3, %v3242_v41  ;;  %v3297_v61 = vrot.slane %v3197_v63, 5  ;;  %v7174_v20 = vpack.i.bf16 %v9696_v53, %v9644_v27 }
 0x411   :  { %v3185_v0 = vld [vmem:[#allocation2 + $0x1e7] sm:$0x1]  ;;  %v3200_v33 = vld [vmem:[#allocation2 + $0x1af] sm:$0x1]  ;;  %v3171_v1 = vld [vmem:[#allocation2 + $0x66] sm:$0x1]  ;;  %7160 = vrot.lane.b32.xlu0 %v7159_v35, %s7281_s28  ;;  %v3246_v26 = vsel %vm1777_vm8, %v3245_v32, %v3244_v8 }
 0x412   :  { %v3201_v51 = vld [vmem:[#allocation2 + $0x1ef] sm:$0x1]  ;;  %v3249_v16 = vrot.slane %v3184_v28, 2  ;;  %v3251_v50 = vrot.slane %v3185_v0, 1  ;;  %v3299_v62 = vrot.slane %v3198_v19, 4  ;;  %v3301_v11 = vrot.slane %v3199_v57, 3 }
 0x413   :  { %v3194_v5 = vld [vmem:[#allocation2 + $0x2f] sm:$0x1]  ;;  %v3170_v46 = vld [vmem:[#allocation2 + $0x26] sm:$0x1]  ;;  %v3214_v47 = vrot.slane %v3171_v1, 7  ;;  %v3248_v10 = vsel %vm1780_vm9, %v3247_v25, %v3246_v26  ;;  %v3303_v7 = vrot.slane %v3200_v33, 2 }
 0x414   :  { %v3294_v45 = vsel %vm1768_vm5, %v3293_v54, %v3194_v5  ;;  %v3305_v48 = vrot.slane %v3201_v51, 1  ;;  %v3172_v6 = vld [vmem:[#allocation2 + $0xa6] sm:$0x1]  ;;  %v3250_v22 = vsel %vm1783_vm10, %v3249_v16, %v3248_v10  ;;  %v3187_v9 = vld [vmem:[#allocation2 + $0x6e] sm:$0x1] }
 0x415   :  { %v3296_v31 = vsel %vm1771_vm6, %v3295_v18, %v3294_v45  ;;  %v3173_v23 = vld [vmem:[#allocation2 + $0xe6] sm:$0x1]  ;;  %v3188_v52 = vld [vmem:[#allocation2 + $0xae] sm:$0x1]  ;;  %v3215_v30 = vsel %vm1768_vm5, %v3214_v47, %v3170_v46  ;;  %v3252_v59 = vsel %vm1786_vm11, %v3251_v50, %v3250_v22  ;;  %v3216_v0 = vrot.slane %v3172_v6, 6 }
 0x416   :  { %v3298_v14 = vsel %vm1774_vm7, %v3297_v61, %v3296_v31  ;;  %v3174_v2 = vld [vmem:[#allocation2 + $0x126] sm:$0x1]  ;;  %v3189_v42 = vld [vmem:[#allocation2 + $0xee] sm:$0x1]  ;;  %v3218_v15 = vrot.slane %v3173_v23, 5  ;;  %v3268_v53 = vrot.slane %v3187_v9, 7 }
 0x417   :  { %v3175_v13 = vld [vmem:[#allocation2 + $0x166] sm:$0x1]  ;;  %v3300_v17 = vsel %vm1777_vm8, %v3299_v62, %v3298_v14  ;;  %v3190_v28 = vld [vmem:[#allocation2 + $0x12e] sm:$0x1]  ;;  %v3220_v19 = vrot.slane %v3174_v2, 4  ;;  %v3217_v27 = vsel %vm1771_vm6, %v3216_v0, %v3215_v30  ;;  %v3270_v12 = vrot.slane %v3188_v52, 6 }
 0x418   :  { %v3176_v43 = vld [vmem:[#allocation2 + $0x1a6] sm:$0x1]  ;;  %v3302_v21 = vsel %vm1780_vm9, %v3301_v11, %v3300_v17  ;;  %v3186_v49 = vld [vmem:[#allocation2 + $0x2e] sm:$0x1]  ;;  %v3222_v24 = vrot.slane %v3175_v13, 3  ;;  %v3219_v25 = vsel %vm1774_vm7, %v3218_v15, %v3217_v27  ;;  %v3272_v51 = vrot.slane %v3189_v42, 5 }
 0x419   :  { %v3177_v36 = vld [vmem:[#allocation2 + $0x1e6] sm:$0x1]  ;;  %v3304_v37 = vsel %vm1783_vm10, %v3303_v7, %v3302_v21  ;;  %v3191_v63 = vld [vmem:[#allocation2 + $0x16e] sm:$0x1]  ;;  %v3224_v39 = vrot.slane %v3176_v43, 2  ;;  %7175 = vrot.lane.b32.xlu0 %v7174_v20, %s7281_s28  ;;  %v3221_v16 = vsel %vm1777_vm8, %v3220_v19, %v3219_v25  ;;  %v3269_v54 = vsel %vm1768_vm5, %v3268_v53, %v3186_v49 }
 0x41a   :  { %v3306_v57 = vsel %vm1786_vm11, %v3305_v48, %v3304_v37  ;;  %v3192_v33 = vld [vmem:[#allocation2 + $0x1ae] sm:$0x1]  ;;  %v3342_v35 = vld [vmem:[#allocation2 + $0x73] sm:$0x1]  ;;  %v3226_v1 = vrot.slane %v3177_v36, 1  ;;  %v3274_v18 = vrot.slane %v3190_v28, 4  ;;  %v3223_v61 = vsel %vm1780_vm9, %v3222_v24, %v3221_v16 }
 0x41b   :  { %v7184_v3 = vpack.i.bf16 %v3306_v57, %v3252_v59  ;;  %v3193_v32 = vld [vmem:[#allocation2 + $0x1ee] sm:$0x1]  ;;  %v3343_v41 = vld [vmem:[#allocation2 + $0xb3] sm:$0x1]  ;;  %v3276_v5 = vrot.slane %v3191_v63, 3  ;;  %v3271_v62 = vsel %vm1771_vm6, %v3270_v12, %v3269_v54  ;;  %v3278_v26 = vrot.slane %v3192_v33, 2 }
 0x41c   :  { %v3341_v8 = vld [vmem:[#allocation2 + $0x33] sm:$0x1]  ;;  %v3463_v46 = vrot.slane %v3342_v35, 7  ;;  %v3225_v47 = vsel %vm1783_vm10, %v3224_v39, %v3223_v61  ;;  %v3273_v10 = vsel %vm1774_vm7, %v3272_v51, %v3271_v62  ;;  %v3280_v31 = vrot.slane %v3193_v32, 1  ;;  %v3593_v6 = vld [vmem:[#allocation2 + $0x75] sm:$0x1] }
 0x41d   :  { %v3344_v50 = vld [vmem:[#allocation2 + $0xf3] sm:$0x1]  ;;  %7185 = vrot.lane.b32.xlu2 %v7184_v3, %s7280_s27  ;;  %v3465_v48 = vrot.slane %v3343_v41, 6  ;;  %v3227_v23 = vsel %vm1786_vm11, %v3226_v1, %v3225_v47  ;;  %v3275_v22 = vsel %vm1777_vm8, %v3274_v18, %v3273_v10  ;;  %v3594_v43 = vld [vmem:[#allocation2 + $0xb5] sm:$0x1]  ;;  %v3653_v37 = vrot.slane %v3593_v6, 7 }
 0x41e   :  { %v3345_v45 = vld [vmem:[#allocation2 + $0x133] sm:$0x1]  ;;  %v3464_v2 = vsel %vm1768_vm5, %v3463_v46, %v3341_v8  ;;  %v3467_v13 = vrot.slane %v3344_v50, 5  ;;  %v3277_v17 = vsel %vm1780_vm9, %v3276_v5, %v3275_v22  ;;  %v3592_v30 = vld [vmem:[#allocation2 + $0x35] sm:$0x1]  ;;  %v3655_v39 = vrot.slane %v3594_v43, 6 }
 0x41f   :  { %v3346_v11 = vld [vmem:[#allocation2 + $0x173] sm:$0x1]  ;;  %v3466_v36 = vsel %vm1771_vm6, %v3465_v48, %v3464_v2  ;;  %v3469_v9 = vrot.slane %v3345_v45, 4  ;;  %v3595_v20 = vld [vmem:[#allocation2 + $0xf5] sm:$0x1]  ;;  %v3279_v21 = vsel %vm1783_vm10, %v3278_v26, %v3277_v17  ;;  %v3654_v53 = vsel %vm1768_vm5, %v3653_v37, %v3592_v30 }
 0x420   :  { %v3347_v7 = vld [vmem:[#allocation2 + $0x1b3] sm:$0x1]  ;;  %v3471_v52 = vrot.slane %v3346_v11, 3  ;;  %v3596_v59 = vld [vmem:[#allocation2 + $0x135] sm:$0x1]  ;;  %v3468_v42 = vsel %vm1774_vm7, %v3467_v13, %v3466_v36  ;;  %v3281_v49 = vsel %vm1786_vm11, %v3280_v31, %v3279_v21  ;;  %v3657_v12 = vrot.slane %v3595_v20, 5 }
 0x421   :  { %v3348_v14 = vld [vmem:[#allocation2 + $0x1f3] sm:$0x1]  ;;  %v3473_v28 = vrot.slane %v3347_v7, 2  ;;  %v3597_v0 = vld [vmem:[#allocation2 + $0x175] sm:$0x1]  ;;  %v3470_v63 = vsel %vm1777_vm8, %v3469_v9, %v3468_v42  ;;  %v7179_v33 = vpack.i.bf16 %v3281_v49, %v3227_v23  ;;  %v3656_v25 = vsel %vm1771_vm6, %v3655_v39, %v3654_v53 }
 0x422   :  { %v3598_v15 = vld [vmem:[#allocation2 + $0x1b5] sm:$0x1]  ;;  %v3475_v19 = vrot.slane %v3348_v14, 1  ;;  %v3334_v57 = vld [vmem:[#allocation2 + $0x72] sm:$0x1]  ;;  %v3472_v27 = vsel %vm1780_vm9, %v3471_v52, %v3470_v63  ;;  %v3659_v1 = vrot.slane %v3596_v59, 4  ;;  %v3658_v18 = vsel %vm1774_vm7, %v3657_v12, %v3656_v25 }
 0x423   :  { %v3599_v24 = vld [vmem:[#allocation2 + $0x1f5] sm:$0x1]  ;;  %v3335_v35 = vld [vmem:[#allocation2 + $0xb2] sm:$0x1]  ;;  %v3474_v32 = vsel %vm1783_vm10, %v3473_v28, %v3472_v27  ;;  %v3661_v51 = vrot.slane %v3597_v0, 3  ;;  %7180 = vrot.lane.b32.xlu1 %v7179_v33, %s7279_s2  ;;  %v3663_v5 = vrot.slane %v3598_v15, 2 }
 0x424   :  { %v3336_v3 = vld [vmem:[#allocation2 + $0xf2] sm:$0x1]  ;;  %v3665_v8 = vrot.slane %v3599_v24, 1  ;;  %v3438_v61 = vrot.slane %v3334_v57, 7  ;;  %v9771_v62 = vsel %vm1786_vm11, %v3475_v19, %v3474_v32  ;;  %v3660_v26 = vsel %vm1777_vm8, %v3659_v1, %v3658_v18  ;;  %v3585_v47 = vld [vmem:[#allocation2 + $0x74] sm:$0x1] }
 0x425   :  { %v3333_v41 = vld [vmem:[#allocation2 + $0x32] sm:$0x1]  ;;  %v3440_v11 = vrot.slane %v3335_v35, 6  ;;  %v3442_v46 = vrot.slane %v3336_v3, 5  ;;  %v3662_v10 = vsel %vm1780_vm9, %v3661_v51, %v3660_v26  ;;  %v3586_v6 = vld [vmem:[#allocation2 + $0xb4] sm:$0x1] }
 0x426   :  { %v3337_v16 = vld [vmem:[#allocation2 + $0x132] sm:$0x1]  ;;  %v3439_v31 = vsel %vm1768_vm5, %v3438_v61, %v3333_v41  ;;  %v3587_v23 = vld [vmem:[#allocation2 + $0xf4] sm:$0x1]  ;;  %v3664_v22 = vsel %vm1783_vm10, %v3663_v5, %v3662_v10  ;;  %v3628_v17 = vrot.slane %v3585_v47, 7  ;;  %v3630_v59 = vrot.slane %v3586_v6, 6 }
 0x427   :  { %v3338_v54 = vld [vmem:[#allocation2 + $0x172] sm:$0x1]  ;;  %v3444_v7 = vrot.slane %v3337_v16, 4  ;;  %v3441_v14 = vsel %vm1771_vm6, %v3440_v11, %v3439_v31  ;;  %v3588_v13 = vld [vmem:[#allocation2 + $0x134] sm:$0x1]  ;;  %v9779_v36 = vsel %vm1786_vm11, %v3665_v8, %v3664_v22  ;;  %v3632_v15 = vrot.slane %v3587_v23, 5 }
 0x428   :  { %v3339_v50 = vld [vmem:[#allocation2 + $0x1b2] sm:$0x1]  ;;  %v3446_v48 = vrot.slane %v3338_v54, 3  ;;  %v3589_v43 = vld [vmem:[#allocation2 + $0x174] sm:$0x1]  ;;  %v3443_v9 = vsel %vm1774_vm7, %v3442_v46, %v3441_v14  ;;  %v7199_v21 = vpack.i.bf16 %v9779_v36, %v9771_v62  ;;  %v3634_v19 = vrot.slane %v3588_v13, 4 }
 0x429   :  { %v3340_v45 = vld [vmem:[#allocation2 + $0x1f2] sm:$0x1]  ;;  %v3448_v2 = vrot.slane %v3339_v50, 2  ;;  %v3584_v30 = vld [vmem:[#allocation2 + $0x34] sm:$0x1]  ;;  %v3445_v42 = vsel %vm1777_vm8, %v3444_v7, %v3443_v9  ;;  %v3636_v24 = vrot.slane %v3589_v43, 3 }
 0x42a   :  { %v3450_v52 = vrot.slane %v3340_v45, 1  ;;  %v3590_v20 = vld [vmem:[#allocation2 + $0x1b4] sm:$0x1]  ;;  %v3629_v0 = vsel %vm1768_vm5, %v3628_v17, %v3584_v30  ;;  %v3326_v37 = vld [vmem:[#allocation2 + $0x71] sm:$0x1]  ;;  %v3447_v49 = vsel %vm1780_vm9, %v3446_v48, %v3445_v42  ;;  %7200 = vrot.lane.b32.xlu2 %v7199_v21, %s7280_s27 }
 0x42b   :  { %v3591_v28 = vld [vmem:[#allocation2 + $0x1f4] sm:$0x1]  ;;  %v3631_v63 = vsel %vm1771_vm6, %v3630_v59, %v3629_v0  ;;  %v3327_v39 = vld [vmem:[#allocation2 + $0xb1] sm:$0x1]  ;;  %v3449_v33 = vsel %vm1783_vm10, %v3448_v2, %v3447_v49  ;;  %v3638_v53 = vrot.slane %v3590_v20, 2  ;;  %v3413_v3 = vrot.slane %v3326_v37, 7 }
 0x42c   :  { %v3328_v57 = vld [vmem:[#allocation2 + $0xf1] sm:$0x1]  ;;  %v3633_v27 = vsel %vm1774_vm7, %v3632_v15, %v3631_v63  ;;  %v3640_v25 = vrot.slane %v3591_v28, 1  ;;  %v3415_v41 = vrot.slane %v3327_v39, 6  ;;  %v9793_v16 = vsel %vm1786_vm11, %v3450_v52, %v3449_v33  ;;  %v3375_v8 = vld [vmem:[#allocation2 + $0x7b] sm:$0x1] }
 0x42d   :  { %v3325_v12 = vld [vmem:[#allocation2 + $0x31] sm:$0x1]  ;;  %v3635_v32 = vsel %vm1777_vm8, %v3634_v19, %v3633_v27  ;;  %v3417_v5 = vrot.slane %v3328_v57, 5  ;;  %v3376_v11 = vld [vmem:[#allocation2 + $0xbb] sm:$0x1]  ;;  %v3561_v2 = vrot.slane %v3375_v8, 7 }
 0x42e   :  { %v3329_v35 = vld [vmem:[#allocation2 + $0x131] sm:$0x1]  ;;  %v3637_v54 = vsel %vm1780_vm9, %v3636_v24, %v3635_v32  ;;  %v3414_v18 = vsel %vm1768_vm5, %v3413_v3, %v3325_v12  ;;  %v3374_v7 = vld [vmem:[#allocation2 + $0x3b] sm:$0x1]  ;;  %v3563_v13 = vrot.slane %v3376_v11, 6 }
 0x42f   :  { %v3330_v1 = vld [vmem:[#allocation2 + $0x171] sm:$0x1]  ;;  %v3639_v50 = vsel %vm1783_vm10, %v3638_v53, %v3637_v54  ;;  %v3416_v26 = vsel %vm1771_vm6, %v3415_v41, %v3414_v18  ;;  %v3419_v45 = vrot.slane %v3329_v35, 4  ;;  %v3377_v48 = vld [vmem:[#allocation2 + $0xfb] sm:$0x1]  ;;  %v3562_v59 = vsel %vm1768_vm5, %v3561_v2, %v3374_v7 }
 0x430   :  { %v3331_v51 = vld [vmem:[#allocation2 + $0x1b1] sm:$0x1]  ;;  %v9800_v46 = vsel %vm1786_vm11, %v3640_v25, %v3639_v50  ;;  %v3418_v47 = vsel %vm1774_vm7, %v3417_v5, %v3416_v26  ;;  %v3421_v10 = vrot.slane %v3330_v1, 3  ;;  %v3378_v22 = vld [vmem:[#allocation2 + $0x13b] sm:$0x1]  ;;  %v3565_v21 = vrot.slane %v3377_v48, 5 }
 0x431   :  { %v3332_v61 = vld [vmem:[#allocation2 + $0x1f1] sm:$0x1]  ;;  %v3423_v31 = vrot.slane %v3331_v51, 2  ;;  %v7194_v6 = vpack.i.bf16 %v9800_v46, %v9793_v16  ;;  %v3420_v23 = vsel %vm1777_vm8, %v3419_v45, %v3418_v47  ;;  %v3379_v14 = vld [vmem:[#allocation2 + $0x17b] sm:$0x1]  ;;  %v3564_v0 = vsel %vm1771_vm6, %v3563_v13, %v3562_v59 }
 0x432   :  { %v3422_v43 = vsel %vm1780_vm9, %v3421_v10, %v3420_v23  ;;  %v3425_v17 = vrot.slane %v3332_v61, 1  ;;  %v3380_v9 = vld [vmem:[#allocation2 + $0x1bb] sm:$0x1]  ;;  %v3609_v52 = vld [vmem:[#allocation2 + $0x7d] sm:$0x1]  ;;  %v3567_v15 = vrot.slane %v3378_v22, 4  ;;  %v3566_v24 = vsel %vm1774_vm7, %v3565_v21, %v3564_v0 }
 0x433   :  { %7195 = vrot.lane.b32.xlu1 %v7194_v6, %s7279_s2  ;;  %v3424_v30 = vsel %vm1783_vm10, %v3423_v31, %v3422_v43  ;;  %v3381_v20 = vld [vmem:[#allocation2 + $0x1fb] sm:$0x1]  ;;  %v3610_v42 = vld [vmem:[#allocation2 + $0xbd] sm:$0x1]  ;;  %v3569_v37 = vrot.slane %v3379_v14, 3  ;;  %v3707_v33 = vrot.slane %v3609_v52, 7 }
 0x434   :  { %v3426_v28 = vsel %vm1786_vm11, %v3425_v17, %v3424_v30  ;;  %v3608_v49 = vld [vmem:[#allocation2 + $0x3d] sm:$0x1]  ;;  %v3709_v27 = vrot.slane %v3610_v42, 6  ;;  %v3568_v53 = vsel %vm1777_vm8, %v3567_v15, %v3566_v24  ;;  %v3571_v12 = vrot.slane %v3380_v9, 2  ;;  %v3367_v3 = vld [vmem:[#allocation2 + $0x7a] sm:$0x1] }
 0x435   :  { %v3611_v63 = vld [vmem:[#allocation2 + $0xfd] sm:$0x1]  ;;  %v7189_v19 = vpack.i.bf16 %v9771_v62, %v3426_v28  ;;  %v3570_v32 = vsel %vm1780_vm9, %v3569_v37, %v3568_v53  ;;  %v3573_v25 = vrot.slane %v3381_v20, 1  ;;  %v3708_v51 = vsel %vm1768_vm5, %v3707_v33, %v3608_v49  ;;  %v3368_v41 = vld [vmem:[#allocation2 + $0xba] sm:$0x1] }
 0x436   :  { %v3612_v39 = vld [vmem:[#allocation2 + $0x13d] sm:$0x1]  ;;  %v3711_v62 = vrot.slane %v3611_v63, 5  ;;  %v3572_v54 = vsel %vm1783_vm10, %v3571_v12, %v3570_v32  ;;  %v3710_v18 = vsel %vm1771_vm6, %v3709_v27, %v3708_v51  ;;  %v3369_v50 = vld [vmem:[#allocation2 + $0xfa] sm:$0x1]  ;;  %v3536_v47 = vrot.slane %v3367_v3, 7 }
 0x437   :  { %v3613_v57 = vld [vmem:[#allocation2 + $0x17d] sm:$0x1]  ;;  %7190 = vrot.lane.b32.xlu0 %v7189_v19, %s7281_s28  ;;  %v3713_v5 = vrot.slane %v3612_v39, 4  ;;  %v3370_v61 = vld [vmem:[#allocation2 + $0x13a] sm:$0x1]  ;;  %v3538_v10 = vrot.slane %v3368_v41, 6  ;;  %v9822_v31 = vsel %vm1786_vm11, %v3573_v25, %v3572_v54 }
 0x438   :  { %v3614_v35 = vld [vmem:[#allocation2 + $0x1bd] sm:$0x1]  ;;  %v3715_v8 = vrot.slane %v3613_v57, 3  ;;  %v3712_v26 = vsel %vm1774_vm7, %v3711_v62, %v3710_v18  ;;  %v3371_v45 = vld [vmem:[#allocation2 + $0x17a] sm:$0x1]  ;;  %v3540_v43 = vrot.slane %v3369_v50, 5 }
 0x439   :  { %v3615_v1 = vld [vmem:[#allocation2 + $0x1fd] sm:$0x1]  ;;  %v3372_v11 = vld [vmem:[#allocation2 + $0x1ba] sm:$0x1]  ;;  %v3714_v7 = vsel %vm1777_vm8, %v3713_v5, %v3712_v26  ;;  %v3717_v48 = vrot.slane %v3614_v35, 2  ;;  %v3542_v17 = vrot.slane %v3370_v61, 4 }
 0x43a   :  { %v3719_v6 = vrot.slane %v3615_v1, 1  ;;  %v3366_v23 = vld [vmem:[#allocation2 + $0x3a] sm:$0x1]  ;;  %v3601_v22 = vld [vmem:[#allocation2 + $0x7c] sm:$0x1]  ;;  %v3716_v14 = vsel %vm1780_vm9, %v3715_v8, %v3714_v7  ;;  %v3544_v20 = vrot.slane %v3371_v45, 3 }
 0x43b   :  { %v3373_v2 = vld [vmem:[#allocation2 + $0x1fa] sm:$0x1]  ;;  %v3537_v13 = vsel %vm1768_vm5, %v3536_v47, %v3366_v23  ;;  %v3602_v9 = vld [vmem:[#allocation2 + $0xbc] sm:$0x1]  ;;  %v3718_v52 = vsel %vm1783_vm10, %v3717_v48, %v3716_v14  ;;  %v3546_v59 = vrot.slane %v3372_v11, 2  ;;  %v3682_v49 = vrot.slane %v3601_v22, 7  ;;  %v9844_v48 = vpop.permute.xlu2 %7075 }
 0x43c   :  { %v3539_v30 = vsel %vm1771_vm6, %v3538_v10, %v3537_v13  ;;  %v3600_v21 = vld [vmem:[#allocation2 + $0x3c] sm:$0x1]  ;;  %v9830_v28 = vsel %vm1786_vm11, %v3719_v6, %v3718_v52  ;;  %v3684_v63 = vrot.slane %v3602_v9, 6  ;;  %v3359_v57 = vld [vmem:[#allocation2 + $0x79] sm:$0x1]  ;;  %v3548_v53 = vrot.slane %v3373_v2, 1  ;;  %v9851_v2 = vpop.permute.xlu0 %7055 }
 0x43d   :  { %v3603_v42 = vld [vmem:[#allocation2 + $0xfc] sm:$0x1]  ;;  %v3541_v0 = vsel %vm1774_vm7, %v3540_v43, %v3539_v30  ;;  %v7214_v19 = vpack.i.bf16 %v9830_v28, %v9822_v31  ;;  %v3360_v33 = vld [vmem:[#allocation2 + $0xb9] sm:$0x1]  ;;  %v3683_v35 = vsel %vm1768_vm5, %v3682_v49, %v3600_v21  ;;  %v3511_v54 = vrot.slane %v3359_v57, 7 }
 0x43e   :  { %v3604_v15 = vld [vmem:[#allocation2 + $0x13c] sm:$0x1]  ;;  %v3543_v24 = vsel %vm1777_vm8, %v3542_v17, %v3541_v0  ;;  %v3686_v3 = vrot.slane %v3603_v42, 5  ;;  %v3361_v32 = vld [vmem:[#allocation2 + $0xf9] sm:$0x1]  ;;  %v3685_v1 = vsel %vm1771_vm6, %v3684_v63, %v3683_v35  ;;  %v3513_v61 = vrot.slane %v3360_v33, 6 }
 0x43f   :  { %v3605_v37 = vld [vmem:[#allocation2 + $0x17c] sm:$0x1]  ;;  %v3545_v27 = vsel %vm1780_vm9, %v3544_v20, %v3543_v24  ;;  %7215 = vrot.lane.b32.xlu2 %v7214_v19, %s7280_s27  ;;  %v3688_v51 = vrot.slane %v3604_v15, 4  ;;  %v3358_v62 = vld [vmem:[#allocation2 + $0x39] sm:$0x1]  ;;  %v3515_v7 = vrot.slane %v3361_v32, 5 }
 0x440   :  { %v3606_v39 = vld [vmem:[#allocation2 + $0x1bc] sm:$0x1]  ;;  %v3547_v25 = vsel %vm1783_vm10, %v3546_v59, %v3545_v27  ;;  %v3362_v41 = vld [vmem:[#allocation2 + $0x139] sm:$0x1]  ;;  %v3687_v18 = vsel %vm1774_vm7, %v3686_v3, %v3685_v1  ;;  %v3690_v5 = vrot.slane %v3605_v37, 3  ;;  %v3512_v10 = vsel %vm1768_vm5, %v3511_v54, %v3358_v62 }
 0x441   :  { %v3607_v12 = vld [vmem:[#allocation2 + $0x1fc] sm:$0x1]  ;;  %v3692_v8 = vrot.slane %v3606_v39, 2  ;;  %v3363_v50 = vld [vmem:[#allocation2 + $0x179] sm:$0x1]  ;;  %v3689_v26 = vsel %vm1777_vm8, %v3688_v51, %v3687_v18  ;;  %v9847_v6 = vsel %vm1786_vm11, %v3548_v53, %v3547_v25  ;;  %v3514_v22 = vsel %vm1771_vm6, %v3513_v61, %v3512_v10  ;;  %v9864_v39 = vpop.permute.xlu1 %7065 }
 0x442   :  { %v3694_v45 = vrot.slane %v3607_v12, 1  ;;  %v3364_v11 = vld [vmem:[#allocation2 + $0x1b9] sm:$0x1]  ;;  %v3691_v23 = vsel %vm1780_vm9, %v3690_v5, %v3689_v26  ;;  %v3517_v14 = vrot.slane %v3362_v41, 4  ;;  %v3516_v43 = vsel %vm1774_vm7, %v3515_v7, %v3514_v22  ;;  %v3739_v9 = vld [vmem:[#allocation2 + $0x77] sm:$0x1] }
 0x443   :  { %v3365_v47 = vld [vmem:[#allocation2 + $0x1f9] sm:$0x1]  ;;  %v3693_v13 = vsel %vm1783_vm10, %v3692_v8, %v3691_v23  ;;  %v3519_v17 = vrot.slane %v3363_v50, 3  ;;  %v3740_v52 = vld [vmem:[#allocation2 + $0xb7] sm:$0x1]  ;;  %v3521_v59 = vrot.slane %v3364_v11, 2  ;;  %v7219_v25 = vpack.i.bf16 %v9830_v28, %v9779_v36 }
 0x444   :  { %v9856_v30 = vsel %vm1786_vm11, %v3694_v45, %v3693_v13  ;;  %v3518_v20 = vsel %vm1777_vm8, %v3517_v14, %v3516_v43  ;;  %v3523_v21 = vrot.slane %v3365_v47, 1  ;;  %v3741_v42 = vld [vmem:[#allocation2 + $0xf7] sm:$0x1]  ;;  %v3755_v33 = vld [vmem:[#allocation2 + $0x7f] sm:$0x1]  ;;  %v3799_v53 = vrot.slane %v3739_v9, 7 }
 0x445   :  { %v3742_v0 = vld [vmem:[#allocation2 + $0x137] sm:$0x1]  ;;  %v7209_v15 = vpack.i.bf16 %v9856_v30, %v9847_v6  ;;  %v3520_v37 = vsel %vm1780_vm9, %v3519_v17, %v3518_v20  ;;  %v3756_v27 = vld [vmem:[#allocation2 + $0xbf] sm:$0x1]  ;;  %v3801_v12 = vrot.slane %v3740_v52, 6  ;;  %v7078_v1 = vunpack.i.h.bf16 %v9844_v48 }
 0x446   :  { %v3738_v49 = vld [vmem:[#allocation2 + $0x37] sm:$0x1]  ;;  %v3522_v57 = vsel %vm1783_vm10, %v3521_v59, %v3520_v37  ;;  %v3757_v3 = vld [vmem:[#allocation2 + $0xff] sm:$0x1]  ;;  %v3803_v18 = vrot.slane %v3741_v42, 5  ;;  %v3805_v5 = vrot.slane %v3742_v0, 4  ;;  %v9889_v59 = vpop.permute.xlu2 %7080 }
 0x447   :  { %v3743_v63 = vld [vmem:[#allocation2 + $0x177] sm:$0x1]  ;;  %7210 = vrot.lane.b32.xlu1 %v7209_v15, %s7279_s2  ;;  %v3524_v35 = vsel %vm1786_vm11, %v3523_v21, %v3522_v57  ;;  %v3758_v32 = vld [vmem:[#allocation2 + $0x13f] sm:$0x1]  ;;  %v3800_v54 = vsel %vm1768_vm5, %v3799_v53, %v3738_v49  ;;  %v3731_v8 = vld [vmem:[#allocation2 + $0x76] sm:$0x1]  ;;  %v7077_v53 = vunpack.i.l.bf16 %v9844_v48 }
 0x448   :  { %v3744_v19 = vld [vmem:[#allocation2 + $0x1b7] sm:$0x1]  ;;  %v6874_v51 = vld [vmem:[%s10917_s3 + $0x38] sm:$0xff]  ;;  %v7204_v62 = vpack.i.bf16 %v9822_v31, %v3524_v35  ;;  %v3802_v61 = vsel %vm1771_vm6, %v3801_v12, %v3800_v54  ;;  %v3807_v26 = vrot.slane %v3743_v63, 3  ;;  %v3853_v45 = vrot.slane %v3755_v33, 7  ;;  %v9893_v63 = vpop.permute.xlu0 %7060  ;;  %v6875_v48 = vld [vmem:[%s10917_s3 + $0x40] sm:$0xff] }
 0x449   :  { %v9862_v24 = vld [vmem:[#allocation2 + $0x1f7] sm:$0x1]  ;;  %v3759_v41 = vld [vmem:[#allocation2 + $0x17f] sm:$0x1]  ;;  %v3855_v11 = vrot.slane %v3756_v27, 6  ;;  %4152 = vmatpush.bf16.msrb.mxu2 %v6874_v51  ;;  %v3804_v10 = vsel %vm1774_vm7, %v3803_v18, %v3802_v61  ;;  %v3809_v7 = vrot.slane %v3744_v19, 2  ;;  %v7068_v12 = vunpack.i.h.bf16 %v9864_v39 }
 0x44a   :  { %v3760_v50 = vld [vmem:[#allocation2 + $0x1bf] sm:$0x1]  ;;  %7205 = vrot.lane.b32.xlu0 %v7204_v62, %s7281_s28  ;;  %v3811_v23 = vrot.slane %v9862_v24, 1  ;;  %v3857_v22 = vrot.slane %v3757_v3, 5  ;;  %v6873_v14 = vld [vmem:[%s10917_s3 + $0x30] sm:$0xff]  ;;  %v3806_v43 = vsel %vm1777_vm8, %v3805_v5, %v3804_v10  ;;  %v3859_v9 = vrot.slane %v3758_v32, 4 }
 0x44b   :  { %v6882_v47 = vld [vmem:[%s10917_s3 + $0x78] sm:$0xff]  ;;  %v3730_v52 = vld [vmem:[#allocation2 + $0x36] sm:$0x1]  ;;  %v3774_v20 = vrot.slane %v3731_v8, 7  ;;  %v3808_v21 = vsel %vm1780_vm9, %v3807_v26, %v3806_v43  ;;  %v3861_v0 = vrot.slane %v3759_v41, 3  ;;  %v3863_v15 = vrot.slane %v3760_v50, 2 }
 0x44c   :  { %v3754_v31 = vld [vmem:[#allocation2 + $0x3f] sm:$0x1]  ;;  %4185 = vmatpush.bf16.msrb.mxu3 %v6882_v47  ;;  %v3732_v37 = vld [vmem:[#allocation2 + $0xb6] sm:$0x1]  ;;  %v3810_v19 = vsel %vm1783_vm10, %v3809_v7, %v3808_v21  ;;  %v3747_v32 = vld [vmem:[#allocation2 + $0x7e] sm:$0x1]  ;;  %v7083_v41 = vunpack.i.h.bf16 %v9889_v59  ;;  %v7082_v54 = vunpack.i.l.bf16 %v9889_v59 }
 0x44d   :  { %v3761_v13 = vld [vmem:[#allocation2 + $0x1ff] sm:$0x1]  ;;  %v3854_v17 = vsel %vm1768_vm5, %v3853_v45, %v3754_v31  ;;  %v3733_v49 = vld [vmem:[#allocation2 + $0xf6] sm:$0x1]  ;;  %4153 = vmatpush.bf16.msrb.mxu2 %v6873_v14  ;;  %v3748_v51 = vld [vmem:[#allocation2 + $0xbe] sm:$0x1]  ;;  %v3775_v62 = vsel %vm1768_vm5, %v3774_v20, %v3730_v52  ;;  %v3812_v18 = vsel %vm1786_vm11, %v3811_v23, %v3810_v19  ;;  %v7067_v14 = vunpack.i.l.bf16 %v9864_v39 }
 0x44e   :  { %v3856_v42 = vsel %vm1771_vm6, %v3855_v11, %v3854_v17  ;;  %v3734_v57 = vld [vmem:[#allocation2 + $0x136] sm:$0x1]  ;;  %v3865_v8 = vrot.slane %v3761_v13, 1  ;;  %v3749_v50 = vld [vmem:[#allocation2 + $0xfe] sm:$0x1]  ;;  %v3776_v61 = vrot.slane %v3732_v37, 6  ;;  %v9913_v11 = vpop.permute.xlu1 %7070 }
 0x44f   :  { %v3858_v24 = vsel %vm1774_vm7, %v3857_v22, %v3856_v42  ;;  %v3735_v33 = vld [vmem:[#allocation2 + $0x176] sm:$0x1]  ;;  %v6872_v45 = vld [vmem:[%s10917_s3 + $0x28] sm:$0xff]  ;;  %v3746_v31 = vld [vmem:[#allocation2 + $0x3e] sm:$0x1]  ;;  %v3778_v23 = vrot.slane %v3733_v49, 5 }
 0x450   :  { %v3736_v27 = vld [vmem:[#allocation2 + $0x1b6] sm:$0x1]  ;;  %v3860_v35 = vsel %vm1777_vm8, %v3859_v9, %v3858_v24  ;;  %v3750_v10 = vld [vmem:[#allocation2 + $0x13e] sm:$0x1]  ;;  %v3780_v22 = vrot.slane %v3734_v57, 4  ;;  %v3777_v43 = vsel %vm1771_vm6, %v3776_v61, %v3775_v62  ;;  %v3828_v17 = vrot.slane %v3747_v32, 7 }
 0x451   :  { %v9900_v3 = vld [vmem:[#allocation2 + $0x1f6] sm:$0x1]  ;;  %v3862_v5 = vsel %vm1780_vm9, %v3861_v0, %v3860_v35  ;;  %v3751_v7 = vld [vmem:[#allocation2 + $0x17e] sm:$0x1]  ;;  %v3830_v9 = vrot.slane %v3748_v51, 6  ;;  %4154 = vmatpush.bf16.msrb.mxu2 %v6872_v45  ;;  %v6880_v52 = vld [vmem:[%s10917_s3 + $0x68] sm:$0xff]  ;;  %v3779_v37 = vsel %vm1774_vm7, %v3778_v23, %v3777_v43  ;;  %v7058_v45 = vunpack.i.h.bf16 %v9851_v2  ;;  %v9947_v43 = vpop.permute.xlu0 %7085 }
 0x452   :  { %v6881_v26 = vld [vmem:[%s10917_s3 + $0x70] sm:$0xff]  ;;  %v3864_v47 = vsel %vm1783_vm10, %v3863_v15, %v3862_v5  ;;  %v6871_v20 = vld [vmem:[%s10917_s3 + $0x20] sm:$0xff]  ;;  %v3752_v0 = vld [vmem:[#allocation2 + $0x1be] sm:$0x1]  ;;  %v3782_v49 = vrot.slane %v3735_v33, 3  ;;  %v3784_v19 = vrot.slane %v3736_v27, 2  ;;  %7220 = vrot.lane.b32.xlu0 %v7219_v25, %s7281_s28  ;;  %v3781_v24 = vsel %vm1777_vm8, %v3780_v22, %v3779_v37 }
 0x453   :  { %v3866_v13 = vsel %vm1786_vm11, %v3865_v8, %v3864_v47  ;;  %4186 = vmatpush.bf16.msrb.mxu3 %v6881_v26  ;;  %v1629_v21 = vld [vmem:[#allocation2 + $0x40] sm:$0x1]  ;;  %v3753_v15 = vld [vmem:[#allocation2 + $0x1fe] sm:$0x1]  ;;  %v3786_v57 = vrot.slane %v9900_v3, 1  ;;  %v3829_v35 = vsel %vm1768_vm5, %v3828_v17, %v3746_v31  ;;  %v3832_v32 = vrot.slane %v3749_v50, 5 }
 0x454   :  { %v7229_v42 = vpack.i.bf16 %v3866_v13, %v3812_v18  ;;  %v6879_v51 = vld [vmem:[%s10917_s3 + $0x60] sm:$0xff]  ;;  %v3783_v33 = vsel %vm1780_vm9, %v3782_v49, %v3781_v24  ;;  %v3831_v27 = vsel %vm1771_vm6, %v3830_v9, %v3829_v35  ;;  %v3834_v36 = vrot.slane %v3750_v10, 4  ;;  %v6870_v50 = vld [vmem:[%s10917_s3 + $0x18] sm:$0xff]  ;;  %v1664_v24 = vld [vmem:[#allocation2 + $0xc8] sm:$0x1]  ;;  %s7284_s28 = smov [#allocation3]  }
 0x455   :  { %v1630_v62 = vld [vmem:[#allocation2 + $0x80] sm:$0x1]  ;;  %v1767_v18 = vrot.slane %v1629_v21, 7  ;;  %v3785_v3 = vsel %vm1783_vm10, %v3784_v19, %v3783_v33  ;;  %v3833_v5 = vsel %vm1774_vm7, %v3832_v32, %v3831_v27  ;;  %v3836_v8 = vrot.slane %v3751_v7, 3  ;;  %4155 = vmatpush.bf16.msrb.mxu2 %v6871_v20  ;;  %v6878_v20 = vld [vmem:[%s10917_s3 + $0x58] sm:$0xff]  ;;  %v6869_v21 = vld [vmem:[%s10917_s3 + $0x10] sm:$0xff] }
 0x456   :  { %7230 = vrot.lane.b32.xlu2 %v7229_v42, %s7280_s27  ;;  %v1631_v28 = vld [vmem:[#allocation2 + $0xc0] sm:$0x1]  ;;  %v3835_v47 = vsel %vm1777_vm8, %v3834_v36, %v3833_v5  ;;  %v3838_v31 = vrot.slane %v3752_v0, 2  ;;  %v1770_v23 = vrot.slane %v1630_v62, 6  ;;  %v7057_v22 = vunpack.i.l.bf16 %v9851_v2  ;;  %v1662_v42 = vld [vmem:[#allocation2 + $0x48] sm:$0x1]  ;;  %v9961_v36 = vpop.permute.xlu1 %7090 }
 0x457   :  { %v1632_v25 = vld [vmem:[#allocation2 + $0x100] sm:$0x1]  ;;  %4187 = vmatpush.bf16.msrb.mxu3 %v6880_v52  ;;  %v3787_v7 = vsel %vm1786_vm11, %v3786_v57, %v3785_v3  ;;  %v3837_v17 = vsel %vm1780_vm9, %v3836_v8, %v3835_v47  ;;  %v3840_v9 = vrot.slane %v3753_v15, 1  ;;  %v1773_v52 = vrot.slane %v1631_v28, 5  ;;  %v1663_v19 = vld [vmem:[#allocation2 + $0x88] sm:$0x1] }
 0x458   :  { %v1633_v61 = vld [vmem:[#allocation2 + $0x140] sm:$0x1]  ;;  %v3839_v0 = vsel %vm1783_vm10, %v3838_v31, %v3837_v17  ;;  %v1776_v37 = vrot.slane %v1632_v25, 4  ;;  %v1872_v57 = vrot.slane %v1662_v42, 7  ;;  %v1661_v33 = vld [vmem:[#allocation2 + $0x8] sm:$0x1] }
 0x459   :  { %v1634_v26 = vld [vmem:[#allocation2 + $0x180] sm:$0x1]  ;;  %v3841_v15 = vsel %vm1786_vm11, %v3840_v9, %v3839_v0  ;;  %4156 = vmatpush.bf16.msrb.mxu2 %v6870_v50  ;;  %v1779_v35 = vrot.slane %v1633_v61, 3  ;;  %v1665_v27 = vld [vmem:[#allocation2 + $0x108] sm:$0x1]  ;;  %v1874_v8 = vrot.slane %v1663_v19, 6 }
 0x45a   :  { %v1635_v10 = vld [vmem:[#allocation2 + $0x1c0] sm:$0x1]  ;;  %v1782_v32 = vrot.slane %v1634_v26, 2  ;;  %v7224_v28 = vpack.i.bf16 %v3841_v15, %v3787_v7  ;;  %v1666_v3 = vld [vmem:[#allocation2 + $0x148] sm:$0x1]  ;;  %v1873_v5 = vsel %vm1768_vm5, %v1872_v57, %v1661_v33  ;;  %v1876_v61 = vrot.slane %v1664_v24, 5 }
 0x45b   :  { %v1628_v13 = vld [vmem:[#allocation2] sm:$0x1]  ;;  %4188 = vmatpush.bf16.msrb.mxu3 %v6879_v51  ;;  %v1785_v47 = vrot.slane %v1635_v10, 1  ;;  %v1668_v50 = vld [vmem:[#allocation2 + $0x1c8] sm:$0x1]  ;;  %v7073_v26 = vunpack.i.h.bf16 %v9913_v11  ;;  %v7072_v7 = vunpack.i.l.bf16 %v9913_v11  ;;  %v6877_v10 = vld [vmem:[%s10917_s3 + $0x50] sm:$0xff]  ;;  %v7063_v15 = vunpack.i.h.bf16 %v9893_v63 }
 0x45c   :  { %v1769_v49 = vsel %vm1768_vm5, %v1767_v18, %v1628_v13  ;;  %v1667_v18 = vld [vmem:[#allocation2 + $0x188] sm:$0x1]  ;;  %7225 = vrot.lane.b32.xlu1 %v7224_v28, %s7279_s2  ;;  %v1878_v13 = vrot.slane %v1665_v27, 4  ;;  %v1880_v42 = vrot.slane %v1666_v3, 3  ;;  %v11129_v24 = vld [vmem:[#allocation23_spill] sm:$0xff]  ;;  %v9994_v27 = vpop.permute.xlu0 %7100  ;;  %v6898_v59 = vld [vmem:[%s10917_s3 + $0xf8] sm:$0xff] }
 0x45d   :  { %v1772_v62 = vsel %vm1771_vm6, %v1770_v23, %v1769_v49  ;;  %v1875_v23 = vsel %vm1771_vm6, %v1874_v8, %v1873_v5  ;;  %4157 = vmatpush.bf16.msrb.mxu2 %v6869_v21  ;;  %v6868_v9 = vld [vmem:[%s10917_s3 + $0x8] sm:$0xff]  ;;  %v1882_v0 = vrot.slane %v1667_v18, 2  ;;  %v1695_v21 = vld [vmem:[#allocation2 + $0x50] sm:$0x1]  ;;  %v2455_v57 = vsel %vm891_vm0, %v11129_v24, %v7073_v26  ;;  %s5791_s29 = sshll.u32 %s7284_s28, 4  ;;  %s5792_s29 = int_to_ptr.vmem [resolvable:$true] %s5791_s29 }
 0x45e   :  { %v1775_v25 = vsel %vm1774_vm7, %v1773_v52, %v1772_v62  ;;  %v1877_v52 = vsel %vm1774_vm7, %v1876_v61, %v1875_v23  ;;  %v6876_v2 = vld [vmem:[%s10917_s3 + $0x48] sm:$0xff]  ;;  %v2456_v8 = vsel %vm2159_vm12, %v2455_v57, %v7078_v1  ;;  %v1698_v26 = vld [vmem:[#allocation2 + $0x110] sm:$0x1]  ;;  %v10022_v39 = vpop.permute.xlu1 %7105  ;;  %v7088_v24 = vunpack.i.h.bf16 %v9947_v43  ;;  %v1731_v57 = vld [vmem:[#allocation2 + $0x118] sm:$0x1] }
 0x45f   :  { %v1778_v51 = vsel %vm1777_vm8, %v1776_v37, %v1775_v25  ;;  %4189 = vmatpush.bf16.msrb.mxu3 %v6878_v20  ;;  %v9979_v37 = vpop.permute.xlu2 %7095  ;;  %v1879_v49 = vsel %vm1777_vm8, %v1878_v13, %v1877_v52  ;;  %v1884_v20 = vrot.slane %v1668_v50, 1  ;;  %v6890_v50 = vld [vmem:[%s10917_s3 + $0xb8] sm:$0xff]  ;;  %v1699_v23 = vld [vmem:[#allocation2 + $0x150] sm:$0x1]  ;;  %v1976_v52 = vrot.slane %v1698_v26, 4 }
 0x460   :  { %v1781_v31 = vsel %vm1780_vm9, %v1779_v35, %v1778_v51  ;;  %v1881_v19 = vsel %vm1780_vm9, %v1880_v42, %v1879_v49  ;;  %v7062_v35 = vunpack.i.l.bf16 %v9893_v63  ;;  %v1697_v51 = vld [vmem:[#allocation2 + $0xd0] sm:$0x1]  ;;  %v2744_v26 = vsel %vm891_vm0, %v9441_v38, %v7088_v24  ;;  %v6896_v38 = vld [vmem:[%s10917_s3 + $0xe8] sm:$0xff] }
 0x461   :  { %v1784_v17 = vsel %vm1783_vm10, %v1782_v32, %v1781_v31  ;;  %v2452_v32 = vsel %vm891_vm0, %v9428_v60, %v7058_v45  ;;  %v1883_v33 = vsel %vm1783_vm10, %v1882_v0, %v1881_v19  ;;  %4158 = vmatpush.bf16.msrb.mxu2 %v6868_v9  ;;  %v6867_v60 = vld [vmem:[%s10917_s3] sm:$0xff]  ;;  %v1696_v45 = vld [vmem:[#allocation2 + $0x90] sm:$0x1]  ;;  %v2457_v31 = vsel %vm2161_vm13, %v2456_v8, %v7083_v41  ;;  %v1734_v8 = vld [vmem:[#allocation2 + $0x1d8] sm:$0x1] }
 0x462   :  { %v1787_v11 = vsel %vm1786_vm11, %v1785_v47, %v1784_v17  ;;  %v1885_v28 = vsel %vm1786_vm11, %v1884_v20, %v1883_v33  ;;  %v2453_v63 = vsel %vm2159_vm12, %v2452_v32, %v7063_v15  ;;  %v1694_v47 = vld [vmem:[#allocation2 + $0x10] sm:$0x1]  ;;  %v1728_v17 = vld [vmem:[#allocation2 + $0x58] sm:$0x1]  ;;  %v7093_v32 = vunpack.i.h.bf16 %v9961_v36 }
 0x463   :  { %v2158_v62 = vsel %vm891_vm0, %v1787_v11, %v7057_v22  ;;  %4190 = vmatpush.bf16.msrb.mxu3 %v6877_v10  ;;  %v1970_v22 = vrot.slane %v1695_v21, 7  ;;  %v2163_v3 = vsel %vm891_vm0, %v1885_v28, %v7072_v7  ;;  %v2454_v5 = vsel %vm2161_vm13, %v2453_v63, %v7068_v12  ;;  %v1700_v13 = vld [vmem:[#allocation2 + $0x190] sm:$0x1]  ;;  %v1729_v10 = vld [vmem:[#allocation2 + $0x98] sm:$0x1] }
 0x464   :  { %v2160_v25 = vsel %vm2159_vm12, %v2158_v62, %v7062_v35  ;;  %v2164_v61 = vsel %vm2159_vm12, %v2163_v3, %v7077_v53  ;;  %v1972_v7 = vrot.slane %v1696_v45, 6  ;;  %v1974_v53 = vrot.slane %v1697_v51, 5  ;;  %v6889_v41 = vld [vmem:[%s10917_s3 + $0xb0] sm:$0xff]  ;;  %v1730_v20 = vld [vmem:[#allocation2 + $0xd8] sm:$0x1]  ;;  %v10050_v3 = vpop.permute.xlu0 %7115 }
 0x465   :  { %v2162_v18 = vsel %vm2161_vm13, %v2160_v25, %v7067_v14  ;;  %v1971_v14 = vsel %vm1768_vm5, %v1970_v22, %v1694_v47  ;;  %v2165_v1 = vsel %vm2161_vm13, %v2164_v61, %v7082_v54  ;;  %4159 = vmatpush.bf16.msrb.mxu2 %v6867_v60  ;;  %v1701_v42 = vld [vmem:[#allocation2 + $0x1d0] sm:$0x1]  ;;  %v1978_v11 = vrot.slane %v1699_v23, 3  ;;  %v1727_v28 = vld [vmem:[#allocation2 + $0x18] sm:$0x1] }
 0x466   :  { %v3876_v12 = vpack.c.bf16 %v2454_v5, %v2162_v18  ;;  %v1973_v9 = vsel %vm1771_vm6, %v1972_v7, %v1971_v14  ;;  %v3877_v54 = vpack.c.bf16 %v2457_v31, %v2165_v1  ;;  %v1980_v49 = vrot.slane %v1700_v13, 2  ;;  %v1732_v25 = vld [vmem:[#allocation2 + $0x158] sm:$0x1]  ;;  %v6897_v18 = vld [vmem:[%s10917_s3 + $0xf0] sm:$0xff]  ;;  %v10068_v13 = vpop.permute.xlu1 %7120 }
 0x467   :  { %4191 = vmatpush.bf16.msrb.mxu3 %v6876_v2  ;;  %v1975_v0 = vsel %vm1774_vm7, %v1974_v53, %v1973_v9  ;;  %v10041_v21 = vpop.permute.xlu2 %7110  ;;  %v2068_v15 = vrot.slane %v1728_v17, 7  ;;  %v2070_v35 = vrot.slane %v1729_v10, 6  ;;  %v7087_v33 = vunpack.i.l.bf16 %v9947_v43  ;;  %v1733_v60 = vld [vmem:[#allocation2 + $0x198] sm:$0x1]  ;;  %v6888_v43 = vld [vmem:[%s10917_s3 + $0xa8] sm:$0xff] }
 0x468   :  { %4160 = vmatmul.bf16.vlgmr.msrb.gmra.mxu2 %v3876_v12  ;;  %v1977_v19 = vsel %vm1777_vm8, %v1976_v52, %v1975_v0  ;;  %v1982_v2 = vrot.slane %v1701_v42, 1  ;;  %v2072_v22 = vrot.slane %v1730_v20, 5  ;;  %v7092_v5 = vunpack.i.l.bf16 %v9961_v36  ;;  %v11130_v9 = vld [vmem:[#allocation24_spill] sm:$0xff] }
 0x469   :  { %4218 = vmatpush.bf16.msra.mxu2 %v6890_v50  ;;  %v1979_v62 = vsel %vm1780_vm9, %v1978_v11, %v1977_v19  ;;  %v2069_v45 = vsel %vm1768_vm5, %v2068_v15, %v1727_v28  ;;  %v2074_v51 = vrot.slane %v1731_v57, 4  ;;  %v7103_v50 = vunpack.i.h.bf16 %v9994_v27  ;;  %v2758_v15 = vld [vmem:[#allocation2 + $0x60] sm:$0x1] }
 0x46a   :  { %v1981_v63 = vsel %vm1783_vm10, %v1980_v49, %v1979_v62  ;;  %v2071_v47 = vsel %vm1771_vm6, %v2070_v35, %v2069_v45  ;;  %v2076_v12 = vrot.slane %v1732_v25, 3  ;;  %v2078_v36 = vrot.slane %v1733_v60, 2  ;;  %v2791_v25 = vld [vmem:[#allocation2 + $0x68] sm:$0x1]  ;;  %v2757_v45 = vld [vmem:[#allocation2 + $0x20] sm:$0x1] }
 0x46b   :  { %4192 = vmatpush.bf16.msrb.mxu3 %v6875_v48  ;;  %v1983_v61 = vsel %vm1786_vm11, %v1982_v2, %v1981_v63  ;;  %v2073_v14 = vsel %vm1774_vm7, %v2072_v22, %v2071_v47  ;;  %v7102_v23 = vunpack.i.l.bf16 %v9994_v27  ;;  %v7108_v7 = vunpack.i.h.bf16 %v10022_v39  ;;  %v6895_v47 = vld [vmem:[%s10917_s3 + $0xe0] sm:$0xff] }
 0x46c   :  { %v2166_v1 = vsel %vm891_vm0, %v1983_v61, %v7087_v33  ;;  %v2075_v31 = vsel %vm1777_vm8, %v2074_v51, %v2073_v14  ;;  %v7107_v48 = vunpack.i.l.bf16 %v10022_v39  ;;  %v2080_v17 = vrot.slane %v1734_v8, 1  ;;  %v2759_v33 = vld [vmem:[#allocation2 + $0xa0] sm:$0x1] }
 0x46d   :  { %4219 = vmatpush.bf16.msra.mxu2 %v6889_v41  ;;  %v2077_v53 = vsel %vm1780_vm9, %v2076_v12, %v2075_v31  ;;  %v2747_v27 = vsel %vm891_vm0, %v11130_v9, %v7103_v50  ;;  %v2745_v39 = vsel %vm2159_vm12, %v2744_v26, %v7093_v32  ;;  %v7098_v41 = vunpack.i.h.bf16 %v9979_v37  ;;  %v6887_v8 = vld [vmem:[%s10917_s3 + $0xa0] sm:$0xff]  ;;  %v2790_v26 = vld [vmem:[#allocation2 + $0x28] sm:$0x1] }
 0x46e   :  { %4193 = vmatmul.bf16.vlgmr.msrb.gmra.mxu3 %v3877_v54  ;;  %v2079_v10 = vsel %vm1783_vm10, %v2078_v36, %v2077_v53  ;;  %v7097_v54 = vunpack.i.l.bf16 %v9979_v37  ;;  %v2748_v49 = vsel %vm2159_vm12, %v2747_v27, %v7108_v7  ;;  %v7113_v20 = vunpack.i.h.bf16 %v10041_v21  ;;  %v7131_v37 = vpop.permute.xlu0 %7130  ;;  %v7136_v63 = vpop.permute.xlu1 %7135  ;;  %v2760_v61 = vld [vmem:[#allocation2 + $0xe0] sm:$0x1] }
 0x46f   :  { %4251 = vmatpush.bf16.msra.mxu3 %v6898_v59  ;;  %v2081_v52 = vsel %vm1786_vm11, %v2080_v17, %v2079_v10  ;;  %v2167_v59 = vsel %vm2159_vm12, %v2166_v1, %v7092_v5  ;;  %v10085_v0 = vpop.permute.xlu2 %7125  ;;  %v7112_v19 = vunpack.i.l.bf16 %v10041_v21  ;;  %v2746_v57 = vsel %vm2161_vm13, %v2745_v39, %v7098_v41  ;;  %v2794_v39 = vld [vmem:[#allocation2 + $0x128] sm:$0x1] }
 0x470   :  { %v2169_v42 = vsel %vm891_vm0, %v2081_v52, %v7102_v23  ;;  %v10092_v24 = vsel %vm2161_vm13, %v2167_v59, %v7097_v54  ;;  %v2749_v32 = vsel %vm2161_vm13, %v2748_v49, %v7113_v20  ;;  %v2830_v28 = vrot.slane %v2758_v15, 7 }
 0x471   :  { %4220 = vmatpush.bf16.msra.mxu2 %v6888_v43  ;;  %v2170_v11 = vsel %vm2159_vm12, %v2169_v42, %v7107_v48  ;;  %v3880_v62 = vpack.c.bf16 %v10092_v24, %v2746_v57  ;;  %v7118_v2 = vunpack.i.h.bf16 %v10050_v3  ;;  %v7117_v60 = vunpack.i.l.bf16 %v10050_v3  ;;  %v2793_v48 = vld [vmem:[#allocation2 + $0xe8] sm:$0x1] }
 0x472   :  { %v10096_v35 = vsel %vm2161_vm13, %v2170_v11, %v7112_v19  ;;  %v2832_v22 = vrot.slane %v2759_v33, 6  ;;  %v2928_v43 = vrot.slane %v2791_v25, 7  ;;  %v2831_v5 = vsel %vm1768_vm5, %v2830_v28, %v2757_v45  ;;  %v2763_v28 = vld [vmem:[#allocation2 + $0x1a0] sm:$0x1] }
 0x473   :  { %4252 = vmatpush.bf16.msra.mxu3 %v6897_v18  ;;  %v3881_v21 = vpack.c.bf16 %v10096_v35, %v2749_v32  ;;  %v2792_v18 = vld [vmem:[#allocation2 + $0xa8] sm:$0x1]  ;;  %v7133_v51 = vunpack.i.h.bf16 %v7131_v37  ;;  %v7132_v50 = vunpack.i.l.bf16 %v7131_v37  ;;  %v7123_v3 = vunpack.i.h.bf16 %v10068_v13 }
 0x474   :  { %v7122_v12 = vunpack.i.l.bf16 %v10068_v13  ;;  %v2929_v1 = vsel %vm1768_vm5, %v2928_v43, %v2790_v26  ;;  %v2930_v31 = vrot.slane %v2792_v18, 6  ;;  %v2750_v36 = vsel %vm891_vm0, %v9582_v34, %v7118_v2  ;;  %v2796_v18 = vld [vmem:[#allocation2 + $0x1a8] sm:$0x1] }
 0x475   :  { %4221 = vmatpush.bf16.msra.mxu2 %v6887_v8  ;;  %v2458_v23 = vsel %vm891_vm0, %v9502_v29, %v7117_v60  ;;  %v2833_v7 = vsel %vm1771_vm6, %v2832_v22, %v2831_v5  ;;  %v7138_v53 = vunpack.i.h.bf16 %v7136_v63  ;;  %v7137_v17 = vunpack.i.l.bf16 %v7136_v63  ;;  %v2764_v5 = vld [vmem:[#allocation2 + $0x1e0] sm:$0x1] }
 0x476   :  { %v2834_v10 = vrot.slane %v2760_v61, 5  ;;  %v7146_v13 = vpop.permute.xlu0 %7145  ;;  %v2753_v9 = vsel %vm891_vm0, %v9616_v40, %v7133_v51  ;;  %v2461_v27 = vsel %vm891_vm0, %v9538_v58, %v7132_v50  ;;  %v2931_v34 = vsel %vm1771_vm6, %v2930_v31, %v2929_v1  ;;  %v7151_v49 = vpop.permute.xlu1 %7150  ;;  %v2762_v40 = vld [vmem:[#allocation2 + $0x160] sm:$0x1] }
 0x477   :  { %4253 = vmatpush.bf16.msra.mxu3 %v6896_v38  ;;  %v7141_v14 = vpop.permute.xlu2 %7140  ;;  %v2761_v38 = vld [vmem:[#allocation2 + $0x120] sm:$0x1]  ;;  %v2459_v52 = vsel %vm2159_vm12, %v2458_v23, %v7122_v12  ;;  %v2751_v29 = vsel %vm2159_vm12, %v2750_v36, %v7123_v3  ;;  %v2932_v41 = vrot.slane %v2793_v48, 5  ;;  %v7128_v54 = vunpack.i.h.bf16 %v10085_v0  ;;  %v2797_v3 = vld [vmem:[#allocation2 + $0x1e8] sm:$0x1] }
 0x478   :  { %4165 = vmatmul.bf16.gmra.mxu2 %v3880_v62  ;;  %v2835_v59 = vsel %vm1774_vm7, %v2834_v10, %v2833_v7  ;;  %v7127_v42 = vunpack.i.l.bf16 %v10085_v0  ;;  %v7143_v11 = vunpack.i.h.bf16 %v7141_v14  ;;  %v2836_v20 = vrot.slane %v2761_v38, 4  ;;  %v2795_v0 = vld [vmem:[#allocation2 + $0x168] sm:$0x1] }
 0x479   :  { %v7142_v19 = vunpack.i.l.bf16 %v7141_v14  ;;  %v2462_v58 = vsel %vm2159_vm12, %v2461_v27, %v7137_v17  ;;  %v2754_v57 = vsel %vm2159_vm12, %v2753_v9, %v7138_v53  ;;  %v2933_v15 = vsel %vm1774_vm7, %v2932_v41, %v2931_v34 }
 0x47a   :  { %v10132_v37 = vsel %vm2161_vm13, %v2459_v52, %v7127_v42  ;;  %v10135_v32 = vsel %vm2161_vm13, %v2751_v29, %v7128_v54  ;;  %v2837_v62 = vsel %vm1777_vm8, %v2836_v20, %v2835_v59  ;;  %v2934_v33 = vrot.slane %v2794_v39, 4  ;;  %v6886_v59 = vld [vmem:[%s10917_s3 + $0x98] sm:$0xff] }
 0x47b   :  { %4254 = vmatpush.bf16.msra.mxu3 %v6895_v47  ;;  %v2838_v25 = vrot.slane %v2762_v40, 3  ;;  %v10139_v63 = vsel %vm2161_vm13, %v2462_v58, %v7142_v19  ;;  %v3884_v45 = vpack.c.bf16 %v10135_v32, %v10132_v37  ;;  %v2936_v43 = vrot.slane %v2795_v0, 3  ;;  %v6894_v39 = vld [vmem:[%s10917_s3 + $0xd8] sm:$0xff]  ;;  %4222 = vmatpush.bf16.msra.mxu2 %v6886_v59 }
 0x47c   :  { %v2935_v2 = vsel %vm1777_vm8, %v2934_v33, %v2933_v15  ;;  %v2840_v8 = vrot.slane %v2763_v28, 2  ;;  %v7148_v26 = vunpack.i.h.bf16 %v7146_v13  ;;  %v7147_v14 = vunpack.i.l.bf16 %v7146_v13 }
 0x47d   :  { %v2839_v22 = vsel %vm1780_vm9, %v2838_v25, %v2837_v62  ;;  %v2937_v51 = vsel %vm1780_vm9, %v2936_v43, %v2935_v2  ;;  %v2938_v12 = vrot.slane %v2796_v18, 2  ;;  %v2842_v1 = vrot.slane %v2764_v5, 1  ;;  %v6884_v5 = vld [vmem:[%s10917_s3 + $0x88] sm:$0xff] }
 0x47e   :  { %4198 = vmatmul.bf16.gmra.mxu3 %v3881_v21  ;;  %v10142_v21 = vsel %vm2161_vm13, %v2754_v57, %v7143_v11  ;;  %v2841_v61 = vsel %vm1783_vm10, %v2840_v8, %v2839_v22  ;;  %v7153_v48 = vunpack.i.h.bf16 %v7151_v49  ;;  %v7152_v53 = vunpack.i.l.bf16 %v7151_v49  ;;  %v6893_v49 = vld [vmem:[%s10917_s3 + $0xd0] sm:$0xff] }
 0x47f   :  { %v7156_v60 = vpop.permute.xlu2 %7155  ;;  %v3885_v47 = vpack.c.bf16 %v10142_v21, %v10139_v63  ;;  %v2939_v36 = vsel %vm1783_vm10, %v2938_v12, %v2937_v51  ;;  %v2843_v17 = vsel %vm1786_vm11, %v2842_v1, %v2841_v61  ;;  %v2940_v38 = vrot.slane %v2797_v3, 1  ;;  %4255 = vmatpush.bf16.msra.mxu3 %v6894_v39  ;;  %v6883_v1 = vld [vmem:[%s10917_s3 + $0x80] sm:$0xff] }
 0x480   :  { %v3164_v10 = vsel %vm891_vm0, %v9658_v55, %v7148_v26  ;;  %v3018_v9 = vsel %vm891_vm0, %v2843_v17, %v7147_v14  ;;  %v7158_v42 = vunpack.i.h.bf16 %v7156_v60  ;;  %v7157_v11 = vunpack.i.l.bf16 %v7156_v60  ;;  %v3351_v17 = vld [vmem:[#allocation2 + $0x78] sm:$0x1] }
 0x481   :  { %v7166_v31 = vpop.permute.xlu1 %7165  ;;  %v2941_v34 = vsel %vm1786_vm11, %v2940_v38, %v2939_v36  ;;  %v3019_v41 = vsel %vm2159_vm12, %v3018_v9, %v7152_v53  ;;  %v3165_v54 = vsel %vm2159_vm12, %v3164_v10, %v7153_v48  ;;  %v3878_v36 = vpack.c.bf16 %v10132_v37, %v10092_v24  ;;  %v3319_v48 = vld [vmem:[#allocation2 + $0xb0] sm:$0x1] }
 0x482   :  { %v7168_v13 = vunpack.i.h.bf16 %v7166_v31  ;;  %v7167_v27 = vunpack.i.l.bf16 %v7166_v31  ;;  %v3020_v57 = vsel %vm2161_vm13, %v3019_v41, %v7157_v11  ;;  %v10179_v15 = vsel %vm2161_vm13, %v3165_v54, %v7158_v42  ;;  %v6891_v31 = vld [vmem:[%s10917_s3 + $0xc0] sm:$0xff]  ;;  %v3317_v10 = vld [vmem:[#allocation2 + $0x30] sm:$0x1] }
 0x483   :  { %v7161_v50 = vpop.permute.xlu0 %7160  ;;  %4256 = vmatpush.bf16.msra.mxu3 %v6893_v49  ;;  %v3888_v33 = vpack.c.bf16 %v10179_v15, %v3020_v57  ;;  %v3882_v38 = vpack.c.bf16 %v3020_v57, %v10135_v32  ;;  %v3392_v9 = vrot.slane %v3319_v48, 6  ;;  %v3353_v32 = vld [vmem:[#allocation2 + $0xf8] sm:$0x1]  ;;  %v3322_v41 = vld [vmem:[#allocation2 + $0x170] sm:$0x1] }
 0x484   :  { %v7163_v23 = vunpack.i.h.bf16 %v7161_v50  ;;  %v7162_v7 = vunpack.i.l.bf16 %v7161_v50  ;;  %v3492_v49 = vrot.slane %v3353_v32, 5  ;;  %v3355_v57 = vld [vmem:[#allocation2 + $0x178] sm:$0x1] }
 0x486   :  { %v3167_v52 = vsel %vm891_vm0, %v9707_v44, %v7163_v23  ;;  %v3021_v29 = vsel %vm891_vm0, %v2941_v34, %v7162_v7  ;;  %v6885_v44 = vld [vmem:[%s10917_s3 + $0x90] sm:$0xff]  ;;  %v3879_v23 = vpack.c.bf16 %v10139_v63, %v10096_v35  ;;  %v3488_v34 = vrot.slane %v3351_v17, 7  ;;  %v3350_v35 = vld [vmem:[#allocation2 + $0x38] sm:$0x1] }
 0x487   :  { %v7171_v55 = vpop.permute.xlu2 %7170  ;;  %v3022_v40 = vsel %vm2159_vm12, %v3021_v29, %v7167_v27  ;;  %v3168_v20 = vsel %vm2159_vm12, %v3167_v52, %v7168_v13  ;;  %4223 = vmatpush.bf16.msra.mxu2 %v6885_v44  ;;  %v3318_v7 = vld [vmem:[#allocation2 + $0x70] sm:$0x1]  ;;  %v3352_v27 = vld [vmem:[#allocation2 + $0xb8] sm:$0x1] }
 0x488   :  { %4170 = vmatmul.bf16.gmra.mxu2 %v3884_v45  ;;  %v7173_v19 = vunpack.i.h.bf16 %v7171_v55  ;;  %v7172_v58 = vunpack.i.l.bf16 %v7171_v55  ;;  %v3390_v53 = vrot.slane %v3318_v7, 7  ;;  %v3320_v52 = vld [vmem:[#allocation2 + $0xf0] sm:$0x1]  ;;  %v3490_v63 = vrot.slane %v3352_v27, 6  ;;  %v3354_v44 = vld [vmem:[#allocation2 + $0x138] sm:$0x1] }
 0x489   :  { %v3321_v29 = vld [vmem:[#allocation2 + $0x130] sm:$0x1]  ;;  %v3394_v59 = vrot.slane %v3320_v52, 5  ;;  %v3489_v39 = vsel %vm1768_vm5, %v3488_v34, %v3350_v35 }
 0x48a   :  { %v3023_v62 = vsel %vm2161_vm13, %v3022_v40, %v7172_v58  ;;  %v10183_v0 = vsel %vm2161_vm13, %v3168_v20, %v7173_v19  ;;  %v3391_v13 = vsel %vm1768_vm5, %v3390_v53, %v3317_v10  ;;  %v3396_v54 = vrot.slane %v3321_v29, 4  ;;  %v3323_v20 = vld [vmem:[#allocation2 + $0x1b0] sm:$0x1] }
 0x48b   :  { %v7176_v28 = vpop.permute.xlu0 %7175  ;;  %v3889_v25 = vpack.c.bf16 %v10183_v0, %v3023_v62  ;;  %4224 = vmatpush.bf16.msra.mxu2 %v6884_v5  ;;  %v3883_v24 = vpack.c.bf16 %v3023_v62, %v10142_v21  ;;  %v3393_v37 = vsel %vm1771_vm6, %v3392_v9, %v3391_v13  ;;  %v3491_v11 = vsel %vm1771_vm6, %v3490_v63, %v3489_v39 }
 0x48c   :  { %v7177_v60 = vunpack.i.l.bf16 %v7176_v28  ;;  %v7178_v22 = vunpack.i.h.bf16 %v7176_v28  ;;  %v3395_v55 = vsel %vm1774_vm7, %v3394_v59, %v3393_v37  ;;  %v3398_v19 = vrot.slane %v3322_v41, 3  ;;  %v3324_v28 = vld [vmem:[#allocation2 + $0x1f0] sm:$0x1] }
 0x48d   :  { %v3397_v21 = vsel %vm1777_vm8, %v3396_v54, %v3395_v55  ;;  %v3493_v58 = vsel %vm1774_vm7, %v3492_v49, %v3491_v11  ;;  %v3494_v62 = vrot.slane %v3354_v44, 4  ;;  %v3402_v5 = vrot.slane %v3324_v28, 1 }
 0x48e   :  { %4203 = vmatmul.bf16.gmra.mxu3 %v3885_v47  ;;  %v3310_v18 = vsel %vm891_vm0, %v9664_v56, %v7177_v60  ;;  %v3313_v50 = vsel %vm891_vm0, %v9717_v4, %v7178_v22  ;;  %v6892_v4 = vld [vmem:[%s10917_s3 + $0xc8] sm:$0xff]  ;;  %v3496_v22 = vrot.slane %v3355_v57, 3 }
 0x48f   :  { %v7186_v43 = vpop.permute.xlu2 %7185  ;;  %4257 = vmatpush.bf16.msra.mxu3 %v6892_v4  ;;  %4225 = vmatpush.bf16.msra.mxu2 %v6883_v1 }
 0x490   :  { %v7187_v51 = vunpack.i.l.bf16 %v7186_v43  ;;  %v7188_v14 = vunpack.i.h.bf16 %v7186_v43 }
 0x493   :  { %4258 = vmatpush.bf16.msra.mxu3 %v6891_v31 }
 0x495   :  { %v7181_v2 = vpop.permute.xlu1 %7180 }
 0x496   :  { %v7182_v45 = vunpack.i.l.bf16 %v7181_v2  ;;  %v7183_v8 = vunpack.i.h.bf16 %v7181_v2  ;;  %v3495_v2 = vsel %vm1777_vm8, %v3494_v62, %v3493_v58 }
 0x498   :  { %4175 = vmatmul.bf16.gmra.mxu2 %v3888_v33  ;;  %v3311_v47 = vsel %vm2159_vm12, %v3310_v18, %v7182_v45  ;;  %v3314_v26 = vsel %vm2159_vm12, %v3313_v50, %v7183_v8  ;;  %v3399_v33 = vsel %vm1780_vm9, %v3398_v19, %v3397_v21  ;;  %v3356_v45 = vld [vmem:[#allocation2 + $0x1b8] sm:$0x1]  ;;  %v7201_v18 = vpop.permute.xlu2 %7200  ;;  %v3497_v50 = vsel %vm1780_vm9, %v3496_v22, %v3495_v2 }
 0x499   :  { %v10196_v61 = vsel %vm2161_vm13, %v3311_v47, %v7187_v51  ;;  %v10202_v3 = vsel %vm2161_vm13, %v3314_v26, %v7188_v14  ;;  %v3357_v51 = vld [vmem:[#allocation2 + $0x1f8] sm:$0x1]  ;;  %v3498_v26 = vrot.slane %v3356_v45, 2  ;;  %v7203_v10 = vunpack.i.h.bf16 %v7201_v18 }
 0x49a   :  { %v3892_v56 = vpack.c.bf16 %v10196_v61, %v10196_v61  ;;  %v3893_v12 = vpack.c.bf16 %v10202_v3, %v10202_v3  ;;  %v3886_v60 = vpack.c.bf16 %v10196_v61, %v10179_v15  ;;  %v3500_v1 = vrot.slane %v3357_v51, 1 }
 0x49b   :  { %v3499_v4 = vsel %vm1783_vm10, %v3498_v26, %v3497_v50  ;;  %v7202_v9 = vunpack.i.l.bf16 %v7201_v18 }
 0x49c   :  { %v3501_v53 = vsel %vm1786_vm11, %v3500_v1, %v3499_v4 }
 0x49e   :  { %4208 = vmatmul.bf16.gmra.mxu3 %v3889_v25  ;;  %v3400_v25 = vrot.slane %v3323_v20, 2 }
 0x4a0   :  { %v3401_v43 = vsel %vm1783_vm10, %v3400_v25, %v3399_v33  ;;  %v7216_v27 = vpop.permute.xlu2 %7215 }
 0x4a1   :  { %v7218_v35 = vunpack.i.h.bf16 %v7216_v27  ;;  %v7217_v63 = vunpack.i.l.bf16 %v7216_v27 }
 0x4a5   :  { %v7196_v40 = vpop.permute.xlu1 %7195 }
 0x4a6   :  { %v7198_v15 = vunpack.i.h.bf16 %v7196_v40  ;;  %v7197_v61 = vunpack.i.l.bf16 %v7196_v40 }
 0x4a8   :  { %4180 = vmatmul.bf16.gmra.mxu2 %v3892_v56  ;;  %v3887_v56 = vpack.c.bf16 %v10202_v3, %v10183_v0 }
 0x4a9   :  { %v7191_v42 = vpop.permute.xlu0 %7190 }
 0x4aa   :  { %v7193_v8 = vunpack.i.h.bf16 %v7191_v42  ;;  %v7192_v47 = vunpack.i.l.bf16 %v7191_v42 }
 0x4ac   :  { %v3724_v31 = vsel %vm891_vm0, %v9793_v16, %v7193_v8 }
 0x4ae   :  { %4213 = vmatmul.bf16.gmra.mxu3 %v3893_v12  ;;  %v3403_v12 = vsel %vm1786_vm11, %v3402_v5, %v3401_v43 }
 0x4b0   :  { %v7231_v49 = vpop.permute.xlu2 %7230 }
 0x4b1   :  { %v7232_v58 = vunpack.i.l.bf16 %v7231_v49  ;;  %v7233_v25 = vunpack.i.h.bf16 %v7231_v49 }
 0x4b8   :  { %4226 = vmatmul.bf16.vlgmr.msra.gmra.mxu2 %v3878_v36  ;;  %v3578_v36 = vsel %vm891_vm0, %v3403_v12, %v7192_v47 }
 0x4b9   :  { %v3579_v3 = vsel %vm2159_vm12, %v3578_v36, %v7197_v61 }
 0x4ba   :  { %v3580_v34 = vsel %vm2161_vm13, %v3579_v3, %v7202_v9 }
 0x4bc   :  { %v7206_v14 = vpop.permute.xlu0 %7205 }
 0x4bd   :  { %v7208_v7 = vunpack.i.h.bf16 %v7206_v14  ;;  %v7207_v48 = vunpack.i.l.bf16 %v7206_v14 }
 0x4be   :  { %4259 = vmatmul.bf16.vlgmr.msra.gmra.mxu3 %v3879_v23  ;;  %v7211_v23 = vpop.permute.xlu1 %7210 }
 0x4bf   :  { %v7213_v17 = vunpack.i.h.bf16 %v7211_v23  ;;  %v7212_v0 = vunpack.i.l.bf16 %v7211_v23  ;;  %v3727_v13 = vsel %vm891_vm0, %v9847_v6, %v7208_v7  ;;  %v3581_v16 = vsel %vm891_vm0, %v3501_v53, %v7207_v48 }
 0x4c1   :  { %v3728_v37 = vsel %vm2159_vm12, %v3727_v13, %v7213_v17 }
 0x4c2   :  { %v3729_v32 = vsel %vm2161_vm13, %v3728_v37, %v7218_v35 }
 0x4c4   :  { %v7221_v29 = vpop.permute.xlu0 %7220 }
 0x4c5   :  { %v7222_v55 = vunpack.i.l.bf16 %v7221_v29  ;;  %v7223_v11 = vunpack.i.h.bf16 %v7221_v29 }
 0x4c7   :  { %v3870_v44 = vsel %vm891_vm0, %v9800_v46, %v7222_v55  ;;  %v3873_v57 = vsel %vm891_vm0, %v9856_v30, %v7223_v11 }
 0x4c8   :  { %4231 = vmatmul.bf16.gmra.mxu2 %v3882_v38  ;;  %v3725_v38 = vsel %vm2159_vm12, %v3724_v31, %v7198_v15 }
 0x4c9   :  { %v3726_v52 = vsel %vm2161_vm13, %v3725_v38, %v7203_v10 }
 0x4ca   :  { %v3890_v59 = vpack.c.bf16 %v3726_v52, %v3580_v34 }
 0x4ce   :  { %4264 = vmatmul.bf16.gmra.mxu3 %v3883_v24  ;;  %v3582_v24 = vsel %vm2159_vm12, %v3581_v16, %v7212_v0  ;;  %v7226_v6 = vpop.permute.xlu1 %7225 }
 0x4cf   :  { %v3583_v39 = vsel %vm2161_vm13, %v3582_v24, %v7217_v63  ;;  %v7227_v42 = vunpack.i.l.bf16 %v7226_v6  ;;  %v7228_v40 = vunpack.i.h.bf16 %v7226_v6 }
 0x4d0   :  { %v3891_v41 = vpack.c.bf16 %v3729_v32, %v3583_v39 }
 0x4d1   :  { %v3871_v19 = vsel %vm2159_vm12, %v3870_v44, %v7227_v42  ;;  %v3874_v28 = vsel %vm2159_vm12, %v3873_v57, %v7228_v40 }
 0x4d2   :  { %v3872_v33 = vsel %vm2161_vm13, %v3871_v19, %v7232_v58  ;;  %v3875_v46 = vsel %vm2161_vm13, %v3874_v28, %v7233_v25 }
 0x4d3   :  { %v3894_v2 = vpack.c.bf16 %v3872_v33, %v3872_v33  ;;  %v3895_v45 = vpack.c.bf16 %v3875_v46, %v3875_v46 }
 0x4d8   :  { %4236 = vmatmul.bf16.gmra.mxu2 %v3886_v60 }
 0x4de   :  { %4269 = vmatmul.bf16.gmra.mxu3 %v3887_v56 }
 0x4e8   :  { %4241 = vmatmul.bf16.gmra.mxu2 %v3890_v59 }
 0x4eb   :  { %v4161_v54 = vpop.f32.mrf.mxu2 }
 0x4ee   :  { %4274 = vmatmul.bf16.gmra.mxu3 %v3891_v41 }
 0x4f1   :  { %v4194_v21 = vpop.f32.mrf.mxu3 }
 0x4f2   :  { %v4195_v20 = vadd.f32 %v4194_v21, %v4161_v54 }
 0x4f3   :  { %v4163_v62 = vpop.f32.mrf.mxu2 }
 0x4f8   :  { %4246 = vmatmul.bf16.gmra.mxu2 %v3894_v2 }
 0x4f9   :  { %v4196_v60 = vpop.f32.mrf.mxu3 }
 0x4fa   :  { %v4197_v17 = vadd.f32 %v4196_v60, %v4163_v62 }
 0x4fb   :  { %v4166_v22 = vpop.f32.mrf.mxu2 }
 0x4fe   :  { %4279 = vmatmul.bf16.gmra.mxu3 %v3895_v45 }
 0x501   :  { %v4199_v18 = vpop.f32.mrf.mxu3 }
 0x502   :  { %v4200_v43 = vadd.f32 %v4199_v18, %v4166_v22 }
 0x503   :  { %v4168_v5 = vpop.f32.mrf.mxu2 }
 0x509   :  { %v4201_v8 = vpop.f32.mrf.mxu3 }
 0x50a   :  { %v4202_v59 = vadd.f32 %v4201_v8, %v4168_v5 }
 0x50b   :  { %v4171_v47 = vpop.f32.mrf.mxu2 }
 0x511   :  { %v4204_v30 = vpop.f32.mrf.mxu3 }
 0x512   :  { %v4205_v51 = vadd.f32 %v4204_v30, %v4171_v47 }
 0x513   :  { %v4173_v50 = vpop.f32.mrf.mxu2 }
 0x519   :  { %v4206_v26 = vpop.f32.mrf.mxu3 }
 0x51b   :  { %v4176_v14 = vpop.f32.mrf.mxu2 }
 0x521   :  { %v4209_v56 = vpop.f32.mrf.mxu3 }
 0x522   :  { %v4210_v12 = vadd.f32 %v4209_v56, %v4176_v14 }
 0x523   :  { %v4178_v15 = vpop.f32.mrf.mxu2 }
 0x529   :  { %v4211_v61 = vpop.f32.mrf.mxu3 }
 0x52a   :  { %v4212_v18 = vadd.f32 %v4211_v61, %v4178_v15 }
 0x52b   :  { %v4181_v4 = vpop.f32.mrf.mxu2 }
 0x531   :  { %v4214_v1 = vpop.f32.mrf.mxu3 }
 0x532   :  { %v4215_v31 = vadd.f32 %v4214_v1, %v4181_v4 }
 0x533   :  { %v4183_v36 = vpop.f32.mrf.mxu2 }
 0x539   :  { %v4216_v23 = vpop.f32.mrf.mxu3 }
 0x53b   :  { %v4227_v7 = vpop.f32.mrf.mxu2 }
 0x53c   :  { %v4228_v38 = vadd.f32 %v4227_v7, %v4195_v20  ;;  %v4207_v20 = vadd.f32 %v4206_v26, %v4173_v50 }
 0x541   :  { %v4260_v48 = vpop.f32.mrf.mxu3 }
 0x542   :  { %v10263_v13 = vadd.f32 %v4260_v48, %v4228_v38 }
 0x543   :  { %v4229_v53 = vpop.f32.mrf.mxu2 }
 0x544   :  { %v4230_v0 = vadd.f32 %v4229_v53, %v4197_v17  ;;  %v4285_v52 = vsel %vm2159_vm12, %v10263_v13, 0.0 }
 0x549   :  { %v4262_v3 = vpop.f32.mrf.mxu3 }
 0x54a   :  { %v10261_v10 = vadd.f32 %v4262_v3, %v4230_v0 }
 0x54b   :  { %v4232_v9 = vpop.f32.mrf.mxu2 }
 0x54c   :  { %v4233_v16 = vadd.f32 %v4232_v9, %v4200_v43  ;;  %v4286_v27 = vsel %vm2159_vm12, %v10261_v10, 0.0  ;;  %v7282_v43 = vmov 72.0  }
 0x54d   :  { %v4287_v37 = vadd.f32 %v4286_v27, %v4285_v52  ;;  %7244 = vrcp.f32 %v7282_v43 }
 0x551   :  { %v4265_v34 = vpop.f32.mrf.mxu3 }
 0x552   :  { %v10269_v24 = vadd.f32 %v4265_v34, %v4233_v16 }
 0x553   :  { %v4234_v29 = vpop.f32.mrf.mxu2  ;;  %v7245_v30 = vpop.eup %7244 }
 0x554   :  { %v4288_v35 = vsel %vm2159_vm12, %v10269_v24, 0.0  ;;  %v4235_v39 = vadd.f32 %v4234_v29, %v4202_v59  ;;  %v4309_v14 = vmul.f32 72.0, %v7245_v30  ;;  %vm4313_vm14 = vweird.f32 %v7245_v30 }
 0x555   :  { %v4289_v63 = vadd.f32 %v4288_v35, %v4287_v37 }
 0x556   :  { %v4310_v36 = vsub.f32 1.0, %v4309_v14  ;;  %v6905_v14 = vld [vmem:[%s10919_s5 + $0x30] sm:$0xff] }
 0x558   :  { %v4311_v61 = vmul.f32 %v7245_v30, %v4310_v36 }
 0x559   :  { %v4267_v32 = vpop.f32.mrf.mxu3 }
 0x55a   :  { %v4268_v6 = vadd.f32 %v4267_v32, %v4235_v39  ;;  %v4312_v0 = vadd.f32 %v7245_v30, %v4311_v61 }
 0x55b   :  { %v4237_v55 = vpop.f32.mrf.mxu2 }
 0x55c   :  { %v4238_v41 = vadd.f32 %v4237_v55, %v4205_v51  ;;  %v4290_v54 = vsel %vm2159_vm12, %v4268_v6, 0.0  ;;  %v4314_v38 = vsel %vm4313_vm14, %v7245_v30, %v4312_v0 }
 0x55d   :  { %v4291_v44 = vadd.f32 %v4290_v54, %v4289_v63 }
 0x561   :  { %v4270_v42 = vpop.f32.mrf.mxu3 }
 0x562   :  { %v4271_v11 = vadd.f32 %v4270_v42, %v4238_v41 }
 0x563   :  { %v4239_v40 = vpop.f32.mrf.mxu2 }
 0x564   :  { %v4292_v49 = vsel %vm2159_vm12, %v4271_v11, 0.0  ;;  %v4240_v19 = vadd.f32 %v4239_v40, %v4207_v20 }
 0x565   :  { %v4293_v21 = vadd.f32 %v4292_v49, %v4291_v44 }
 0x569   :  { %v4272_v58 = vpop.f32.mrf.mxu3 }
 0x56a   :  { %v4273_v57 = vadd.f32 %v4272_v58, %v4240_v19 }
 0x56b   :  { %v4242_v62 = vpop.f32.mrf.mxu2 }
 0x56c   :  { %v4243_v33 = vadd.f32 %v4242_v62, %v4210_v12  ;;  %v4294_v28 = vsel %vm2159_vm12, %v4273_v57, 0.0 }
 0x56d   :  { %v4295_v60 = vadd.f32 %v4294_v28, %v4293_v21 }
 0x571   :  { %v4275_v25 = vpop.f32.mrf.mxu3 }
 0x572   :  { %v4276_v2 = vadd.f32 %v4275_v25, %v4243_v33 }
 0x573   :  { %v4244_v22 = vpop.f32.mrf.mxu2 }
 0x574   :  { %v4296_v46 = vsel %vm2159_vm12, %v4276_v2, 0.0  ;;  %v4245_v5 = vadd.f32 %v4244_v22, %v4212_v18 }
 0x575   :  { %v4297_v45 = vadd.f32 %v4296_v46, %v4295_v60 }
 0x579   :  { %v4277_v8 = vpop.f32.mrf.mxu3 }
 0x57a   :  { %v4278_v47 = vadd.f32 %v4277_v8, %v4245_v5 }
 0x57b   :  { %v4247_v51 = vpop.f32.mrf.mxu2 }
 0x57c   :  { %v4248_v50 = vadd.f32 %v4247_v51, %v4215_v31  ;;  %v4298_v26 = vsel %vm2159_vm12, %v4278_v47, 0.0  ;;  %v6906_v51 = vld [vmem:[%s10919_s5 + $0x38] sm:$0xff] }
 0x57d   :  { %v4299_v4 = vadd.f32 %v4298_v26, %v4297_v45  ;;  %4723 = vmatpush.bf16.msrb.mxu2 %v6906_v51 }
 0x581   :  { %v4280_v56 = vpop.f32.mrf.mxu3  ;;  %4724 = vmatpush.bf16.msrb.mxu2 %v6905_v14 }
 0x582   :  { %v4281_v12 = vadd.f32 %v4280_v56, %v4248_v50  ;;  %v6914_v50 = vld [vmem:[%s10919_s5 + $0x78] sm:$0xff]  ;;  %v6913_v56 = vld [vmem:[%s10919_s5 + $0x70] sm:$0xff] }
 0x583   :  { %v4249_v7 = vpop.f32.mrf.mxu2  ;;  %4736 = vmatpush.bf16.msrb.mxu3 %v6914_v50  ;;  %v6923_v50 = vld [vmem:[%s10919_s5 + $0xc0] sm:$0xff] }
 0x584   :  { %v4300_v1 = vsel %vm2159_vm12, %v4281_v12, 0.0  ;;  %v6911_v7 = vld [vmem:[%s10919_s5 + $0x60] sm:$0xff] }
 0x585   :  { %v4301_v23 = vadd.f32 %v4300_v1, %v4299_v4  ;;  %v6912_v4 = vld [vmem:[%s10919_s5 + $0x68] sm:$0xff] }
 0x587   :  { %v4302_v15 = vrot.slane %v4301_v23, 4  ;;  %4737 = vmatpush.bf16.msrb.mxu3 %v6913_v56 }
 0x589   :  { %v4303_v48 = vadd.f32 %v4302_v15, %v4301_v23  ;;  %v4282_v53 = vpop.f32.mrf.mxu3  ;;  %v6903_v23 = vld [vmem:[%s10919_s5 + $0x20] sm:$0xff] }
 0x58a   :  { %v4284_v53 = vld [vmem:[%s10918_s4] sm:$0x3] }
 0x58b   :  { %v4304_v17 = vrot.slane %v4303_v48, 2  ;;  %4738 = vmatpush.bf16.msrb.mxu3 %v6912_v4 }
 0x58d   :  { %v4305_v3 = vadd.f32 %v4304_v17, %v4303_v48  ;;  %v6902_v48 = vld [vmem:[%s10919_s5 + $0x18] sm:$0xff] }
 0x58f   :  { %v4306_v31 = vrot.slane %v4305_v3, 1  ;;  %4739 = vmatpush.bf16.msrb.mxu3 %v6911_v7  ;;  %v6934_v7 = vld [vmem:[%s10919_s5 + $0x118] sm:$0xff] }
 0x591   :  { %v4307_v9 = vadd.f32 %v4306_v31, %v4305_v3  ;;  %v10353_v3 = vperm.slane %v4284_v53, 0 }
 0x593   :  { %v4315_v16 = vmul.f32 %v4314_v38, %v4307_v9 }
 0x595   :  { %v10280_v27 = vsub.f32 %v10263_v13, %v4315_v16  ;;  %v10283_v34 = vsub.f32 %v10261_v10, %v4315_v16  ;;  %v10286_v52 = vsub.f32 %v10269_v24, %v4315_v16  ;;  %v10288_v37 = vsub.f32 %v4268_v6, %v4315_v16 }
 0x596   :  { %v10290_v35 = vsub.f32 %v4271_v11, %v4315_v16  ;;  %v10292_v63 = vsub.f32 %v4276_v2, %v4315_v16  ;;  %v10294_v29 = vsub.f32 %v4281_v12, %v4315_v16  ;;  %v10302_v39 = vsub.f32 %v4273_v57, %v4315_v16  ;;  %v6904_v12 = vld [vmem:[%s10919_s5 + $0x28] sm:$0xff] }
 0x597   :  { %v4325_v59 = vmul.f32 %v10280_v27, %v10280_v27  ;;  %v4326_v13 = vmul.f32 %v10283_v34, %v10283_v34  ;;  %v4327_v10 = vmul.f32 %v10286_v52, %v10286_v52  ;;  %v4328_v24 = vmul.f32 %v10288_v37, %v10288_v37  ;;  %4725 = vmatpush.bf16.msrb.mxu2 %v6904_v12 }
 0x598   :  { %v4329_v41 = vmul.f32 %v10290_v35, %v10290_v35  ;;  %v4323_v11 = vsub.f32 %v4278_v47, %v4315_v16  ;;  %v4330_v44 = vmul.f32 %v10302_v39, %v10302_v39  ;;  %v4331_v40 = vmul.f32 %v10292_v63, %v10292_v63 }
 0x599   :  { %v4334_v32 = vsel %vm2159_vm12, %v4325_v59, 0.0  ;;  %v4335_v6 = vsel %vm2159_vm12, %v4326_v13, 0.0  ;;  %v4337_v54 = vsel %vm2159_vm12, %v4327_v10, 0.0  ;;  %v4339_v49 = vsel %vm2159_vm12, %v4328_v24, 0.0 }
 0x59a   :  { %v4336_v55 = vadd.f32 %v4335_v6, %v4334_v32  ;;  %v4341_v20 = vsel %vm2159_vm12, %v4329_v41, 0.0  ;;  %v4332_v58 = vmul.f32 %v4323_v11, %v4323_v11  ;;  %v4343_v57 = vsel %vm2159_vm12, %v4330_v44, 0.0 }
 0x59b   :  { %v4333_v33 = vmul.f32 %v10294_v29, %v10294_v29  ;;  %v4345_v28 = vsel %vm2159_vm12, %v4331_v40, 0.0  ;;  %4726 = vmatpush.bf16.msrb.mxu2 %v6903_v23  ;;  %v6900_v40 = vld [vmem:[%s10919_s5 + $0x8] sm:$0xff] }
 0x59c   :  { %v4338_v42 = vadd.f32 %v4337_v54, %v4336_v55  ;;  %v4347_v2 = vsel %vm2159_vm12, %v4332_v58, 0.0  ;;  %v6908_v58 = vld [vmem:[%s10919_s5 + $0x48] sm:$0xff] }
 0x59d   :  { %v4349_v46 = vsel %vm2159_vm12, %v4333_v33, 0.0  ;;  %v6921_v33 = vld [vmem:[%s10919_s5 + $0xb0] sm:$0xff] }
 0x59e   :  { %v4340_v21 = vadd.f32 %v4339_v49, %v4338_v42  ;;  %v6901_v49 = vld [vmem:[%s10919_s5 + $0x10] sm:$0xff] }
 0x59f   :  { %4727 = vmatpush.bf16.msrb.mxu2 %v6902_v48 }
 0x5a0   :  { %v4342_v19 = vadd.f32 %v4341_v20, %v4340_v21  ;;  %v6910_v21 = vld [vmem:[%s10919_s5 + $0x58] sm:$0xff]  ;;  %v6909_v20 = vld [vmem:[%s10919_s5 + $0x50] sm:$0xff] }
 0x5a1   :  { %4740 = vmatpush.bf16.msrb.mxu3 %v6910_v21 }
 0x5a2   :  { %v4344_v62 = vadd.f32 %v4343_v57, %v4342_v19  ;;  %v6899_v19 = vld [vmem:[%s10919_s5] sm:$0xff]  ;;  %v6922_v57 = vld [vmem:[%s10919_s5 + $0xb8] sm:$0xff] }
 0x5a3   :  { %4728 = vmatpush.bf16.msrb.mxu2 %v6901_v49 }
 0x5a4   :  { %v4346_v25 = vadd.f32 %v4345_v28, %v4344_v62  ;;  %v6907_v62 = vld [vmem:[%s10919_s5 + $0x40] sm:$0xff]  ;;  %v6930_v28 = vld [vmem:[%s10919_s5 + $0xf8] sm:$0xff] }
 0x5a5   :  { %4741 = vmatpush.bf16.msrb.mxu3 %v6909_v20 }
 0x5a6   :  { %v4348_v60 = vadd.f32 %v4347_v2, %v4346_v25  ;;  %v6920_v25 = vld [vmem:[%s10919_s5 + $0xa8] sm:$0xff]  ;;  %v6929_v2 = vld [vmem:[%s10919_s5 + $0xf0] sm:$0xff] }
 0x5a7   :  { %4729 = vmatpush.bf16.msrb.mxu2 %v6900_v40 }
 0x5a8   :  { %v4350_v45 = vadd.f32 %v4349_v46, %v4348_v60  ;;  %v6919_v60 = vld [vmem:[%s10919_s5 + $0xa0] sm:$0xff]  ;;  %v6928_v46 = vld [vmem:[%s10919_s5 + $0xe8] sm:$0xff] }
 0x5a9   :  { %4742 = vmatpush.bf16.msrb.mxu3 %v6908_v58 }
 0x5aa   :  { %v4351_v22 = vrot.slane %v4350_v45, 4 }
 0x5ab   :  { %4730 = vmatpush.bf16.msrb.mxu2 %v6899_v19 }
 0x5ac   :  { %v4352_v18 = vadd.f32 %v4351_v22, %v4350_v45  ;;  %v6918_v45 = vld [vmem:[%s10919_s5 + $0x98] sm:$0xff]  ;;  %v6927_v22 = vld [vmem:[%s10919_s5 + $0xe0] sm:$0xff] }
 0x5ad   :  { %4743 = vmatpush.bf16.msrb.mxu3 %v6907_v62 }
 0x5ae   :  { %v4353_v43 = vrot.slane %v4352_v18, 2 }
 0x5af   :  { %4749 = vmatpush.bf16.msra.mxu2 %v6922_v57 }
 0x5b0   :  { %v4354_v5 = vadd.f32 %v4353_v43, %v4352_v18  ;;  %v6917_v18 = vld [vmem:[%s10919_s5 + $0x90] sm:$0xff]  ;;  %v6926_v43 = vld [vmem:[%s10919_s5 + $0xd8] sm:$0xff] }
 0x5b1   :  { %4762 = vmatpush.bf16.msra.mxu3 %v6930_v28 }
 0x5b2   :  { %v4355_v8 = vrot.slane %v4354_v5, 1 }
 0x5b3   :  { %4750 = vmatpush.bf16.msra.mxu2 %v6921_v33 }
 0x5b4   :  { %v4356_v47 = vadd.f32 %v4355_v8, %v4354_v5  ;;  %v6916_v5 = vld [vmem:[%s10919_s5 + $0x88] sm:$0xff]  ;;  %v6925_v8 = vld [vmem:[%s10919_s5 + $0xd0] sm:$0xff] }
 0x5b5   :  { %4763 = vmatpush.bf16.msra.mxu3 %v6929_v2 }
 0x5b6   :  { %v4357_v30 = vmul.f32 %v4356_v47, %v4314_v38  ;;  %v10357_v38 = vperm.slane %v4284_v53, 1  ;;  %v6915_v47 = vld [vmem:[%s10919_s5 + $0x80] sm:$0xff] }
 0x5b7   :  { %4751 = vmatpush.bf16.msra.mxu2 %v6920_v25 }
 0x5b8   :  { %v4358_v26 = vadd.f32 1e-05, %v4357_v30  ;;  %v6924_v30 = vld [vmem:[%s10919_s5 + $0xc8] sm:$0xff] }
 0x5b9   :  { %4764 = vmatpush.bf16.msra.mxu3 %v6928_v46 }
 0x5ba   :  { %7246 = vrsqrt.f32 %v4358_v26  ;;  %vm4365_vm0 = vweird.f32 %v4358_v26 }
 0x5bb   :  { %4752 = vmatpush.bf16.msra.mxu2 %v6919_v60 }
 0x5bd   :  { %4765 = vmatpush.bf16.msra.mxu3 %v6927_v22 }
 0x5bf   :  { %4753 = vmatpush.bf16.msra.mxu2 %v6918_v45 }
 0x5c0   :  { %v7247_v1 = vpop.eup %7246 }
 0x5c1   :  { %v4360_v36 = vmul.f32 %v7247_v1, %v4358_v26  ;;  %vm4366_vm15 = vweird.f32 %v7247_v1  ;;  %4766 = vmatpush.bf16.msra.mxu3 %v6926_v43 }
 0x5c2   :  { %vm4367_vm1 = vmor %vm4365_vm0, %vm4366_vm15 }
 0x5c3   :  { %v4361_v15 = vmul.f32 %v7247_v1, %v4360_v36  ;;  %4754 = vmatpush.bf16.msra.mxu2 %v6917_v18 }
 0x5c5   :  { %v4362_v61 = vmul.f32 0.5, %v4361_v15  ;;  %4767 = vmatpush.bf16.msra.mxu3 %v6925_v8 }
 0x5c7   :  { %v4363_v17 = vsub.f32 1.5, %v4362_v61  ;;  %4755 = vmatpush.bf16.msra.mxu2 %v6916_v5 }
 0x5c9   :  { %v4364_v0 = vmul.f32 %v7247_v1, %v4363_v17  ;;  %4768 = vmatpush.bf16.msra.mxu3 %v6924_v30  ;;  %v6933_v17 = vld [vmem:[%s10919_s5 + $0x110] sm:$0xff] }
 0x5cb   :  { %v10355_v31 = vsel %vm4367_vm1, %v7247_v1, %v4364_v0  ;;  %4756 = vmatpush.bf16.msra.mxu2 %v6915_v47 }
 0x5cc   :  { %v4376_v9 = vmul.f32 %v10355_v31, %v4323_v11  ;;  %v4370_v16 = vmul.f32 %v10355_v31, %v10283_v34  ;;  %v4372_v59 = vmul.f32 %v10355_v31, %v10288_v37  ;;  %v4374_v13 = vmul.f32 %v10355_v31, %v10302_v39 }
 0x5cd   :  { %v4369_v51 = vmul.f32 %v10355_v31, %v10280_v27  ;;  %v4371_v14 = vmul.f32 %v10355_v31, %v10286_v52  ;;  %4769 = vmatpush.bf16.msra.mxu3 %v6923_v50  ;;  %v4373_v23 = vmul.f32 %v10355_v31, %v10290_v35  ;;  %v4375_v0 = vmul.f32 %v10355_v31, %v10292_v63  ;;  %v6931_v63 = vld [vmem:[%s10919_s5 + $0x100] sm:$0xff] }
 0x5ce   :  { %v4386_v10 = vmul.f32 %v10353_v3, %v4376_v9  ;;  %v4380_v24 = vmul.f32 %v10353_v3, %v4370_v16  ;;  %v4382_v32 = vmul.f32 %v10353_v3, %v4372_v59  ;;  %v4384_v6 = vmul.f32 %v10353_v3, %v4374_v13  ;;  %v6932_v59 = vld [vmem:[%s10919_s5 + $0x108] sm:$0xff] }
 0x5cf   :  { %v4379_v26 = vmul.f32 %v10353_v3, %v4369_v51  ;;  %v4381_v12 = vmul.f32 %v10353_v3, %v4371_v14  ;;  %v4383_v53 = vmul.f32 %v10353_v3, %v4373_v23  ;;  %v4385_v13 = vmul.f32 %v10353_v3, %v4375_v0  ;;  %v6461_v0 = vld [vmem:[%s10921_s7 + $0x80] sm:$0xf] }
 0x5d0   :  { %v4396_v55 = vadd.f32 %v10357_v38, %v4386_v10  ;;  %v4390_v41 = vadd.f32 %v10357_v38, %v4380_v24  ;;  %v4392_v34 = vadd.f32 %v10357_v38, %v4382_v32  ;;  %v4394_v54 = vadd.f32 %v10357_v38, %v4384_v6 }
 0x5d1   :  { %v4389_v56 = vadd.f32 %v10357_v38, %v4379_v26  ;;  %v4391_v27 = vadd.f32 %v10357_v38, %v4381_v12  ;;  %v4393_v16 = vadd.f32 %v10357_v38, %v4383_v53  ;;  %v4395_v32 = vadd.f32 %v10357_v38, %v4385_v13  ;;  %v6463_v13 = vld [vmem:[%s10921_s7 + $0xa0] sm:$0xf0] }
 0x5d2   :  { %v4405_v37 = vmax.f32 %v4396_v55, 0.0  ;;  %v4399_v42 = vmax.f32 %v4390_v41, 0.0  ;;  %v4401_v11 = vmax.f32 %v4392_v34, 0.0  ;;  %v4403_v39 = vmax.f32 %v4394_v54, 0.0 }
 0x5d3   :  { %v4398_v4 = vmax.f32 %v4389_v56, 0.0  ;;  %v4400_v48 = vmax.f32 %v4391_v27, 0.0  ;;  %v4402_v24 = vmax.f32 %v4393_v16, 0.0  ;;  %v4377_v41 = vmul.f32 %v10355_v31, %v10294_v29 }
 0x5d4   :  { %4420 = vrot.lane.b32.xlu2 %v4405_v37, %s7279_s2  ;;  %4408 = vrot.lane.b32.xlu0 %v4399_v42, %s7279_s2  ;;  %v7234_v44 = vpack.i.bf16 %v4403_v39, %v4401_v11  ;;  %v4404_v34 = vmax.f32 %v4395_v32, 0.0  ;;  %v7283_v31 = vmov 8.0   ;;  %v6429_v32 = vld [vmem:[%s10921_s7 + $0x40] sm:$0xf] }
 0x5d5   :  { %v4387_v42 = vmul.f32 %v10353_v3, %v4377_v41  ;;  %7248 = vrcp.f32 %v7283_v31  ;;  %v6431_v41 = vld [vmem:[%s10921_s7 + $0x60] sm:$0xf0] }
 0x5d6   :  { %7235 = vrot.lane.b32.xlu1 %v7234_v44, %s7279_s2 }
 0x5d7   :  { %v4397_v39 = vadd.f32 %v10357_v38, %v4387_v42  ;;  %v6939_v42 = vld [vmem:[%s10921_s7 + $0x1c] sm:$0xf0] }
 0x5d9   :  { %v4406_v44 = vmax.f32 %v4397_v39, 0.0  ;;  %v6399_v39 = vld [vmem:[%s10921_s7 + $0x20] sm:$0xf0] }
 0x5db   :  { %v4431_v49 = vpack.c.bf16 %v4406_v44, %v4406_v44  ;;  %v7249_v62 = vpop.eup %7248  ;;  %v6501_v44 = vld [vmem:[%s10921_s7 + $0xc8] sm:$0xf] }
 0x5dc   :  { %v4797_v25 = vmul.f32 8.0, %v7249_v62  ;;  %vm4801_vm2 = vweird.f32 %v7249_v62 }
 0x5de   :  { %v4798_v46 = vsub.f32 1.0, %v4797_v25 }
 0x5e0   :  { %v4799_v18 = vmul.f32 %v7249_v62, %v4798_v46  ;;  %v6437_v46 = vld [vmem:[%s10921_s7 + $0x48] sm:$0xf] }
 0x5e2   :  { %v4800_v47 = vadd.f32 %v7249_v62, %v4799_v18  ;;  %v6439_v18 = vld [vmem:[%s10921_s7 + $0x68] sm:$0xf0] }
 0x5e4   :  { %v4802_v50 = vsel %vm4801_vm2, %v7249_v62, %v4800_v47  ;;  %v6469_v62 = vld [vmem:[%s10921_s7 + $0x88] sm:$0xf] }
 0x62e   :  { %v4421_v55 = vpop.permute.xlu2 %4420 }
 0x62f   :  { %v4426_v37 = vsel %vm2159_vm12, %v4404_v34, %v4421_v55  ;;  %v6943_v55 = vld [vmem:[%s10921_s7 + $0x44] sm:$0xf] }
 0x630   :  { %v4430_v11 = vpack.c.bf16 %v4426_v37, %v4426_v37  ;;  %v6397_v37 = vld [vmem:[%s10921_s7] sm:$0xf] }
 0x646   :  { %v4409_v1 = vpop.permute.xlu0 %4408 }
 0x647   :  { %v4423_v36 = vsel %vm2159_vm12, %v4398_v4, %v4409_v1 }
 0x648   :  { %v4427_v15 = vpack.c.bf16 %v4423_v36, %v4423_v36  ;;  %v7236_v52 = vpop.permute.xlu1 %7235 }
 0x649   :  { %v7237_v61 = vunpack.i.l.bf16 %v7236_v52  ;;  %v7238_v10 = vunpack.i.h.bf16 %v7236_v52  ;;  %v6493_v52 = vld [vmem:[%s10921_s7 + $0xc0] sm:$0xf] }
 0x64a   :  { %4731 = vmatmul.bf16.vlgmr.msrb.gmra.mxu2 %v4427_v15 }
 0x64b   :  { %4779 = vmatpush.bf16.msrb.mxu2 %v6934_v7  ;;  %v4424_v35 = vsel %vm2159_vm12, %v4400_v48, %v7237_v61  ;;  %v4425_v6 = vsel %vm2159_vm12, %v4402_v24, %v7238_v10  ;;  %v6963_v61 = vld [vmem:[%s10921_s7 + $0xdc] sm:$0xf0]  ;;  %v6959_v48 = vld [vmem:[%s10921_s7 + $0xc4] sm:$0xf] }
 0x64c   :  { %v4428_v9 = vpack.c.bf16 %v4424_v35, %v4424_v35  ;;  %v4429_v54 = vpack.c.bf16 %v4425_v6, %v4425_v6  ;;  %v6494_v53 = vor.u32 %v6963_v61, %v6493_v52  ;;  %v6955_v35 = vld [vmem:[%s10921_s7 + $0x9c] sm:$0xf0]  ;;  %v6965_v61 = vld [vmem:[%s10921_s7 + $0xec] sm:$0xf0] }
 0x64d   :  { %v6462_v10 = vor.u32 %v6955_v35, %v6461_v0  ;;  %v6947_v6 = vld [vmem:[%s10921_s7 + $0x5c] sm:$0xf0]  ;;  %v6477_v35 = vld [vmem:[%s10921_s7 + $0x90] sm:$0xf] }
 0x64e   :  { %4744 = vmatmul.bf16.vlgmr.msrb.gmra.mxu3 %v4428_v9  ;;  %v6430_v34 = vor.u32 %v6947_v6, %v6429_v32  ;;  %v6949_v32 = vld [vmem:[%s10921_s7 + $0x6c] sm:$0xf0]  ;;  %v6945_v6 = vld [vmem:[%s10921_s7 + $0x54] sm:$0xf] }
 0x64f   :  { %4780 = vmatpush.bf16.msrb.mxu2 %v6933_v17  ;;  %v6495_v17 = vld [vmem:[%s10921_s7 + $0xe0] sm:$0xf0]  ;;  %5049 = vmatpush.bf16.msrb.mxu3 %v6494_v53 }
 0x650   :  { %v6498_v16 = vor.u32 %v6959_v48, %v6495_v17  ;;  %v6511_v48 = vld [vmem:[%s10921_s7 + $0xf0] sm:$0xf0] }
 0x653   :  { %4781 = vmatpush.bf16.msrb.mxu2 %v6932_v59  ;;  %v6951_v59 = vld [vmem:[%s10921_s7 + $0x84] sm:$0xf]  ;;  %5050 = vmatpush.bf16.msrb.mxu3 %v6462_v10 }
 0x657   :  { %4782 = vmatpush.bf16.msrb.mxu2 %v6931_v63  ;;  %v6466_v63 = vor.u32 %v6951_v59, %v6463_v13  ;;  %5051 = vmatpush.bf16.msrb.mxu3 %v6430_v34  ;;  %v6953_v59 = vld [vmem:[%s10921_s7 + $0x94] sm:$0xf] }
 0x658   :  { %v6479_v13 = vld [vmem:[%s10921_s7 + $0xb0] sm:$0xf0] }
 0x65a   :  { %4757 = vmatmul.bf16.vlgmr.msra.gmra.mxu2 %v4429_v54  ;;  %v6434_v54 = vor.u32 %v6943_v55, %v6431_v41  ;;  %v6447_v55 = vld [vmem:[%s10921_s7 + $0x70] sm:$0xf0] }
 0x65b   :  { %5062 = vmatpush.bf16.msra.mxu2 %v6498_v16  ;;  %v6957_v16 = vld [vmem:[%s10921_s7 + $0xac] sm:$0xf0]  ;;  %v6450_v34 = vor.u32 %v6945_v6, %v6447_v55  ;;  %v6983_v6 = vld [vmem:[%s10923_s9 + $0x80] sm:$0xff] }
 0x65c   :  { %v6478_v10 = vor.u32 %v6957_v16, %v6477_v35  ;;  %v6996_v35 = vld [vmem:[%s10923_s9 + $0xe8] sm:$0xff]  ;;  %v6995_v16 = vld [vmem:[%s10923_s9 + $0xe0] sm:$0xff] }
 0x65d   :  { %v6991_v55 = vld [vmem:[%s10923_s9 + $0xc0] sm:$0xff] }
 0x65e   :  { %4770 = vmatmul.bf16.vlgmr.msra.gmra.mxu3 %v4430_v11  ;;  %v6935_v11 = vld [vmem:[%s10921_s7 + $0x4] sm:$0xf] }
 0x65f   :  { %5063 = vmatpush.bf16.msra.mxu2 %v6466_v63  ;;  %v6445_v63 = vld [vmem:[%s10921_s7 + $0x50] sm:$0xf] }
 0x660   :  { %v6446_v41 = vor.u32 %v6949_v32, %v6445_v63  ;;  %v6984_v63 = vld [vmem:[%s10923_s9 + $0x88] sm:$0xff] }
 0x661   :  { %v6992_v32 = vld [vmem:[%s10923_s9 + $0xc8] sm:$0xff] }
 0x663   :  { %5064 = vmatpush.bf16.msra.mxu2 %v6434_v54  ;;  %v6413_v54 = vld [vmem:[%s10921_s7 + $0x10] sm:$0xf] }
 0x66a   :  { %6394 = vmatmul.msk.bf16.vlgmr.msrb.gmra.mxu2 %vm2159_vm12, %v4431_v49  ;;  %v6964_v49 = vld [vmem:[%s10921_s7 + $0xe4] sm:$0xf0] }
 0x66b   :  { %v6502_v31 = vor.u32 %v6964_v49, %v6501_v44  ;;  %v6517_v49 = vld [vmem:[%s10921_s7 + $0xd8] sm:$0xf] }
 0x6cd   :  { %v4732_v21 = vpop.f32.mrf.mxu2 }
 0x6d1   :  { %v4745_v40 = vpop.f32.mrf.mxu3 }
 0x6d2   :  { %v4746_v33 = vadd.f32 %v4745_v40, %v4732_v21  ;;  %v6960_v21 = vld [vmem:[%s10921_s7 + $0xcc] sm:$0xf] }
 0x6d3   :  { %v6503_v40 = vld [vmem:[%s10921_s7 + $0xe8] sm:$0xf0] }
 0x6d5   :  { %v4734_v20 = vpop.f32.mrf.mxu2 }
 0x6d6   :  { %v6398_v20 = vor.u32 %v6939_v42, %v6397_v37  ;;  %v6941_v37 = vld [vmem:[%s10921_s7 + $0x2c] sm:$0xf0]  ;;  %v6937_v42 = vld [vmem:[%s10921_s7 + $0x14] sm:$0xf] }
 0x6d8   :  { %5052 = vmatpush.bf16.msrb.mxu3 %v6398_v20  ;;  %v6519_v20 = vld [vmem:[%s10921_s7 + $0xf8] sm:$0xf0] }
 0x6d9   :  { %v4747_v19 = vpop.f32.mrf.mxu3 }
 0x6dc   :  { %5075 = vmatpush.bf16.msra.mxu3 %v6502_v31  ;;  %v6485_v31 = vld [vmem:[%s10921_s7 + $0x98] sm:$0xf] }
 0x6dd   :  { %v4758_v29 = vpop.f32.mrf.mxu2 }
 0x6de   :  { %v4759_v3 = vadd.f32 %v4758_v29, %v4746_v33  ;;  %v6402_v29 = vor.u32 %v6935_v11, %v6399_v39  ;;  %v6956_v33 = vld [vmem:[%s10921_s7 + $0xa4] sm:$0xf0]  ;;  %v6415_v11 = vld [vmem:[%s10921_s7 + $0x30] sm:$0xf0]  ;;  %v6414_v39 = vor.u32 %v6941_v37, %v6413_v54 }
 0x6df   :  { %v6418_v44 = vor.u32 %v6937_v42, %v6415_v11 }
 0x6e0   :  { %5065 = vmatpush.bf16.msra.mxu2 %v6402_v29 }
 0x6e1   :  { %v4771_v58 = vpop.f32.mrf.mxu3 }
 0x6e2   :  { %v4772_v2 = vadd.f32 %v4771_v58, %v4759_v3  ;;  %v6952_v3 = vld [vmem:[%s10921_s7 + $0x8c] sm:$0xf] }
 0x6e5   :  { %v4760_v57 = vpop.f32.mrf.mxu2 }
 0x6e6   :  { %v6506_v57 = vor.u32 %v6960_v21, %v6503_v40  ;;  %v6966_v21 = vld [vmem:[%s10921_s7 + $0xf4] sm:$0xf0]  ;;  %v6962_v40 = vld [vmem:[%s10921_s7 + $0xdc] sm:$0xf] }
 0x6e7   :  { %v6522_v29 = vor.u32 %v6962_v40, %v6519_v20  ;;  %v7014_v40 = vld [vmem:[%s10923_s9 + $0x178] sm:$0xff] }
 0x6e8   :  { %5088 = vmatpush.bf16.msrb.mxu2 %v6506_v57  ;;  %v6954_v57 = vld [vmem:[%s10921_s7 + $0x9c] sm:$0xf] }
 0x6e9   :  { %v4773_v28 = vpop.f32.mrf.mxu3 }
 0x6ea   :  { %v6471_v28 = vld [vmem:[%s10921_s7 + $0xa8] sm:$0xf0] }
 0x6ed   :  { %v4784_v38 = vpop.f32.mrf.mxu2 }
 0x6ee   :  { %v4785_v60 = vadd.f32 %v4784_v38, %v4772_v2  ;;  %v6470_v2 = vor.u32 %v6956_v33, %v6469_v62  ;;  %v6487_v62 = vld [vmem:[%s10921_s7 + $0xb8] sm:$0xf0] }
 0x6f0   :  { %v4789_v45 = vsel %vm2159_vm12, %v4785_v60, 0.0  ;;  %5076 = vmatpush.bf16.msra.mxu3 %v6470_v2  ;;  %v6946_v2 = vld [vmem:[%s10921_s7 + $0x5c] sm:$0xf] }
 0x6f1   :  { %v4790_v22 = vrot.slane %v4789_v45, 4 }
 0x6f3   :  { %v4791_v43 = vadd.f32 %v4790_v22, %v4789_v45  ;;  %v6948_v45 = vld [vmem:[%s10921_s7 + $0x64] sm:$0xf0]  ;;  %v6944_v22 = vld [vmem:[%s10921_s7 + $0x4c] sm:$0xf] }
 0x6f5   :  { %v4792_v5 = vrot.slane %v4791_v43, 2  ;;  %v4786_v8 = vpop.f32.mrf.mxu2 }
 0x6f6   :  { %v6438_v8 = vor.u32 %v6948_v45, %v6437_v46  ;;  %v6421_v45 = vld [vmem:[%s10921_s7 + $0x18] sm:$0xf] }
 0x6f7   :  { %v4793_v30 = vadd.f32 %v4792_v5, %v4791_v43  ;;  %v4788_v43 = vld [vmem:[%s10920_s6] sm:$0x3] }
 0x6f8   :  { %5077 = vmatpush.bf16.msra.mxu3 %v6438_v8 }
 0x6f9   :  { %v4794_v51 = vrot.slane %v4793_v30, 1 }
 0x6fb   :  { %v4795_v26 = vadd.f32 %v4794_v51, %v4793_v30  ;;  %v6442_v30 = vor.u32 %v6944_v22, %v6439_v18  ;;  %v6405_v51 = vld [vmem:[%s10921_s7 + $0x8] sm:$0xf]  ;;  %v6942_v22 = vld [vmem:[%s10921_s7 + $0x34] sm:$0xf0]  ;;  %v6938_v18 = vld [vmem:[%s10921_s7 + $0x1c] sm:$0xf] }
 0x6fd   :  { %v4803_v14 = vmul.f32 %v4802_v50, %v4795_v26  ;;  %v4826_v26 = vperm.slane %v4788_v43, 0 }
 0x6ff   :  { %v10484_v56 = vsub.f32 %v4785_v60, %v4803_v14  ;;  %v6474_v60 = vor.u32 %v6952_v3, %v6471_v28  ;;  %v6936_v14 = vld [vmem:[%s10921_s7 + $0xc] sm:$0xf]  ;;  %v6490_v3 = vor.u32 %v6954_v57, %v6487_v62  ;;  %v6453_v28 = vld [vmem:[%s10921_s7 + $0x58] sm:$0xf]  ;;  %v7013_v57 = vld [vmem:[%s10923_s9 + $0x170] sm:$0xff] }
 0x700   :  { %v7004_v62 = vld [vmem:[%s10923_s9 + $0x128] sm:$0xff] }
 0x701   :  { %v4805_v12 = vmul.f32 %v10484_v56, %v10484_v56  ;;  %5089 = vmatpush.bf16.msrb.mxu2 %v6474_v60 }
 0x703   :  { %v4806_v4 = vsel %vm2159_vm12, %v4805_v12, 0.0  ;;  %v6407_v12 = vld [vmem:[%s10921_s7 + $0x28] sm:$0xf0] }
 0x704   :  { %v4807_v1 = vrot.slane %v4806_v4, 4 }
 0x705   :  { %5090 = vmatpush.bf16.msrb.mxu2 %v6442_v30  ;;  %v6982_v30 = vld [vmem:[%s10923_s9 + $0x78] sm:$0xff] }
 0x706   :  { %v4808_v27 = vadd.f32 %v4807_v1, %v4806_v4 }
 0x708   :  { %v4809_v36 = vrot.slane %v4808_v27, 2 }
 0x70a   :  { %v4810_v23 = vadd.f32 %v4809_v36, %v4808_v27  ;;  %v4828_v27 = vperm.slane %v4788_v43, 1  ;;  %v6423_v43 = vld [vmem:[%s10921_s7 + $0x38] sm:$0xf0] }
 0x70b   :  { %v6426_v8 = vor.u32 %v6938_v18, %v6423_v43  ;;  %v7002_v43 = vld [vmem:[%s10923_s9 + $0x118] sm:$0xff] }
 0x70c   :  { %v4811_v7 = vrot.slane %v4810_v23, 1 }
 0x70e   :  { %v4812_v15 = vadd.f32 %v4811_v7, %v4810_v23  ;;  %v6410_v23 = vor.u32 %v6936_v14, %v6407_v12  ;;  %v6980_v14 = vld [vmem:[%s10923_s9 + $0x68] sm:$0xff]  ;;  %v6971_v12 = vld [vmem:[%s10923_s9 + $0x20] sm:$0xff] }
 0x710   :  { %v4813_v9 = vmul.f32 %v4812_v15, %v4802_v50  ;;  %v6940_v50 = vld [vmem:[%s10921_s7 + $0x24] sm:$0xf0]  ;;  %v6509_v15 = vld [vmem:[%s10921_s7 + $0xd0] sm:$0xf]  ;;  %5091 = vmatpush.bf16.msrb.mxu2 %v6410_v23 }
 0x711   :  { %v6406_v36 = vor.u32 %v6940_v50, %v6405_v51  ;;  %v6510_v17 = vor.u32 %v6965_v61, %v6509_v15  ;;  %v6973_v51 = vld [vmem:[%s10923_s9 + $0x30] sm:$0xff]  ;;  %v6976_v15 = vld [vmem:[%s10923_s9 + $0x48] sm:$0xff]  ;;  %v6975_v61 = vld [vmem:[%s10923_s9 + $0x40] sm:$0xff] }
 0x712   :  { %v4814_v24 = vadd.f32 1e-05, %v4813_v9  ;;  %v6981_v50 = vld [vmem:[%s10923_s9 + $0x70] sm:$0xff] }
 0x713   :  { %5078 = vmatpush.bf16.msra.mxu3 %v6406_v36  ;;  %v6969_v36 = vld [vmem:[%s10923_s9 + $0x10] sm:$0xff] }
 0x714   :  { %7250 = vrsqrt.f32 %v4814_v24  ;;  %vm4821_vm4 = vweird.f32 %v4814_v24  ;;  %v6977_v23 = vld [vmem:[%s10923_s9 + $0x50] sm:$0xff] }
 0x71a   :  { %v7251_v19 = vpop.eup %7250 }
 0x71b   :  { %v4816_v58 = vmul.f32 %v7251_v19, %v4814_v24  ;;  %vm4822_vm3 = vweird.f32 %v7251_v19  ;;  %v6482_v24 = vor.u32 %v6953_v59, %v6479_v13  ;;  %v6986_v59 = vld [vmem:[%s10923_s9 + $0x98] sm:$0xff] }
 0x71c   :  { %vm4823_vm5 = vmor %vm4821_vm4, %vm4822_vm3  ;;  %v6994_v13 = vld [vmem:[%s10923_s9 + $0xd8] sm:$0xff] }
 0x71d   :  { %v4817_v25 = vmul.f32 %v7251_v19, %v4816_v58  ;;  %v6958_v58 = vld [vmem:[%s10921_s7 + $0xb4] sm:$0xf0] }
 0x71e   :  { %v6486_v33 = vor.u32 %v6958_v58, %v6485_v31  ;;  %v7005_v58 = vld [vmem:[%s10923_s9 + $0x130] sm:$0xff] }
 0x71f   :  { %v4818_v38 = vmul.f32 0.5, %v4817_v25  ;;  %v6950_v25 = vld [vmem:[%s10921_s7 + $0x74] sm:$0xf0] }
 0x720   :  { %v6454_v60 = vor.u32 %v6950_v25, %v6453_v28 }
 0x721   :  { %v4819_v5 = vsub.f32 1.5, %v4818_v38  ;;  %v6455_v38 = vld [vmem:[%s10921_s7 + $0x78] sm:$0xf0] }
 0x722   :  { %v6458_v46 = vor.u32 %v6946_v2, %v6455_v38  ;;  %v7003_v38 = vld [vmem:[%s10923_s9 + $0x120] sm:$0xff] }
 0x723   :  { %v4820_v47 = vmul.f32 %v7251_v19, %v4819_v5  ;;  %v6422_v5 = vor.u32 %v6942_v22, %v6421_v45 }
 0x725   :  { %v4824_v4 = vsel %vm4823_vm5, %v7251_v19, %v4820_v47  ;;  %v6518_v19 = vor.u32 %v6966_v21, %v6517_v49  ;;  %v6974_v47 = vld [vmem:[%s10923_s9 + $0x38] sm:$0xff] }
 0x726   :  { %v4825_v1 = vmul.f32 %v4824_v4, %v10484_v56  ;;  %v6961_v56 = vld [vmem:[%s10921_s7 + $0xd4] sm:$0xf]  ;;  %v6979_v4 = vld [vmem:[%s10923_s9 + $0x60] sm:$0xff]  ;;  %v7006_v21 = vld [vmem:[%s10923_s9 + $0x138] sm:$0xff] }
 0x727   :  { %v6514_v0 = vor.u32 %v6961_v56, %v6511_v48  ;;  %v6990_v56 = vld [vmem:[%s10923_s9 + $0xb8] sm:$0xff] }
 0x728   :  { %v4827_v7 = vmul.f32 %v4826_v26, %v4825_v1  ;;  %v6972_v26 = vld [vmem:[%s10923_s9 + $0x28] sm:$0xff]  ;;  %v6970_v1 = vld [vmem:[%s10923_s9 + $0x18] sm:$0xff] }
 0x729   :  { %v6998_v48 = vld [vmem:[%s10923_s9 + $0xf8] sm:$0xff] }
 0x72a   :  { %v4829_v52 = vadd.f32 %v4828_v27, %v4827_v7  ;;  %v6978_v27 = vld [vmem:[%s10923_s9 + $0x58] sm:$0xff]  ;;  %v6968_v7 = vld [vmem:[%s10923_s9 + $0x8] sm:$0xff] }
 0x72c   :  { %v4830_v53 = vmax.f32 %v4829_v52, 0.0  ;;  %v6967_v52 = vld [vmem:[%s10923_s9] sm:$0xff] }
 0x72e   :  { %v10604_v9 = vpack.c.bf16 %v4830_v53, %v4830_v53  ;;  %v6989_v53 = vld [vmem:[%s10923_s9 + $0xb0] sm:$0xff] }
 0x730   :  { %6523 = vmatmul.msk.bf16.vlgmr.msrb.gmra.mxu3 %vm2159_vm12, %v10604_v9  ;;  %6524 = vmatmul.msk.bf16.vlgmr.msra.gmra.mxu2 %vm2159_vm12, %v10604_v9 }
 0x731   :  { %5101 = vmatpush.bf16.msrb.mxu3 %v6510_v17  ;;  %5114 = vmatpush.bf16.msra.mxu2 %v6514_v0  ;;  %v6997_v17 = vld [vmem:[%s10923_s9 + $0xf0] sm:$0xff]  ;;  %v6988_v0 = vld [vmem:[%s10923_s9 + $0xa8] sm:$0xff] }
 0x735   :  { %5102 = vmatpush.bf16.msrb.mxu3 %v6478_v10  ;;  %5115 = vmatpush.bf16.msra.mxu2 %v6482_v24  ;;  %v6985_v10 = vld [vmem:[%s10923_s9 + $0x90] sm:$0xff] }
 0x736   :  { %v6993_v24 = vld [vmem:[%s10923_s9 + $0xd0] sm:$0xff] }
 0x739   :  { %5103 = vmatpush.bf16.msrb.mxu3 %v6446_v41  ;;  %5116 = vmatpush.bf16.msra.mxu2 %v6450_v34  ;;  %v10802_v41 = vld [vmem:[%s10922_s8] sm:$0xff] }
 0x73a   :  { %v4866_v34 = vperm.slane %v10802_v41, 0  ;;  %v4867_v54 = vperm.slane %v10802_v41, 1  ;;  %v4869_v28 = vperm.slane %v10802_v41, 3 }
 0x73d   :  { %5104 = vmatpush.bf16.msrb.mxu3 %v6414_v39  ;;  %5117 = vmatpush.bf16.msra.mxu2 %v6418_v44 }
 0x740   :  { %6525 = vmatmul.msk.bf16.vlgmr.msra.gmra.mxu3 %vm2159_vm12, %v10604_v9  ;;  %6526 = vmatmul.msk.bf16.vlgmr.msrb.gmra.mxu2 %vm2159_vm12, %v10604_v9 }
 0x741   :  { %5127 = vmatpush.bf16.msra.mxu3 %v6518_v19  ;;  %5140 = vmatpush.bf16.msrb.mxu2 %v6522_v29 }
 0x745   :  { %5128 = vmatpush.bf16.msra.mxu3 %v6486_v33  ;;  %5141 = vmatpush.bf16.msrb.mxu2 %v6490_v3  ;;  %v7012_v33 = vld [vmem:[%s10923_s9 + $0x168] sm:$0xff]  ;;  %v4868_v3 = vperm.slane %v10802_v41, 2 }
 0x749   :  { %5129 = vmatpush.bf16.msra.mxu3 %v6454_v60  ;;  %5142 = vmatpush.bf16.msrb.mxu2 %v6458_v46  ;;  %v7011_v60 = vld [vmem:[%s10923_s9 + $0x160] sm:$0xff] }
 0x74d   :  { %5130 = vmatpush.bf16.msra.mxu3 %v6422_v5  ;;  %5143 = vmatpush.bf16.msrb.mxu2 %v6426_v8  ;;  %v7010_v5 = vld [vmem:[%s10923_s9 + $0x158] sm:$0xff] }
 0x750   :  { %6527 = vmatmul.msk.bf16.vlgmr.msrb.gmra.mxu3 %vm2159_vm12, %v10604_v9  ;;  %6528 = vmatmul.msk.bf16.vlgmr.msra.gmra.mxu2 %vm2159_vm12, %v10604_v9 }
 0x751   :  { %5681 = vmatpush.bf16.msrb.mxu3 %v6974_v47  ;;  %5694 = vmatpush.bf16.msra.mxu2 %v6982_v30 }
 0x755   :  { %5682 = vmatpush.bf16.msrb.mxu3 %v6973_v51  ;;  %5695 = vmatpush.bf16.msra.mxu2 %v6981_v50  ;;  %v7001_v50 = vld [vmem:[%s10923_s9 + $0x110] sm:$0xff] }
 0x759   :  { %5683 = vmatpush.bf16.msrb.mxu3 %v6972_v26  ;;  %5696 = vmatpush.bf16.msra.mxu2 %v6980_v14  ;;  %v7009_v26 = vld [vmem:[%s10923_s9 + $0x150] sm:$0xff]  ;;  %v7000_v14 = vld [vmem:[%s10923_s9 + $0x108] sm:$0xff] }
 0x75d   :  { %5684 = vmatpush.bf16.msrb.mxu3 %v6971_v12  ;;  %5697 = vmatpush.bf16.msra.mxu2 %v6979_v4  ;;  %v7008_v12 = vld [vmem:[%s10923_s9 + $0x148] sm:$0xff]  ;;  %v4870_v4 = vperm.slane %v10802_v41, 4 }
 0x760   :  { %6529 = vmatmul.msk.bf16.vlgmr.msra.gmra.mxu3 %vm2159_vm12, %v10604_v9  ;;  %6530 = vmatmul.msk.bf16.vlgmr.msrb.gmra.mxu2 %vm2159_vm12, %v10604_v9  ;;  %v6987_v9 = vld [vmem:[%s10923_s9 + $0xa0] sm:$0xff] }
 0x761   :  { %5685 = vmatpush.bf16.msrb.mxu3 %v6970_v1  ;;  %5698 = vmatpush.bf16.msra.mxu2 %v6978_v27  ;;  %v4871_v1 = vperm.slane %v10802_v41, 5 }
 0x765   :  { %5686 = vmatpush.bf16.msrb.mxu3 %v6969_v36  ;;  %5699 = vmatpush.bf16.msra.mxu2 %v6977_v23  ;;  %v6999_v23 = vld [vmem:[%s10923_s9 + $0x100] sm:$0xff] }
 0x769   :  { %5687 = vmatpush.bf16.msrb.mxu3 %v6968_v7  ;;  %5700 = vmatpush.bf16.msra.mxu2 %v6976_v15  ;;  %v7007_v7 = vld [vmem:[%s10923_s9 + $0x140] sm:$0xff] }
 0x76d   :  { %5688 = vmatpush.bf16.msrb.mxu3 %v6967_v52  ;;  %5701 = vmatpush.bf16.msra.mxu2 %v6975_v61  ;;  %v7022_v61 = vld [vmem:[%s10923_s9 + $0x1b8] sm:$0xff] }
 0x771   :  { %5707 = vmatpush.bf16.msra.mxu3 %v6990_v56  ;;  %5720 = vmatpush.bf16.msrb.mxu2 %v6998_v48  ;;  %v7030_v56 = vld [vmem:[%s10923_s9 + $0x1f8] sm:$0xff] }
 0x775   :  { %5708 = vmatpush.bf16.msra.mxu3 %v6989_v53  ;;  %5721 = vmatpush.bf16.msrb.mxu2 %v6997_v17 }
 0x779   :  { %5709 = vmatpush.bf16.msra.mxu3 %v6988_v0  ;;  %5722 = vmatpush.bf16.msrb.mxu2 %v6996_v35  ;;  %v7021_v35 = vld [vmem:[%s10923_s9 + $0x1b0] sm:$0xff] }
 0x77d   :  { %5710 = vmatpush.bf16.msra.mxu3 %v6987_v9  ;;  %5723 = vmatpush.bf16.msrb.mxu2 %v6995_v16  ;;  %v7029_v9 = vld [vmem:[%s10923_s9 + $0x1f0] sm:$0xff] }
 0x781   :  { %5711 = vmatpush.bf16.msra.mxu3 %v6986_v59  ;;  %5724 = vmatpush.bf16.msrb.mxu2 %v6994_v13  ;;  %v7020_v13 = vld [vmem:[%s10923_s9 + $0x1a8] sm:$0xff] }
 0x785   :  { %5712 = vmatpush.bf16.msra.mxu3 %v6985_v10  ;;  %5725 = vmatpush.bf16.msrb.mxu2 %v6993_v24  ;;  %v7028_v10 = vld [vmem:[%s10923_s9 + $0x1e8] sm:$0xff]  ;;  %v7019_v24 = vld [vmem:[%s10923_s9 + $0x1a0] sm:$0xff] }
 0x789   :  { %5713 = vmatpush.bf16.msra.mxu3 %v6984_v63  ;;  %5726 = vmatpush.bf16.msrb.mxu2 %v6992_v32  ;;  %v7027_v63 = vld [vmem:[%s10923_s9 + $0x1e0] sm:$0xff] }
 0x78d   :  { %5714 = vmatpush.bf16.msra.mxu3 %v6983_v6  ;;  %5727 = vmatpush.bf16.msrb.mxu2 %v6991_v55  ;;  %v7018_v55 = vld [vmem:[%s10923_s9 + $0x198] sm:$0xff] }
 0x7b3   :  { %v5054_v37 = vpop.f32.mrf.mxu3  ;;  %v5067_v42 = vpop.f32.mrf.mxu2 }
 0x7b4   :  { %v5055_v11 = vadd.f32 %v5054_v37, %v4866_v34  ;;  %v5068_v39 = vadd.f32 %v5067_v42, %v4867_v54  ;;  %v7026_v34 = vld [vmem:[%s10923_s9 + $0x1d8] sm:$0xff]  ;;  %v7017_v54 = vld [vmem:[%s10923_s9 + $0x190] sm:$0xff]  ;;  %v4872_v42 = vperm.slane %v10802_v41, 6 }
 0x7b5   :  { %v7025_v37 = vld [vmem:[%s10923_s9 + $0x1d0] sm:$0xff] }
 0x7b6   :  { %v5149_v44 = vmax.f32 %v5055_v11, 0.0  ;;  %v5150_v49 = vmax.f32 %v5068_v39, 0.0  ;;  %v4873_v11 = vperm.slane %v10802_v41, 7  ;;  %v7015_v41 = vld [vmem:[%s10923_s9 + $0x180] sm:$0xff] }
 0x7b8   :  { %v5157_v20 = vpack.c.bf16 %v5149_v44, %v5149_v44  ;;  %v5158_v19 = vpack.c.bf16 %v5150_v49, %v5150_v49  ;;  %v7016_v49 = vld [vmem:[%s10923_s9 + $0x188] sm:$0xff] }
 0x7ba   :  { %5689 = vmatmul.bf16.vlgmr.msrb.gmra.mxu3 %v5157_v20  ;;  %5702 = vmatmul.bf16.vlgmr.msra.gmra.mxu2 %v5158_v19  ;;  %v7023_v19 = vld [vmem:[%s10923_s9 + $0x1c0] sm:$0xff] }
 0x7bb   :  { %5733 = vmatpush.bf16.msrb.mxu3 %v7006_v21  ;;  %5746 = vmatpush.bf16.msra.mxu2 %v7014_v40  ;;  %v5056_v29 = vpop.f32.mrf.mxu3  ;;  %v5069_v31 = vpop.f32.mrf.mxu2  ;;  %v7024_v21 = vld [vmem:[%s10923_s9 + $0x1c8] sm:$0xff] }
 0x7bf   :  { %5734 = vmatpush.bf16.msrb.mxu3 %v7005_v58  ;;  %5747 = vmatpush.bf16.msra.mxu2 %v7013_v57 }
 0x7c3   :  { %5735 = vmatpush.bf16.msrb.mxu3 %v7004_v62  ;;  %5748 = vmatpush.bf16.msra.mxu2 %v7012_v33  ;;  %v5080_v25 = vpop.f32.mrf.mxu3  ;;  %v5093_v2 = vpop.f32.mrf.mxu2 }
 0x7c4   :  { %v5081_v46 = vadd.f32 %v5080_v25, %v4868_v3  ;;  %v5094_v45 = vadd.f32 %v5093_v2, %v4869_v28 }
 0x7c6   :  { %v5151_v22 = vmax.f32 %v5081_v46, 0.0  ;;  %v5152_v18 = vmax.f32 %v5094_v45, 0.0 }
 0x7c7   :  { %5736 = vmatpush.bf16.msrb.mxu3 %v7003_v38  ;;  %5749 = vmatpush.bf16.msra.mxu2 %v7011_v60 }
 0x7c8   :  { %v5159_v8 = vpack.c.bf16 %v5151_v22, %v5151_v22  ;;  %v5160_v47 = vpack.c.bf16 %v5152_v18, %v5152_v18  ;;  %v7239_v22 = vld [vmem:[%s10924_s10] ss:$0 sm:$0xff] }
 0x7ca   :  { %5715 = vmatmul.bf16.vlgmr.msra.gmra.mxu3 %v5159_v8  ;;  %5728 = vmatmul.bf16.vlgmr.msrb.gmra.mxu2 %v5160_v47 }
 0x7cb   :  { %5737 = vmatpush.bf16.msrb.mxu3 %v7002_v43  ;;  %5750 = vmatpush.bf16.msra.mxu2 %v7010_v5  ;;  %v5082_v30 = vpop.f32.mrf.mxu3  ;;  %v5095_v51 = vpop.f32.mrf.mxu2 }
 0x7cf   :  { %5738 = vmatpush.bf16.msrb.mxu3 %v7001_v50  ;;  %5751 = vmatpush.bf16.msra.mxu2 %v7009_v26 }
 0x7d3   :  { %5739 = vmatpush.bf16.msrb.mxu3 %v7000_v14  ;;  %5752 = vmatpush.bf16.msra.mxu2 %v7008_v12  ;;  %v5106_v27 = vpop.f32.mrf.mxu3  ;;  %v5119_v36 = vpop.f32.mrf.mxu2 }
 0x7d4   :  { %v5107_v15 = vadd.f32 %v5106_v27, %v4870_v4  ;;  %v5120_v52 = vadd.f32 %v5119_v36, %v4871_v1 }
 0x7d6   :  { %v5153_v48 = vmax.f32 %v5107_v15, 0.0  ;;  %v5154_v53 = vmax.f32 %v5120_v52, 0.0 }
 0x7d7   :  { %5740 = vmatpush.bf16.msrb.mxu3 %v6999_v23  ;;  %5753 = vmatpush.bf16.msra.mxu2 %v7007_v7 }
 0x7d8   :  { %v5161_v17 = vpack.c.bf16 %v5153_v48, %v5153_v48  ;;  %v5162_v0 = vpack.c.bf16 %v5154_v53, %v5154_v53 }
 0x7da   :  { %5741 = vmatmul.bf16.vlgmr.msrb.gmra.mxu3 %v5161_v17  ;;  %5754 = vmatmul.bf16.vlgmr.msra.gmra.mxu2 %v5162_v0 }
 0x7db   :  { %5759 = vmatpush.bf16.msra.mxu3 %v7022_v61  ;;  %5772 = vmatpush.bf16.msrb.mxu2 %v7030_v56  ;;  %v5108_v16 = vpop.f32.mrf.mxu3  ;;  %v5121_v59 = vpop.f32.mrf.mxu2 }
 0x7df   :  { %5760 = vmatpush.bf16.msra.mxu3 %v7021_v35  ;;  %5773 = vmatpush.bf16.msrb.mxu2 %v7029_v9 }
 0x7e3   :  { %5761 = vmatpush.bf16.msra.mxu3 %v7020_v13  ;;  %5774 = vmatpush.bf16.msrb.mxu2 %v7028_v10  ;;  %v5132_v32 = vpop.f32.mrf.mxu3  ;;  %v5145_v6 = vpop.f32.mrf.mxu2 }
 0x7e4   :  { %v5133_v40 = vadd.f32 %v5132_v32, %v4872_v42  ;;  %v5146_v20 = vadd.f32 %v5145_v6, %v4873_v11 }
 0x7e6   :  { %v5155_v29 = vmax.f32 %v5133_v40, 0.0  ;;  %v5156_v31 = vmax.f32 %v5146_v20, 0.0 }
 0x7e7   :  { %5762 = vmatpush.bf16.msra.mxu3 %v7019_v24  ;;  %5775 = vmatpush.bf16.msrb.mxu2 %v7027_v63 }
 0x7e8   :  { %v5163_v58 = vpack.c.bf16 %v5155_v29, %v5155_v29  ;;  %v5164_v57 = vpack.c.bf16 %v5156_v31, %v5156_v31 }
 0x7eb   :  { %5763 = vmatpush.bf16.msra.mxu3 %v7018_v55  ;;  %5776 = vmatpush.bf16.msrb.mxu2 %v7026_v34  ;;  %v5134_v39 = vpop.f32.mrf.mxu3  ;;  %v5147_v44 = vpop.f32.mrf.mxu2 }
 0x7ef   :  { %5764 = vmatpush.bf16.msra.mxu3 %v7017_v54  ;;  %5777 = vmatpush.bf16.msrb.mxu2 %v7025_v37 }
 0x7f3   :  { %5765 = vmatpush.bf16.msra.mxu3 %v7016_v49  ;;  %5778 = vmatpush.bf16.msrb.mxu2 %v7024_v21 }
 0x7f7   :  { %5766 = vmatpush.bf16.msra.mxu3 %v7015_v41  ;;  %5779 = vmatpush.bf16.msrb.mxu2 %v7023_v19 }
 0x7fa   :  { %5767 = vmatmul.bf16.vlgmr.msra.gmra.mxu3 %v5163_v58  ;;  %5780 = vmatmul.bf16.vlgmr.msrb.gmra.mxu2 %v5164_v57 }
 0x83d   :  { %v5690_v62 = vpop.f32.mrf.mxu3  ;;  %v5703_v33 = vpop.f32.mrf.mxu2 }
 0x83e   :  { %v5691_v5 = vadd.f32 %v7239_v22, %v5690_v62 }
 0x840   :  { %v5704_v8 = vadd.f32 %v5703_v33, %v5691_v5 }
 0x845   :  { %v5692_v3 = vpop.f32.mrf.mxu3  ;;  %v5705_v28 = vpop.f32.mrf.mxu2 }
 0x84d   :  { %v5716_v25 = vpop.f32.mrf.mxu3  ;;  %v5729_v2 = vpop.f32.mrf.mxu2 }
 0x84e   :  { %v5717_v47 = vadd.f32 %v5716_v25, %v5704_v8 }
 0x850   :  { %v5730_v30 = vadd.f32 %v5729_v2, %v5717_v47 }
 0x855   :  { %v5718_v38 = vpop.f32.mrf.mxu3  ;;  %v5731_v60 = vpop.f32.mrf.mxu2 }
 0x85d   :  { %v5742_v46 = vpop.f32.mrf.mxu3  ;;  %v5755_v45 = vpop.f32.mrf.mxu2 }
 0x85e   :  { %v5743_v51 = vadd.f32 %v5742_v46, %v5730_v30 }
 0x860   :  { %v5756_v50 = vadd.f32 %v5755_v45, %v5743_v51 }
 0x865   :  { %v5744_v18 = vpop.f32.mrf.mxu3  ;;  %v5757_v43 = vpop.f32.mrf.mxu2 }
 0x87d   :  { %v5768_v26 = vpop.f32.mrf.mxu3  ;;  %v5781_v14 = vpop.f32.mrf.mxu2 }
 0x87e   :  { %v5769_v12 = vadd.f32 %v5768_v26, %v5756_v50 }
 0x880   :  { %v5782_v4 = vadd.f32 %v5781_v14, %v5769_v12 }
 0x882   :  { %5785 = vst [vmem:[#allocation3] sm:$0xff] %v5782_v4 }
 0x883   :  { %5796 = dma.vmem_to_hbm [thread:$0]  %s5792_s29, 128, %s5794_s12, [#allocation4]  }
 0x885   :  { %v5770_v1 = vpop.f32.mrf.mxu3  ;;  %v5783_v27 = vpop.f32.mrf.mxu2 }
 0x886   :  { %7276 = dma.done.wait [#allocation4], 128  }
 0x887   :  { %7277 = vsyncadd [#allocation4], 4294967168 }
 0x888   :  { %5801 = vsyncpa [#allocation4], 1 }

</bundles_post_ra>
